<compile_context>
chip_gen: v6e
topology: v6e:2x2x1
jax: 0.10.0
libtpu: 0.0.40
codegen_flags: <defaults>
</compile_context>

<pallas_src>
import jax
import jax.numpy as jnp
from jax.experimental import pallas as pl
from jax.experimental.pallas import tpu as pltpu


N_ELEM = 10          # antenna elements
OUT = 61             # DOA grid size (-30..30 deg)
PROJ_PAD = 64        # lane pad for the 61-wide steering projection
OUT_PAD = 128        # lane pad for the final layer output (unmasked stores)
N_W = 8              # manually-DMA'd int8 weight tensors (w0 split in 3 + w1..w5)
BATCH_TILE_MAX = 256 # rows per grid step for large batches


# ----------------------------------------------------------------------------
# Fused Pallas kernel: SALayer + DOANet MLP, with manual weight-DMA pipelining
# ----------------------------------------------------------------------------
def fused_kernel(*refs):
    (xr_ref, xi_ref, ar_ref, ai_ref, w1r_ref, w1i_ref, sab1_ref) = refs[:7]
    sb = refs[7:19]                       # (s0, b0, s1, b1, ..., s5, b5) f32
    w_hbm = refs[19:19 + N_W]             # int8 weights, resident in HBM
    out_ref = refs[19 + N_W]
    w_buf = refs[20 + N_W:20 + 2 * N_W]   # persistent VMEM int8 scratch
    sem = refs[20 + 2 * N_W]              # DMA semaphores, shape (N_W,)

    step0 = pl.program_id(0) == 0

    # Kick off ALL weight DMAs on the first grid step.  They stream while the
    # SA front-end and earlier layers compute; scratch persists across steps,
    # so later batch tiles reuse the already-resident weights.
    @pl.when(step0)
    def _start_all():
        for i in range(N_W):
            pltpu.make_async_copy(w_hbm[i], w_buf[i], sem.at[i]).start()

    def get_w(i):
        """Wait for weight i (first step only), dequantize int8 -> bf16."""
        @pl.when(step0)
        def _wait():
            pltpu.make_async_copy(w_hbm[i], w_buf[i], sem.at[i]).wait()
        # VPU dequant; cheap in a DMA-bound kernel.  Per-column scale is
        # applied after the dot, so only the int8 -> bf16 cast happens here.
        return w_buf[i][...].astype(jnp.float32).astype(jnp.bfloat16)

    B = xr_ref.shape[0]
    xr = xr_ref[...]                      # (B, N) real part
    xi = xi_ref[...]                      # (B, N) imag part

    # eval-mode SparseLayer.thresholding: |x| > 1e-3  <=>  |x|^2 > 1e-6
    mag2 = xr * xr + xi * xi
    masks = (mag2 > 1e-6).astype(jnp.float32)
    sparsity = jnp.sum(masks, axis=1, keepdims=True)           # (B, 1)
    # Exact reciprocal (sparsity is a small integer <= N); clamp avoids 1/0
    # on batch-padding rows.
    inv_s = 1.0 / jnp.maximum(sparsity, 1.0)

    # |AH @ x| and |AH @ mask|: stacked [xr; xi; masks] LHS -> 2 MXU pushes.
    lhs = jnp.concatenate([xr, xi, masks], axis=0)             # (3B, N)
    pr = jnp.dot(lhs, ar_ref[...], preferred_element_type=jnp.float32)
    pi = jnp.dot(lhs, ai_ref[...], preferred_element_type=jnp.float32)
    re = pr[:B] - pi[B:2 * B]
    im = pi[:B] + pr[B:2 * B]
    x_fft = jnp.sqrt(re * re + im * im) * inv_s                # (B, 64)
    mre = pr[2 * B:]
    mim = pi[2 * B:]
    m_fft = jnp.sqrt(mre * mre + mim * mim) * inv_s            # (B, 64)

    # embedded = relu(view_as_real(x).flatten @ W + b) / sparsity; the
    # embedding weight is pre-split into real/imag row halves so the
    # interleaved flat view is never materialized.
    emb = (jnp.dot(xr, w1r_ref[...], preferred_element_type=jnp.float32)
           + jnp.dot(xi, w1i_ref[...], preferred_element_type=jnp.float32)
           + sab1_ref[...])
    emb = jnp.maximum(emb, 0.0) * inv_s                        # (B, 512)

    # DOANet layer 0: cat([m_fft, x_fft, emb]) @ W0 + b0 as three row-split
    # dots (no in-kernel lane concat of widths 61|61|512).
    acc = (jnp.dot(m_fft.astype(jnp.bfloat16), get_w(0),
                   preferred_element_type=jnp.float32)
           + jnp.dot(x_fft.astype(jnp.bfloat16), get_w(1),
                     preferred_element_type=jnp.float32)
           + jnp.dot(emb.astype(jnp.bfloat16), get_w(2),
                     preferred_element_type=jnp.float32))
    h = jnp.maximum(acc * sb[0][...] + sb[1][...], 0.0)

    # DOANet layers 1..5 (ReLU, ..., ReLU, Sigmoid); activations stay in VMEM.
    for li in range(1, 6):
        y = jnp.dot(h.astype(jnp.bfloat16), get_w(li + 2),
                    preferred_element_type=jnp.float32)
        y = y * sb[2 * li][...] + sb[2 * li + 1][...]
        h = jax.nn.sigmoid(y) if li == 5 else jnp.maximum(y, 0.0)

    out_ref[...] = h.astype(out_ref.dtype)


def _sadoanet_pallas(xr, xi, params, batch_tile):
    Bp, N = xr.shape
    nb = Bp // batch_tile

    small = [params["ar"], params["ai"], params["sa_w1r"], params["sa_w1i"],
             params["sa_b1"]]
    sb = []
    for s, b in zip(params["mlp_s"], params["mlp_b"]):
        sb.extend([s, b])
    wq = params["mlp_wq"]                 # 8 int8 weight tensors

    def bcast_spec(shape):
        return pl.BlockSpec(shape, lambda i, _n=len(shape): (0,) * _n)

    in_specs = (
        [pl.BlockSpec((batch_tile, N), lambda i: (i, 0)),
         pl.BlockSpec((batch_tile, N), lambda i: (i, 0))]
        + [bcast_spec(a.shape) for a in small]
        + [bcast_spec(a.shape) for a in sb]
        + [pl.BlockSpec(memory_space=pl.ANY) for _ in wq]
    )
    out_specs = pl.BlockSpec((batch_tile, OUT_PAD), lambda i: (i, 0))

    scratch = ([pltpu.VMEM(w.shape, jnp.int8) for w in wq]
               + [pltpu.SemaphoreType.DMA((N_W,))])

    weight_bytes = (sum(int(w.size) for w in wq)             # int8
                    + 4 * sum(int(a.size) for a in small + sb))
    flops = (2 * Bp * sum(int(w.shape[0]) * int(w.shape[1]) for w in wq)
             + 2 * Bp * (3 * N * PROJ_PAD + 2 * N * 512))
    cost = pl.CostEstimate(
        flops=int(flops),
        transcendentals=int(Bp * (2 * PROJ_PAD + OUT_PAD)),
        bytes_accessed=int(weight_bytes
                           + 4 * (xr.size + xi.size + Bp * OUT_PAD)),
    )

    return pl.pallas_call(
        fused_kernel,
        out_shape=jax.ShapeDtypeStruct((Bp, OUT_PAD), jnp.float32),
        grid=(nb,),
        in_specs=in_specs,
        out_specs=out_specs,
        scratch_shapes=scratch,
        compiler_params=pltpu.CompilerParams(
            # Single-TC ("arbitrary"): weights are DMA'd once at grid step 0
            # into persistent scratch; a "parallel" batch split would
            # re-stream the full weight set per core, which only pays off
            # well past the compute/DMA crossover.
            dimension_semantics=("arbitrary",),
            # ~21 MiB peak at a 256-row tile (int8 weights ~4 MiB + dequant
            # temporaries + f32 activations); 40 MiB leaves headroom and stays
            # under v7x's 64 MiB physical VMEM.
            vmem_limit_bytes=40 * 1024 * 1024,
        ),
        cost_estimate=cost,
    )(xr, xi, *small, *sb, *wq)


# ----------------------------------------------------------------------------
# Parameter / constant construction (glue, plain JAX)
# ----------------------------------------------------------------------------
def steering_vector(number_element, theta_deg):
    """ULA steering matrix a(theta), shape (number_element, len(theta))."""
    theta = jnp.deg2rad(theta_deg.astype(jnp.float32))
    n = jnp.arange(number_element, dtype=jnp.float32)[:, None]
    phase = jnp.pi * n * jnp.sin(theta)[None, :]
    return jnp.exp(1j * phase.astype(jnp.complex64))


def init_linear(key, fan_in, fan_out):
    """PyTorch-style U(-1/sqrt(fan_in), 1/sqrt(fan_in)) for weight and bias."""
    kw, kb = jax.random.split(key)
    bound = 1.0 / jnp.sqrt(float(fan_in))
    w = jax.random.uniform(kw, (fan_in, fan_out), jnp.float32, -bound, bound)
    b = jax.random.uniform(kb, (1, fan_out), jnp.float32, -bound, bound)
    return w, b


def quantize_cols(w):
    """Symmetric int8 quantization with a per-output-column scale."""
    absmax = jnp.max(jnp.abs(w), axis=0, keepdims=True)
    scale = jnp.maximum(absmax, 1e-8) / 127.0
    q = jnp.clip(jnp.round(w / scale), -127.0, 127.0).astype(jnp.int8)
    return q, scale.astype(jnp.float32)


def make_params(key, number_element=10, output_size=61):
    keys = jax.random.split(key, 8)
    N = number_element
    params = {}

    # SALayer embedding linear: 2N -> 512.  Split rows into real/imag halves
    # (interleaved [re0, im0, re1, im1, ...] flat-view layout).
    w1, b1 = init_linear(keys[0], 2 * N, 512)
    params["sa_w1r"] = w1[0::2, :]
    params["sa_w1i"] = w1[1::2, :]
    params["sa_b1"] = b1

    # conj steering matrix, real/imag (N, 61), lane-padded 61 -> 64.
    a_conj = jnp.conj(steering_vector(N, jnp.arange(-30, 31)))
    pad_c = PROJ_PAD - output_size
    params["ar"] = jnp.pad(jnp.real(a_conj).astype(jnp.float32),
                           ((0, 0), (0, pad_c)))
    params["ai"] = jnp.pad(jnp.imag(a_conj).astype(jnp.float32),
                           ((0, 0), (0, pad_c)))

    # DOANet MLP: 634 -> 2048 -> 1024 -> 512 -> 256 -> 128 -> 61 (lane-pad 128)
    input_size = 512 + output_size * 2
    dims = [input_size, 2048, 1024, 512, 256, 128, output_size]
    ws, bs = [], []
    for i, (d_in, d_out) in enumerate(zip(dims[:-1], dims[1:])):
        w, b = init_linear(keys[i + 1], d_in, d_out)
        ws.append(w)
        bs.append(b)

    # Lane-pad the final layer 61 -> 128 output columns (unmasked stores;
    # wrapper slices back to 61).
    ws[-1] = jnp.pad(ws[-1], ((0, 0), (0, OUT_PAD - output_size)))
    bs[-1] = jnp.pad(bs[-1], ((0, 0), (0, OUT_PAD - output_size)))

    wq, scales = [], []
    for w in ws:
        q, s = quantize_cols(w)
        wq.append(q)
        scales.append(s)

    # Layer-0 weight row-split to match the [m_fft | x_fft | emb] concat order
    # of the PyTorch SALayer; rows padded 61 -> 64 (zeros) to match the
    # lane-padded projections.  All three splits share the per-column scale.
    def pad_rows(a, rows):
        return jnp.pad(a, ((0, rows - a.shape[0]), (0, 0)))

    q0 = wq[0]
    q0_m = pad_rows(q0[:output_size], PROJ_PAD)
    q0_x = pad_rows(q0[output_size:2 * output_size], PROJ_PAD)
    q0_e = q0[2 * output_size:]

    params["mlp_wq"] = [q0_m, q0_x, q0_e] + wq[1:]   # 8 int8 tensors
    params["mlp_s"] = scales                         # 6 per-column scales
    params["mlp_b"] = bs                             # 6 f32 biases
    return params


# ----------------------------------------------------------------------------
# Full forward (SADOANet, is_sparse=True, eval mode)
# ----------------------------------------------------------------------------
@jax.jit
def sadoanet_forward(params, x_ri):
    """x_ri: (B, N, 2) float32, last axis = (real, imag) like view_as_complex."""
    B = x_ri.shape[0]
    xr = x_ri[..., 0]
    xi = x_ri[..., 1]

    # Batch tiling: small batches run as a single tile padded to 8 rows (f32
    # sublane); large batches run 256-row tiles so the per-step activation
    # footprint stays bounded and x/out DMA pipelines with compute.
    if B >= BATCH_TILE_MAX:
        tile = BATCH_TILE_MAX
    else:
        tile = max(8, -(-B // 8) * 8)
    Bp = -(-B // tile) * tile
    if Bp != B:
        xr = jnp.pad(xr, ((0, Bp - B), (0, 0)))
        xi = jnp.pad(xi, ((0, Bp - B), (0, 0)))

    out = _sadoanet_pallas(xr, xi, params, tile)
    return out[:B, :OUT]


if __name__ == "__main__":
    key = jax.random.PRNGKey(0)
    k_params, k_x = jax.random.split(key)

    B, N, OUT_SIZE = 4, 10, 61
    params = make_params(k_params, number_element=N, output_size=OUT_SIZE)
    x = jax.random.normal(k_x, (B, N, 2), dtype=jnp.float32)

    out = sadoanet_forward(params, x)
    out = jax.block_until_ready(out)

    assert out.shape == (B, OUT_SIZE), out.shape
    assert bool(jnp.all(jnp.isfinite(out)))
    assert bool(jnp.all((out >= 0.0) & (out <= 1.0)))   # sigmoid output range
    print("KERNEL_OK")
</pallas_src>

<mosaic_0001>
module attributes {stable_mosaic.version = 11 : i64} {
  func.func @fused_kernel(%arg0: i32, %arg1: memref<8x10xf32, #tpu.memory_space<vmem>>, %arg2: memref<8x10xf32, #tpu.memory_space<vmem>>, %arg3: memref<10x64xf32, #tpu.memory_space<vmem>>, %arg4: memref<10x64xf32, #tpu.memory_space<vmem>>, %arg5: memref<10x512xf32, #tpu.memory_space<vmem>>, %arg6: memref<10x512xf32, #tpu.memory_space<vmem>>, %arg7: memref<1x512xf32, #tpu.memory_space<vmem>>, %arg8: memref<1x2048xf32, #tpu.memory_space<vmem>>, %arg9: memref<1x2048xf32, #tpu.memory_space<vmem>>, %arg10: memref<1x1024xf32, #tpu.memory_space<vmem>>, %arg11: memref<1x1024xf32, #tpu.memory_space<vmem>>, %arg12: memref<1x512xf32, #tpu.memory_space<vmem>>, %arg13: memref<1x512xf32, #tpu.memory_space<vmem>>, %arg14: memref<1x256xf32, #tpu.memory_space<vmem>>, %arg15: memref<1x256xf32, #tpu.memory_space<vmem>>, %arg16: memref<1x128xf32, #tpu.memory_space<vmem>>, %arg17: memref<1x128xf32, #tpu.memory_space<vmem>>, %arg18: memref<1x128xf32, #tpu.memory_space<vmem>>, %arg19: memref<1x128xf32, #tpu.memory_space<vmem>>, %arg20: memref<64x2048xi8, #tpu.memory_space<any>>, %arg21: memref<64x2048xi8, #tpu.memory_space<any>>, %arg22: memref<512x2048xi8, #tpu.memory_space<any>>, %arg23: memref<2048x1024xi8, #tpu.memory_space<any>>, %arg24: memref<1024x512xi8, #tpu.memory_space<any>>, %arg25: memref<512x256xi8, #tpu.memory_space<any>>, %arg26: memref<256x128xi8, #tpu.memory_space<any>>, %arg27: memref<128x128xi8, #tpu.memory_space<any>>, %arg28: memref<8x128xf32, #tpu.memory_space<vmem>>, %arg29: memref<64x2048xi8, #tpu.memory_space<vmem>>, %arg30: memref<64x2048xi8, #tpu.memory_space<vmem>>, %arg31: memref<512x2048xi8, #tpu.memory_space<vmem>>, %arg32: memref<2048x1024xi8, #tpu.memory_space<vmem>>, %arg33: memref<1024x512xi8, #tpu.memory_space<vmem>>, %arg34: memref<512x256xi8, #tpu.memory_space<vmem>>, %arg35: memref<256x128xi8, #tpu.memory_space<vmem>>, %arg36: memref<128x128xi8, #tpu.memory_space<vmem>>, %arg37: memref<8x!tpu.dma_semaphore, #tpu.memory_space<semaphore_mem>>) attributes {dimension_semantics = [#tpu.dimension_semantics<arbitrary>], iteration_bounds = array<i64: 1>, scalar_prefetch = 0 : i64, scratch_operands = 9 : i64, tpu.core_type = #tpu.core_type<tc>, window_params = [{transform_indices = @transform_0, window_bounds = array<i64: 8, 10>}, {transform_indices = @transform_1, window_bounds = array<i64: 8, 10>}, {pipeline_mode = #tpu.pipeline_mode<synchronous>, transform_indices = @transform_2, window_bounds = array<i64: 10, 64>}, {pipeline_mode = #tpu.pipeline_mode<synchronous>, transform_indices = @transform_3, window_bounds = array<i64: 10, 64>}, {pipeline_mode = #tpu.pipeline_mode<synchronous>, transform_indices = @transform_4, window_bounds = array<i64: 10, 512>}, {pipeline_mode = #tpu.pipeline_mode<synchronous>, transform_indices = @transform_5, window_bounds = array<i64: 10, 512>}, {pipeline_mode = #tpu.pipeline_mode<synchronous>, transform_indices = @transform_6, window_bounds = array<i64: 1, 512>}, {pipeline_mode = #tpu.pipeline_mode<synchronous>, transform_indices = @transform_7, window_bounds = array<i64: 1, 2048>}, {pipeline_mode = #tpu.pipeline_mode<synchronous>, transform_indices = @transform_8, window_bounds = array<i64: 1, 2048>}, {pipeline_mode = #tpu.pipeline_mode<synchronous>, transform_indices = @transform_9, window_bounds = array<i64: 1, 1024>}, {pipeline_mode = #tpu.pipeline_mode<synchronous>, transform_indices = @transform_10, window_bounds = array<i64: 1, 1024>}, {pipeline_mode = #tpu.pipeline_mode<synchronous>, transform_indices = @transform_11, window_bounds = array<i64: 1, 512>}, {pipeline_mode = #tpu.pipeline_mode<synchronous>, transform_indices = @transform_12, window_bounds = array<i64: 1, 512>}, {pipeline_mode = #tpu.pipeline_mode<synchronous>, transform_indices = @transform_13, window_bounds = array<i64: 1, 256>}, {pipeline_mode = #tpu.pipeline_mode<synchronous>, transform_indices = @transform_14, window_bounds = array<i64: 1, 256>}, {pipeline_mode = #tpu.pipeline_mode<synchronous>, transform_indices = @transform_15, window_bounds = array<i64: 1, 128>}, {pipeline_mode = #tpu.pipeline_mode<synchronous>, transform_indices = @transform_16, window_bounds = array<i64: 1, 128>}, {pipeline_mode = #tpu.pipeline_mode<synchronous>, transform_indices = @transform_17, window_bounds = array<i64: 1, 128>}, {pipeline_mode = #tpu.pipeline_mode<synchronous>, transform_indices = @transform_18, window_bounds = array<i64: 1, 128>}, {}, {}, {}, {}, {}, {}, {}, {}, {transform_indices = @transform_27, window_bounds = array<i64: 8, 128>}]} {
    %c0_i32 = arith.constant 0 : i32
    %0 = arith.cmpi eq, %arg0, %c0_i32 : i32
    %1 = arith.extui %0 : i1 to i32
    %c0_i32_0 = arith.constant 0 : i32
    %2 = arith.cmpi ne, %1, %c0_i32_0 : i32
    scf.if %2 {
      %c0_i32_86 = arith.constant 0 : i32
      %165 = tpu.memref_slice %arg37[%c0_i32_86] : memref<8x!tpu.dma_semaphore, #tpu.memory_space<semaphore_mem>> -> memref<1x!tpu.dma_semaphore, #tpu.memory_space<semaphore_mem>>
      %166 = tpu.memref_squeeze %165 : memref<1x!tpu.dma_semaphore, #tpu.memory_space<semaphore_mem>> -> memref<!tpu.dma_semaphore, #tpu.memory_space<semaphore_mem>>
      tpu.enqueue_dma source(%arg20 : memref<64x2048xi8, #tpu.memory_space<any>>) target(%arg29 : memref<64x2048xi8, #tpu.memory_space<vmem>>) target_semaphore(%166 : memref<!tpu.dma_semaphore, #tpu.memory_space<semaphore_mem>>)
      %c1_i32 = arith.constant 1 : i32
      %167 = tpu.memref_slice %arg37[%c1_i32] : memref<8x!tpu.dma_semaphore, #tpu.memory_space<semaphore_mem>> -> memref<1x!tpu.dma_semaphore, #tpu.memory_space<semaphore_mem>>
      %168 = tpu.memref_squeeze %167 : memref<1x!tpu.dma_semaphore, #tpu.memory_space<semaphore_mem>> -> memref<!tpu.dma_semaphore, #tpu.memory_space<semaphore_mem>>
      tpu.enqueue_dma source(%arg21 : memref<64x2048xi8, #tpu.memory_space<any>>) target(%arg30 : memref<64x2048xi8, #tpu.memory_space<vmem>>) target_semaphore(%168 : memref<!tpu.dma_semaphore, #tpu.memory_space<semaphore_mem>>)
      %c2_i32 = arith.constant 2 : i32
      %169 = tpu.memref_slice %arg37[%c2_i32] : memref<8x!tpu.dma_semaphore, #tpu.memory_space<semaphore_mem>> -> memref<1x!tpu.dma_semaphore, #tpu.memory_space<semaphore_mem>>
      %170 = tpu.memref_squeeze %169 : memref<1x!tpu.dma_semaphore, #tpu.memory_space<semaphore_mem>> -> memref<!tpu.dma_semaphore, #tpu.memory_space<semaphore_mem>>
      tpu.enqueue_dma source(%arg22 : memref<512x2048xi8, #tpu.memory_space<any>>) target(%arg31 : memref<512x2048xi8, #tpu.memory_space<vmem>>) target_semaphore(%170 : memref<!tpu.dma_semaphore, #tpu.memory_space<semaphore_mem>>)
      %c3_i32 = arith.constant 3 : i32
      %171 = tpu.memref_slice %arg37[%c3_i32] : memref<8x!tpu.dma_semaphore, #tpu.memory_space<semaphore_mem>> -> memref<1x!tpu.dma_semaphore, #tpu.memory_space<semaphore_mem>>
      %172 = tpu.memref_squeeze %171 : memref<1x!tpu.dma_semaphore, #tpu.memory_space<semaphore_mem>> -> memref<!tpu.dma_semaphore, #tpu.memory_space<semaphore_mem>>
      tpu.enqueue_dma source(%arg23 : memref<2048x1024xi8, #tpu.memory_space<any>>) target(%arg32 : memref<2048x1024xi8, #tpu.memory_space<vmem>>) target_semaphore(%172 : memref<!tpu.dma_semaphore, #tpu.memory_space<semaphore_mem>>)
      %c4_i32 = arith.constant 4 : i32
      %173 = tpu.memref_slice %arg37[%c4_i32] : memref<8x!tpu.dma_semaphore, #tpu.memory_space<semaphore_mem>> -> memref<1x!tpu.dma_semaphore, #tpu.memory_space<semaphore_mem>>
      %174 = tpu.memref_squeeze %173 : memref<1x!tpu.dma_semaphore, #tpu.memory_space<semaphore_mem>> -> memref<!tpu.dma_semaphore, #tpu.memory_space<semaphore_mem>>
      tpu.enqueue_dma source(%arg24 : memref<1024x512xi8, #tpu.memory_space<any>>) target(%arg33 : memref<1024x512xi8, #tpu.memory_space<vmem>>) target_semaphore(%174 : memref<!tpu.dma_semaphore, #tpu.memory_space<semaphore_mem>>)
      %c5_i32 = arith.constant 5 : i32
      %175 = tpu.memref_slice %arg37[%c5_i32] : memref<8x!tpu.dma_semaphore, #tpu.memory_space<semaphore_mem>> -> memref<1x!tpu.dma_semaphore, #tpu.memory_space<semaphore_mem>>
      %176 = tpu.memref_squeeze %175 : memref<1x!tpu.dma_semaphore, #tpu.memory_space<semaphore_mem>> -> memref<!tpu.dma_semaphore, #tpu.memory_space<semaphore_mem>>
      tpu.enqueue_dma source(%arg25 : memref<512x256xi8, #tpu.memory_space<any>>) target(%arg34 : memref<512x256xi8, #tpu.memory_space<vmem>>) target_semaphore(%176 : memref<!tpu.dma_semaphore, #tpu.memory_space<semaphore_mem>>)
      %c6_i32 = arith.constant 6 : i32
      %177 = tpu.memref_slice %arg37[%c6_i32] : memref<8x!tpu.dma_semaphore, #tpu.memory_space<semaphore_mem>> -> memref<1x!tpu.dma_semaphore, #tpu.memory_space<semaphore_mem>>
      %178 = tpu.memref_squeeze %177 : memref<1x!tpu.dma_semaphore, #tpu.memory_space<semaphore_mem>> -> memref<!tpu.dma_semaphore, #tpu.memory_space<semaphore_mem>>
      tpu.enqueue_dma source(%arg26 : memref<256x128xi8, #tpu.memory_space<any>>) target(%arg35 : memref<256x128xi8, #tpu.memory_space<vmem>>) target_semaphore(%178 : memref<!tpu.dma_semaphore, #tpu.memory_space<semaphore_mem>>)
      %c7_i32 = arith.constant 7 : i32
      %179 = tpu.memref_slice %arg37[%c7_i32] : memref<8x!tpu.dma_semaphore, #tpu.memory_space<semaphore_mem>> -> memref<1x!tpu.dma_semaphore, #tpu.memory_space<semaphore_mem>>
      %180 = tpu.memref_squeeze %179 : memref<1x!tpu.dma_semaphore, #tpu.memory_space<semaphore_mem>> -> memref<!tpu.dma_semaphore, #tpu.memory_space<semaphore_mem>>
      tpu.enqueue_dma source(%arg27 : memref<128x128xi8, #tpu.memory_space<any>>) target(%arg36 : memref<128x128xi8, #tpu.memory_space<vmem>>) target_semaphore(%180 : memref<!tpu.dma_semaphore, #tpu.memory_space<semaphore_mem>>)
    } else {
    }
    %c0 = arith.constant 0 : index
    %c0_1 = arith.constant 0 : index
    %3 = vector.load %arg1[%c0, %c0_1] : memref<8x10xf32, #tpu.memory_space<vmem>>, vector<8x10xf32>
    %c0_2 = arith.constant 0 : index
    %c0_3 = arith.constant 0 : index
    %4 = vector.load %arg2[%c0_2, %c0_3] : memref<8x10xf32, #tpu.memory_space<vmem>>, vector<8x10xf32>
    %5 = arith.mulf %3, %3 : vector<8x10xf32>
    %6 = arith.mulf %4, %4 : vector<8x10xf32>
    %7 = arith.addf %5, %6 : vector<8x10xf32>
    %cst = arith.constant 9.99999997E-7 : f32
    %8 = vector.broadcast %cst : f32 to vector<8x10xf32>
    %9 = arith.cmpf ogt, %7, %8 : vector<8x10xf32>
    %10 = arith.extui %9 : vector<8x10xi1> to vector<8x10xi32>
    %11 = arith.sitofp %10 : vector<8x10xi32> to vector<8x10xf32>
    %cst_4 = arith.constant dense<0.000000e+00> : vector<8xf32>
    %12 = vector.multi_reduction <add>, %11, %cst_4 [1] : vector<8x10xf32> to vector<8xf32>
    %13 = vector.shape_cast %12 : vector<8xf32> to vector<8x1xf32>
    %cst_5 = arith.constant 1.000000e+00 : f32
    %14 = vector.broadcast %cst_5 : f32 to vector<8x1xf32>
    %15 = arith.maximumf %13, %14 : vector<8x1xf32>
    %cst_6 = arith.constant 1.000000e+00 : f32
    %16 = vector.broadcast %cst_6 : f32 to vector<8x1xf32>
    %17 = arith.divf %16, %15 : vector<8x1xf32>
    %18 = tpu.concatenate %3, %4, %11 in 0 : vector<8x10xf32>, vector<8x10xf32>, vector<8x10xf32> -> vector<24x10xf32>
    %c0_7 = arith.constant 0 : index
    %c0_8 = arith.constant 0 : index
    %19 = vector.load %arg3[%c0_7, %c0_8] : memref<10x64xf32, #tpu.memory_space<vmem>>, vector<10x64xf32>
    %cst_9 = arith.constant dense<0.000000e+00> : vector<24x64xf32>
    %20 = tpu.matmul %18, %19, %cst_9 {dimension_numbers = #tpu.dot_dimension_numbers<[1], [0], [0], [1], [0, 0, 1, 1], [], []>} : vector<24x10xf32>, vector<10x64xf32>, vector<24x64xf32> -> vector<24x64xf32>
    %c0_10 = arith.constant 0 : index
    %c0_11 = arith.constant 0 : index
    %21 = vector.load %arg4[%c0_10, %c0_11] : memref<10x64xf32, #tpu.memory_space<vmem>>, vector<10x64xf32>
    %cst_12 = arith.constant dense<0.000000e+00> : vector<24x64xf32>
    %22 = tpu.matmul %18, %21, %cst_12 {dimension_numbers = #tpu.dot_dimension_numbers<[1], [0], [0], [1], [0, 0, 1, 1], [], []>} : vector<24x10xf32>, vector<10x64xf32>, vector<24x64xf32> -> vector<24x64xf32>
    %23 = vector.extract_strided_slice %20 {offsets = [0, 0], sizes = [8, 64], strides = [1, 1]} : vector<24x64xf32> to vector<8x64xf32>
    %24 = vector.extract_strided_slice %22 {offsets = [8, 0], sizes = [8, 64], strides = [1, 1]} : vector<24x64xf32> to vector<8x64xf32>
    %25 = arith.subf %23, %24 : vector<8x64xf32>
    %26 = vector.extract_strided_slice %22 {offsets = [0, 0], sizes = [8, 64], strides = [1, 1]} : vector<24x64xf32> to vector<8x64xf32>
    %27 = vector.extract_strided_slice %20 {offsets = [8, 0], sizes = [8, 64], strides = [1, 1]} : vector<24x64xf32> to vector<8x64xf32>
    %28 = arith.addf %26, %27 : vector<8x64xf32>
    %29 = arith.mulf %25, %25 : vector<8x64xf32>
    %30 = arith.mulf %28, %28 : vector<8x64xf32>
    %31 = arith.addf %29, %30 : vector<8x64xf32>
    %32 = math.sqrt %31 : vector<8x64xf32>
    %33 = vector.broadcast %17 : vector<8x1xf32> to vector<8x64xf32>
    %34 = arith.mulf %32, %33 : vector<8x64xf32>
    %35 = vector.extract_strided_slice %20 {offsets = [16, 0], sizes = [8, 64], strides = [1, 1]} : vector<24x64xf32> to vector<8x64xf32>
    %36 = vector.extract_strided_slice %22 {offsets = [16, 0], sizes = [8, 64], strides = [1, 1]} : vector<24x64xf32> to vector<8x64xf32>
    %37 = arith.mulf %35, %35 : vector<8x64xf32>
    %38 = arith.mulf %36, %36 : vector<8x64xf32>
    %39 = arith.addf %37, %38 : vector<8x64xf32>
    %40 = math.sqrt %39 : vector<8x64xf32>
    %41 = vector.broadcast %17 : vector<8x1xf32> to vector<8x64xf32>
    %42 = arith.mulf %40, %41 : vector<8x64xf32>
    %c0_13 = arith.constant 0 : index
    %c0_14 = arith.constant 0 : index
    %43 = vector.load %arg5[%c0_13, %c0_14] : memref<10x512xf32, #tpu.memory_space<vmem>>, vector<10x512xf32>
    %cst_15 = arith.constant dense<0.000000e+00> : vector<8x512xf32>
    %44 = tpu.matmul %3, %43, %cst_15 {dimension_numbers = #tpu.dot_dimension_numbers<[1], [0], [0], [1], [0, 0, 1, 1], [], []>} : vector<8x10xf32>, vector<10x512xf32>, vector<8x512xf32> -> vector<8x512xf32>
    %c0_16 = arith.constant 0 : index
    %c0_17 = arith.constant 0 : index
    %45 = vector.load %arg6[%c0_16, %c0_17] : memref<10x512xf32, #tpu.memory_space<vmem>>, vector<10x512xf32>
    %cst_18 = arith.constant dense<0.000000e+00> : vector<8x512xf32>
    %46 = tpu.matmul %4, %45, %cst_18 {dimension_numbers = #tpu.dot_dimension_numbers<[1], [0], [0], [1], [0, 0, 1, 1], [], []>} : vector<8x10xf32>, vector<10x512xf32>, vector<8x512xf32> -> vector<8x512xf32>
    %47 = arith.addf %44, %46 : vector<8x512xf32>
    %c0_19 = arith.constant 0 : index
    %c0_20 = arith.constant 0 : index
    %48 = vector.load %arg7[%c0_19, %c0_20] : memref<1x512xf32, #tpu.memory_space<vmem>>, vector<1x512xf32>
    %49 = vector.broadcast %48 : vector<1x512xf32> to vector<8x512xf32>
    %50 = arith.addf %47, %49 : vector<8x512xf32>
    %cst_21 = arith.constant 0.000000e+00 : f32
    %51 = vector.broadcast %cst_21 : f32 to vector<8x512xf32>
    %52 = arith.maximumf %50, %51 : vector<8x512xf32>
    %53 = vector.broadcast %17 : vector<8x1xf32> to vector<8x512xf32>
    %54 = arith.mulf %52, %53 : vector<8x512xf32>
    %55 = arith.truncf %42 : vector<8x64xf32> to vector<8x64xbf16>
    %56 = arith.extui %0 : i1 to i32
    %c0_i32_22 = arith.constant 0 : i32
    %57 = arith.cmpi ne, %56, %c0_i32_22 : i32
    scf.if %57 {
      %c0_i32_86 = arith.constant 0 : i32
      %165 = tpu.memref_slice %arg37[%c0_i32_86] : memref<8x!tpu.dma_semaphore, #tpu.memory_space<semaphore_mem>> -> memref<1x!tpu.dma_semaphore, #tpu.memory_space<semaphore_mem>>
      %166 = tpu.memref_squeeze %165 : memref<1x!tpu.dma_semaphore, #tpu.memory_space<semaphore_mem>> -> memref<!tpu.dma_semaphore, #tpu.memory_space<semaphore_mem>>
      tpu.wait_dma2 semaphore(%166 : memref<!tpu.dma_semaphore, #tpu.memory_space<semaphore_mem>>) src(%arg20 : memref<64x2048xi8, #tpu.memory_space<any>>) dst(%arg29 : memref<64x2048xi8, #tpu.memory_space<vmem>>)
    } else {
    }
    %c0_23 = arith.constant 0 : index
    %c0_24 = arith.constant 0 : index
    %58 = vector.load %arg29[%c0_23, %c0_24] : memref<64x2048xi8, #tpu.memory_space<vmem>>, vector<64x2048xi8>
    %59 = arith.sitofp %58 : vector<64x2048xi8> to vector<64x2048xf32>
    %60 = arith.truncf %59 : vector<64x2048xf32> to vector<64x2048xbf16>
    %cst_25 = arith.constant dense<0.000000e+00> : vector<8x2048xf32>
    %61 = tpu.matmul %55, %60, %cst_25 {dimension_numbers = #tpu.dot_dimension_numbers<[1], [0], [0], [1], [0, 0, 1, 1], [], []>} : vector<8x64xbf16>, vector<64x2048xbf16>, vector<8x2048xf32> -> vector<8x2048xf32>
    %62 = arith.truncf %34 : vector<8x64xf32> to vector<8x64xbf16>
    %63 = arith.extui %0 : i1 to i32
    %c0_i32_26 = arith.constant 0 : i32
    %64 = arith.cmpi ne, %63, %c0_i32_26 : i32
    scf.if %64 {
      %c1_i32 = arith.constant 1 : i32
      %165 = tpu.memref_slice %arg37[%c1_i32] : memref<8x!tpu.dma_semaphore, #tpu.memory_space<semaphore_mem>> -> memref<1x!tpu.dma_semaphore, #tpu.memory_space<semaphore_mem>>
      %166 = tpu.memref_squeeze %165 : memref<1x!tpu.dma_semaphore, #tpu.memory_space<semaphore_mem>> -> memref<!tpu.dma_semaphore, #tpu.memory_space<semaphore_mem>>
      tpu.wait_dma2 semaphore(%166 : memref<!tpu.dma_semaphore, #tpu.memory_space<semaphore_mem>>) src(%arg21 : memref<64x2048xi8, #tpu.memory_space<any>>) dst(%arg30 : memref<64x2048xi8, #tpu.memory_space<vmem>>)
    } else {
    }
    %c0_27 = arith.constant 0 : index
    %c0_28 = arith.constant 0 : index
    %65 = vector.load %arg30[%c0_27, %c0_28] : memref<64x2048xi8, #tpu.memory_space<vmem>>, vector<64x2048xi8>
    %66 = arith.sitofp %65 : vector<64x2048xi8> to vector<64x2048xf32>
    %67 = arith.truncf %66 : vector<64x2048xf32> to vector<64x2048xbf16>
    %cst_29 = arith.constant dense<0.000000e+00> : vector<8x2048xf32>
    %68 = tpu.matmul %62, %67, %cst_29 {dimension_numbers = #tpu.dot_dimension_numbers<[1], [0], [0], [1], [0, 0, 1, 1], [], []>} : vector<8x64xbf16>, vector<64x2048xbf16>, vector<8x2048xf32> -> vector<8x2048xf32>
    %69 = arith.addf %61, %68 : vector<8x2048xf32>
    %70 = arith.truncf %54 : vector<8x512xf32> to vector<8x512xbf16>
    %71 = arith.extui %0 : i1 to i32
    %c0_i32_30 = arith.constant 0 : i32
    %72 = arith.cmpi ne, %71, %c0_i32_30 : i32
    scf.if %72 {
      %c2_i32 = arith.constant 2 : i32
      %165 = tpu.memref_slice %arg37[%c2_i32] : memref<8x!tpu.dma_semaphore, #tpu.memory_space<semaphore_mem>> -> memref<1x!tpu.dma_semaphore, #tpu.memory_space<semaphore_mem>>
      %166 = tpu.memref_squeeze %165 : memref<1x!tpu.dma_semaphore, #tpu.memory_space<semaphore_mem>> -> memref<!tpu.dma_semaphore, #tpu.memory_space<semaphore_mem>>
      tpu.wait_dma2 semaphore(%166 : memref<!tpu.dma_semaphore, #tpu.memory_space<semaphore_mem>>) src(%arg22 : memref<512x2048xi8, #tpu.memory_space<any>>) dst(%arg31 : memref<512x2048xi8, #tpu.memory_space<vmem>>)
    } else {
    }
    %c0_31 = arith.constant 0 : index
    %c0_32 = arith.constant 0 : index
    %73 = vector.load %arg31[%c0_31, %c0_32] : memref<512x2048xi8, #tpu.memory_space<vmem>>, vector<512x2048xi8>
    %74 = arith.sitofp %73 : vector<512x2048xi8> to vector<512x2048xf32>
    %75 = arith.truncf %74 : vector<512x2048xf32> to vector<512x2048xbf16>
    %cst_33 = arith.constant dense<0.000000e+00> : vector<8x2048xf32>
    %76 = tpu.matmul %70, %75, %cst_33 {dimension_numbers = #tpu.dot_dimension_numbers<[1], [0], [0], [1], [0, 0, 1, 1], [], []>} : vector<8x512xbf16>, vector<512x2048xbf16>, vector<8x2048xf32> -> vector<8x2048xf32>
    %77 = arith.addf %69, %76 : vector<8x2048xf32>
    %c0_34 = arith.constant 0 : index
    %c0_35 = arith.constant 0 : index
    %78 = vector.load %arg8[%c0_34, %c0_35] : memref<1x2048xf32, #tpu.memory_space<vmem>>, vector<1x2048xf32>
    %79 = vector.broadcast %78 : vector<1x2048xf32> to vector<8x2048xf32>
    %80 = arith.mulf %77, %79 : vector<8x2048xf32>
    %c0_36 = arith.constant 0 : index
    %c0_37 = arith.constant 0 : index
    %81 = vector.load %arg9[%c0_36, %c0_37] : memref<1x2048xf32, #tpu.memory_space<vmem>>, vector<1x2048xf32>
    %82 = vector.broadcast %81 : vector<1x2048xf32> to vector<8x2048xf32>
    %83 = arith.addf %80, %82 : vector<8x2048xf32>
    %cst_38 = arith.constant 0.000000e+00 : f32
    %84 = vector.broadcast %cst_38 : f32 to vector<8x2048xf32>
    %85 = arith.maximumf %83, %84 : vector<8x2048xf32>
    %86 = arith.truncf %85 : vector<8x2048xf32> to vector<8x2048xbf16>
    %87 = arith.extui %0 : i1 to i32
    %c0_i32_39 = arith.constant 0 : i32
    %88 = arith.cmpi ne, %87, %c0_i32_39 : i32
    scf.if %88 {
      %c3_i32 = arith.constant 3 : i32
      %165 = tpu.memref_slice %arg37[%c3_i32] : memref<8x!tpu.dma_semaphore, #tpu.memory_space<semaphore_mem>> -> memref<1x!tpu.dma_semaphore, #tpu.memory_space<semaphore_mem>>
      %166 = tpu.memref_squeeze %165 : memref<1x!tpu.dma_semaphore, #tpu.memory_space<semaphore_mem>> -> memref<!tpu.dma_semaphore, #tpu.memory_space<semaphore_mem>>
      tpu.wait_dma2 semaphore(%166 : memref<!tpu.dma_semaphore, #tpu.memory_space<semaphore_mem>>) src(%arg23 : memref<2048x1024xi8, #tpu.memory_space<any>>) dst(%arg32 : memref<2048x1024xi8, #tpu.memory_space<vmem>>)
    } else {
    }
    %c0_40 = arith.constant 0 : index
    %c0_41 = arith.constant 0 : index
    %89 = vector.load %arg32[%c0_40, %c0_41] : memref<2048x1024xi8, #tpu.memory_space<vmem>>, vector<2048x1024xi8>
    %90 = arith.sitofp %89 : vector<2048x1024xi8> to vector<2048x1024xf32>
    %91 = arith.truncf %90 : vector<2048x1024xf32> to vector<2048x1024xbf16>
    %cst_42 = arith.constant dense<0.000000e+00> : vector<8x1024xf32>
    %92 = tpu.matmul %86, %91, %cst_42 {dimension_numbers = #tpu.dot_dimension_numbers<[1], [0], [0], [1], [0, 0, 1, 1], [], []>} : vector<8x2048xbf16>, vector<2048x1024xbf16>, vector<8x1024xf32> -> vector<8x1024xf32>
    %c0_43 = arith.constant 0 : index
    %c0_44 = arith.constant 0 : index
    %93 = vector.load %arg10[%c0_43, %c0_44] : memref<1x1024xf32, #tpu.memory_space<vmem>>, vector<1x1024xf32>
    %94 = vector.broadcast %93 : vector<1x1024xf32> to vector<8x1024xf32>
    %95 = arith.mulf %92, %94 : vector<8x1024xf32>
    %c0_45 = arith.constant 0 : index
    %c0_46 = arith.constant 0 : index
    %96 = vector.load %arg11[%c0_45, %c0_46] : memref<1x1024xf32, #tpu.memory_space<vmem>>, vector<1x1024xf32>
    %97 = vector.broadcast %96 : vector<1x1024xf32> to vector<8x1024xf32>
    %98 = arith.addf %95, %97 : vector<8x1024xf32>
    %cst_47 = arith.constant 0.000000e+00 : f32
    %99 = vector.broadcast %cst_47 : f32 to vector<8x1024xf32>
    %100 = arith.maximumf %98, %99 : vector<8x1024xf32>
    %101 = arith.truncf %100 : vector<8x1024xf32> to vector<8x1024xbf16>
    %102 = arith.extui %0 : i1 to i32
    %c0_i32_48 = arith.constant 0 : i32
    %103 = arith.cmpi ne, %102, %c0_i32_48 : i32
    scf.if %103 {
      %c4_i32 = arith.constant 4 : i32
      %165 = tpu.memref_slice %arg37[%c4_i32] : memref<8x!tpu.dma_semaphore, #tpu.memory_space<semaphore_mem>> -> memref<1x!tpu.dma_semaphore, #tpu.memory_space<semaphore_mem>>
      %166 = tpu.memref_squeeze %165 : memref<1x!tpu.dma_semaphore, #tpu.memory_space<semaphore_mem>> -> memref<!tpu.dma_semaphore, #tpu.memory_space<semaphore_mem>>
      tpu.wait_dma2 semaphore(%166 : memref<!tpu.dma_semaphore, #tpu.memory_space<semaphore_mem>>) src(%arg24 : memref<1024x512xi8, #tpu.memory_space<any>>) dst(%arg33 : memref<1024x512xi8, #tpu.memory_space<vmem>>)
    } else {
    }
    %c0_49 = arith.constant 0 : index
    %c0_50 = arith.constant 0 : index
    %104 = vector.load %arg33[%c0_49, %c0_50] : memref<1024x512xi8, #tpu.memory_space<vmem>>, vector<1024x512xi8>
    %105 = arith.sitofp %104 : vector<1024x512xi8> to vector<1024x512xf32>
    %106 = arith.truncf %105 : vector<1024x512xf32> to vector<1024x512xbf16>
    %cst_51 = arith.constant dense<0.000000e+00> : vector<8x512xf32>
    %107 = tpu.matmul %101, %106, %cst_51 {dimension_numbers = #tpu.dot_dimension_numbers<[1], [0], [0], [1], [0, 0, 1, 1], [], []>} : vector<8x1024xbf16>, vector<1024x512xbf16>, vector<8x512xf32> -> vector<8x512xf32>
    %c0_52 = arith.constant 0 : index
    %c0_53 = arith.constant 0 : index
    %108 = vector.load %arg12[%c0_52, %c0_53] : memref<1x512xf32, #tpu.memory_space<vmem>>, vector<1x512xf32>
    %109 = vector.broadcast %108 : vector<1x512xf32> to vector<8x512xf32>
    %110 = arith.mulf %107, %109 : vector<8x512xf32>
    %c0_54 = arith.constant 0 : index
    %c0_55 = arith.constant 0 : index
    %111 = vector.load %arg13[%c0_54, %c0_55] : memref<1x512xf32, #tpu.memory_space<vmem>>, vector<1x512xf32>
    %112 = vector.broadcast %111 : vector<1x512xf32> to vector<8x512xf32>
    %113 = arith.addf %110, %112 : vector<8x512xf32>
    %cst_56 = arith.constant 0.000000e+00 : f32
    %114 = vector.broadcast %cst_56 : f32 to vector<8x512xf32>
    %115 = arith.maximumf %113, %114 : vector<8x512xf32>
    %116 = arith.truncf %115 : vector<8x512xf32> to vector<8x512xbf16>
    %117 = arith.extui %0 : i1 to i32
    %c0_i32_57 = arith.constant 0 : i32
    %118 = arith.cmpi ne, %117, %c0_i32_57 : i32
    scf.if %118 {
      %c5_i32 = arith.constant 5 : i32
      %165 = tpu.memref_slice %arg37[%c5_i32] : memref<8x!tpu.dma_semaphore, #tpu.memory_space<semaphore_mem>> -> memref<1x!tpu.dma_semaphore, #tpu.memory_space<semaphore_mem>>
      %166 = tpu.memref_squeeze %165 : memref<1x!tpu.dma_semaphore, #tpu.memory_space<semaphore_mem>> -> memref<!tpu.dma_semaphore, #tpu.memory_space<semaphore_mem>>
      tpu.wait_dma2 semaphore(%166 : memref<!tpu.dma_semaphore, #tpu.memory_space<semaphore_mem>>) src(%arg25 : memref<512x256xi8, #tpu.memory_space<any>>) dst(%arg34 : memref<512x256xi8, #tpu.memory_space<vmem>>)
    } else {
    }
    %c0_58 = arith.constant 0 : index
    %c0_59 = arith.constant 0 : index
    %119 = vector.load %arg34[%c0_58, %c0_59] : memref<512x256xi8, #tpu.memory_space<vmem>>, vector<512x256xi8>
    %120 = arith.sitofp %119 : vector<512x256xi8> to vector<512x256xf32>
    %121 = arith.truncf %120 : vector<512x256xf32> to vector<512x256xbf16>
    %cst_60 = arith.constant dense<0.000000e+00> : vector<8x256xf32>
    %122 = tpu.matmul %116, %121, %cst_60 {dimension_numbers = #tpu.dot_dimension_numbers<[1], [0], [0], [1], [0, 0, 1, 1], [], []>} : vector<8x512xbf16>, vector<512x256xbf16>, vector<8x256xf32> -> vector<8x256xf32>
    %c0_61 = arith.constant 0 : index
    %c0_62 = arith.constant 0 : index
    %123 = vector.load %arg14[%c0_61, %c0_62] : memref<1x256xf32, #tpu.memory_space<vmem>>, vector<1x256xf32>
    %124 = vector.broadcast %123 : vector<1x256xf32> to vector<8x256xf32>
    %125 = arith.mulf %122, %124 : vector<8x256xf32>
    %c0_63 = arith.constant 0 : index
    %c0_64 = arith.constant 0 : index
    %126 = vector.load %arg15[%c0_63, %c0_64] : memref<1x256xf32, #tpu.memory_space<vmem>>, vector<1x256xf32>
    %127 = vector.broadcast %126 : vector<1x256xf32> to vector<8x256xf32>
    %128 = arith.addf %125, %127 : vector<8x256xf32>
    %cst_65 = arith.constant 0.000000e+00 : f32
    %129 = vector.broadcast %cst_65 : f32 to vector<8x256xf32>
    %130 = arith.maximumf %128, %129 : vector<8x256xf32>
    %131 = arith.truncf %130 : vector<8x256xf32> to vector<8x256xbf16>
    %132 = arith.extui %0 : i1 to i32
    %c0_i32_66 = arith.constant 0 : i32
    %133 = arith.cmpi ne, %132, %c0_i32_66 : i32
    scf.if %133 {
      %c6_i32 = arith.constant 6 : i32
      %165 = tpu.memref_slice %arg37[%c6_i32] : memref<8x!tpu.dma_semaphore, #tpu.memory_space<semaphore_mem>> -> memref<1x!tpu.dma_semaphore, #tpu.memory_space<semaphore_mem>>
      %166 = tpu.memref_squeeze %165 : memref<1x!tpu.dma_semaphore, #tpu.memory_space<semaphore_mem>> -> memref<!tpu.dma_semaphore, #tpu.memory_space<semaphore_mem>>
      tpu.wait_dma2 semaphore(%166 : memref<!tpu.dma_semaphore, #tpu.memory_space<semaphore_mem>>) src(%arg26 : memref<256x128xi8, #tpu.memory_space<any>>) dst(%arg35 : memref<256x128xi8, #tpu.memory_space<vmem>>)
    } else {
    }
    %c0_67 = arith.constant 0 : index
    %c0_68 = arith.constant 0 : index
    %134 = vector.load %arg35[%c0_67, %c0_68] : memref<256x128xi8, #tpu.memory_space<vmem>>, vector<256x128xi8>
    %135 = arith.sitofp %134 : vector<256x128xi8> to vector<256x128xf32>
    %136 = arith.truncf %135 : vector<256x128xf32> to vector<256x128xbf16>
    %cst_69 = arith.constant dense<0.000000e+00> : vector<8x128xf32>
    %137 = tpu.matmul %131, %136, %cst_69 {dimension_numbers = #tpu.dot_dimension_numbers<[1], [0], [0], [1], [0, 0, 1, 1], [], []>} : vector<8x256xbf16>, vector<256x128xbf16>, vector<8x128xf32> -> vector<8x128xf32>
    %c0_70 = arith.constant 0 : index
    %c0_71 = arith.constant 0 : index
    %138 = vector.load %arg16[%c0_70, %c0_71] : memref<1x128xf32, #tpu.memory_space<vmem>>, vector<1x128xf32>
    %139 = vector.broadcast %138 : vector<1x128xf32> to vector<8x128xf32>
    %140 = arith.mulf %137, %139 : vector<8x128xf32>
    %c0_72 = arith.constant 0 : index
    %c0_73 = arith.constant 0 : index
    %141 = vector.load %arg17[%c0_72, %c0_73] : memref<1x128xf32, #tpu.memory_space<vmem>>, vector<1x128xf32>
    %142 = vector.broadcast %141 : vector<1x128xf32> to vector<8x128xf32>
    %143 = arith.addf %140, %142 : vector<8x128xf32>
    %cst_74 = arith.constant 0.000000e+00 : f32
    %144 = vector.broadcast %cst_74 : f32 to vector<8x128xf32>
    %145 = arith.maximumf %143, %144 : vector<8x128xf32>
    %146 = arith.truncf %145 : vector<8x128xf32> to vector<8x128xbf16>
    %147 = arith.extui %0 : i1 to i32
    %c0_i32_75 = arith.constant 0 : i32
    %148 = arith.cmpi ne, %147, %c0_i32_75 : i32
    scf.if %148 {
      %c7_i32 = arith.constant 7 : i32
      %165 = tpu.memref_slice %arg37[%c7_i32] : memref<8x!tpu.dma_semaphore, #tpu.memory_space<semaphore_mem>> -> memref<1x!tpu.dma_semaphore, #tpu.memory_space<semaphore_mem>>
      %166 = tpu.memref_squeeze %165 : memref<1x!tpu.dma_semaphore, #tpu.memory_space<semaphore_mem>> -> memref<!tpu.dma_semaphore, #tpu.memory_space<semaphore_mem>>
      tpu.wait_dma2 semaphore(%166 : memref<!tpu.dma_semaphore, #tpu.memory_space<semaphore_mem>>) src(%arg27 : memref<128x128xi8, #tpu.memory_space<any>>) dst(%arg36 : memref<128x128xi8, #tpu.memory_space<vmem>>)
    } else {
    }
    %c0_76 = arith.constant 0 : index
    %c0_77 = arith.constant 0 : index
    %149 = vector.load %arg36[%c0_76, %c0_77] : memref<128x128xi8, #tpu.memory_space<vmem>>, vector<128x128xi8>
    %150 = arith.sitofp %149 : vector<128x128xi8> to vector<128x128xf32>
    %151 = arith.truncf %150 : vector<128x128xf32> to vector<128x128xbf16>
    %cst_78 = arith.constant dense<0.000000e+00> : vector<8x128xf32>
    %152 = tpu.matmul %146, %151, %cst_78 {dimension_numbers = #tpu.dot_dimension_numbers<[1], [0], [0], [1], [0, 0, 1, 1], [], []>} : vector<8x128xbf16>, vector<128x128xbf16>, vector<8x128xf32> -> vector<8x128xf32>
    %c0_79 = arith.constant 0 : index
    %c0_80 = arith.constant 0 : index
    %153 = vector.load %arg18[%c0_79, %c0_80] : memref<1x128xf32, #tpu.memory_space<vmem>>, vector<1x128xf32>
    %154 = vector.broadcast %153 : vector<1x128xf32> to vector<8x128xf32>
    %155 = arith.mulf %152, %154 : vector<8x128xf32>
    %c0_81 = arith.constant 0 : index
    %c0_82 = arith.constant 0 : index
    %156 = vector.load %arg19[%c0_81, %c0_82] : memref<1x128xf32, #tpu.memory_space<vmem>>, vector<1x128xf32>
    %157 = vector.broadcast %156 : vector<1x128xf32> to vector<8x128xf32>
    %158 = arith.addf %155, %157 : vector<8x128xf32>
    %159 = arith.negf %158 : vector<8x128xf32>
    %160 = math.exp %159 : vector<8x128xf32>
    %cst_83 = arith.constant 1.000000e+00 : f32
    %161 = vector.broadcast %cst_83 : f32 to vector<8x128xf32>
    %162 = arith.addf %161, %160 : vector<8x128xf32>
    %163 = arith.divf %161, %162 : vector<8x128xf32>
    %c0_84 = arith.constant 0 : index
    %c0_85 = arith.constant 0 : index
    %164 = vector.load %arg28[%c0_84, %c0_85] : memref<8x128xf32, #tpu.memory_space<vmem>>, vector<8x128xf32>
    tpu.vector_store %arg28[%c0_84, %c0_85], %163 {strides = array<i32>} : memref<8x128xf32, #tpu.memory_space<vmem>>, vector<8x128xf32>,
    return
  }
  func.func @transform_0(%arg0: i32) -> (i32, i32) {
    %c0_i32 = arith.constant 0 : i32
    %c0_i32_0 = arith.constant 0 : i32
    return %arg0, %c0_i32 : i32, i32
  }
  func.func @transform_1(%arg0: i32) -> (i32, i32) {
    %c0_i32 = arith.constant 0 : i32
    %c0_i32_0 = arith.constant 0 : i32
    return %arg0, %c0_i32 : i32, i32
  }
  func.func @transform_2(%arg0: i32) -> (i32, i32) {
    %c0_i32 = arith.constant 0 : i32
    %c0_i32_0 = arith.constant 0 : i32
    %c0_i32_1 = arith.constant 0 : i32
    return %c0_i32, %c0_i32_0 : i32, i32
  }
  func.func @transform_3(%arg0: i32) -> (i32, i32) {
    %c0_i32 = arith.constant 0 : i32
    %c0_i32_0 = arith.constant 0 : i32
    %c0_i32_1 = arith.constant 0 : i32
    return %c0_i32, %c0_i32_0 : i32, i32
  }
  func.func @transform_4(%arg0: i32) -> (i32, i32) {
    %c0_i32 = arith.constant 0 : i32
    %c0_i32_0 = arith.constant 0 : i32
    %c0_i32_1 = arith.constant 0 : i32
    return %c0_i32, %c0_i32_0 : i32, i32
  }
  func.func @transform_5(%arg0: i32) -> (i32, i32) {
    %c0_i32 = arith.constant 0 : i32
    %c0_i32_0 = arith.constant 0 : i32
    %c0_i32_1 = arith.constant 0 : i32
    return %c0_i32, %c0_i32_0 : i32, i32
  }
  func.func @transform_6(%arg0: i32) -> (i32, i32) {
    %c0_i32 = arith.constant 0 : i32
    %c0_i32_0 = arith.constant 0 : i32
    %c0_i32_1 = arith.constant 0 : i32
    return %c0_i32, %c0_i32_0 : i32, i32
  }
  func.func @transform_7(%arg0: i32) -> (i32, i32) {
    %c0_i32 = arith.constant 0 : i32
    %c0_i32_0 = arith.constant 0 : i32
    %c0_i32_1 = arith.constant 0 : i32
    return %c0_i32, %c0_i32_0 : i32, i32
  }
  func.func @transform_8(%arg0: i32) -> (i32, i32) {
    %c0_i32 = arith.constant 0 : i32
    %c0_i32_0 = arith.constant 0 : i32
    %c0_i32_1 = arith.constant 0 : i32
    return %c0_i32, %c0_i32_0 : i32, i32
  }
  func.func @transform_9(%arg0: i32) -> (i32, i32) {
    %c0_i32 = arith.constant 0 : i32
    %c0_i32_0 = arith.constant 0 : i32
    %c0_i32_1 = arith.constant 0 : i32
    return %c0_i32, %c0_i32_0 : i32, i32
  }
  func.func @transform_10(%arg0: i32) -> (i32, i32) {
    %c0_i32 = arith.constant 0 : i32
    %c0_i32_0 = arith.constant 0 : i32
    %c0_i32_1 = arith.constant 0 : i32
    return %c0_i32, %c0_i32_0 : i32, i32
  }
  func.func @transform_11(%arg0: i32) -> (i32, i32) {
    %c0_i32 = arith.constant 0 : i32
    %c0_i32_0 = arith.constant 0 : i32
    %c0_i32_1 = arith.constant 0 : i32
    return %c0_i32, %c0_i32_0 : i32, i32
  }
  func.func @transform_12(%arg0: i32) -> (i32, i32) {
    %c0_i32 = arith.constant 0 : i32
    %c0_i32_0 = arith.constant 0 : i32
    %c0_i32_1 = arith.constant 0 : i32
    return %c0_i32, %c0_i32_0 : i32, i32
  }
  func.func @transform_13(%arg0: i32) -> (i32, i32) {
    %c0_i32 = arith.constant 0 : i32
    %c0_i32_0 = arith.constant 0 : i32
    %c0_i32_1 = arith.constant 0 : i32
    return %c0_i32, %c0_i32_0 : i32, i32
  }
  func.func @transform_14(%arg0: i32) -> (i32, i32) {
    %c0_i32 = arith.constant 0 : i32
    %c0_i32_0 = arith.constant 0 : i32
    %c0_i32_1 = arith.constant 0 : i32
    return %c0_i32, %c0_i32_0 : i32, i32
  }
  func.func @transform_15(%arg0: i32) -> (i32, i32) {
    %c0_i32 = arith.constant 0 : i32
    %c0_i32_0 = arith.constant 0 : i32
    %c0_i32_1 = arith.constant 0 : i32
    return %c0_i32, %c0_i32_0 : i32, i32
  }
  func.func @transform_16(%arg0: i32) -> (i32, i32) {
    %c0_i32 = arith.constant 0 : i32
    %c0_i32_0 = arith.constant 0 : i32
    %c0_i32_1 = arith.constant 0 : i32
    return %c0_i32, %c0_i32_0 : i32, i32
  }
  func.func @transform_17(%arg0: i32) -> (i32, i32) {
    %c0_i32 = arith.constant 0 : i32
    %c0_i32_0 = arith.constant 0 : i32
    %c0_i32_1 = arith.constant 0 : i32
    return %c0_i32, %c0_i32_0 : i32, i32
  }
  func.func @transform_18(%arg0: i32) -> (i32, i32) {
    %c0_i32 = arith.constant 0 : i32
    %c0_i32_0 = arith.constant 0 : i32
    %c0_i32_1 = arith.constant 0 : i32
    return %c0_i32, %c0_i32_0 : i32, i32
  }
  func.func @transform_27(%arg0: i32) -> (i32, i32) {
    %c0_i32 = arith.constant 0 : i32
    %c0_i32_0 = arith.constant 0 : i32
    return %arg0, %c0_i32 : i32, i32
  }
}

</mosaic_0001>

<bundles_post_ra>
// kernel: sadoanet_forward.1
= control target key start
LH: loop header
LB: loop body
LE: loop exit
PB: predicated region body
PF: predicated region fallthrough
CT: control target
= control target key end

     0   :  { %s9503_s0 = inlined_call_operand.vmem [shape: f32[8,10], index: 0, kind: input, shape index: {}]   ;;  %s9504_s1 = inlined_call_operand.vmem [shape: f32[8,10], index: 1, kind: input, shape index: {}]   ;;  %s9505_s2 = inlined_call_operand.hbm [shape: f32[10,64], index: 2, kind: input, shape index: {}]   ;;  %s9506_s3 = inlined_call_operand.hbm [shape: f32[10,64], index: 3, kind: input, shape index: {}]   ;;  %s9507_s4 = inlined_call_operand.hbm [shape: f32[10,512], index: 4, kind: input, shape index: {}]   ;;  %s9508_s5 = inlined_call_operand.hbm [shape: f32[10,512], index: 5, kind: input, shape index: {}]   ;;  %s9509_s6 = inlined_call_operand.hbm [shape: f32[1,512], index: 6, kind: input, shape index: {}]   ;;  %s9510_s7 = inlined_call_operand.hbm [shape: f32[1,2048], index: 7, kind: input, shape index: {}]   ;;  %s9511_s8 = inlined_call_operand.hbm [shape: f32[1,2048], index: 8, kind: input, shape index: {}]   ;;  %s9512_s9 = inlined_call_operand.hbm [shape: f32[1,1024], index: 9, kind: input, shape index: {}]   ;;  %s9513_s10 = inlined_call_operand.hbm [shape: f32[1,1024], index: 10, kind: input, shape index: {}]   ;;  %s9514_s11 = inlined_call_operand.hbm [shape: f32[1,512], index: 11, kind: input, shape index: {}]   ;;  %s9515_s12 = inlined_call_operand.hbm [shape: f32[1,512], index: 12, kind: input, shape index: {}]   ;;  %s9516_s13 = inlined_call_operand.hbm [shape: f32[1,256], index: 13, kind: input, shape index: {}]   ;;  %s9517_s14 = inlined_call_operand.hbm [shape: f32[1,256], index: 14, kind: input, shape index: {}]   ;;  %s9518_s15 = inlined_call_operand.hbm [shape: f32[1,128], index: 15, kind: input, shape index: {}]   ;;  %s9519_s16 = inlined_call_operand.hbm [shape: f32[1,128], index: 16, kind: input, shape index: {}]   ;;  %s9520_s17 = inlined_call_operand.hbm [shape: f32[1,128], index: 17, kind: input, shape index: {}]   ;;  %s9521_s18 = inlined_call_operand.hbm [shape: f32[1,128], index: 18, kind: input, shape index: {}]   ;;  %s9522_s19 = inlined_call_operand.hbm [shape: s8[64,2048], index: 19, kind: input, shape index: {}]   ;;  %s9523_s20 = inlined_call_operand.hbm [shape: s8[64,2048], index: 20, kind: input, shape index: {}]   ;;  %s9524_s21 = inlined_call_operand.hbm [shape: s8[512,2048], index: 21, kind: input, shape index: {}]   ;;  %s9525_s22 = inlined_call_operand.hbm [shape: s8[2048,1024], index: 22, kind: input, shape index: {}]   ;;  %s9526_s23 = inlined_call_operand.hbm [shape: s8[1024,512], index: 23, kind: input, shape index: {}]   ;;  %s9527_s24 = inlined_call_operand.hbm [shape: s8[512,256], index: 24, kind: input, shape index: {}]   ;;  %s9528_s25 = inlined_call_operand.hbm [shape: s8[256,128], index: 25, kind: input, shape index: {}]   ;;  %s9529_s26 = inlined_call_operand.hbm [shape: s8[128,128], index: 26, kind: input, shape index: {}]   ;;  %s9530_s27 = inlined_call_operand.vmem [shape: f32[8,128], index: 27, kind: output, shape index: {}]  }
   0x1   :  { %9535 = sst [smem:[#allocation72_spill]] %s9503_s0 }
   0x2   :  { %9536 = sst [smem:[#allocation73_spill]] %s9504_s1 }
   0x3   :  { %9537 = sst [smem:[#allocation74_spill]] %s9505_s2 }
   0x4   :  { %9538 = sst [smem:[#allocation75_spill]] %s9506_s3 }
   0x5   :  { %9539 = sst [smem:[#allocation76_spill]] %s9507_s4 }
   0x6   :  { %9540 = sst [smem:[#allocation77_spill]] %s9508_s5 }
   0x7   :  { %9541 = sst [smem:[#allocation78_spill]] %s9509_s6 }
   0x8   :  { %9542 = sst [smem:[#allocation79_spill]] %s9510_s7 }
   0x9   :  { %9543 = sst [smem:[#allocation80_spill]] %s9511_s8 }
   0xa   :  { %9544 = sst [smem:[#allocation81_spill]] %s9512_s9 }
   0xb   :  { %9545 = sst [smem:[#allocation82_spill]] %s9513_s10 }
   0xc   :  { %9546 = sst [smem:[#allocation83_spill]] %s9514_s11 }
   0xd   :  { %9547 = sst [smem:[#allocation84_spill]] %s9530_s27 }
   0xe   :  { %32 = vsyncpa [#allocation12], 0 }
   0xf   :  { %33 = vsyncpa [#allocation14], 0 }
  0x10   :  { %34 = vsyncpa [#allocation17], 0 }
  0x11   :  { %35 = vsyncpa [#allocation20], 0 }
  0x12   :  { %36 = vsyncpa [#allocation23], 0 }
  0x13   :  { %37 = vsyncpa [#allocation26], 0 }
  0x14   :  { %38 = vsyncpa [#allocation29], 0 }
  0x15   :  { %39 = vsyncpa [#allocation32], 0 }
  0x16   :  { %40 = vsyncpa [#allocation35], 0  ;;  %s8437_s7 = smov [#allocation13]  }
  0x17   :  { %s62_s4 = sshll.u32 %s8437_s7, 4  ;;  %s63_s4 = int_to_ptr.vmem [resolvable:$true] %s62_s4 }
  0x18   :  { %s7911_s8 = scalar_lea.vmem %s63_s4, 256  ;;  %p7916_p1 = scmp.lt.s32.totalorder %s63_s4, %s63_s4 }
  0x19   :  { %p7912_p0 = scmp.ne.s32.totalorder %s63_s4, %s7911_s8  ;;  %p7917_p2 = scmp.lt.s32.totalorder %s7911_s8, %s7911_s8 }
  0x1b   :  { %p7918_p3 = por %p7917_p2, %p7916_p1 }
  0x1d   :  { %p7919_p4 = pnand %p7918_p3, %p7912_p0 }
  0x1f   :  { %7922 = shalt.err (!%p7919_p4)
}
  0x20   :  { %s9531_s30 = smov 128   ;;  %s9532_s9 = smov 8  }
  0x21   :  { %s9548_s0 = sld [smem:[#allocation75_spill]]  ;;  %s8440_s10 = smov [#allocation16]  }
  0x22   :  { %s86_s29 = sshll.u32 %s8440_s10, 4  ;;  %s8441_s1 = smov [#allocation19]   ;;  %s87_s29 = int_to_ptr.vmem [resolvable:$true] %s86_s29 }
  0x23   :  { %s109_s6 = sshll.u32 %s8441_s1, 4  ;;  %s7931_s11 = scalar_lea.vmem %s87_s29, 1024  ;;  %s110_s6 = int_to_ptr.vmem [resolvable:$true] %s109_s6 }
  0x24   :  { %p7932_p5 = scmp.ne.s32.totalorder %s87_s29, %s7931_s11  ;;  %p7936_p6 = scmp.lt.s32.totalorder %s87_s29, %s87_s29 }
  0x25   :  { %p7937_p7 = scmp.lt.s32.totalorder %s7931_s11, %s7931_s11 }
  0x27   :  { %68 = dma.hbm_to_vmem [thread:$0]  %s9548_s0, 256, %s63_s4, [#allocation14], %s9531_s30, %s9531_s30, %s9532_s9  }
  0x28   :  { %p7938_p8 = por %p7937_p7, %p7936_p6 }
  0x2a   :  { %p7939_p9 = pnand %p7938_p8, %p7932_p5 }
  0x2c   :  { %7942 = shalt.err (!%p7939_p9)
}
  0x2d   :  { %s8442_s2 = smov 512   ;;  %s8443_s3 = smov 32  }
  0x2e   :  { %s9549_s4 = sld [smem:[#allocation77_spill]]  ;;  %s7951_s5 = scalar_lea.vmem %s110_s6, 256 }
  0x2f   :  { %p7952_p10 = scmp.ne.s32.totalorder %s110_s6, %s7951_s5  ;;  %p7956_p11 = scmp.lt.s32.totalorder %s110_s6, %s110_s6 }
  0x30   :  { %p7957_p12 = scmp.lt.s32.totalorder %s7951_s5, %s7951_s5 }
  0x32   :  { %p7958_p13 = por %p7957_p12, %p7956_p11 }
  0x34   :  { %92 = dma.hbm_to_vmem [thread:$0]  %s9549_s4, 1024, %s87_s29, [#allocation17], %s8442_s2, %s8442_s2, %s8443_s3  }
  0x35   :  { %p7959_p0 = pnand %p7958_p13, %p7952_p10 }
  0x37   :  { %7962 = shalt.err (!%p7959_p0)
}
  0x38   :  { %s9550_s10 = sld [smem:[#allocation79_spill]]  ;;  %s8444_s1 = smov [#allocation22]  }
  0x39   :  { %s129_s11 = sshll.u32 %s8444_s1, 4  ;;  %s8445_s30 = smov [#allocation25]   ;;  %s130_s11 = int_to_ptr.vmem [resolvable:$true] %s129_s11 }
  0x3a   :  { %s149_s9 = sshll.u32 %s8445_s30, 4  ;;  %s7971_s27 = scalar_lea.vmem %s130_s11, 128  ;;  %s150_s9 = int_to_ptr.vmem [resolvable:$true] %s149_s9 }
  0x3b   :  { %p7972_p1 = scmp.ne.s32.totalorder %s130_s11, %s7971_s27  ;;  %p7976_p2 = scmp.lt.s32.totalorder %s130_s11, %s130_s11 }
  0x3c   :  { %p7977_p3 = scmp.lt.s32.totalorder %s7971_s27, %s7971_s27 }
  0x3e   :  { %112 = dma.hbm_to_vmem [thread:$0]  %s9550_s10, 256, %s110_s6, [#allocation20]  }
  0x3f   :  { %p7978_p4 = por %p7977_p3, %p7976_p2 }
  0x41   :  { %p7979_p5 = pnand %p7978_p4, %p7972_p1 }
  0x43   :  { %7982 = shalt.err (!%p7979_p5)
}
  0x44   :  { %s9551_s8 = sld [smem:[#allocation81_spill]]  ;;  %s7991_s4 = scalar_lea.vmem %s150_s9, 64 }
  0x45   :  { %p7992_p6 = scmp.ne.s32.totalorder %s150_s9, %s7991_s4  ;;  %p7996_p7 = scmp.lt.s32.totalorder %s150_s9, %s150_s9 }
  0x46   :  { %p7997_p8 = scmp.lt.s32.totalorder %s7991_s4, %s7991_s4 }
  0x48   :  { %p7998_p9 = por %p7997_p8, %p7996_p7 }
  0x4a   :  { %132 = dma.hbm_to_vmem [thread:$0]  %s9551_s8, 128, %s130_s11, [#allocation23]  }
  0x4b   :  { %p7999_p10 = pnand %p7998_p9, %p7992_p6 }
  0x4d   :  { %8002 = shalt.err (!%p7999_p10)
}
  0x4e   :  { %s9552_s5 = sld [smem:[#allocation83_spill]]  ;;  %s8446_s27 = smov [#allocation28]  }
  0x4f   :  { %s169_s28 = sshll.u32 %s8446_s27, 4  ;;  %s8447_s0 = smov [#allocation31]   ;;  %s170_s28 = int_to_ptr.vmem [resolvable:$true] %s169_s28 }
  0x50   :  { %s189_s10 = sshll.u32 %s8447_s0, 4  ;;  %s8011_s1 = scalar_lea.vmem %s170_s28, 32  ;;  %s190_s10 = int_to_ptr.vmem [resolvable:$true] %s189_s10 }
  0x51   :  { %p8012_p11 = scmp.ne.s32.totalorder %s170_s28, %s8011_s1  ;;  %p8016_p12 = scmp.lt.s32.totalorder %s170_s28, %s170_s28 }
  0x52   :  { %p8017_p13 = scmp.lt.s32.totalorder %s8011_s1, %s8011_s1 }
  0x54   :  { %152 = dma.hbm_to_vmem [thread:$0]  %s9552_s5, 64, %s150_s9, [#allocation26]  }
  0x55   :  { %p8018_p0 = por %p8017_p13, %p8016_p12 }
  0x57   :  { %p8019_p1 = pnand %p8018_p0, %p8012_p11 }
  0x59   :  { %8022 = shalt.err (!%p8019_p1)
}
  0x5a   :  { %172 = dma.hbm_to_vmem [thread:$0]  %s9516_s13, 32, %s170_s28, [#allocation29]  }
  0x5b   :  { %s8031_s7 = scalar_lea.vmem %s190_s10, 16  ;;  %s8035_s9 = scalar_lea.vmem %s190_s10, 32 }
  0x5c   :  { %p8032_p2 = scmp.ne.s32.totalorder %s190_s10, %s8031_s7  ;;  %p8036_p3 = scmp.lt.s32.totalorder %s190_s10, %s190_s10 }
  0x5d   :  { %p8037_p4 = scmp.lt.s32.totalorder %s8035_s9, %s8031_s7 }
  0x5f   :  { %p8038_p5 = por %p8037_p4, %p8036_p3 }
  0x61   :  { %p8039_p6 = pnand %p8038_p5, %p8032_p2 }
  0x63   :  { %8042 = shalt.err (!%p8039_p6)
}
  0x64   :  { %192 = dma.hbm_to_vmem [thread:$0]  %s9518_s15, 16, %s190_s10, [#allocation32]  }
  0x65   :  { %s8448_s30 = smov [#allocation34]   ;;  %s8449_s5 = smov [#allocation11]  }
  0x66   :  { %s209_s6 = sshll.u32 %s8448_s30, 4  ;;  %s50_s27 = sshll.u32 %s8449_s5, 4  ;;  %s210_s6 = int_to_ptr.vmem [resolvable:$true] %s209_s6  ;;  %s51_s27 = int_to_ptr.vmem [resolvable:$true] %s50_s27 }
  0x67   :  { %s8051_s0 = scalar_lea.vmem %s210_s6, 16  ;;  %s8055_s13 = scalar_lea.vmem %s210_s6, 32 }
  0x68   :  { %p8052_p7 = scmp.ne.s32.totalorder %s210_s6, %s8051_s0  ;;  %p8056_p8 = scmp.lt.s32.totalorder %s210_s6, %s210_s6 }
  0x69   :  { %p8057_p9 = scmp.lt.s32.totalorder %s8055_s13, %s8051_s0 }
  0x6b   :  { %p8058_p10 = por %p8057_p9, %p8056_p8 }
  0x6d   :  { %p8059_p11 = pnand %p8058_p10, %p8052_p7 }
  0x6f   :  { %8062 = shalt.err (!%p8059_p11)
}
  0x70   :  { %212 = dma.hbm_to_vmem [thread:$0]  %s9520_s17, 16, %s210_s6, [#allocation35]  }
  0x71   :  { %s8071_s11 = scalar_lea.vmem %s51_s27, 256  ;;  %p8076_p13 = scmp.lt.s32.totalorder %s51_s27, %s51_s27 }
  0x72   :  { %p8072_p12 = scmp.ne.s32.totalorder %s51_s27, %s8071_s11  ;;  %p8077_p0 = scmp.lt.s32.totalorder %s8071_s11, %s8071_s11 }
  0x74   :  { %p8078_p1 = por %p8077_p0, %p8076_p13 }
  0x76   :  { %p8079_p2 = pnand %p8078_p1, %p8072_p12 }
  0x78   :  { %8082 = shalt.err (!%p8079_p2)
}
  0x79   :  { %s9553_s15 = smov 8   ;;  %s9554_s10 = smov 128  }
  0x7a   :  { %s9555_s9 = sld [smem:[#allocation74_spill]]  ;;  %s8450_s8 = smov [#allocation15]  }
  0x7b   :  { %s74_s4 = sshll.u32 %s8450_s8, 4  ;;  %s8451_s30 = smov [#allocation18]   ;;  %s75_s4 = int_to_ptr.vmem [resolvable:$true] %s74_s4 }
  0x7c   :  { %s99_s17 = sshll.u32 %s8451_s30, 4  ;;  %s8091_s6 = scalar_lea.vmem %s75_s4, 1024  ;;  %s100_s17 = int_to_ptr.vmem [resolvable:$true] %s99_s17 }
  0x7d   :  { %p8092_p3 = scmp.ne.s32.totalorder %s75_s4, %s8091_s6  ;;  %p8096_p4 = scmp.lt.s32.totalorder %s75_s4, %s75_s4 }
  0x7e   :  { %p8097_p5 = scmp.lt.s32.totalorder %s8091_s6, %s8091_s6 }
  0x80   :  { %56 = dma.hbm_to_vmem [thread:$0]  %s9555_s9, 256, %s51_s27, [#allocation12], %s9554_s10, %s9554_s10, %s9553_s15  }
  0x81   :  { %p8098_p6 = por %p8097_p5, %p8096_p4 }
  0x83   :  { %p8099_p7 = pnand %p8098_p6, %p8092_p3 }
  0x85   :  { %8102 = shalt.err (!%p8099_p7)
}
  0x86   :  { %s9556_s13 = sld [smem:[#allocation76_spill]]  ;;  %s8111_s27 = scalar_lea.vmem %s100_s17, 64 }
  0x87   :  { %p8112_p8 = scmp.ne.s32.totalorder %s100_s17, %s8111_s27  ;;  %p8116_p9 = scmp.lt.s32.totalorder %s100_s17, %s100_s17 }
  0x88   :  { %p8117_p10 = scmp.lt.s32.totalorder %s8111_s27, %s8111_s27 }
  0x8a   :  { %p8118_p11 = por %p8117_p10, %p8116_p9 }
  0x8c   :  { %80 = dma.hbm_to_vmem [thread:$0]  %s9556_s13, 1024, %s75_s4, [#allocation14], %s8442_s2, %s8442_s2, %s8443_s3  }
  0x8d   :  { %p8119_p12 = pnand %p8118_p11, %p8112_p8 }
  0x8f   :  { %8122 = shalt.err (!%p8119_p12)
}
  0x90   :  { %s9557_s11 = sld [smem:[#allocation78_spill]]  ;;  %s8452_s15 = smov [#allocation21]  }
  0x91   :  { %s119_s10 = sshll.u32 %s8452_s15, 4  ;;  %s8453_s29 = smov [#allocation24]   ;;  %s120_s10 = int_to_ptr.vmem [resolvable:$true] %s119_s10 }
  0x92   :  { %s139_s7 = sshll.u32 %s8453_s29, 4  ;;  %s8131_s9 = scalar_lea.vmem %s120_s10, 256  ;;  %s140_s7 = int_to_ptr.vmem [resolvable:$true] %s139_s7 }
  0x93   :  { %p8132_p13 = scmp.ne.s32.totalorder %s120_s10, %s8131_s9  ;;  %p8136_p0 = scmp.lt.s32.totalorder %s120_s10, %s120_s10 }
  0x94   :  { %p8137_p1 = scmp.lt.s32.totalorder %s8131_s9, %s8131_s9 }
  0x96   :  { %102 = dma.hbm_to_vmem [thread:$0]  %s9557_s11, 64, %s100_s17, [#allocation17]  }
  0x97   :  { %p8138_p2 = por %p8137_p1, %p8136_p0 }
  0x99   :  { %p8139_p3 = pnand %p8138_p2, %p8132_p13 }
  0x9b   :  { %8142 = shalt.err (!%p8139_p3)
}
  0x9c   :  { %s9558_s8 = sld [smem:[#allocation80_spill]]  ;;  %s8151_s4 = scalar_lea.vmem %s140_s7, 128 }
  0x9d   :  { %p8152_p4 = scmp.ne.s32.totalorder %s140_s7, %s8151_s4  ;;  %p8156_p5 = scmp.lt.s32.totalorder %s140_s7, %s140_s7 }
  0x9e   :  { %p8157_p6 = scmp.lt.s32.totalorder %s8151_s4, %s8151_s4 }
  0xa0   :  { %p8158_p7 = por %p8157_p6, %p8156_p5 }
  0xa2   :  { %122 = dma.hbm_to_vmem [thread:$0]  %s9558_s8, 256, %s120_s10, [#allocation20]  }
  0xa3   :  { %p8159_p8 = pnand %p8158_p7, %p8152_p4 }
  0xa5   :  { %8162 = shalt.err (!%p8159_p8)
}
  0xa6   :  { %s9559_s6 = sld [smem:[#allocation82_spill]]  ;;  %s8454_s5 = smov [#allocation27]  }
  0xa7   :  { %s159_s0 = sshll.u32 %s8454_s5, 4  ;;  %s8455_s13 = smov [#allocation30]   ;;  %s160_s0 = int_to_ptr.vmem [resolvable:$true] %s159_s0 }
  0xa8   :  { %s179_s27 = sshll.u32 %s8455_s13, 4  ;;  %s8171_s28 = scalar_lea.vmem %s160_s0, 64  ;;  %s180_s27 = int_to_ptr.vmem [resolvable:$true] %s179_s27 }
  0xa9   :  { %p8172_p9 = scmp.ne.s32.totalorder %s160_s0, %s8171_s28  ;;  %p8176_p10 = scmp.lt.s32.totalorder %s160_s0, %s160_s0 }
  0xaa   :  { %p8177_p11 = scmp.lt.s32.totalorder %s8171_s28, %s8171_s28 }
  0xac   :  { %142 = dma.hbm_to_vmem [thread:$0]  %s9559_s6, 128, %s140_s7, [#allocation23]  }
  0xad   :  { %p8178_p12 = por %p8177_p11, %p8176_p10 }
  0xaf   :  { %p8179_p13 = pnand %p8178_p12, %p8172_p9 }
  0xb1   :  { %8182 = shalt.err (!%p8179_p13)
}
  0xb2   :  { %162 = dma.hbm_to_vmem [thread:$0]  %s9515_s12, 64, %s160_s0, [#allocation26]  }
  0xb3   :  { %s8191_s15 = scalar_lea.vmem %s180_s27, 32  ;;  %p8196_p1 = scmp.lt.s32.totalorder %s180_s27, %s180_s27 }
  0xb4   :  { %p8192_p0 = scmp.ne.s32.totalorder %s180_s27, %s8191_s15  ;;  %p8197_p2 = scmp.lt.s32.totalorder %s8191_s15, %s8191_s15 }
  0xb6   :  { %p8198_p3 = por %p8197_p2, %p8196_p1 }
  0xb8   :  { %p8199_p4 = pnand %p8198_p3, %p8192_p0 }
  0xba   :  { %8202 = shalt.err (!%p8199_p4)
}
  0xbb   :  { %182 = dma.hbm_to_vmem [thread:$0]  %s9517_s14, 32, %s180_s27, [#allocation29]  }
  0xbc   :  { %s8456_s7 = smov [#allocation33]   ;;  %s8457_s2 = smov [#allocation36]  }
  0xbd   :  { %s199_s9 = sshll.u32 %s8456_s7, 4  ;;  %s219_s3 = sshll.u32 %s8457_s2, 4  ;;  %s200_s9 = int_to_ptr.vmem [resolvable:$true] %s199_s9  ;;  %s220_s3 = int_to_ptr.vmem [resolvable:$true] %s219_s3 }
  0xbe   :  { %s8211_s8 = scalar_lea.vmem %s200_s9, 16  ;;  %s8215_s12 = scalar_lea.vmem %s200_s9, 32 }
  0xbf   :  { %p8212_p5 = scmp.ne.s32.totalorder %s200_s9, %s8211_s8  ;;  %p8216_p6 = scmp.lt.s32.totalorder %s200_s9, %s200_s9 }
  0xc0   :  { %p8217_p7 = scmp.lt.s32.totalorder %s8215_s12, %s8211_s8 }
  0xc2   :  { %p8218_p8 = por %p8217_p7, %p8216_p6 }
  0xc4   :  { %p8219_p9 = pnand %p8218_p8, %p8212_p5 }
  0xc6   :  { %8222 = shalt.err (!%p8219_p9)
}
  0xc7   :  { %202 = dma.hbm_to_vmem [thread:$0]  %s9519_s16, 16, %s200_s9, [#allocation32]  }
  0xc8   :  { %s8231_s17 = scalar_lea.vmem %s220_s3, 16  ;;  %s8235_s14 = scalar_lea.vmem %s220_s3, 32 }
  0xc9   :  { %p8232_p10 = scmp.ne.s32.totalorder %s220_s3, %s8231_s17  ;;  %p8236_p11 = scmp.lt.s32.totalorder %s220_s3, %s220_s3 }
  0xca   :  { %p8237_p12 = scmp.lt.s32.totalorder %s8235_s14, %s8231_s17 }
  0xcc   :  { %p8238_p13 = por %p8237_p12, %p8236_p11 }
  0xce   :  { %p8239_p0 = pnand %p8238_p13, %p8232_p10 }
  0xd0   :  { %8242 = shalt.err (!%p8239_p0)
}
  0xd1   :  { %222 = dma.hbm_to_vmem [thread:$0]  %s9521_s18, 16, %s220_s3, [#allocation35]  }
  0xd2   :  { %8403 = dma.done.wait [#allocation12], 256  }
  0xd3   :  { %8404 = vsyncadd [#allocation12], 4294967040 }
  0xd4   :  { %8405 = dma.done.wait [#allocation14], 1280  }
  0xd5   :  { %8406 = vsyncadd [#allocation14], 4294966016 }
  0xd6   :  { %8407 = dma.done.wait [#allocation17], 1088  }
  0xd7   :  { %8408 = vsyncadd [#allocation17], 4294966208 }
  0xd8   :  { %8409 = dma.done.wait [#allocation20], 512  }
  0xd9   :  { %8410 = vsyncadd [#allocation20], 4294966784 }
  0xda   :  { %8411 = dma.done.wait [#allocation23], 256  }
  0xdb   :  { %8412 = vsyncadd [#allocation23], 4294967040 }
  0xdc   :  { %8413 = dma.done.wait [#allocation26], 128  }
  0xdd   :  { %8414 = vsyncadd [#allocation26], 4294967168 }
  0xde   :  { %8415 = dma.done.wait [#allocation29], 64  }
  0xdf   :  { %8416 = vsyncadd [#allocation29], 4294967232 }
  0xe0   :  { %8417 = dma.done.wait [#allocation32], 32  }
  0xe1   :  { %8418 = vsyncadd [#allocation32], 4294967264 }
  0xe2   :  { %8419 = dma.done.wait [#allocation35], 32  }
  0xe3   :  { %8420 = vsyncadd [#allocation35], 4294967264  ;;  %v9533_v0 = vmov 0.0   ;;  %vm8459_vm0 = vmmov 0   ;;  %vm400_vm1 = vcmask 1041408   ;;  %v389_v3 = vld [vmem:[#allocation11] sm:$0xff] }
  0xe4   :  { %7809 = vmatprep.subr.mxu0 %v9533_v0  ;;  %7822 = vmatprep.subr.mxu1 %v9533_v0  ;;  %v390_v1 = vld [vmem:[#allocation11 + $0x8] sm:$0x3]  ;;  %v485_v2 = vld [vmem:[#allocation13 + $0x8] sm:$0x3]  ;;  %v484_v4 = vld [vmem:[#allocation13] sm:$0xff]  ;;  %s9560_s0 = sld [smem:[#allocation72_spill]] }
  0xe5   :  { %7813 = vmatprep.mubr.msk.f32.mxu0 %vm8459_vm0, %v9533_v0  ;;  %7826 = vmatprep.mubr.msk.f32.mxu1 %vm8459_vm0, %v9533_v0  ;;  %vm382_vm2 = vcmask 80896   ;;  %s9561_s28 = sld [smem:[#allocation73_spill]]  ;;  %v606_v9 = vld [vmem:[#allocation16 + $0x28] sm:$0x3]  ;;  %v608_v10 = vld [vmem:[#allocation16 + $0x38] sm:$0x3] }
  0xe6   :  { %7810 = vmatpush3.msk.msra.mxu0 %vm400_vm1, %v390_v1  ;;  %7823 = vmatpush3.msk.msra.mxu1 %vm400_vm1, %v485_v2  ;;  %v605_v12 = vld [vmem:[#allocation16 + $0x20] sm:$0x3]  ;;  %v607_v13 = vld [vmem:[#allocation16 + $0x30] sm:$0x3]  ;;  %v602_v14 = vld [vmem:[#allocation16 + $0x8] sm:$0xff]  ;;  %s8460_s1 = smov [#allocation2]  }
  0xe7   :  { %7811 = vmatprep.subr.mxu0 %v9533_v0  ;;  %7824 = vmatprep.subr.mxu1 %v9533_v0  ;;  %v604_v15 = vld [vmem:[#allocation16 + $0x18] sm:$0xff]  ;;  %v601_v16 = vld [vmem:[#allocation16] sm:$0xff]  ;;  %v603_v17 = vld [vmem:[#allocation16 + $0x10] sm:$0xff]  ;;  %s286_s11 = sshll.u32 %s8460_s1, 4  ;;  %s8461_s15 = smov [#allocation3]   ;;  %s287_s11 = int_to_ptr.vmem [resolvable:$true] %s286_s11 }
  0xe8   :  { %7812 = vmatpush3.msra.mxu0 %v389_v3  ;;  %7825 = vmatpush3.msra.mxu1 %v484_v4  ;;  %v598_v19 = vld [vmem:[#allocation15 + $0x28] sm:$0x3]  ;;  %v600_v20 = vld [vmem:[#allocation15 + $0x38] sm:$0x3]  ;;  %v597_v22 = vld [vmem:[#allocation15 + $0x20] sm:$0x3]  ;;  %p8256_p2 = scmp.lt.s32.totalorder %s287_s11, %s287_s11 }
  0xe9   :  { %7727 = vmatprep.subr.msk.mxu0 %vm400_vm1, %v606_v9  ;;  %7730 = vmatprep.subr.msk.mxu1 %vm400_vm1, %v608_v10  ;;  %v599_v23 = vld [vmem:[#allocation15 + $0x30] sm:$0x3]  ;;  %v594_v24 = vld [vmem:[#allocation15 + $0x8] sm:$0xff]  ;;  %v596_v25 = vld [vmem:[#allocation15 + $0x18] sm:$0xff]  ;;  %s298_s10 = sshll.u32 %s8461_s15, 4  ;;  %s8251_s29 = scalar_lea.vmem %s287_s11, 4096  ;;  %s299_s10 = int_to_ptr.vmem [resolvable:$true] %s298_s10 }
  0xea   :  { %v8683_v5 = vld [vmem:[%s9560_s0] sm:$0xff]  ;;  %v595_v27 = vld [vmem:[#allocation15 + $0x10] sm:$0xff]  ;;  %p8252_p1 = scmp.ne.s32.totalorder %s287_s11, %s8251_s29  ;;  %p8257_p3 = scmp.lt.s32.totalorder %s8251_s29, %s8251_s29 }
  0xeb   :  { %v375_v6 = vld [vmem:[%s9561_s28] sm:$0xff]  ;;  %v376_v7 = vmul.f32 %v8683_v5, %v8683_v5  ;;  %7814 = vmatmul.mubr.msk.f32.vlgmr.msra.gmra.mxu0 %vm382_vm2, %v8683_v5  ;;  %7827 = vmatmul.mubr.msk.f32.vlgmr.msra.gmra.mxu1 %vm382_vm2, %v8683_v5 }
  0xec   :  { %v377_v8 = vmul.f32 %v375_v6, %v375_v6  ;;  %7816 = vmatprep.mubr.msk.f32.mxu0 %vm8459_vm0, %v9533_v0  ;;  %7829 = vmatprep.mubr.msk.f32.mxu1 %vm8459_vm0, %v9533_v0  ;;  %v593_v26 = vld [vmem:[#allocation15] sm:$0xff]  ;;  %p8258_p4 = por %p8257_p3, %p8256_p2 }
  0xed   :  { %7728 = vmatpush1.msk.msra.mxu0 %vm400_vm1, %v605_v12  ;;  %7731 = vmatpush1.msk.msra.mxu1 %vm400_vm1, %v607_v13 }
  0xee   :  { %v378_v11 = vadd.f32 %v377_v8, %v376_v7  ;;  %651 = vmatprep.subr.mxu0 %v602_v14  ;;  %722 = vmatprep.subr.mxu1 %v604_v15  ;;  %p8259_p5 = pnand %p8258_p4, %p8252_p1 }
  0xef   :  { %7817 = vmatmul.mubr.msk.f32.gmra.mxu0 %vm382_vm2, %v375_v6  ;;  %7830 = vmatmul.mubr.msk.f32.gmra.mxu1 %vm382_vm2, %v375_v6 }
  0xf0   :  { %vm379_vm3 = vcmp.gt.f32.partialorder %v378_v11, 1e-06  ;;  %7819 = vmatprep.mubr.msk.f32.mxu0 %vm8459_vm0, %v9533_v0  ;;  %7832 = vmatprep.mubr.msk.f32.mxu1 %vm8459_vm0, %v9533_v0 }
  0xf1   :  { %v7718_v18 = vsel %vm379_vm3, 1.0, %v9533_v0  ;;  %652 = vmatpush1.msra.mxu0 %v601_v16  ;;  %723 = vmatpush1.msra.mxu1 %v603_v17 }
  0xf2   :  { %v383_v21 = vsel %vm382_vm2, %v7718_v18, 0.0  ;;  %7733 = vmatprep.subr.msk.mxu0 %vm400_vm1, %v598_v19  ;;  %7736 = vmatprep.subr.msk.mxu1 %vm400_vm1, %v600_v20 }
  0xf3   :  { %7820 = vmatmul.mubr.msk.f32.gmra.mxu0 %vm382_vm2, %v7718_v18  ;;  %7833 = vmatmul.mubr.msk.f32.gmra.mxu1 %vm382_vm2, %v7718_v18 }
  0xf4   :  { %685 = vmatprep.mubr.f32.mxu0 %v9533_v0  ;;  %756 = vmatprep.mubr.f32.mxu1 %v9533_v0 }
  0xf5   :  { %384 = vadd.xlane.f32.xlu0 %v383_v21 }
  0xf7   :  { %7729 = vmatmul.mubr.msk.f32.vlgmr.msra.gmra.mxu0 %vm382_vm2, %v375_v6  ;;  %7732 = vmatmul.mubr.msk.f32.vlgmr.msra.gmra.mxu1 %vm382_vm2, %v375_v6 }
  0xf8   :  { %7734 = vmatpush1.msk.msra.mxu0 %vm400_vm1, %v597_v22  ;;  %7737 = vmatpush1.msk.msra.mxu1 %vm400_vm1, %v599_v23 }
  0xf9   :  { %805 = vmatprep.subr.mxu0 %v594_v24  ;;  %876 = vmatprep.subr.mxu1 %v596_v25 }
  0xfa   :  { %806 = vmatpush1.msra.mxu0 %v593_v26  ;;  %839 = vmatprep.mubr.f32.mxu0 %v9533_v0 }
  0xfb   :  { %877 = vmatpush1.msra.mxu1 %v595_v27  ;;  %910 = vmatprep.mubr.f32.mxu1 %v9533_v0 }
  0xfc   :  { %7735 = vmatmul.mubr.msk.f32.vlgmr.msra.gmra.mxu0 %vm382_vm2, %v8683_v5  ;;  %7738 = vmatmul.mubr.msk.f32.vlgmr.msra.gmra.mxu1 %vm382_vm2, %v8683_v5 }
  0xfd   :  { %8262 = shalt.err (!%p8259_p5)  }
  0xfe   :  { %289 = dma.hbm_to_vmem [thread:$0]  %s9522_s19, 4096, %s287_s11, [#allocation10] }
  0xff   :  { %s8271_s2 = scalar_lea.vmem %s299_s10, 4096  ;;  %p8276_p7 = scmp.lt.s32.totalorder %s299_s10, %s299_s10 }
 0x100   :  { %p8272_p6 = scmp.ne.s32.totalorder %s299_s10, %s8271_s2  ;;  %p8277_p8 = scmp.lt.s32.totalorder %s8271_s2, %s8271_s2 }
 0x102   :  { %p8278_p9 = por %p8277_p8, %p8276_p7 }
 0x104   :  { %p8279_p10 = pnand %p8278_p9, %p8272_p6 }
 0x106   :  { %8282 = shalt.err (!%p8279_p10)  }
 0x107   :  { %301 = dma.hbm_to_vmem [thread:$0]  %s9523_s20, 4096, %s299_s10, [#allocation10 + $0x1] }
 0x108   :  { %s8462_s12 = smov [#allocation4]   ;;  %s8463_s30 = smov [#allocation5]  }
 0x109   :  { %s310_s4 = sshll.u32 %s8462_s12, 4  ;;  %s322_s17 = sshll.u32 %s8463_s30, 4  ;;  %s311_s4 = int_to_ptr.vmem [resolvable:$true] %s310_s4  ;;  %s323_s17 = int_to_ptr.vmem [resolvable:$true] %s322_s17 }
 0x10a   :  { %s8291_s14 = scalar_lea.vmem %s311_s4, 32768  ;;  %p8296_p12 = scmp.lt.s32.totalorder %s311_s4, %s311_s4 }
 0x10b   :  { %p8292_p11 = scmp.ne.s32.totalorder %s311_s4, %s8291_s14  ;;  %p8297_p13 = scmp.lt.s32.totalorder %s8291_s14, %s8291_s14 }
 0x10d   :  { %p8298_p0 = por %p8297_p13, %p8296_p12 }
 0x10f   :  { %p8299_p1 = pnand %p8298_p0, %p8292_p11 }
 0x111   :  { %8302 = shalt.err (!%p8299_p1)  }
 0x112   :  { %313 = dma.hbm_to_vmem [thread:$0]  %s9524_s21, 32768, %s311_s4, [#allocation10 + $0x2] }
 0x113   :  { %s8311_s5 = scalar_lea.vmem %s323_s17, 65536  ;;  %p8316_p3 = scmp.lt.s32.totalorder %s323_s17, %s323_s17 }
 0x114   :  { %p8312_p2 = scmp.ne.s32.totalorder %s323_s17, %s8311_s5  ;;  %p8317_p4 = scmp.lt.s32.totalorder %s8311_s5, %s8311_s5 }
 0x116   :  { %p8318_p5 = por %p8317_p4, %p8316_p3 }
 0x118   :  { %p8319_p6 = pnand %p8318_p5, %p8312_p2 }
 0x11a   :  { %8322 = shalt.err (!%p8319_p6)  }
 0x11b   :  { %325 = dma.hbm_to_vmem [thread:$0]  %s9525_s22, 65536, %s323_s17, [#allocation10 + $0x3] }
 0x11c   :  { %s8464_s18 = smov [#allocation6]   ;;  %s8465_s13 = smov [#allocation7]  }
 0x11d   :  { %s334_s0 = sshll.u32 %s8464_s18, 4  ;;  %s346_s27 = sshll.u32 %s8465_s13, 4  ;;  %s335_s0 = int_to_ptr.vmem [resolvable:$true] %s334_s0  ;;  %s347_s27 = int_to_ptr.vmem [resolvable:$true] %s346_s27 }
 0x11e   :  { %s8331_s28 = scalar_lea.vmem %s335_s0, 16384  ;;  %p8336_p8 = scmp.lt.s32.totalorder %s335_s0, %s335_s0 }
 0x11f   :  { %p8332_p7 = scmp.ne.s32.totalorder %s335_s0, %s8331_s28  ;;  %p8337_p9 = scmp.lt.s32.totalorder %s8331_s28, %s8331_s28 }
 0x121   :  { %p8338_p10 = por %p8337_p9, %p8336_p8 }
 0x123   :  { %p8339_p11 = pnand %p8338_p10, %p8332_p7 }
 0x125   :  { %8342 = shalt.err (!%p8339_p11)  }
 0x126   :  { %337 = dma.hbm_to_vmem [thread:$0]  %s9526_s23, 16384, %s335_s0, [#allocation10 + $0x4] }
 0x127   :  { %s8351_s11 = scalar_lea.vmem %s347_s27, 4096  ;;  %p8356_p13 = scmp.lt.s32.totalorder %s347_s27, %s347_s27 }
 0x128   :  { %p8352_p12 = scmp.ne.s32.totalorder %s347_s27, %s8351_s11  ;;  %p8357_p0 = scmp.lt.s32.totalorder %s8351_s11, %s8351_s11 }
 0x12a   :  { %p8358_p1 = por %p8357_p0, %p8356_p13 }
 0x12c   :  { %p8359_p2 = pnand %p8358_p1, %p8352_p12 }
 0x12e   :  { %8362 = shalt.err (!%p8359_p2)  }
 0x12f   :  { %349 = dma.hbm_to_vmem [thread:$0]  %s9527_s24, 4096, %s347_s27, [#allocation10 + $0x5] }
 0x130   :  { %s8466_s10 = smov [#allocation8]   ;;  %s8467_s7 = smov [#allocation9]  }
 0x131   :  { %s358_s29 = sshll.u32 %s8466_s10, 4  ;;  %s370_s9 = sshll.u32 %s8467_s7, 4  ;;  %s359_s29 = int_to_ptr.vmem [resolvable:$true] %s358_s29  ;;  %s371_s9 = int_to_ptr.vmem [resolvable:$true] %s370_s9 }
 0x132   :  { %s8371_s2 = scalar_lea.vmem %s359_s29, 1024  ;;  %p8376_p4 = scmp.lt.s32.totalorder %s359_s29, %s359_s29 }
 0x133   :  { %p8372_p3 = scmp.ne.s32.totalorder %s359_s29, %s8371_s2  ;;  %p8377_p5 = scmp.lt.s32.totalorder %s8371_s2, %s8371_s2 }
 0x135   :  { %p8378_p6 = por %p8377_p5, %p8376_p4 }
 0x137   :  { %p8379_p7 = pnand %p8378_p6, %p8372_p3 }
 0x139   :  { %8382 = shalt.err (!%p8379_p7)  }
 0x13a   :  { %361 = dma.hbm_to_vmem [thread:$0]  %s9528_s25, 1024, %s359_s29, [#allocation10 + $0x6] }
 0x13b   :  { %s8391_s8 = scalar_lea.vmem %s371_s9, 512  ;;  %p8396_p9 = scmp.lt.s32.totalorder %s371_s9, %s371_s9 }
 0x13c   :  { %p8392_p8 = scmp.ne.s32.totalorder %s371_s9, %s8391_s8  ;;  %p8397_p10 = scmp.lt.s32.totalorder %s8391_s8, %s8391_s8 }
 0x13e   :  { %p8398_p11 = por %p8397_p10, %p8396_p9 }
 0x140   :  { %p8399_p12 = pnand %p8398_p11, %p8392_p8 }
 0x142   :  { %8402 = shalt.err (!%p8399_p12)  }
 0x143   :  { %373 = dma.hbm_to_vmem [thread:$0]  %s9529_s26, 512, %s371_s9, [#allocation10 + $0x7]  ;;  %v919_v36 = vlaneseq  ;;  %v917_v56 = vld [vmem:[#allocation18] sm:$0xf] }
 0x145   :  { %v8752_v45 = vshrl.u32 %v919_v36, 7 }
 0x147   :  { %v8755_v54 = vsub.s32 0, %v8752_v45  ;;  %v8758_v55 = vsub.s32 2, %v8752_v45  ;;  %v8761_v59 = vsub.s32 1, %v8752_v45  ;;  %v8764_v60 = vsub.s32 3, %v8752_v45 }
 0x149   :  { %v922_v61 = vrot.slane %v917_v56, %v8755_v54  ;;  %v930_v62 = vrot.slane %v917_v56, %v8758_v55  ;;  %v926_v4 = vrot.slane %v917_v56, %v8761_v59  ;;  %v934_v5 = vrot.slane %v917_v56, %v8764_v60 }
 0x17e   :  { %v385_v30 = vpop.xlane.xlu0 %384 }
 0x17f   :  { %v386_v35 = vmax.f32 %v385_v30, 1.0 }
 0x181   :  { %7887 = vrcp.f32 %v386_v35 }
 0x18e   :  { %v7888_v12 = vpop.eup %7887 }
 0x1ab   :  { %v470_v28 = vpop.f32.mrf.mxu0  ;;  %v555_v29 = vpop.f32.mrf.mxu1 }
 0x1ad   :  { %v7815_v31 = vpop.f32.mrf.mxu0  ;;  %v7828_v32 = vpop.f32.mrf.mxu1 }
 0x1af   :  { %v475_v33 = vpop.f32.mrf.mxu0  ;;  %v560_v34 = vpop.f32.mrf.mxu1 }
 0x1b0   :  { %v570_v37 = vadd.f32 %v555_v29, %v475_v33  ;;  %v569_v38 = vsub.f32 %v470_v28, %v560_v34 }
 0x1b1   :  { %v7818_v39 = vpop.f32.mrf.mxu0  ;;  %v7831_v40 = vpop.f32.mrf.mxu1 }
 0x1b2   :  { %v572_v41 = vmul.f32 %v570_v37, %v570_v37  ;;  %v571_v42 = vmul.f32 %v569_v38, %v569_v38 }
 0x1b3   :  { %v480_v43 = vpop.f32.mrf.mxu0  ;;  %v565_v44 = vpop.f32.mrf.mxu1 }
 0x1b4   :  { %v573_v46 = vadd.f32 %v572_v41, %v571_v42  ;;  %v582_v47 = vmul.f32 %v480_v43, %v480_v43  ;;  %v583_v48 = vmul.f32 %v565_v44, %v565_v44 }
 0x1b5   :  { %v7821_v49 = vpop.f32.mrf.mxu0  ;;  %v7834_v50 = vpop.f32.mrf.mxu1 }
 0x1b6   :  { %7889 = vrsqrt.f32 %v573_v46  ;;  %v584_v51 = vadd.f32 %v583_v48, %v582_v47  ;;  %vm576_vm4 = vcmp.eq.f32.partialorder %v573_v46, inf  ;;  %v579_v23 = vand.u32 2147483648, %v573_v46 }
 0x1b7   :  { %v687_v52 = vpop.f32.mrf.mxu0  ;;  %v758_v53 = vpop.f32.mrf.mxu1  ;;  %vm578_vm5 = vcmp.eq.f32.partialorder %v573_v46, 0.0 }
 0x1b8   :  { %7891 = vrsqrt.f32 %v584_v51  ;;  %vm587_vm6 = vcmp.eq.f32.partialorder %v584_v51, inf  ;;  %v590_v30 = vand.u32 2147483648, %v584_v51  ;;  %vm589_vm7 = vcmp.eq.f32.partialorder %v584_v51, 0.0 }
 0x1b9   :  { %v689_v57 = vpop.f32.mrf.mxu0  ;;  %v760_v58 = vpop.f32.mrf.mxu1 }
 0x1bc   :  { %v841_v63 = vpop.f32.mrf.mxu0  ;;  %v912_v1 = vpop.f32.mrf.mxu1 }
 0x1bd   :  { %v842_v2 = vadd.f32 %v841_v63, %v687_v52  ;;  %v913_v3 = vadd.f32 %v912_v1, %v758_v53 }
 0x1be   :  { %v843_v6 = vpop.f32.mrf.mxu0  ;;  %v914_v7 = vpop.f32.mrf.mxu1 }
 0x1bf   :  { %v939_v8 = vadd.f32 %v922_v61, %v842_v2  ;;  %v941_v9 = vadd.f32 %v930_v62, %v913_v3  ;;  %v844_v10 = vadd.f32 %v843_v6, %v689_v57  ;;  %v915_v11 = vadd.f32 %v914_v7, %v760_v58 }
 0x1c1   :  { %v943_v13 = vmax.f32 %v939_v8, 0.0  ;;  %v945_v14 = vmax.f32 %v941_v9, 0.0  ;;  %v940_v15 = vadd.f32 %v926_v4, %v844_v10  ;;  %v942_v16 = vadd.f32 %v934_v5, %v915_v11 }
 0x1c3   :  { %v7890_v17 = vpop.eup %7889  ;;  %v8770_v18 = vmul.f32 %v7888_v12, %v943_v13  ;;  %v8772_v19 = vmul.f32 %v7888_v12, %v945_v14  ;;  %v944_v20 = vmax.f32 %v940_v15, 0.0  ;;  %v946_v21 = vmax.f32 %v942_v16, 0.0 }
 0x1c4   :  { %v575_v22 = vmul.f32 %v7890_v17, %v573_v46 }
 0x1c5   :  { %v8774_v24 = vmul.f32 %v7888_v12, %v944_v20  ;;  %v8776_v25 = vmul.f32 %v7888_v12, %v946_v21  ;;  %v7892_v26 = vpop.eup %7891 }
 0x1c6   :  { %v577_v27 = vsel %vm576_vm4, %v573_v46, %v575_v22  ;;  %v586_v29 = vmul.f32 %v7892_v26, %v584_v51 }
 0x1c7   :  { %v580_v28 = vsel %vm578_vm5, %v579_v23, %v577_v27 }
 0x1c8   :  { %v581_v31 = vmul.f32 %v7888_v12, %v580_v28  ;;  %v588_v32 = vsel %vm587_vm6, %v584_v51, %v586_v29 }
 0x1c9   :  { %v591_v33 = vsel %vm589_vm7, %v590_v30, %v588_v32 }
 0x1ca   :  { %v592_v34 = vmul.f32 %v7888_v12, %v591_v33 }
 0x1cc   :  { %v8778_v35 = vpack.c.bf16 %v592_v34, %v592_v34 }
 0x1cd   :  { %8421 = dma.done.wait [#allocation10], 4096 }
 0x1ce   :  { %8422 = vsyncadd [#allocation10], 4294963200  ;;  %v8780_v36 = vpack.c.bf16 %v581_v31, %v581_v31  ;;  %v8782_v37 = vld [vmem:[#allocation2] sm:$0xff]  ;;  %v8784_v38 = vld [vmem:[#allocation2 + $0x8] sm:$0xff] }
 0x1cf   :  { %v8786_v39 = vld [vmem:[#allocation2 + $0x10] sm:$0xff]  ;;  %v8788_v40 = vld [vmem:[#allocation2 + $0x18] sm:$0xff]  ;;  %v8790_v41 = vld [vmem:[#allocation2 + $0x20] sm:$0xff] }
 0x1d0   :  { %v8792_v42 = vld [vmem:[#allocation2 + $0x28] sm:$0xff]  ;;  %v8798_v48 = vld [vmem:[#allocation2 + $0x30] sm:$0xff]  ;;  %v8800_v49 = vld [vmem:[#allocation2 + $0x38] sm:$0xff] }
 0x1d1   :  { %v8802_v50 = vld [vmem:[#allocation2 + $0x40] sm:$0xff]  ;;  %v8808_v57 = vld [vmem:[#allocation2 + $0x48] sm:$0xff]  ;;  %v8810_v58 = vld [vmem:[#allocation2 + $0x50] sm:$0xff] }
 0x1d2   :  { %v8812_v61 = vld [vmem:[#allocation2 + $0x58] sm:$0xff]  ;;  %v8818_v3 = vld [vmem:[#allocation2 + $0x60] sm:$0xff]  ;;  %v8820_v4 = vld [vmem:[#allocation2 + $0x68] sm:$0xff] }
 0x1d3   :  { %v8822_v5 = vld [vmem:[#allocation2 + $0x70] sm:$0xff]  ;;  %v8828_v10 = vld [vmem:[#allocation2 + $0x78] sm:$0xff]  ;;  %v8830_v11 = vld [vmem:[#allocation2 + $0x80] sm:$0xff] }
 0x1d4   :  { %v8832_v12 = vld [vmem:[#allocation2 + $0x88] sm:$0xff]  ;;  %v8838_v17 = vld [vmem:[#allocation2 + $0x90] sm:$0xff]  ;;  %v8840_v20 = vld [vmem:[#allocation2 + $0x98] sm:$0xff] }
 0x1d5   :  { %v8842_v21 = vld [vmem:[#allocation2 + $0xa0] sm:$0xff]  ;;  %v8848_v28 = vld [vmem:[#allocation2 + $0xa8] sm:$0xff]  ;;  %v8850_v29 = vld [vmem:[#allocation2 + $0xb0] sm:$0xff] }
 0x1d6   :  { %v8852_v30 = vld [vmem:[#allocation2 + $0xb8] sm:$0xff]  ;;  %v8858_v0 = vld [vmem:[#allocation2 + $0xc0] sm:$0xff]  ;;  %v8860_v15 = vld [vmem:[#allocation2 + $0xc8] sm:$0xff] }
 0x1d7   :  { %v8862_v13 = vld [vmem:[#allocation2 + $0xd0] sm:$0xff]  ;;  %v8868_v8 = vld [vmem:[#allocation2 + $0xd8] sm:$0xff]  ;;  %v8870_v6 = vld [vmem:[#allocation2 + $0xe0] sm:$0xff] }
 0x1d8   :  { %v8872_v33 = vld [vmem:[#allocation2 + $0xe8] sm:$0xff]  ;;  %v8878_v62 = vld [vmem:[#allocation2 + $0xf0] sm:$0xff]  ;;  %v8880_v14 = vld [vmem:[#allocation2 + $0xf8] sm:$0xff] }
 0x1d9   :  { %8423 = dma.done.wait [#allocation10 + $0x1], 4096 }
 0x1da   :  { %8424 = vsyncadd [#allocation10 + $0x1], 4294963200  ;;  %v8468_v23 = vmov 0   ;;  %v1081_v7 = vld [vmem:[#allocation3 + $0x88] sm:$0xff]  ;;  %v1083_v1 = vld [vmem:[#allocation3 + $0x98] sm:$0xff]  ;;  %vm1160_vm8 = vcmask 523264  }
 0x1db   :  { %1196 = vmatprep.mubr.bf16.mxu0 %v8468_v23  ;;  %1237 = vmatprep.mubr.bf16.mxu1 %v8468_v23  ;;  %v1080_v43 = vld [vmem:[#allocation3 + $0x80] sm:$0xff]  ;;  %v1129_v46 = vunpack.c.l.s8.bf16 %v1081_v7  ;;  %v1145_v51 = vunpack.c.h.s8.bf16 %v1081_v7  ;;  %v1131_v47 = vunpack.c.l.s8.bf16 %v1083_v1  ;;  %v1147_v44 = vunpack.c.h.s8.bf16 %v1083_v1  ;;  %v1082_v9 = vld [vmem:[#allocation3 + $0x90] sm:$0xff]  ;;  %v1065_v16 = vld [vmem:[#allocation3 + $0x8] sm:$0xff] }
 0x1dc   :  { %v1144_v2 = vunpack.c.h.s8.bf16 %v1080_v43  ;;  %v1146_v56 = vunpack.c.h.s8.bf16 %v1082_v9  ;;  %v1067_v32 = vld [vmem:[#allocation3 + $0x18] sm:$0xff]  ;;  %v1128_v27 = vunpack.c.l.s8.bf16 %v1080_v43  ;;  %v1130_v31 = vunpack.c.l.s8.bf16 %v1082_v9  ;;  %v1064_v53 = vld [vmem:[#allocation3] sm:$0xff]  ;;  %v1066_v52 = vld [vmem:[#allocation3 + $0x10] sm:$0xff] }
 0x1dd   :  { %1172 = vmatprep.subr.bf16.mxu0 %v1145_v51  ;;  %1213 = vmatprep.subr.bf16.mxu1 %v1147_v44  ;;  %v1113_v22 = vunpack.c.h.s8.bf16 %v1065_v16  ;;  %v1115_v34 = vunpack.c.h.s8.bf16 %v1067_v32  ;;  %v1112_v1 = vunpack.c.h.s8.bf16 %v1064_v53  ;;  %v1114_v7 = vunpack.c.h.s8.bf16 %v1066_v52  ;;  %v1085_v51 = vld [vmem:[#allocation3 + $0xa8] sm:$0xff]  ;;  %v1087_v44 = vld [vmem:[#allocation3 + $0xb8] sm:$0xff]  ;;  %v1086_v9 = vld [vmem:[#allocation3 + $0xb0] sm:$0xff] }
 0x1de   :  { %1173 = vmatpush1.bf16.msra.mxu0 %v1144_v2  ;;  %1214 = vmatpush1.bf16.msra.mxu1 %v1146_v56  ;;  %v1097_v26 = vunpack.c.l.s8.bf16 %v1065_v16  ;;  %v1099_v63 = vunpack.c.l.s8.bf16 %v1067_v32  ;;  %v1096_v43 = vunpack.c.l.s8.bf16 %v1064_v53  ;;  %v1098_v56 = vunpack.c.l.s8.bf16 %v1066_v52  ;;  %v1084_v2 = vld [vmem:[#allocation3 + $0xa0] sm:$0xff]  ;;  %v1069_v32 = vld [vmem:[#allocation3 + $0x28] sm:$0xff] }
 0x1df   :  { %1174 = vmatprep.subr.bf16.mxu0 %v1129_v46  ;;  %1215 = vmatprep.subr.bf16.mxu1 %v1131_v47  ;;  %v1149_v46 = vunpack.c.h.s8.bf16 %v1085_v51  ;;  %v1151_v47 = vunpack.c.h.s8.bf16 %v1087_v44  ;;  %v1133_v16 = vunpack.c.l.s8.bf16 %v1085_v51  ;;  %v1132_v52 = vunpack.c.l.s8.bf16 %v1084_v2 }
 0x1e0   :  { %v1134_v53 = vunpack.c.l.s8.bf16 %v1086_v9 }
 0x1e2   :  { %1175 = vmatpush1.bf16.msra.mxu0 %v1128_v27  ;;  %1216 = vmatpush1.bf16.msra.mxu1 %v1130_v31  ;;  %v1148_v27 = vunpack.c.h.s8.bf16 %v1084_v2  ;;  %v1135_v31 = vunpack.c.l.s8.bf16 %v1087_v44 }
 0x1e3   :  { %1176 = vmatprep.subr.bf16.mxu0 %v1113_v22  ;;  %1217 = vmatprep.subr.bf16.mxu1 %v1115_v34  ;;  %v1150_v22 = vunpack.c.h.s8.bf16 %v1086_v9  ;;  %v1071_v34 = vld [vmem:[#allocation3 + $0x38] sm:$0xff] }
 0x1e6   :  { %1177 = vmatpush1.bf16.msra.mxu0 %v1112_v1  ;;  %1218 = vmatpush1.bf16.msra.mxu1 %v1114_v7  ;;  %v1068_v1 = vld [vmem:[#allocation3 + $0x20] sm:$0xff]  ;;  %v1070_v7 = vld [vmem:[#allocation3 + $0x30] sm:$0xff] }
 0x1e7   :  { %1178 = vmatprep.subr.bf16.mxu0 %v1097_v26  ;;  %1219 = vmatprep.subr.bf16.mxu1 %v1099_v63  ;;  %v1117_v63 = vunpack.c.h.s8.bf16 %v1069_v32  ;;  %v1119_v26 = vunpack.c.h.s8.bf16 %v1071_v34  ;;  %v1116_v51 = vunpack.c.h.s8.bf16 %v1068_v1  ;;  %v1118_v44 = vunpack.c.h.s8.bf16 %v1070_v7 }
 0x1e8   :  { %v1100_v2 = vunpack.c.l.s8.bf16 %v1068_v1  ;;  %v1102_v9 = vunpack.c.l.s8.bf16 %v1070_v7 }
 0x1ea   :  { %1179 = vmatpush1.bf16.msra.mxu0 %v1096_v43  ;;  %1220 = vmatpush1.bf16.msra.mxu1 %v1098_v56  ;;  %v1101_v43 = vunpack.c.l.s8.bf16 %v1069_v32  ;;  %v1103_v56 = vunpack.c.l.s8.bf16 %v1071_v34 }
 0x1eb   :  { %1254 = vmatprep.subr.bf16.mxu0 %v1149_v46  ;;  %1295 = vmatprep.subr.bf16.mxu1 %v1151_v47  ;;  %v1089_v46 = vld [vmem:[#allocation3 + $0xc8] sm:$0xff]  ;;  %v1091_v47 = vld [vmem:[#allocation3 + $0xd8] sm:$0xff] }
 0x1ec   :  { %v1137_v32 = vunpack.c.l.s8.bf16 %v1089_v46  ;;  %v1139_v34 = vunpack.c.l.s8.bf16 %v1091_v47 }
 0x1ed   :  { %7739 = vmatmul.mubr.msk.bf16.vlgmr.msra.gmra.mxu0 %vm1160_vm8, %v8780_v36  ;;  %7740 = vmatmul.mubr.msk.bf16.vlgmr.msra.gmra.mxu1 %vm1160_vm8, %v8780_v36 }
 0x1ee   :  { %1255 = vmatpush1.bf16.msra.mxu0 %v1148_v27  ;;  %1296 = vmatpush1.bf16.msra.mxu1 %v1150_v22  ;;  %v1153_v27 = vunpack.c.h.s8.bf16 %v1089_v46  ;;  %v1155_v22 = vunpack.c.h.s8.bf16 %v1091_v47 }
 0x1ef   :  { %1256 = vmatprep.subr.bf16.mxu0 %v1133_v16  ;;  %1297 = vmatprep.subr.bf16.mxu1 %v1135_v31  ;;  %v1088_v16 = vld [vmem:[#allocation3 + $0xc0] sm:$0xff]  ;;  %v1090_v31 = vld [vmem:[#allocation3 + $0xd0] sm:$0xff] }
 0x1f0   :  { %1278 = vmatprep.mubr.bf16.mxu0 %v8468_v23  ;;  %1319 = vmatprep.mubr.bf16.mxu1 %v8468_v23  ;;  %v1136_v1 = vunpack.c.l.s8.bf16 %v1088_v16  ;;  %v1138_v7 = vunpack.c.l.s8.bf16 %v1090_v31 }
 0x1f2   :  { %1257 = vmatpush1.bf16.msra.mxu0 %v1132_v52  ;;  %1298 = vmatpush1.bf16.msra.mxu1 %v1134_v53  ;;  %v1152_v52 = vunpack.c.h.s8.bf16 %v1088_v16  ;;  %v1154_v53 = vunpack.c.h.s8.bf16 %v1090_v31 }
 0x1f3   :  { %1258 = vmatprep.subr.bf16.mxu0 %v1117_v63  ;;  %1299 = vmatprep.subr.bf16.mxu1 %v1119_v26  ;;  %v1073_v63 = vld [vmem:[#allocation3 + $0x48] sm:$0xff]  ;;  %v1075_v26 = vld [vmem:[#allocation3 + $0x58] sm:$0xff] }
 0x1f6   :  { %1259 = vmatpush1.bf16.msra.mxu0 %v1116_v51  ;;  %1300 = vmatpush1.bf16.msra.mxu1 %v1118_v44  ;;  %v1121_v51 = vunpack.c.h.s8.bf16 %v1073_v63  ;;  %v1123_v44 = vunpack.c.h.s8.bf16 %v1075_v26 }
 0x1f7   :  { %1260 = vmatprep.subr.bf16.mxu0 %v1101_v43  ;;  %1301 = vmatprep.subr.bf16.mxu1 %v1103_v56  ;;  %v1072_v43 = vld [vmem:[#allocation3 + $0x40] sm:$0xff]  ;;  %v1074_v56 = vld [vmem:[#allocation3 + $0x50] sm:$0xff] }
 0x1f8   :  { %v1120_v46 = vunpack.c.h.s8.bf16 %v1072_v43  ;;  %v1122_v47 = vunpack.c.h.s8.bf16 %v1074_v56  ;;  %v1104_v16 = vunpack.c.l.s8.bf16 %v1072_v43  ;;  %v1106_v31 = vunpack.c.l.s8.bf16 %v1074_v56 }
 0x1fa   :  { %1261 = vmatpush1.bf16.msra.mxu0 %v1100_v2  ;;  %1302 = vmatpush1.bf16.msra.mxu1 %v1102_v9  ;;  %v1105_v2 = vunpack.c.l.s8.bf16 %v1073_v63  ;;  %v1107_v9 = vunpack.c.l.s8.bf16 %v1075_v26 }
 0x1fb   :  { %1336 = vmatprep.subr.bf16.mxu0 %v1153_v27  ;;  %1377 = vmatprep.subr.bf16.mxu1 %v1155_v22  ;;  %v1093_v27 = vld [vmem:[#allocation3 + $0xe8] sm:$0xff]  ;;  %v1095_v22 = vld [vmem:[#allocation3 + $0xf8] sm:$0xff] }
 0x1fc   :  { %v1141_v63 = vunpack.c.l.s8.bf16 %v1093_v27  ;;  %v1143_v26 = vunpack.c.l.s8.bf16 %v1095_v22 }
 0x1fd   :  { %7741 = vmatmul.mubr.msk.bf16.vlgmr.msra.gmra.mxu0 %vm1160_vm8, %v8780_v36  ;;  %7742 = vmatmul.mubr.msk.bf16.vlgmr.msra.gmra.mxu1 %vm1160_vm8, %v8780_v36 }
 0x1fe   :  { %1337 = vmatpush1.bf16.msra.mxu0 %v1152_v52  ;;  %1378 = vmatpush1.bf16.msra.mxu1 %v1154_v53  ;;  %v1157_v52 = vunpack.c.h.s8.bf16 %v1093_v27  ;;  %v1159_v53 = vunpack.c.h.s8.bf16 %v1095_v22 }
 0x1ff   :  { %1338 = vmatprep.subr.bf16.mxu0 %v1137_v32  ;;  %1379 = vmatprep.subr.bf16.mxu1 %v1139_v34  ;;  %v1092_v32 = vld [vmem:[#allocation3 + $0xe0] sm:$0xff]  ;;  %v1094_v34 = vld [vmem:[#allocation3 + $0xf0] sm:$0xff] }
 0x200   :  { %1360 = vmatprep.mubr.bf16.mxu0 %v8468_v23  ;;  %1401 = vmatprep.mubr.bf16.mxu1 %v8468_v23  ;;  %v1140_v43 = vunpack.c.l.s8.bf16 %v1092_v32  ;;  %v1142_v56 = vunpack.c.l.s8.bf16 %v1094_v34 }
 0x202   :  { %1339 = vmatpush1.bf16.msra.mxu0 %v1136_v1  ;;  %1380 = vmatpush1.bf16.msra.mxu1 %v1138_v7  ;;  %v1156_v1 = vunpack.c.h.s8.bf16 %v1092_v32  ;;  %v1158_v7 = vunpack.c.h.s8.bf16 %v1094_v34  ;;  %v9562_v32 = vunpack.c.h.s8.bf16 %v8832_v12  ;;  %v9563_v34 = vunpack.c.h.s8.bf16 %v8840_v20 }
 0x203   :  { %1340 = vmatprep.subr.bf16.mxu0 %v1121_v51  ;;  %1381 = vmatprep.subr.bf16.mxu1 %v1123_v44  ;;  %v1077_v51 = vld [vmem:[#allocation3 + $0x68] sm:$0xff]  ;;  %v1079_v44 = vld [vmem:[#allocation3 + $0x78] sm:$0xff] }
 0x206   :  { %1341 = vmatpush1.bf16.msra.mxu0 %v1120_v46  ;;  %1382 = vmatpush1.bf16.msra.mxu1 %v1122_v47  ;;  %v1125_v46 = vunpack.c.h.s8.bf16 %v1077_v51  ;;  %v1127_v47 = vunpack.c.h.s8.bf16 %v1079_v44 }
 0x207   :  { %1342 = vmatprep.subr.bf16.mxu0 %v1105_v2  ;;  %1383 = vmatprep.subr.bf16.mxu1 %v1107_v9  ;;  %v1076_v2 = vld [vmem:[#allocation3 + $0x60] sm:$0xff]  ;;  %v1078_v9 = vld [vmem:[#allocation3 + $0x70] sm:$0xff] }
 0x208   :  { %v1124_v27 = vunpack.c.h.s8.bf16 %v1076_v2  ;;  %v1126_v22 = vunpack.c.h.s8.bf16 %v1078_v9 }
 0x20a   :  { %1343 = vmatpush1.bf16.msra.mxu0 %v1104_v16  ;;  %1384 = vmatpush1.bf16.msra.mxu1 %v1106_v31  ;;  %v1109_v16 = vunpack.c.l.s8.bf16 %v1077_v51  ;;  %v1111_v31 = vunpack.c.l.s8.bf16 %v1079_v44  ;;  %v9568_v51 = vunpack.c.l.s8.bf16 %v8830_v11  ;;  %v9570_v44 = vunpack.c.h.s8.bf16 %v8784_v38 }
 0x20b   :  { %1418 = vmatprep.subr.bf16.mxu0 %v1157_v52  ;;  %1459 = vmatprep.subr.bf16.mxu1 %v1159_v53  ;;  %v1108_v52 = vunpack.c.l.s8.bf16 %v1076_v2  ;;  %v1110_v53 = vunpack.c.l.s8.bf16 %v1078_v9  ;;  %v9579_v2 = vunpack.c.h.s8.bf16 %v8852_v30  ;;  %v9584_v9 = vunpack.c.l.s8.bf16 %v8842_v21 }
 0x20d   :  { %7743 = vmatmul.mubr.msk.bf16.vlgmr.msra.gmra.mxu0 %vm1160_vm8, %v8780_v36  ;;  %7744 = vmatmul.mubr.msk.bf16.vlgmr.msra.gmra.mxu1 %vm1160_vm8, %v8780_v36 }
 0x20e   :  { %1419 = vmatpush1.bf16.msra.mxu0 %v1156_v1  ;;  %1460 = vmatpush1.bf16.msra.mxu1 %v1158_v7  ;;  %v9564_v1 = vunpack.c.h.s8.bf16 %v8830_v11  ;;  %v9565_v7 = vunpack.c.h.s8.bf16 %v8838_v17  ;;  %v9575_v11 = vunpack.c.l.s8.bf16 %v8788_v40 }
 0x20f   :  { %1420 = vmatprep.subr.bf16.mxu0 %v1141_v63  ;;  %1461 = vmatprep.subr.bf16.mxu1 %v1143_v26  ;;  %v9566_v63 = vunpack.c.l.s8.bf16 %v8832_v12  ;;  %v9567_v26 = vunpack.c.l.s8.bf16 %v8840_v20  ;;  %v9572_v12 = vunpack.c.h.s8.bf16 %v8782_v37  ;;  %v9573_v20 = vunpack.c.h.s8.bf16 %v8786_v39 }
 0x210   :  { %1442 = vmatprep.mubr.bf16.mxu0 %v8468_v23  ;;  %1483 = vmatprep.mubr.bf16.mxu1 %v8468_v23 }
 0x212   :  { %1421 = vmatpush1.bf16.msra.mxu0 %v1140_v43  ;;  %1462 = vmatpush1.bf16.msra.mxu1 %v1142_v56  ;;  %v9571_v43 = vunpack.c.h.s8.bf16 %v8788_v40  ;;  %v9574_v56 = vunpack.c.l.s8.bf16 %v8784_v38  ;;  %v9580_v38 = vunpack.c.h.s8.bf16 %v8842_v21  ;;  %v9583_v40 = vunpack.c.l.s8.bf16 %v8852_v30 }
 0x213   :  { %1422 = vmatprep.subr.bf16.mxu0 %v1125_v46  ;;  %1463 = vmatprep.subr.bf16.mxu1 %v1127_v47  ;;  %v9577_v46 = vunpack.c.l.s8.bf16 %v8786_v39  ;;  %v9578_v47 = vunpack.c.h.s8.bf16 %v8848_v28  ;;  %v9582_v39 = vunpack.c.l.s8.bf16 %v8848_v28  ;;  %v9588_v28 = vunpack.c.h.s8.bf16 %v8790_v41 }
 0x214   :  { %v9589_v30 = vunpack.c.h.s8.bf16 %v8798_v48  ;;  %v9591_v21 = vunpack.c.l.s8.bf16 %v8800_v49 }
 0x216   :  { %1423 = vmatpush1.bf16.msra.mxu0 %v1124_v27  ;;  %1464 = vmatpush1.bf16.msra.mxu1 %v1126_v22  ;;  %v9585_v27 = vunpack.c.l.s8.bf16 %v8850_v29  ;;  %v9586_v22 = vunpack.c.h.s8.bf16 %v8792_v42 }
 0x217   :  { %1424 = vmatprep.subr.bf16.mxu0 %v1109_v16  ;;  %1465 = vmatprep.subr.bf16.mxu1 %v1111_v31  ;;  %v9587_v16 = vunpack.c.h.s8.bf16 %v8800_v49  ;;  %v9590_v31 = vunpack.c.l.s8.bf16 %v8792_v42  ;;  %v9596_v42 = vunpack.c.h.s8.bf16 %v8858_v0  ;;  %v9599_v49 = vunpack.c.l.s8.bf16 %v8868_v8 }
 0x21a   :  { %1425 = vmatpush1.bf16.msra.mxu0 %v1108_v52  ;;  %1466 = vmatpush1.bf16.msra.mxu1 %v1110_v53  ;;  %v9593_v52 = vunpack.c.l.s8.bf16 %v8798_v48  ;;  %v9594_v53 = vunpack.c.h.s8.bf16 %v8860_v15  ;;  %v9598_v48 = vunpack.c.l.s8.bf16 %v8860_v15  ;;  %v9604_v15 = vunpack.c.h.s8.bf16 %v8802_v50 }
 0x21b   :  { %1503 = vmatprep.subr.bf16.mxu0 %v9562_v32  ;;  %1544 = vmatprep.subr.bf16.mxu1 %v9563_v34  ;;  %v9595_v32 = vunpack.c.h.s8.bf16 %v8868_v8  ;;  %v9600_v34 = vunpack.c.l.s8.bf16 %v8858_v0  ;;  %v9605_v8 = vunpack.c.h.s8.bf16 %v8810_v58  ;;  %v9607_v0 = vunpack.c.l.s8.bf16 %v8812_v61 }
 0x21d   :  { %7745 = vmatmul.mubr.msk.bf16.vlgmr.msra.gmra.mxu0 %vm1160_vm8, %v8780_v36  ;;  %7746 = vmatmul.mubr.msk.bf16.vlgmr.msra.gmra.mxu1 %vm1160_vm8, %v8780_v36  ;;  %v9569_v36 = vunpack.c.l.s8.bf16 %v8838_v17  ;;  %v9576_v17 = vunpack.c.l.s8.bf16 %v8782_v37  ;;  %v9581_v37 = vunpack.c.h.s8.bf16 %v8850_v29  ;;  %v9592_v29 = vunpack.c.l.s8.bf16 %v8790_v41 }
 0x21e   :  { %1504 = vmatpush1.bf16.msra.mxu0 %v9564_v1  ;;  %1545 = vmatpush1.bf16.msra.mxu1 %v9565_v7  ;;  %v9597_v41 = vunpack.c.h.s8.bf16 %v8862_v13  ;;  %v9601_v1 = vunpack.c.l.s8.bf16 %v8862_v13  ;;  %v9602_v7 = vunpack.c.h.s8.bf16 %v8808_v57  ;;  %v9608_v13 = vunpack.c.l.s8.bf16 %v8802_v50 }
 0x21f   :  { %1505 = vmatprep.subr.bf16.mxu0 %v9566_v63  ;;  %1546 = vmatprep.subr.bf16.mxu1 %v9567_v26  ;;  %v9603_v63 = vunpack.c.h.s8.bf16 %v8812_v61  ;;  %v9606_v26 = vunpack.c.l.s8.bf16 %v8808_v57  ;;  %v9612_v57 = vunpack.c.h.s8.bf16 %v8870_v6  ;;  %v9613_v50 = vunpack.c.h.s8.bf16 %v8878_v62 }
 0x220   :  { %1527 = vmatprep.mubr.bf16.mxu0 %v8468_v23  ;;  %1568 = vmatprep.mubr.bf16.mxu1 %v8468_v23  ;;  %v9615_v61 = vunpack.c.l.s8.bf16 %v8880_v14 }
 0x222   :  { %1506 = vmatpush1.bf16.msra.mxu0 %v9568_v51  ;;  %1547 = vmatpush1.bf16.msra.mxu1 %v9569_v36  ;;  %v9609_v51 = vunpack.c.l.s8.bf16 %v8810_v58  ;;  %v9610_v36 = vunpack.c.h.s8.bf16 %v8872_v33  ;;  %v9614_v58 = vunpack.c.l.s8.bf16 %v8872_v33  ;;  %v9620_v33 = vunpack.c.h.s8.bf16 %v8818_v3 }
 0x223   :  { %1507 = vmatprep.subr.bf16.mxu0 %v9570_v44  ;;  %1548 = vmatprep.subr.bf16.mxu1 %v9571_v43  ;;  %v9611_v44 = vunpack.c.h.s8.bf16 %v8880_v14  ;;  %v9616_v43 = vunpack.c.l.s8.bf16 %v8870_v6  ;;  %v9621_v14 = vunpack.c.h.s8.bf16 %v8822_v5  ;;  %v9623_v6 = vunpack.c.l.s8.bf16 %v8828_v10 }
 0x226   :  { %1508 = vmatpush1.bf16.msra.mxu0 %v9572_v12  ;;  %1549 = vmatpush1.bf16.msra.mxu1 %v9573_v20  ;;  %v9617_v12 = vunpack.c.l.s8.bf16 %v8878_v62  ;;  %v9618_v20 = vunpack.c.h.s8.bf16 %v8820_v4  ;;  %v9624_v62 = vunpack.c.l.s8.bf16 %v8818_v3  ;;  %v9096_v3 = vpack.c.bf16 %v8772_v19, %v8772_v19 }
 0x227   :  { %1509 = vmatprep.subr.bf16.mxu0 %v9574_v56  ;;  %1550 = vmatprep.subr.bf16.mxu1 %v9575_v11  ;;  %v9619_v56 = vunpack.c.h.s8.bf16 %v8828_v10  ;;  %v9625_v11 = vunpack.c.l.s8.bf16 %v8822_v5  ;;  %v9100_v5 = vpack.c.bf16 %v8776_v25, %v8776_v25 }
 0x22a   :  { %1510 = vmatpush1.bf16.msra.mxu0 %v9576_v17  ;;  %1551 = vmatpush1.bf16.msra.mxu1 %v9577_v46  ;;  %v9088_v17 = vpack.c.bf16 %v8770_v18, %v8770_v18 }
 0x22b   :  { %1585 = vmatprep.subr.bf16.mxu0 %v9578_v47  ;;  %1626 = vmatprep.subr.bf16.mxu1 %v9579_v2 }
 0x22d   :  { %7747 = vmatmul.mubr.msk.bf16.vlgmr.msra.gmra.mxu0 %vm1160_vm8, %v8778_v35  ;;  %7748 = vmatmul.mubr.msk.bf16.vlgmr.msra.gmra.mxu1 %vm1160_vm8, %v8778_v35 }
 0x22e   :  { %1586 = vmatpush1.bf16.msra.mxu0 %v9580_v38  ;;  %1627 = vmatpush1.bf16.msra.mxu1 %v9581_v37 }
 0x22f   :  { %1587 = vmatprep.subr.bf16.mxu0 %v9582_v39  ;;  %1628 = vmatprep.subr.bf16.mxu1 %v9583_v40 }
 0x230   :  { %1609 = vmatprep.mubr.bf16.mxu0 %v8468_v23  ;;  %1650 = vmatprep.mubr.bf16.mxu1 %v8468_v23 }
 0x232   :  { %1588 = vmatpush1.bf16.msra.mxu0 %v9584_v9  ;;  %1629 = vmatpush1.bf16.msra.mxu1 %v9585_v27 }
 0x233   :  { %1589 = vmatprep.subr.bf16.mxu0 %v9586_v22  ;;  %1630 = vmatprep.subr.bf16.mxu1 %v9587_v16 }
 0x236   :  { %1590 = vmatpush1.bf16.msra.mxu0 %v9588_v28  ;;  %1631 = vmatpush1.bf16.msra.mxu1 %v9589_v30 }
 0x237   :  { %1591 = vmatprep.subr.bf16.mxu0 %v9590_v31  ;;  %1632 = vmatprep.subr.bf16.mxu1 %v9591_v21 }
 0x23a   :  { %1592 = vmatpush1.bf16.msra.mxu0 %v9592_v29  ;;  %1633 = vmatpush1.bf16.msra.mxu1 %v9593_v52 }
 0x23b   :  { %1667 = vmatprep.subr.bf16.mxu0 %v9594_v53  ;;  %1708 = vmatprep.subr.bf16.mxu1 %v9595_v32 }
 0x23d   :  { %7749 = vmatmul.mubr.msk.bf16.vlgmr.msra.gmra.mxu0 %vm1160_vm8, %v8778_v35  ;;  %7750 = vmatmul.mubr.msk.bf16.vlgmr.msra.gmra.mxu1 %vm1160_vm8, %v8778_v35 }
 0x23e   :  { %1668 = vmatpush1.bf16.msra.mxu0 %v9596_v42  ;;  %1709 = vmatpush1.bf16.msra.mxu1 %v9597_v41 }
 0x23f   :  { %1669 = vmatprep.subr.bf16.mxu0 %v9598_v48  ;;  %1710 = vmatprep.subr.bf16.mxu1 %v9599_v49 }
 0x240   :  { %1691 = vmatprep.mubr.bf16.mxu0 %v8468_v23  ;;  %1732 = vmatprep.mubr.bf16.mxu1 %v8468_v23 }
 0x242   :  { %1670 = vmatpush1.bf16.msra.mxu0 %v9600_v34  ;;  %1711 = vmatpush1.bf16.msra.mxu1 %v9601_v1 }
 0x243   :  { %1671 = vmatprep.subr.bf16.mxu0 %v9602_v7  ;;  %1712 = vmatprep.subr.bf16.mxu1 %v9603_v63 }
 0x246   :  { %1672 = vmatpush1.bf16.msra.mxu0 %v9604_v15  ;;  %1713 = vmatpush1.bf16.msra.mxu1 %v9605_v8 }
 0x247   :  { %1673 = vmatprep.subr.bf16.mxu0 %v9606_v26  ;;  %1714 = vmatprep.subr.bf16.mxu1 %v9607_v0 }
 0x24a   :  { %1674 = vmatpush1.bf16.msra.mxu0 %v9608_v13  ;;  %1715 = vmatpush1.bf16.msra.mxu1 %v9609_v51 }
 0x24b   :  { %1749 = vmatprep.subr.bf16.mxu0 %v9610_v36  ;;  %1790 = vmatprep.subr.bf16.mxu1 %v9611_v44 }
 0x24d   :  { %7751 = vmatmul.mubr.msk.bf16.vlgmr.msra.gmra.mxu0 %vm1160_vm8, %v8778_v35  ;;  %7752 = vmatmul.mubr.msk.bf16.vlgmr.msra.gmra.mxu1 %vm1160_vm8, %v8778_v35 }
 0x24e   :  { %1750 = vmatpush1.bf16.msra.mxu0 %v9612_v57  ;;  %1791 = vmatpush1.bf16.msra.mxu1 %v9613_v50 }
 0x24f   :  { %1751 = vmatprep.subr.bf16.mxu0 %v9614_v58  ;;  %1792 = vmatprep.subr.bf16.mxu1 %v9615_v61 }
 0x250   :  { %1773 = vmatprep.mubr.bf16.mxu0 %v8468_v23  ;;  %1814 = vmatprep.mubr.bf16.mxu1 %v8468_v23  ;;  %v9622_v23 = vunpack.c.l.s8.bf16 %v8820_v4  ;;  %v9092_v4 = vpack.c.bf16 %v8774_v24, %v8774_v24 }
 0x252   :  { %1752 = vmatpush1.bf16.msra.mxu0 %v9616_v43  ;;  %1793 = vmatpush1.bf16.msra.mxu1 %v9617_v12 }
 0x253   :  { %1753 = vmatprep.subr.bf16.mxu0 %v9618_v20  ;;  %1794 = vmatprep.subr.bf16.mxu1 %v9619_v56 }
 0x256   :  { %1754 = vmatpush1.bf16.msra.mxu0 %v9620_v33  ;;  %1795 = vmatpush1.bf16.msra.mxu1 %v9621_v14 }
 0x257   :  { %1755 = vmatprep.subr.bf16.mxu0 %v9622_v23  ;;  %1796 = vmatprep.subr.bf16.mxu1 %v9623_v6 }
 0x25a   :  { %1756 = vmatpush1.bf16.msra.mxu0 %v9624_v62  ;;  %1797 = vmatpush1.bf16.msra.mxu1 %v9625_v11 }
 0x25d   :  { %7753 = vmatmul.mubr.msk.bf16.vlgmr.msra.gmra.mxu0 %vm1160_vm8, %v8778_v35  ;;  %7754 = vmatmul.mubr.msk.bf16.vlgmr.msra.gmra.mxu1 %vm1160_vm8, %v8778_v35 }
 0x2ad   :  { %v1198_v10 = vpop.f32.mrf.mxu0  ;;  %v1239_v46 = vpop.f32.mrf.mxu1 }
 0x2af   :  { %v1200_v47 = vpop.f32.mrf.mxu0  ;;  %v1241_v35 = vpop.f32.mrf.mxu1 }
 0x2b1   :  { %v1202_v2 = vpop.f32.mrf.mxu0  ;;  %v1243_v38 = vpop.f32.mrf.mxu1 }
 0x2b3   :  { %v1203_v18 = vpop.f32.mrf.mxu0  ;;  %v1244_v37 = vpop.f32.mrf.mxu1 }
 0x2bd   :  { %v1280_v39 = vpop.f32.mrf.mxu0  ;;  %v1321_v40 = vpop.f32.mrf.mxu1 }
 0x2bf   :  { %v1282_v24 = vpop.f32.mrf.mxu0  ;;  %v1323_v9 = vpop.f32.mrf.mxu1 }
 0x2c1   :  { %v1284_v27 = vpop.f32.mrf.mxu0  ;;  %v1325_v22 = vpop.f32.mrf.mxu1 }
 0x2c3   :  { %v1285_v19 = vpop.f32.mrf.mxu0  ;;  %v1326_v16 = vpop.f32.mrf.mxu1 }
 0x2cd   :  { %v1362_v28 = vpop.f32.mrf.mxu0  ;;  %v1403_v30 = vpop.f32.mrf.mxu1 }
 0x2cf   :  { %v1364_v25 = vpop.f32.mrf.mxu0  ;;  %v1405_v31 = vpop.f32.mrf.mxu1 }
 0x2d1   :  { %v1366_v21 = vpop.f32.mrf.mxu0  ;;  %v1407_v29 = vpop.f32.mrf.mxu1 }
 0x2d3   :  { %v1367_v52 = vpop.f32.mrf.mxu0  ;;  %v1408_v53 = vpop.f32.mrf.mxu1 }
 0x2dd   :  { %v1444_v32 = vpop.f32.mrf.mxu0  ;;  %v1485_v42 = vpop.f32.mrf.mxu1 }
 0x2df   :  { %v1446_v41 = vpop.f32.mrf.mxu0  ;;  %v1487_v48 = vpop.f32.mrf.mxu1 }
 0x2e1   :  { %v1448_v49 = vpop.f32.mrf.mxu0  ;;  %v1489_v34 = vpop.f32.mrf.mxu1 }
 0x2e3   :  { %v1449_v1 = vpop.f32.mrf.mxu0  ;;  %v1490_v7 = vpop.f32.mrf.mxu1 }
 0x2ed   :  { %v1529_v63 = vpop.f32.mrf.mxu0  ;;  %v1570_v15 = vpop.f32.mrf.mxu1 }
 0x2ee   :  { %v9102_v8 = vadd.f32 %v1529_v63, %v1198_v10  ;;  %v9104_v26 = vadd.f32 %v1570_v15, %v1239_v46 }
 0x2ef   :  { %v1531_v0 = vpop.f32.mrf.mxu0  ;;  %v1572_v13 = vpop.f32.mrf.mxu1 }
 0x2f0   :  { %v9106_v51 = vadd.f32 %v1531_v0, %v1200_v47  ;;  %v9108_v36 = vadd.f32 %v1572_v13, %v1241_v35 }
 0x2f1   :  { %v1533_v44 = vpop.f32.mrf.mxu0  ;;  %v1574_v57 = vpop.f32.mrf.mxu1 }
 0x2f3   :  { %v1534_v50 = vpop.f32.mrf.mxu0  ;;  %v1575_v58 = vpop.f32.mrf.mxu1 }
 0x2fd   :  { %v1611_v61 = vpop.f32.mrf.mxu0  ;;  %v1652_v43 = vpop.f32.mrf.mxu1 }
 0x2fe   :  { %v9110_v12 = vadd.f32 %v1611_v61, %v1280_v39  ;;  %v9112_v20 = vadd.f32 %v1652_v43, %v1321_v40 }
 0x2ff   :  { %v1613_v56 = vpop.f32.mrf.mxu0  ;;  %v1654_v33 = vpop.f32.mrf.mxu1 }
 0x300   :  { %v9114_v14 = vadd.f32 %v1613_v56, %v1282_v24  ;;  %v9116_v23 = vadd.f32 %v1654_v33, %v1323_v9 }
 0x301   :  { %v1615_v6 = vpop.f32.mrf.mxu0  ;;  %v1656_v62 = vpop.f32.mrf.mxu1 }
 0x303   :  { %v1616_v11 = vpop.f32.mrf.mxu0  ;;  %v1657_v10 = vpop.f32.mrf.mxu1 }
 0x30d   :  { %v1693_v46 = vpop.f32.mrf.mxu0  ;;  %v1734_v47 = vpop.f32.mrf.mxu1 }
 0x30e   :  { %v9118_v35 = vadd.f32 %v1693_v46, %v1362_v28  ;;  %v9120_v2 = vadd.f32 %v1734_v47, %v1403_v30 }
 0x30f   :  { %v1695_v38 = vpop.f32.mrf.mxu0  ;;  %v1736_v18 = vpop.f32.mrf.mxu1 }
 0x310   :  { %v9122_v37 = vadd.f32 %v1695_v38, %v1364_v25  ;;  %v9124_v39 = vadd.f32 %v1736_v18, %v1405_v31 }
 0x311   :  { %v1697_v40 = vpop.f32.mrf.mxu0  ;;  %v1738_v24 = vpop.f32.mrf.mxu1 }
 0x313   :  { %v1698_v9 = vpop.f32.mrf.mxu0  ;;  %v1739_v27 = vpop.f32.mrf.mxu1 }
 0x31d   :  { %v1775_v22 = vpop.f32.mrf.mxu0  ;;  %v1816_v19 = vpop.f32.mrf.mxu1 }
 0x31e   :  { %v9126_v16 = vadd.f32 %v1775_v22, %v1444_v32  ;;  %v9128_v21 = vadd.f32 %v1816_v19, %v1485_v42 }
 0x31f   :  { %v1777_v28 = vpop.f32.mrf.mxu0  ;;  %v1818_v29 = vpop.f32.mrf.mxu1 }
 0x320   :  { %v9130_v30 = vadd.f32 %v1777_v28, %v1446_v41  ;;  %v9132_v52 = vadd.f32 %v1818_v29, %v1487_v48 }
 0x321   :  { %v1779_v25 = vpop.f32.mrf.mxu0  ;;  %v1820_v53 = vpop.f32.mrf.mxu1 }
 0x323   :  { %v1780_v31 = vpop.f32.mrf.mxu0  ;;  %v1821_v49 = vpop.f32.mrf.mxu1 }
 0x324   :  { %8425 = dma.done.wait [#allocation10 + $0x2], 32768 }
 0x325   :  { %8426 = vsyncadd [#allocation10 + $0x2], 4294934528  ;;  %2635 = vmatprep.mubr.bf16.mxu0 %v9092_v4  ;;  %2676 = vmatprep.mubr.bf16.mxu1 %v9100_v5  ;;  %v1884_v32 = vld [vmem:[#allocation4 + $0x188] sm:$0xff]  ;;  %v1883_v42 = vld [vmem:[#allocation4 + $0x180] sm:$0xff] }
 0x326   :  { %v2012_v34 = vld [vmem:[#allocation4 + $0x588] sm:$0xff]  ;;  %v2188_v1 = vunpack.c.l.s8.bf16 %v1884_v32  ;;  %v2204_v7 = vunpack.c.h.s8.bf16 %v1884_v32  ;;  %v2011_v15 = vld [vmem:[#allocation4 + $0x580] sm:$0xff]  ;;  %v2203_v48 = vunpack.c.h.s8.bf16 %v1883_v42  ;;  %v2187_v57 = vunpack.c.l.s8.bf16 %v1883_v42 }
 0x327   :  { %v2444_v63 = vunpack.c.l.s8.bf16 %v2012_v34  ;;  %v2460_v41 = vunpack.c.h.s8.bf16 %v2012_v34  ;;  %v2459_v0 = vunpack.c.h.s8.bf16 %v2011_v15  ;;  %v1868_v13 = vld [vmem:[#allocation4 + $0x108] sm:$0xff]  ;;  %v2443_v50 = vunpack.c.l.s8.bf16 %v2011_v15  ;;  %v1867_v43 = vld [vmem:[#allocation4 + $0x100] sm:$0xff] }
 0x328   :  { %v1996_v44 = vld [vmem:[#allocation4 + $0x508] sm:$0xff]  ;;  %2603 = vmatprep.subr.bf16.mxu0 %v2204_v7  ;;  %v2172_v58 = vunpack.c.h.s8.bf16 %v1868_v13  ;;  %v1995_v56 = vld [vmem:[#allocation4 + $0x500] sm:$0xff]  ;;  %v2171_v33 = vunpack.c.h.s8.bf16 %v1867_v43  ;;  %v2156_v62 = vunpack.c.l.s8.bf16 %v1868_v13  ;;  %v2155_v47 = vunpack.c.l.s8.bf16 %v1867_v43 }
 0x329   :  { %2644 = vmatprep.subr.bf16.mxu1 %v2460_v41  ;;  %2604 = vmatpush1.bf16.msra.mxu0 %v2203_v48  ;;  %v2428_v61 = vunpack.c.h.s8.bf16 %v1996_v44  ;;  %v2427_v6 = vunpack.c.h.s8.bf16 %v1995_v56  ;;  %v2412_v11 = vunpack.c.l.s8.bf16 %v1996_v44  ;;  %v1852_v10 = vld [vmem:[#allocation4 + $0x88] sm:$0xff]  ;;  %v2411_v38 = vunpack.c.l.s8.bf16 %v1995_v56  ;;  %v1851_v24 = vld [vmem:[#allocation4 + $0x80] sm:$0xff] }
 0x32a   :  { %2645 = vmatpush1.bf16.msra.mxu1 %v2459_v0  ;;  %2605 = vmatprep.subr.bf16.mxu0 %v2188_v1  ;;  %v1980_v46 = vld [vmem:[#allocation4 + $0x488] sm:$0xff]  ;;  %v2140_v18 = vunpack.c.h.s8.bf16 %v1852_v10  ;;  %v1979_v9 = vld [vmem:[#allocation4 + $0x480] sm:$0xff]  ;;  %v2139_v27 = vunpack.c.h.s8.bf16 %v1851_v24  ;;  %v2124_v19 = vunpack.c.l.s8.bf16 %v1852_v10  ;;  %v2123_v53 = vunpack.c.l.s8.bf16 %v1851_v24 }
 0x32b   :  { %2646 = vmatprep.subr.bf16.mxu1 %v2444_v63  ;;  %v2396_v40 = vunpack.c.h.s8.bf16 %v1980_v46  ;;  %v2395_v22 = vunpack.c.h.s8.bf16 %v1979_v9  ;;  %v2380_v28 = vunpack.c.l.s8.bf16 %v1980_v46  ;;  %v1836_v29 = vld [vmem:[#allocation4 + $0x8] sm:$0xff]  ;;  %v2379_v31 = vunpack.c.l.s8.bf16 %v1979_v9  ;;  %v1835_v34 = vld [vmem:[#allocation4] sm:$0xff] }
 0x32c   :  { %v1964_v25 = vld [vmem:[#allocation4 + $0x408] sm:$0xff]  ;;  %v2108_v49 = vunpack.c.h.s8.bf16 %v1836_v29  ;;  %v1963_v42 = vld [vmem:[#allocation4 + $0x400] sm:$0xff]  ;;  %v2107_v1 = vunpack.c.h.s8.bf16 %v1835_v34  ;;  %v2092_v63 = vunpack.c.l.s8.bf16 %v1836_v29  ;;  %v2091_v0 = vunpack.c.l.s8.bf16 %v1835_v34 }
 0x32d   :  { %2606 = vmatpush1.bf16.msra.mxu0 %v2187_v57  ;;  %v2364_v32 = vunpack.c.h.s8.bf16 %v1964_v25  ;;  %v2363_v7 = vunpack.c.h.s8.bf16 %v1963_v42  ;;  %v2348_v41 = vunpack.c.l.s8.bf16 %v1964_v25  ;;  %v1948_v15 = vld [vmem:[#allocation4 + $0x388] sm:$0xff]  ;;  %v2347_v13 = vunpack.c.l.s8.bf16 %v1963_v42 }
 0x32e   :  { %2647 = vmatpush1.bf16.msra.mxu1 %v2443_v50  ;;  %2607 = vmatprep.subr.bf16.mxu0 %v2172_v58  ;;  %v2076_v48 = vld [vmem:[#allocation4 + $0x788] sm:$0xff]  ;;  %v2332_v44 = vunpack.c.h.s8.bf16 %v1948_v15  ;;  %v1947_v50 = vld [vmem:[#allocation4 + $0x380] sm:$0xff]  ;;  %v2316_v56 = vunpack.c.l.s8.bf16 %v1948_v15 }
 0x32f   :  { %2648 = vmatprep.subr.bf16.mxu1 %v2428_v61  ;;  %v2588_v57 = vunpack.c.h.s8.bf16 %v2076_v48  ;;  %v2075_v58 = vld [vmem:[#allocation4 + $0x780] sm:$0xff]  ;;  %v2331_v61 = vunpack.c.h.s8.bf16 %v1947_v50 }
 0x330   :  { %v2587_v43 = vunpack.c.h.s8.bf16 %v2075_v58  ;;  %v2571_v10 = vunpack.c.l.s8.bf16 %v2075_v58 }
 0x331   :  { %2608 = vmatpush1.bf16.msra.mxu0 %v2171_v33  ;;  %v2572_v33 = vunpack.c.l.s8.bf16 %v2076_v48 }
 0x332   :  { %2649 = vmatpush1.bf16.msra.mxu1 %v2427_v6  ;;  %2609 = vmatprep.subr.bf16.mxu0 %v2156_v62  ;;  %v1932_v6 = vld [vmem:[#allocation4 + $0x308] sm:$0xff] }
 0x333   :  { %2650 = vmatprep.subr.bf16.mxu1 %v2412_v11  ;;  %v2060_v62 = vld [vmem:[#allocation4 + $0x708] sm:$0xff]  ;;  %v2315_v11 = vunpack.c.l.s8.bf16 %v1947_v50  ;;  %v2300_v46 = vunpack.c.h.s8.bf16 %v1932_v6  ;;  %v2284_v9 = vunpack.c.l.s8.bf16 %v1932_v6 }
 0x335   :  { %2610 = vmatpush1.bf16.msra.mxu0 %v2155_v47  ;;  %v2556_v47 = vunpack.c.h.s8.bf16 %v2060_v62 }
 0x336   :  { %2651 = vmatpush1.bf16.msra.mxu1 %v2411_v38  ;;  %2611 = vmatprep.subr.bf16.mxu0 %v2140_v18  ;;  %v1931_v38 = vld [vmem:[#allocation4 + $0x300] sm:$0xff] }
 0x337   :  { %2652 = vmatprep.subr.bf16.mxu1 %v2396_v40  ;;  %v2059_v18 = vld [vmem:[#allocation4 + $0x700] sm:$0xff]  ;;  %v2299_v40 = vunpack.c.h.s8.bf16 %v1931_v38 }
 0x338   :  { %v2555_v24 = vunpack.c.h.s8.bf16 %v2059_v18  ;;  %v2539_v29 = vunpack.c.l.s8.bf16 %v2059_v18 }
 0x339   :  { %2612 = vmatpush1.bf16.msra.mxu0 %v2139_v27  ;;  %v2540_v27 = vunpack.c.l.s8.bf16 %v2060_v62 }
 0x33a   :  { %2653 = vmatpush1.bf16.msra.mxu1 %v2395_v22  ;;  %2613 = vmatprep.subr.bf16.mxu0 %v2124_v19  ;;  %v1916_v22 = vld [vmem:[#allocation4 + $0x288] sm:$0xff] }
 0x33b   :  { %2654 = vmatprep.subr.bf16.mxu1 %v2380_v28  ;;  %v2044_v19 = vld [vmem:[#allocation4 + $0x688] sm:$0xff]  ;;  %v2283_v28 = vunpack.c.l.s8.bf16 %v1931_v38  ;;  %v2268_v25 = vunpack.c.h.s8.bf16 %v1916_v22  ;;  %v2252_v42 = vunpack.c.l.s8.bf16 %v1916_v22 }
 0x33d   :  { %2614 = vmatpush1.bf16.msra.mxu0 %v2123_v53  ;;  %v2524_v53 = vunpack.c.h.s8.bf16 %v2044_v19 }
 0x33e   :  { %2655 = vmatpush1.bf16.msra.mxu1 %v2379_v31  ;;  %2615 = vmatprep.subr.bf16.mxu0 %v2108_v49  ;;  %v1915_v31 = vld [vmem:[#allocation4 + $0x280] sm:$0xff] }
 0x33f   :  { %2656 = vmatprep.subr.bf16.mxu1 %v2364_v32  ;;  %v2043_v49 = vld [vmem:[#allocation4 + $0x680] sm:$0xff]  ;;  %v2267_v32 = vunpack.c.h.s8.bf16 %v1915_v31 }
 0x340   :  { %v2523_v34 = vunpack.c.h.s8.bf16 %v2043_v49  ;;  %v2507_v15 = vunpack.c.l.s8.bf16 %v2043_v49 }
 0x341   :  { %2616 = vmatpush1.bf16.msra.mxu0 %v2107_v1  ;;  %v2508_v1 = vunpack.c.l.s8.bf16 %v2044_v19 }
 0x342   :  { %2657 = vmatpush1.bf16.msra.mxu1 %v2363_v7  ;;  %2617 = vmatprep.subr.bf16.mxu0 %v2092_v63  ;;  %v1900_v7 = vld [vmem:[#allocation4 + $0x208] sm:$0xff] }
 0x343   :  { %2658 = vmatprep.subr.bf16.mxu1 %v2348_v41  ;;  %v2028_v63 = vld [vmem:[#allocation4 + $0x608] sm:$0xff]  ;;  %v2251_v41 = vunpack.c.l.s8.bf16 %v1915_v31  ;;  %v2236_v48 = vunpack.c.h.s8.bf16 %v1900_v7  ;;  %v2220_v58 = vunpack.c.l.s8.bf16 %v1900_v7 }
 0x345   :  { %2618 = vmatpush1.bf16.msra.mxu0 %v2091_v0  ;;  %v2492_v0 = vunpack.c.h.s8.bf16 %v2028_v63 }
 0x346   :  { %2659 = vmatpush1.bf16.msra.mxu1 %v2347_v13  ;;  %2619 = vmatprep.subr.bf16.mxu0 %v2332_v44  ;;  %v1899_v13 = vld [vmem:[#allocation4 + $0x200] sm:$0xff] }
 0x347   :  { %2660 = vmatprep.subr.bf16.mxu1 %v2588_v57  ;;  %v2027_v44 = vld [vmem:[#allocation4 + $0x600] sm:$0xff]  ;;  %v2235_v57 = vunpack.c.h.s8.bf16 %v1899_v13 }
 0x348   :  { %v2491_v50 = vunpack.c.h.s8.bf16 %v2027_v44  ;;  %v2475_v6 = vunpack.c.l.s8.bf16 %v2027_v44 }
 0x349   :  { %2620 = vmatpush2.bf16.msra.mxu0 %v2331_v61  ;;  %v2476_v61 = vunpack.c.l.s8.bf16 %v2028_v63 }
 0x34a   :  { %2661 = vmatpush2.bf16.msra.mxu1 %v2587_v43  ;;  %2621 = vmatprep.subr.bf16.mxu0 %v2316_v56  ;;  %v1886_v43 = vld [vmem:[#allocation4 + $0x198] sm:$0xff] }
 0x34b   :  { %2662 = vmatprep.subr.bf16.mxu1 %v2572_v33  ;;  %v2014_v56 = vld [vmem:[#allocation4 + $0x598] sm:$0xff]  ;;  %v2219_v33 = vunpack.c.l.s8.bf16 %v1899_v13  ;;  %v2206_v62 = vunpack.c.h.s8.bf16 %v1886_v43  ;;  %v2190_v18 = vunpack.c.l.s8.bf16 %v1886_v43 }
 0x34d   :  { %2622 = vmatpush2.bf16.msra.mxu0 %v2315_v11  ;;  %v2462_v11 = vunpack.c.h.s8.bf16 %v2014_v56 }
 0x34e   :  { %2663 = vmatpush2.bf16.msra.mxu1 %v2571_v10  ;;  %2623 = vmatprep.subr.bf16.mxu0 %v2300_v46  ;;  %v1885_v10 = vld [vmem:[#allocation4 + $0x190] sm:$0xff] }
 0x34f   :  { %2664 = vmatprep.subr.bf16.mxu1 %v2556_v47  ;;  %v2013_v46 = vld [vmem:[#allocation4 + $0x590] sm:$0xff]  ;;  %v2205_v47 = vunpack.c.h.s8.bf16 %v1885_v10 }
 0x350   :  { %v2461_v38 = vunpack.c.h.s8.bf16 %v2013_v46  ;;  %v2445_v22 = vunpack.c.l.s8.bf16 %v2013_v46 }
 0x351   :  { %2624 = vmatpush2.bf16.msra.mxu0 %v2299_v40  ;;  %v2446_v40 = vunpack.c.l.s8.bf16 %v2014_v56 }
 0x352   :  { %2665 = vmatpush2.bf16.msra.mxu1 %v2555_v24  ;;  %2625 = vmatprep.subr.bf16.mxu0 %v2284_v9  ;;  %v1870_v24 = vld [vmem:[#allocation4 + $0x118] sm:$0xff] }
 0x353   :  { %2666 = vmatprep.subr.bf16.mxu1 %v2540_v27  ;;  %v1998_v9 = vld [vmem:[#allocation4 + $0x518] sm:$0xff]  ;;  %v2189_v27 = vunpack.c.l.s8.bf16 %v1885_v10  ;;  %v2174_v19 = vunpack.c.h.s8.bf16 %v1870_v24  ;;  %v2158_v49 = vunpack.c.l.s8.bf16 %v1870_v24 }
 0x355   :  { %2626 = vmatpush2.bf16.msra.mxu0 %v2283_v28  ;;  %v2430_v28 = vunpack.c.h.s8.bf16 %v1998_v9 }
 0x356   :  { %2667 = vmatpush2.bf16.msra.mxu1 %v2539_v29  ;;  %2627 = vmatprep.subr.bf16.mxu0 %v2268_v25  ;;  %v1869_v29 = vld [vmem:[#allocation4 + $0x110] sm:$0xff] }
 0x357   :  { %2668 = vmatprep.subr.bf16.mxu1 %v2524_v53  ;;  %v1997_v25 = vld [vmem:[#allocation4 + $0x510] sm:$0xff]  ;;  %v2173_v53 = vunpack.c.h.s8.bf16 %v1869_v29 }
 0x358   :  { %v2429_v31 = vunpack.c.h.s8.bf16 %v1997_v25  ;;  %v2413_v7 = vunpack.c.l.s8.bf16 %v1997_v25 }
 0x359   :  { %2628 = vmatpush2.bf16.msra.mxu0 %v2267_v32  ;;  %v2414_v32 = vunpack.c.l.s8.bf16 %v1998_v9 }
 0x35a   :  { %2669 = vmatpush2.bf16.msra.mxu1 %v2523_v34  ;;  %2629 = vmatprep.subr.bf16.mxu0 %v2252_v42  ;;  %v1854_v34 = vld [vmem:[#allocation4 + $0x98] sm:$0xff] }
 0x35b   :  { %2670 = vmatprep.subr.bf16.mxu1 %v2508_v1  ;;  %v1982_v42 = vld [vmem:[#allocation4 + $0x498] sm:$0xff]  ;;  %v2157_v1 = vunpack.c.l.s8.bf16 %v1869_v29  ;;  %v2142_v63 = vunpack.c.h.s8.bf16 %v1854_v34  ;;  %v2126_v44 = vunpack.c.l.s8.bf16 %v1854_v34 }
 0x35d   :  { %2630 = vmatpush2.bf16.msra.mxu0 %v2251_v41  ;;  %v2398_v41 = vunpack.c.h.s8.bf16 %v1982_v42 }
 0x35e   :  { %2671 = vmatpush2.bf16.msra.mxu1 %v2507_v15  ;;  %2631 = vmatprep.subr.bf16.mxu0 %v2236_v48  ;;  %v1853_v15 = vld [vmem:[#allocation4 + $0x90] sm:$0xff] }
 0x35f   :  { %2672 = vmatprep.subr.bf16.mxu1 %v2492_v0  ;;  %v1981_v48 = vld [vmem:[#allocation4 + $0x490] sm:$0xff]  ;;  %v2141_v0 = vunpack.c.h.s8.bf16 %v1853_v15 }
 0x360   :  { %v2397_v13 = vunpack.c.h.s8.bf16 %v1981_v48  ;;  %v2381_v43 = vunpack.c.l.s8.bf16 %v1981_v48 }
 0x361   :  { %2632 = vmatpush2.bf16.msra.mxu0 %v2235_v57  ;;  %v2382_v57 = vunpack.c.l.s8.bf16 %v1982_v42 }
 0x362   :  { %2673 = vmatpush2.bf16.msra.mxu1 %v2491_v50  ;;  %2633 = vmatprep.subr.bf16.mxu0 %v2220_v58  ;;  %v1838_v50 = vld [vmem:[#allocation4 + $0x18] sm:$0xff] }
 0x363   :  { %2674 = vmatprep.subr.bf16.mxu1 %v2476_v61  ;;  %v1966_v58 = vld [vmem:[#allocation4 + $0x418] sm:$0xff]  ;;  %v2125_v61 = vunpack.c.l.s8.bf16 %v1853_v15  ;;  %v2110_v56 = vunpack.c.h.s8.bf16 %v1838_v50  ;;  %v2094_v46 = vunpack.c.l.s8.bf16 %v1838_v50 }
 0x365   :  { %2634 = vmatpush2.bf16.msra.mxu0 %v2219_v33  ;;  %v2366_v33 = vunpack.c.h.s8.bf16 %v1966_v58 }
 0x366   :  { %2675 = vmatpush2.bf16.msra.mxu1 %v2475_v6  ;;  %2685 = vmatprep.subr.bf16.mxu0 %v2206_v62  ;;  %v1837_v6 = vld [vmem:[#allocation4 + $0x10] sm:$0xff] }
 0x367   :  { %2726 = vmatprep.subr.bf16.mxu1 %v2462_v11  ;;  %v1965_v62 = vld [vmem:[#allocation4 + $0x410] sm:$0xff]  ;;  %v2109_v11 = vunpack.c.h.s8.bf16 %v1837_v6 }
 0x368   :  { %2636 = vmatmul.mubr.bf16.vlgmr.msra.gmra.mxu0 %v9088_v17  ;;  %v2365_v10 = vunpack.c.h.s8.bf16 %v1965_v62  ;;  %v2349_v24 = vunpack.c.l.s8.bf16 %v1965_v62 }
 0x369   :  { %2677 = vmatmul.mubr.bf16.vlgmr.msra.gmra.mxu1 %v9096_v3  ;;  %2686 = vmatpush1.bf16.msra.mxu0 %v2205_v47  ;;  %v2350_v47 = vunpack.c.l.s8.bf16 %v1966_v58 }
 0x36a   :  { %2727 = vmatpush1.bf16.msra.mxu1 %v2461_v38  ;;  %2687 = vmatprep.subr.bf16.mxu0 %v2190_v18  ;;  %v1950_v38 = vld [vmem:[#allocation4 + $0x398] sm:$0xff] }
 0x36b   :  { %2728 = vmatprep.subr.bf16.mxu1 %v2446_v40  ;;  %2717 = vmatprep.mubr.bf16.mxu0 %v9092_v4  ;;  %v2078_v18 = vld [vmem:[#allocation4 + $0x798] sm:$0xff]  ;;  %v2093_v40 = vunpack.c.l.s8.bf16 %v1837_v6  ;;  %v2334_v9 = vunpack.c.h.s8.bf16 %v1950_v38  ;;  %v2318_v25 = vunpack.c.l.s8.bf16 %v1950_v38 }
 0x36c   :  { %2758 = vmatprep.mubr.bf16.mxu1 %v9100_v5 }
 0x36d   :  { %2688 = vmatpush1.bf16.msra.mxu0 %v2189_v27  ;;  %v2590_v27 = vunpack.c.h.s8.bf16 %v2078_v18 }
 0x36e   :  { %2729 = vmatpush1.bf16.msra.mxu1 %v2445_v22  ;;  %2689 = vmatprep.subr.bf16.mxu0 %v2174_v19  ;;  %v1949_v22 = vld [vmem:[#allocation4 + $0x390] sm:$0xff] }
 0x36f   :  { %2730 = vmatprep.subr.bf16.mxu1 %v2430_v28  ;;  %v2077_v19 = vld [vmem:[#allocation4 + $0x790] sm:$0xff]  ;;  %v2333_v28 = vunpack.c.h.s8.bf16 %v1949_v22 }
 0x370   :  { %v2589_v29 = vunpack.c.h.s8.bf16 %v2077_v19  ;;  %v2573_v34 = vunpack.c.l.s8.bf16 %v2077_v19 }
 0x371   :  { %2690 = vmatpush1.bf16.msra.mxu0 %v2173_v53  ;;  %v2574_v53 = vunpack.c.l.s8.bf16 %v2078_v18 }
 0x372   :  { %2731 = vmatpush1.bf16.msra.mxu1 %v2429_v31  ;;  %2691 = vmatprep.subr.bf16.mxu0 %v2158_v49  ;;  %v1934_v31 = vld [vmem:[#allocation4 + $0x318] sm:$0xff] }
 0x373   :  { %2732 = vmatprep.subr.bf16.mxu1 %v2414_v32  ;;  %v2062_v49 = vld [vmem:[#allocation4 + $0x718] sm:$0xff]  ;;  %v2317_v32 = vunpack.c.l.s8.bf16 %v1949_v22  ;;  %v2302_v42 = vunpack.c.h.s8.bf16 %v1934_v31  ;;  %v2286_v48 = vunpack.c.l.s8.bf16 %v1934_v31 }
 0x375   :  { %2692 = vmatpush1.bf16.msra.mxu0 %v2157_v1  ;;  %v2558_v1 = vunpack.c.h.s8.bf16 %v2062_v49 }
 0x376   :  { %2733 = vmatpush1.bf16.msra.mxu1 %v2413_v7  ;;  %2693 = vmatprep.subr.bf16.mxu0 %v2142_v63  ;;  %v1933_v7 = vld [vmem:[#allocation4 + $0x310] sm:$0xff] }
 0x377   :  { %2734 = vmatprep.subr.bf16.mxu1 %v2398_v41  ;;  %v2061_v63 = vld [vmem:[#allocation4 + $0x710] sm:$0xff]  ;;  %v2301_v41 = vunpack.c.h.s8.bf16 %v1933_v7 }
 0x378   :  { %v2557_v15 = vunpack.c.h.s8.bf16 %v2061_v63  ;;  %v2541_v50 = vunpack.c.l.s8.bf16 %v2061_v63 }
 0x379   :  { %2694 = vmatpush1.bf16.msra.mxu0 %v2141_v0  ;;  %v2542_v0 = vunpack.c.l.s8.bf16 %v2062_v49 }
 0x37a   :  { %2735 = vmatpush1.bf16.msra.mxu1 %v2397_v13  ;;  %2695 = vmatprep.subr.bf16.mxu0 %v2126_v44  ;;  %v1918_v13 = vld [vmem:[#allocation4 + $0x298] sm:$0xff] }
 0x37b   :  { %2736 = vmatprep.subr.bf16.mxu1 %v2382_v57  ;;  %v2046_v44 = vld [vmem:[#allocation4 + $0x698] sm:$0xff]  ;;  %v2285_v57 = vunpack.c.l.s8.bf16 %v1933_v7  ;;  %v2270_v58 = vunpack.c.h.s8.bf16 %v1918_v13  ;;  %v2254_v62 = vunpack.c.l.s8.bf16 %v1918_v13 }
 0x37d   :  { %2696 = vmatpush1.bf16.msra.mxu0 %v2125_v61  ;;  %v2526_v61 = vunpack.c.h.s8.bf16 %v2046_v44 }
 0x37e   :  { %2737 = vmatpush1.bf16.msra.mxu1 %v2381_v43  ;;  %2697 = vmatprep.subr.bf16.mxu0 %v2110_v56  ;;  %v1917_v43 = vld [vmem:[#allocation4 + $0x290] sm:$0xff] }
 0x37f   :  { %2738 = vmatprep.subr.bf16.mxu1 %v2366_v33  ;;  %v2045_v56 = vld [vmem:[#allocation4 + $0x690] sm:$0xff]  ;;  %v2269_v33 = vunpack.c.h.s8.bf16 %v1917_v43 }
 0x380   :  { %v2525_v6 = vunpack.c.h.s8.bf16 %v2045_v56  ;;  %v2509_v38 = vunpack.c.l.s8.bf16 %v2045_v56 }
 0x381   :  { %2698 = vmatpush1.bf16.msra.mxu0 %v2109_v11  ;;  %v2510_v11 = vunpack.c.l.s8.bf16 %v2046_v44 }
 0x382   :  { %2739 = vmatpush1.bf16.msra.mxu1 %v2365_v10  ;;  %2699 = vmatprep.subr.bf16.mxu0 %v2094_v46  ;;  %v1902_v10 = vld [vmem:[#allocation4 + $0x218] sm:$0xff] }
 0x383   :  { %2740 = vmatprep.subr.bf16.mxu1 %v2350_v47  ;;  %v2030_v46 = vld [vmem:[#allocation4 + $0x618] sm:$0xff]  ;;  %v2253_v47 = vunpack.c.l.s8.bf16 %v1917_v43  ;;  %v2238_v18 = vunpack.c.h.s8.bf16 %v1902_v10  ;;  %v2222_v19 = vunpack.c.l.s8.bf16 %v1902_v10 }
 0x385   :  { %2700 = vmatpush1.bf16.msra.mxu0 %v2093_v40  ;;  %v2494_v40 = vunpack.c.h.s8.bf16 %v2030_v46 }
 0x386   :  { %2741 = vmatpush1.bf16.msra.mxu1 %v2349_v24  ;;  %2701 = vmatprep.subr.bf16.mxu0 %v2334_v9  ;;  %v1901_v24 = vld [vmem:[#allocation4 + $0x210] sm:$0xff] }
 0x387   :  { %2742 = vmatprep.subr.bf16.mxu1 %v2590_v27  ;;  %v2029_v9 = vld [vmem:[#allocation4 + $0x610] sm:$0xff]  ;;  %v2237_v27 = vunpack.c.h.s8.bf16 %v1901_v24 }
 0x388   :  { %v2493_v22 = vunpack.c.h.s8.bf16 %v2029_v9  ;;  %v2477_v31 = vunpack.c.l.s8.bf16 %v2029_v9 }
 0x389   :  { %2702 = vmatpush2.bf16.msra.mxu0 %v2333_v28  ;;  %v2478_v28 = vunpack.c.l.s8.bf16 %v2030_v46 }
 0x38a   :  { %2743 = vmatpush2.bf16.msra.mxu1 %v2589_v29  ;;  %2703 = vmatprep.subr.bf16.mxu0 %v2318_v25  ;;  %v1888_v29 = vld [vmem:[#allocation4 + $0x1a8] sm:$0xff] }
 0x38b   :  { %2744 = vmatprep.subr.bf16.mxu1 %v2574_v53  ;;  %v2016_v25 = vld [vmem:[#allocation4 + $0x5a8] sm:$0xff]  ;;  %v2221_v53 = vunpack.c.l.s8.bf16 %v1901_v24  ;;  %v2208_v49 = vunpack.c.h.s8.bf16 %v1888_v29  ;;  %v2192_v63 = vunpack.c.l.s8.bf16 %v1888_v29 }
 0x38d   :  { %2704 = vmatpush2.bf16.msra.mxu0 %v2317_v32  ;;  %v2464_v32 = vunpack.c.h.s8.bf16 %v2016_v25 }
 0x38e   :  { %2745 = vmatpush2.bf16.msra.mxu1 %v2573_v34  ;;  %2705 = vmatprep.subr.bf16.mxu0 %v2302_v42  ;;  %v1887_v34 = vld [vmem:[#allocation4 + $0x1a0] sm:$0xff] }
 0x38f   :  { %2746 = vmatprep.subr.bf16.mxu1 %v2558_v1  ;;  %v2015_v42 = vld [vmem:[#allocation4 + $0x5a0] sm:$0xff]  ;;  %v2207_v1 = vunpack.c.h.s8.bf16 %v1887_v34 }
 0x390   :  { %v2463_v7 = vunpack.c.h.s8.bf16 %v2015_v42  ;;  %v2447_v13 = vunpack.c.l.s8.bf16 %v2015_v42 }
 0x391   :  { %2706 = vmatpush2.bf16.msra.mxu0 %v2301_v41  ;;  %v2448_v41 = vunpack.c.l.s8.bf16 %v2016_v25 }
 0x392   :  { %2747 = vmatpush2.bf16.msra.mxu1 %v2557_v15  ;;  %2707 = vmatprep.subr.bf16.mxu0 %v2286_v48  ;;  %v1872_v15 = vld [vmem:[#allocation4 + $0x128] sm:$0xff] }
 0x393   :  { %2748 = vmatprep.subr.bf16.mxu1 %v2542_v0  ;;  %v2000_v48 = vld [vmem:[#allocation4 + $0x528] sm:$0xff]  ;;  %v2191_v0 = vunpack.c.l.s8.bf16 %v1887_v34  ;;  %v2176_v44 = vunpack.c.h.s8.bf16 %v1872_v15  ;;  %v2160_v56 = vunpack.c.l.s8.bf16 %v1872_v15 }
 0x395   :  { %2708 = vmatpush2.bf16.msra.mxu0 %v2285_v57  ;;  %v2432_v57 = vunpack.c.h.s8.bf16 %v2000_v48 }
 0x396   :  { %2749 = vmatpush2.bf16.msra.mxu1 %v2541_v50  ;;  %2709 = vmatprep.subr.bf16.mxu0 %v2270_v58  ;;  %v1871_v50 = vld [vmem:[#allocation4 + $0x120] sm:$0xff] }
 0x397   :  { %2750 = vmatprep.subr.bf16.mxu1 %v2526_v61  ;;  %v1999_v58 = vld [vmem:[#allocation4 + $0x520] sm:$0xff]  ;;  %v2175_v61 = vunpack.c.h.s8.bf16 %v1871_v50 }
 0x398   :  { %v2431_v43 = vunpack.c.h.s8.bf16 %v1999_v58  ;;  %v2415_v10 = vunpack.c.l.s8.bf16 %v1999_v58 }
 0x399   :  { %2710 = vmatpush2.bf16.msra.mxu0 %v2269_v33  ;;  %v2416_v33 = vunpack.c.l.s8.bf16 %v2000_v48 }
 0x39a   :  { %2751 = vmatpush2.bf16.msra.mxu1 %v2525_v6  ;;  %2711 = vmatprep.subr.bf16.mxu0 %v2254_v62  ;;  %v1856_v6 = vld [vmem:[#allocation4 + $0xa8] sm:$0xff] }
 0x39b   :  { %2752 = vmatprep.subr.bf16.mxu1 %v2510_v11  ;;  %v1984_v62 = vld [vmem:[#allocation4 + $0x4a8] sm:$0xff]  ;;  %v2159_v11 = vunpack.c.l.s8.bf16 %v1871_v50  ;;  %v2144_v46 = vunpack.c.h.s8.bf16 %v1856_v6  ;;  %v2128_v9 = vunpack.c.l.s8.bf16 %v1856_v6 }
 0x39d   :  { %2712 = vmatpush2.bf16.msra.mxu0 %v2253_v47  ;;  %v2400_v47 = vunpack.c.h.s8.bf16 %v1984_v62 }
 0x39e   :  { %2753 = vmatpush2.bf16.msra.mxu1 %v2509_v38  ;;  %2713 = vmatprep.subr.bf16.mxu0 %v2238_v18  ;;  %v1855_v38 = vld [vmem:[#allocation4 + $0xa0] sm:$0xff] }
 0x39f   :  { %2754 = vmatprep.subr.bf16.mxu1 %v2494_v40  ;;  %v1983_v18 = vld [vmem:[#allocation4 + $0x4a0] sm:$0xff]  ;;  %v2143_v40 = vunpack.c.h.s8.bf16 %v1855_v38 }
 0x3a0   :  { %v2399_v24 = vunpack.c.h.s8.bf16 %v1983_v18  ;;  %v2383_v29 = vunpack.c.l.s8.bf16 %v1983_v18 }
 0x3a1   :  { %2714 = vmatpush2.bf16.msra.mxu0 %v2237_v27  ;;  %v2384_v27 = vunpack.c.l.s8.bf16 %v1984_v62 }
 0x3a2   :  { %2755 = vmatpush2.bf16.msra.mxu1 %v2493_v22  ;;  %2715 = vmatprep.subr.bf16.mxu0 %v2222_v19  ;;  %v1840_v22 = vld [vmem:[#allocation4 + $0x28] sm:$0xff] }
 0x3a3   :  { %2756 = vmatprep.subr.bf16.mxu1 %v2478_v28  ;;  %v1968_v19 = vld [vmem:[#allocation4 + $0x428] sm:$0xff]  ;;  %v2127_v28 = vunpack.c.l.s8.bf16 %v1855_v38  ;;  %v2112_v25 = vunpack.c.h.s8.bf16 %v1840_v22  ;;  %v2096_v42 = vunpack.c.l.s8.bf16 %v1840_v22 }
 0x3a5   :  { %2716 = vmatpush2.bf16.msra.mxu0 %v2221_v53  ;;  %v2368_v53 = vunpack.c.h.s8.bf16 %v1968_v19 }
 0x3a6   :  { %2757 = vmatpush2.bf16.msra.mxu1 %v2477_v31  ;;  %2767 = vmatprep.subr.bf16.mxu0 %v2208_v49  ;;  %v1839_v31 = vld [vmem:[#allocation4 + $0x20] sm:$0xff] }
 0x3a7   :  { %2808 = vmatprep.subr.bf16.mxu1 %v2464_v32  ;;  %v1967_v49 = vld [vmem:[#allocation4 + $0x420] sm:$0xff]  ;;  %v2111_v32 = vunpack.c.h.s8.bf16 %v1839_v31 }
 0x3a8   :  { %2718 = vmatmul.mubr.bf16.vlgmr.msra.gmra.mxu0 %v9088_v17  ;;  %v2367_v34 = vunpack.c.h.s8.bf16 %v1967_v49  ;;  %v2351_v15 = vunpack.c.l.s8.bf16 %v1967_v49 }
 0x3a9   :  { %2759 = vmatmul.mubr.bf16.vlgmr.msra.gmra.mxu1 %v9096_v3  ;;  %2768 = vmatpush1.bf16.msra.mxu0 %v2207_v1  ;;  %v2352_v1 = vunpack.c.l.s8.bf16 %v1968_v19 }
 0x3aa   :  { %2809 = vmatpush1.bf16.msra.mxu1 %v2463_v7  ;;  %2769 = vmatprep.subr.bf16.mxu0 %v2192_v63  ;;  %v1952_v7 = vld [vmem:[#allocation4 + $0x3a8] sm:$0xff] }
 0x3ab   :  { %2810 = vmatprep.subr.bf16.mxu1 %v2448_v41  ;;  %2799 = vmatprep.mubr.bf16.mxu0 %v9092_v4  ;;  %v2080_v63 = vld [vmem:[#allocation4 + $0x7a8] sm:$0xff]  ;;  %v2095_v41 = vunpack.c.l.s8.bf16 %v1839_v31  ;;  %v2336_v48 = vunpack.c.h.s8.bf16 %v1952_v7  ;;  %v2320_v58 = vunpack.c.l.s8.bf16 %v1952_v7 }
 0x3ac   :  { %2840 = vmatprep.mubr.bf16.mxu1 %v9100_v5 }
 0x3ad   :  { %2770 = vmatpush1.bf16.msra.mxu0 %v2191_v0  ;;  %v2592_v0 = vunpack.c.h.s8.bf16 %v2080_v63 }
 0x3ae   :  { %2811 = vmatpush1.bf16.msra.mxu1 %v2447_v13  ;;  %2771 = vmatprep.subr.bf16.mxu0 %v2176_v44  ;;  %v1951_v13 = vld [vmem:[#allocation4 + $0x3a0] sm:$0xff] }
 0x3af   :  { %2812 = vmatprep.subr.bf16.mxu1 %v2432_v57  ;;  %v2079_v44 = vld [vmem:[#allocation4 + $0x7a0] sm:$0xff]  ;;  %v2335_v57 = vunpack.c.h.s8.bf16 %v1951_v13 }
 0x3b0   :  { %v2591_v50 = vunpack.c.h.s8.bf16 %v2079_v44  ;;  %v2575_v6 = vunpack.c.l.s8.bf16 %v2079_v44 }
 0x3b1   :  { %2772 = vmatpush1.bf16.msra.mxu0 %v2175_v61  ;;  %v2576_v61 = vunpack.c.l.s8.bf16 %v2080_v63 }
 0x3b2   :  { %2813 = vmatpush1.bf16.msra.mxu1 %v2431_v43  ;;  %2773 = vmatprep.subr.bf16.mxu0 %v2160_v56  ;;  %v1936_v43 = vld [vmem:[#allocation4 + $0x328] sm:$0xff] }
 0x3b3   :  { %2814 = vmatprep.subr.bf16.mxu1 %v2416_v33  ;;  %v2064_v56 = vld [vmem:[#allocation4 + $0x728] sm:$0xff]  ;;  %v2319_v33 = vunpack.c.l.s8.bf16 %v1951_v13  ;;  %v2304_v62 = vunpack.c.h.s8.bf16 %v1936_v43  ;;  %v2288_v18 = vunpack.c.l.s8.bf16 %v1936_v43 }
 0x3b5   :  { %2774 = vmatpush1.bf16.msra.mxu0 %v2159_v11  ;;  %v2560_v11 = vunpack.c.h.s8.bf16 %v2064_v56 }
 0x3b6   :  { %2815 = vmatpush1.bf16.msra.mxu1 %v2415_v10  ;;  %2775 = vmatprep.subr.bf16.mxu0 %v2144_v46  ;;  %v1935_v10 = vld [vmem:[#allocation4 + $0x320] sm:$0xff] }
 0x3b7   :  { %2816 = vmatprep.subr.bf16.mxu1 %v2400_v47  ;;  %v2063_v46 = vld [vmem:[#allocation4 + $0x720] sm:$0xff]  ;;  %v2303_v47 = vunpack.c.h.s8.bf16 %v1935_v10 }
 0x3b8   :  { %v2559_v38 = vunpack.c.h.s8.bf16 %v2063_v46  ;;  %v2543_v22 = vunpack.c.l.s8.bf16 %v2063_v46 }
 0x3b9   :  { %2776 = vmatpush1.bf16.msra.mxu0 %v2143_v40  ;;  %v2544_v40 = vunpack.c.l.s8.bf16 %v2064_v56 }
 0x3ba   :  { %2817 = vmatpush1.bf16.msra.mxu1 %v2399_v24  ;;  %2777 = vmatprep.subr.bf16.mxu0 %v2128_v9  ;;  %v1920_v24 = vld [vmem:[#allocation4 + $0x2a8] sm:$0xff] }
 0x3bb   :  { %2818 = vmatprep.subr.bf16.mxu1 %v2384_v27  ;;  %v2048_v9 = vld [vmem:[#allocation4 + $0x6a8] sm:$0xff]  ;;  %v2287_v27 = vunpack.c.l.s8.bf16 %v1935_v10  ;;  %v2272_v19 = vunpack.c.h.s8.bf16 %v1920_v24  ;;  %v2256_v49 = vunpack.c.l.s8.bf16 %v1920_v24 }
 0x3bd   :  { %2778 = vmatpush1.bf16.msra.mxu0 %v2127_v28  ;;  %v2528_v28 = vunpack.c.h.s8.bf16 %v2048_v9 }
 0x3be   :  { %2819 = vmatpush1.bf16.msra.mxu1 %v2383_v29  ;;  %2779 = vmatprep.subr.bf16.mxu0 %v2112_v25  ;;  %v1919_v29 = vld [vmem:[#allocation4 + $0x2a0] sm:$0xff] }
 0x3bf   :  { %2820 = vmatprep.subr.bf16.mxu1 %v2368_v53  ;;  %v2047_v25 = vld [vmem:[#allocation4 + $0x6a0] sm:$0xff]  ;;  %v2271_v53 = vunpack.c.h.s8.bf16 %v1919_v29 }
 0x3c0   :  { %v2527_v31 = vunpack.c.h.s8.bf16 %v2047_v25  ;;  %v2511_v7 = vunpack.c.l.s8.bf16 %v2047_v25 }
 0x3c1   :  { %2780 = vmatpush1.bf16.msra.mxu0 %v2111_v32  ;;  %v2512_v32 = vunpack.c.l.s8.bf16 %v2048_v9 }
 0x3c2   :  { %2821 = vmatpush1.bf16.msra.mxu1 %v2367_v34  ;;  %2781 = vmatprep.subr.bf16.mxu0 %v2096_v42  ;;  %v1904_v34 = vld [vmem:[#allocation4 + $0x228] sm:$0xff] }
 0x3c3   :  { %2822 = vmatprep.subr.bf16.mxu1 %v2352_v1  ;;  %v2032_v42 = vld [vmem:[#allocation4 + $0x628] sm:$0xff]  ;;  %v2255_v1 = vunpack.c.l.s8.bf16 %v1919_v29  ;;  %v2240_v63 = vunpack.c.h.s8.bf16 %v1904_v34  ;;  %v2224_v44 = vunpack.c.l.s8.bf16 %v1904_v34 }
 0x3c5   :  { %2782 = vmatpush1.bf16.msra.mxu0 %v2095_v41  ;;  %v2496_v41 = vunpack.c.h.s8.bf16 %v2032_v42 }
 0x3c6   :  { %2823 = vmatpush1.bf16.msra.mxu1 %v2351_v15  ;;  %2783 = vmatprep.subr.bf16.mxu0 %v2336_v48  ;;  %v1903_v15 = vld [vmem:[#allocation4 + $0x220] sm:$0xff] }
 0x3c7   :  { %2824 = vmatprep.subr.bf16.mxu1 %v2592_v0  ;;  %v2031_v48 = vld [vmem:[#allocation4 + $0x620] sm:$0xff]  ;;  %v2239_v0 = vunpack.c.h.s8.bf16 %v1903_v15 }
 0x3c8   :  { %v2495_v13 = vunpack.c.h.s8.bf16 %v2031_v48  ;;  %v2479_v43 = vunpack.c.l.s8.bf16 %v2031_v48 }
 0x3c9   :  { %2784 = vmatpush2.bf16.msra.mxu0 %v2335_v57  ;;  %v2480_v57 = vunpack.c.l.s8.bf16 %v2032_v42 }
 0x3ca   :  { %2825 = vmatpush2.bf16.msra.mxu1 %v2591_v50  ;;  %2785 = vmatprep.subr.bf16.mxu0 %v2320_v58  ;;  %v1890_v50 = vld [vmem:[#allocation4 + $0x1b8] sm:$0xff] }
 0x3cb   :  { %2826 = vmatprep.subr.bf16.mxu1 %v2576_v61  ;;  %v2018_v58 = vld [vmem:[#allocation4 + $0x5b8] sm:$0xff]  ;;  %v2223_v61 = vunpack.c.l.s8.bf16 %v1903_v15  ;;  %v2210_v56 = vunpack.c.h.s8.bf16 %v1890_v50  ;;  %v2194_v46 = vunpack.c.l.s8.bf16 %v1890_v50 }
 0x3cd   :  { %2786 = vmatpush2.bf16.msra.mxu0 %v2319_v33  ;;  %v2466_v33 = vunpack.c.h.s8.bf16 %v2018_v58 }
 0x3ce   :  { %2827 = vmatpush2.bf16.msra.mxu1 %v2575_v6  ;;  %2787 = vmatprep.subr.bf16.mxu0 %v2304_v62  ;;  %v1889_v6 = vld [vmem:[#allocation4 + $0x1b0] sm:$0xff] }
 0x3cf   :  { %2828 = vmatprep.subr.bf16.mxu1 %v2560_v11  ;;  %v2017_v62 = vld [vmem:[#allocation4 + $0x5b0] sm:$0xff]  ;;  %v2209_v11 = vunpack.c.h.s8.bf16 %v1889_v6 }
 0x3d0   :  { %v2465_v10 = vunpack.c.h.s8.bf16 %v2017_v62  ;;  %v2449_v24 = vunpack.c.l.s8.bf16 %v2017_v62 }
 0x3d1   :  { %2788 = vmatpush2.bf16.msra.mxu0 %v2303_v47  ;;  %v2450_v47 = vunpack.c.l.s8.bf16 %v2018_v58 }
 0x3d2   :  { %2829 = vmatpush2.bf16.msra.mxu1 %v2559_v38  ;;  %2789 = vmatprep.subr.bf16.mxu0 %v2288_v18  ;;  %v1874_v38 = vld [vmem:[#allocation4 + $0x138] sm:$0xff] }
 0x3d3   :  { %2830 = vmatprep.subr.bf16.mxu1 %v2544_v40  ;;  %v2002_v18 = vld [vmem:[#allocation4 + $0x538] sm:$0xff]  ;;  %v2193_v40 = vunpack.c.l.s8.bf16 %v1889_v6  ;;  %v2178_v9 = vunpack.c.h.s8.bf16 %v1874_v38  ;;  %v2162_v25 = vunpack.c.l.s8.bf16 %v1874_v38 }
 0x3d5   :  { %2790 = vmatpush2.bf16.msra.mxu0 %v2287_v27  ;;  %v2434_v27 = vunpack.c.h.s8.bf16 %v2002_v18 }
 0x3d6   :  { %2831 = vmatpush2.bf16.msra.mxu1 %v2543_v22  ;;  %2791 = vmatprep.subr.bf16.mxu0 %v2272_v19  ;;  %v1873_v22 = vld [vmem:[#allocation4 + $0x130] sm:$0xff] }
 0x3d7   :  { %2832 = vmatprep.subr.bf16.mxu1 %v2528_v28  ;;  %v2001_v19 = vld [vmem:[#allocation4 + $0x530] sm:$0xff]  ;;  %v2177_v28 = vunpack.c.h.s8.bf16 %v1873_v22 }
 0x3d8   :  { %v2433_v29 = vunpack.c.h.s8.bf16 %v2001_v19  ;;  %v2417_v34 = vunpack.c.l.s8.bf16 %v2001_v19 }
 0x3d9   :  { %2792 = vmatpush2.bf16.msra.mxu0 %v2271_v53  ;;  %v2418_v53 = vunpack.c.l.s8.bf16 %v2002_v18 }
 0x3da   :  { %2833 = vmatpush2.bf16.msra.mxu1 %v2527_v31  ;;  %2793 = vmatprep.subr.bf16.mxu0 %v2256_v49  ;;  %v1858_v31 = vld [vmem:[#allocation4 + $0xb8] sm:$0xff] }
 0x3db   :  { %2834 = vmatprep.subr.bf16.mxu1 %v2512_v32  ;;  %v1986_v49 = vld [vmem:[#allocation4 + $0x4b8] sm:$0xff]  ;;  %v2161_v32 = vunpack.c.l.s8.bf16 %v1873_v22  ;;  %v2146_v42 = vunpack.c.h.s8.bf16 %v1858_v31  ;;  %v2130_v48 = vunpack.c.l.s8.bf16 %v1858_v31 }
 0x3dd   :  { %2794 = vmatpush2.bf16.msra.mxu0 %v2255_v1  ;;  %v2402_v1 = vunpack.c.h.s8.bf16 %v1986_v49 }
 0x3de   :  { %2835 = vmatpush2.bf16.msra.mxu1 %v2511_v7  ;;  %2795 = vmatprep.subr.bf16.mxu0 %v2240_v63  ;;  %v1857_v7 = vld [vmem:[#allocation4 + $0xb0] sm:$0xff] }
 0x3df   :  { %2836 = vmatprep.subr.bf16.mxu1 %v2496_v41  ;;  %v1985_v63 = vld [vmem:[#allocation4 + $0x4b0] sm:$0xff]  ;;  %v2145_v41 = vunpack.c.h.s8.bf16 %v1857_v7 }
 0x3e0   :  { %v2401_v15 = vunpack.c.h.s8.bf16 %v1985_v63  ;;  %v2385_v50 = vunpack.c.l.s8.bf16 %v1985_v63 }
 0x3e1   :  { %2796 = vmatpush2.bf16.msra.mxu0 %v2239_v0  ;;  %v2386_v0 = vunpack.c.l.s8.bf16 %v1986_v49 }
 0x3e2   :  { %2837 = vmatpush2.bf16.msra.mxu1 %v2495_v13  ;;  %2797 = vmatprep.subr.bf16.mxu0 %v2224_v44  ;;  %v1842_v13 = vld [vmem:[#allocation4 + $0x38] sm:$0xff] }
 0x3e3   :  { %2838 = vmatprep.subr.bf16.mxu1 %v2480_v57  ;;  %v1970_v44 = vld [vmem:[#allocation4 + $0x438] sm:$0xff]  ;;  %v2129_v57 = vunpack.c.l.s8.bf16 %v1857_v7  ;;  %v2114_v58 = vunpack.c.h.s8.bf16 %v1842_v13  ;;  %v2098_v62 = vunpack.c.l.s8.bf16 %v1842_v13 }
 0x3e5   :  { %2798 = vmatpush2.bf16.msra.mxu0 %v2223_v61  ;;  %v2370_v61 = vunpack.c.h.s8.bf16 %v1970_v44 }
 0x3e6   :  { %2839 = vmatpush2.bf16.msra.mxu1 %v2479_v43  ;;  %2849 = vmatprep.subr.bf16.mxu0 %v2210_v56  ;;  %v1841_v43 = vld [vmem:[#allocation4 + $0x30] sm:$0xff] }
 0x3e7   :  { %2890 = vmatprep.subr.bf16.mxu1 %v2466_v33  ;;  %v1969_v56 = vld [vmem:[#allocation4 + $0x430] sm:$0xff]  ;;  %v2113_v33 = vunpack.c.h.s8.bf16 %v1841_v43 }
 0x3e8   :  { %2800 = vmatmul.mubr.bf16.vlgmr.msra.gmra.mxu0 %v9088_v17  ;;  %v2369_v6 = vunpack.c.h.s8.bf16 %v1969_v56  ;;  %v2353_v38 = vunpack.c.l.s8.bf16 %v1969_v56 }
 0x3e9   :  { %2841 = vmatmul.mubr.bf16.vlgmr.msra.gmra.mxu1 %v9096_v3  ;;  %2850 = vmatpush1.bf16.msra.mxu0 %v2209_v11  ;;  %v2354_v11 = vunpack.c.l.s8.bf16 %v1970_v44 }
 0x3ea   :  { %2891 = vmatpush1.bf16.msra.mxu1 %v2465_v10  ;;  %2851 = vmatprep.subr.bf16.mxu0 %v2194_v46  ;;  %v1954_v10 = vld [vmem:[#allocation4 + $0x3b8] sm:$0xff] }
 0x3eb   :  { %2892 = vmatprep.subr.bf16.mxu1 %v2450_v47  ;;  %2881 = vmatprep.mubr.bf16.mxu0 %v9092_v4  ;;  %v2082_v46 = vld [vmem:[#allocation4 + $0x7b8] sm:$0xff]  ;;  %v2097_v47 = vunpack.c.l.s8.bf16 %v1841_v43  ;;  %v2338_v18 = vunpack.c.h.s8.bf16 %v1954_v10  ;;  %v2322_v19 = vunpack.c.l.s8.bf16 %v1954_v10 }
 0x3ec   :  { %2922 = vmatprep.mubr.bf16.mxu1 %v9100_v5 }
 0x3ed   :  { %2852 = vmatpush1.bf16.msra.mxu0 %v2193_v40  ;;  %v2594_v40 = vunpack.c.h.s8.bf16 %v2082_v46 }
 0x3ee   :  { %2893 = vmatpush1.bf16.msra.mxu1 %v2449_v24  ;;  %2853 = vmatprep.subr.bf16.mxu0 %v2178_v9  ;;  %v1953_v24 = vld [vmem:[#allocation4 + $0x3b0] sm:$0xff] }
 0x3ef   :  { %2894 = vmatprep.subr.bf16.mxu1 %v2434_v27  ;;  %v2081_v9 = vld [vmem:[#allocation4 + $0x7b0] sm:$0xff]  ;;  %v2337_v27 = vunpack.c.h.s8.bf16 %v1953_v24 }
 0x3f0   :  { %v2593_v22 = vunpack.c.h.s8.bf16 %v2081_v9  ;;  %v2577_v31 = vunpack.c.l.s8.bf16 %v2081_v9 }
 0x3f1   :  { %2854 = vmatpush1.bf16.msra.mxu0 %v2177_v28  ;;  %v2578_v28 = vunpack.c.l.s8.bf16 %v2082_v46 }
 0x3f2   :  { %2895 = vmatpush1.bf16.msra.mxu1 %v2433_v29  ;;  %2855 = vmatprep.subr.bf16.mxu0 %v2162_v25  ;;  %v1938_v29 = vld [vmem:[#allocation4 + $0x338] sm:$0xff] }
 0x3f3   :  { %2896 = vmatprep.subr.bf16.mxu1 %v2418_v53  ;;  %v2066_v25 = vld [vmem:[#allocation4 + $0x738] sm:$0xff]  ;;  %v2321_v53 = vunpack.c.l.s8.bf16 %v1953_v24  ;;  %v2306_v49 = vunpack.c.h.s8.bf16 %v1938_v29  ;;  %v2290_v63 = vunpack.c.l.s8.bf16 %v1938_v29 }
 0x3f5   :  { %2856 = vmatpush1.bf16.msra.mxu0 %v2161_v32  ;;  %v2562_v32 = vunpack.c.h.s8.bf16 %v2066_v25 }
 0x3f6   :  { %2897 = vmatpush1.bf16.msra.mxu1 %v2417_v34  ;;  %2857 = vmatprep.subr.bf16.mxu0 %v2146_v42  ;;  %v1937_v34 = vld [vmem:[#allocation4 + $0x330] sm:$0xff] }
 0x3f7   :  { %2898 = vmatprep.subr.bf16.mxu1 %v2402_v1  ;;  %v2065_v42 = vld [vmem:[#allocation4 + $0x730] sm:$0xff]  ;;  %v2305_v1 = vunpack.c.h.s8.bf16 %v1937_v34 }
 0x3f8   :  { %v2561_v7 = vunpack.c.h.s8.bf16 %v2065_v42  ;;  %v2545_v13 = vunpack.c.l.s8.bf16 %v2065_v42  ;;  %v9148_v42 = vld [vmem:[#allocation19] sm:$0xff] }
 0x3f9   :  { %2858 = vmatpush1.bf16.msra.mxu0 %v2145_v41  ;;  %v2546_v41 = vunpack.c.l.s8.bf16 %v2066_v25 }
 0x3fa   :  { %2899 = vmatpush1.bf16.msra.mxu1 %v2401_v15  ;;  %2859 = vmatprep.subr.bf16.mxu0 %v2130_v48  ;;  %v1922_v15 = vld [vmem:[#allocation4 + $0x2b8] sm:$0xff] }
 0x3fb   :  { %2900 = vmatprep.subr.bf16.mxu1 %v2386_v0  ;;  %v2050_v48 = vld [vmem:[#allocation4 + $0x6b8] sm:$0xff]  ;;  %v2289_v0 = vunpack.c.l.s8.bf16 %v1937_v34  ;;  %v2274_v44 = vunpack.c.h.s8.bf16 %v1922_v15  ;;  %v2258_v56 = vunpack.c.l.s8.bf16 %v1922_v15 }
 0x3fd   :  { %2860 = vmatpush1.bf16.msra.mxu0 %v2129_v57  ;;  %v2530_v57 = vunpack.c.h.s8.bf16 %v2050_v48 }
 0x3fe   :  { %2901 = vmatpush1.bf16.msra.mxu1 %v2385_v50  ;;  %2861 = vmatprep.subr.bf16.mxu0 %v2114_v58  ;;  %v1921_v50 = vld [vmem:[#allocation4 + $0x2b0] sm:$0xff] }
 0x3ff   :  { %2902 = vmatprep.subr.bf16.mxu1 %v2370_v61  ;;  %v2049_v58 = vld [vmem:[#allocation4 + $0x6b0] sm:$0xff]  ;;  %v2273_v61 = vunpack.c.h.s8.bf16 %v1921_v50 }
 0x400   :  { %v2529_v43 = vunpack.c.h.s8.bf16 %v2049_v58  ;;  %v2513_v10 = vunpack.c.l.s8.bf16 %v2049_v58 }
 0x401   :  { %2862 = vmatpush1.bf16.msra.mxu0 %v2113_v33  ;;  %v2514_v33 = vunpack.c.l.s8.bf16 %v2050_v48 }
 0x402   :  { %2903 = vmatpush1.bf16.msra.mxu1 %v2369_v6  ;;  %2863 = vmatprep.subr.bf16.mxu0 %v2098_v62  ;;  %v1906_v6 = vld [vmem:[#allocation4 + $0x238] sm:$0xff] }
 0x403   :  { %2904 = vmatprep.subr.bf16.mxu1 %v2354_v11  ;;  %v2034_v62 = vld [vmem:[#allocation4 + $0x638] sm:$0xff]  ;;  %v2257_v11 = vunpack.c.l.s8.bf16 %v1921_v50  ;;  %v2242_v46 = vunpack.c.h.s8.bf16 %v1906_v6  ;;  %v2226_v9 = vunpack.c.l.s8.bf16 %v1906_v6  ;;  %v1875_v6 = vld [vmem:[#allocation4 + $0x140] sm:$0xff] }
 0x405   :  { %2864 = vmatpush1.bf16.msra.mxu0 %v2097_v47  ;;  %v2498_v47 = vunpack.c.h.s8.bf16 %v2034_v62 }
 0x406   :  { %2905 = vmatpush1.bf16.msra.mxu1 %v2353_v38  ;;  %2865 = vmatprep.subr.bf16.mxu0 %v2338_v18  ;;  %v1905_v38 = vld [vmem:[#allocation4 + $0x230] sm:$0xff] }
 0x407   :  { %2906 = vmatprep.subr.bf16.mxu1 %v2594_v40  ;;  %v2033_v18 = vld [vmem:[#allocation4 + $0x630] sm:$0xff]  ;;  %v2241_v40 = vunpack.c.h.s8.bf16 %v1905_v38 }
 0x408   :  { %v2497_v24 = vunpack.c.h.s8.bf16 %v2033_v18  ;;  %v2481_v29 = vunpack.c.l.s8.bf16 %v2033_v18 }
 0x409   :  { %2866 = vmatpush2.bf16.msra.mxu0 %v2337_v27  ;;  %v2482_v27 = vunpack.c.l.s8.bf16 %v2034_v62  ;;  %v2003_v62 = vld [vmem:[#allocation4 + $0x540] sm:$0xff] }
 0x40a   :  { %2907 = vmatpush2.bf16.msra.mxu1 %v2593_v22  ;;  %2867 = vmatprep.subr.bf16.mxu0 %v2322_v19  ;;  %v1892_v22 = vld [vmem:[#allocation4 + $0x1c8] sm:$0xff] }
 0x40b   :  { %2908 = vmatprep.subr.bf16.mxu1 %v2578_v28  ;;  %v2020_v19 = vld [vmem:[#allocation4 + $0x5c8] sm:$0xff]  ;;  %v2225_v28 = vunpack.c.l.s8.bf16 %v1905_v38  ;;  %v2212_v25 = vunpack.c.h.s8.bf16 %v1892_v22 }
 0x40d   :  { %2868 = vmatpush2.bf16.msra.mxu0 %v2321_v53  ;;  %v2468_v53 = vunpack.c.h.s8.bf16 %v2020_v19 }
 0x40e   :  { %2909 = vmatpush2.bf16.msra.mxu1 %v2577_v31  ;;  %2869 = vmatprep.subr.bf16.mxu0 %v2306_v49  ;;  %v1891_v31 = vld [vmem:[#allocation4 + $0x1c0] sm:$0xff] }
 0x40f   :  { %2910 = vmatprep.subr.bf16.mxu1 %v2562_v32  ;;  %v2019_v49 = vld [vmem:[#allocation4 + $0x5c0] sm:$0xff]  ;;  %v2211_v32 = vunpack.c.h.s8.bf16 %v1891_v31 }
 0x410   :  { %v2467_v34 = vunpack.c.h.s8.bf16 %v2019_v49  ;;  %v2451_v50 = vunpack.c.l.s8.bf16 %v2019_v49 }
 0x411   :  { %2870 = vmatpush2.bf16.msra.mxu0 %v2305_v1  ;;  %v2196_v1 = vunpack.c.l.s8.bf16 %v1892_v22 }
 0x412   :  { %2911 = vmatpush2.bf16.msra.mxu1 %v2561_v7  ;;  %2871 = vmatprep.subr.bf16.mxu0 %v2290_v63  ;;  %v2452_v7 = vunpack.c.l.s8.bf16 %v2020_v19  ;;  %v1876_v63 = vld [vmem:[#allocation4 + $0x148] sm:$0xff] }
 0x413   :  { %2912 = vmatprep.subr.bf16.mxu1 %v2546_v41  ;;  %v2004_v41 = vld [vmem:[#allocation4 + $0x548] sm:$0xff]  ;;  %v2164_v19 = vunpack.c.l.s8.bf16 %v1876_v63 }
 0x415   :  { %2872 = vmatpush2.bf16.msra.mxu0 %v2289_v0  ;;  %v9150_v0 = vld [vmem:[#allocation21] sm:$0xff] }
 0x416   :  { %2913 = vmatpush2.bf16.msra.mxu1 %v2545_v13  ;;  %2873 = vmatprep.subr.bf16.mxu0 %v2274_v44  ;;  %v3282_v44 = vrot.slane %v9148_v42, %v8755_v54 }
 0x417   :  { %2914 = vmatprep.subr.bf16.mxu1 %v2530_v57  ;;  %v2195_v57 = vunpack.c.l.s8.bf16 %v1891_v31  ;;  %v1988_v31 = vld [vmem:[#allocation4 + $0x4c8] sm:$0xff] }
 0x419   :  { %2874 = vmatpush2.bf16.msra.mxu0 %v2273_v61 }
 0x41a   :  { %2915 = vmatpush2.bf16.msra.mxu1 %v2529_v43  ;;  %2875 = vmatprep.subr.bf16.mxu0 %v2258_v56  ;;  %v3286_v43 = vrot.slane %v9148_v42, %v8761_v59  ;;  %v2180_v56 = vunpack.c.h.s8.bf16 %v1876_v63 }
 0x41b   :  { %2916 = vmatprep.subr.bf16.mxu1 %v2514_v33  ;;  %v2436_v33 = vunpack.c.h.s8.bf16 %v2004_v41 }
 0x41d   :  { %2876 = vmatpush2.bf16.msra.mxu0 %v2257_v11 }
 0x41e   :  { %2917 = vmatpush2.bf16.msra.mxu1 %v2513_v10  ;;  %2877 = vmatprep.subr.bf16.mxu0 %v2242_v46  ;;  %v3382_v10 = vrot.slane %v9150_v0, %v8755_v54 }
 0x41f   :  { %2918 = vmatprep.subr.bf16.mxu1 %v2498_v47  ;;  %v3386_v47 = vrot.slane %v9150_v0, %v8761_v59 }
 0x421   :  { %2878 = vmatpush2.bf16.msra.mxu0 %v2241_v40 }
 0x422   :  { %2919 = vmatpush2.bf16.msra.mxu1 %v2497_v24  ;;  %2879 = vmatprep.subr.bf16.mxu0 %v2226_v9  ;;  %v2179_v9 = vunpack.c.h.s8.bf16 %v1875_v6 }
 0x423   :  { %2920 = vmatprep.subr.bf16.mxu1 %v2482_v27 }
 0x425   :  { %2880 = vmatpush2.bf16.msra.mxu0 %v2225_v28  ;;  %v2420_v28 = vunpack.c.l.s8.bf16 %v2004_v41 }
 0x426   :  { %2921 = vmatpush2.bf16.msra.mxu1 %v2481_v29  ;;  %2931 = vmatprep.subr.bf16.mxu0 %v2212_v25 }
 0x427   :  { %2972 = vmatprep.subr.bf16.mxu1 %v2468_v53  ;;  %v1860_v53 = vld [vmem:[#allocation4 + $0xc8] sm:$0xff] }
 0x428   :  { %v2637_v15 = vpop.f32.mrf.mxu0  ;;  %2882 = vmatmul.mubr.bf16.vlgmr.msra.gmra.mxu0 %v9088_v17 }
 0x429   :  { %v2678_v48 = vpop.f32.mrf.mxu1  ;;  %2923 = vmatmul.mubr.bf16.vlgmr.msra.gmra.mxu1 %v9096_v3  ;;  %2932 = vmatpush1.bf16.msra.mxu0 %v2211_v32 }
 0x42a   :  { %v2679_v13 = vadd.f32 %v2678_v48, %v2637_v15  ;;  %2973 = vmatpush1.bf16.msra.mxu1 %v2467_v34  ;;  %v2639_v58 = vpop.f32.mrf.mxu0  ;;  %2933 = vmatprep.subr.bf16.mxu0 %v2196_v1  ;;  %v2163_v34 = vunpack.c.l.s8.bf16 %v1875_v6  ;;  %v2148_v1 = vunpack.c.h.s8.bf16 %v1860_v53  ;;  %v1859_v15 = vld [vmem:[#allocation4 + $0xc0] sm:$0xff] }
 0x42b   :  { %v2680_v61 = vpop.f32.mrf.mxu1  ;;  %2974 = vmatprep.subr.bf16.mxu1 %v2452_v7  ;;  %2963 = vmatprep.mubr.bf16.mxu0 %v9092_v4  ;;  %v2404_v7 = vunpack.c.h.s8.bf16 %v1988_v31  ;;  %v1987_v48 = vld [vmem:[#allocation4 + $0x4c0] sm:$0xff] }
 0x42c   :  { %v3259_v11 = vadd.f32 %v2679_v13, %v9102_v8  ;;  %v2681_v46 = vadd.f32 %v2680_v61, %v2639_v58  ;;  %3004 = vmatprep.mubr.bf16.mxu1 %v9100_v5  ;;  %v2641_v38 = vpop.f32.mrf.mxu0  ;;  %v2435_v8 = vunpack.c.h.s8.bf16 %v2003_v62  ;;  %v2388_v58 = vunpack.c.l.s8.bf16 %v1988_v31  ;;  %v1844_v61 = vld [vmem:[#allocation4 + $0x48] sm:$0xff] }
 0x42d   :  { %v2682_v18 = vpop.f32.mrf.mxu1  ;;  %2934 = vmatpush1.bf16.msra.mxu0 %v2195_v57  ;;  %v2403_v57 = vunpack.c.h.s8.bf16 %v1987_v48  ;;  %v2116_v6 = vunpack.c.h.s8.bf16 %v1844_v61  ;;  %v2100_v38 = vunpack.c.l.s8.bf16 %v1844_v61  ;;  %v2052_v61 = vld [vmem:[#allocation4 + $0x6c8] sm:$0xff] }
 0x42e   :  { %v3359_v40 = vmul.f32 %v3282_v44, %v3259_v11  ;;  %v3260_v24 = vadd.f32 %v2681_v46, %v9106_v51  ;;  %2975 = vmatpush1.bf16.msra.mxu1 %v2451_v50  ;;  %v2642_v27 = vpop.f32.mrf.mxu0  ;;  %2935 = vmatprep.subr.bf16.mxu0 %v2180_v56  ;;  %v2419_v51 = vunpack.c.l.s8.bf16 %v2003_v62  ;;  %v2147_v44 = vunpack.c.h.s8.bf16 %v1859_v15  ;;  %v1843_v11 = vld [vmem:[#allocation4 + $0x40] sm:$0xff] }
 0x42f   :  { %v2683_v22 = vpop.f32.mrf.mxu1  ;;  %2976 = vmatprep.subr.bf16.mxu1 %v2436_v33  ;;  %v2132_v50 = vunpack.c.l.s8.bf16 %v1860_v53  ;;  %v2131_v56 = vunpack.c.l.s8.bf16 %v1859_v15  ;;  %v2387_v33 = vunpack.c.l.s8.bf16 %v1987_v48  ;;  %v2115_v46 = vunpack.c.h.s8.bf16 %v1843_v11  ;;  %v1939_v15 = vld [vmem:[#allocation4 + $0x340] sm:$0xff] }
 0x430   :  { %v3459_v29 = vadd.f32 %v3382_v10, %v3359_v40  ;;  %v3360_v25 = vmul.f32 %v3286_v43, %v3260_v24  ;;  %v1972_v43 = vld [vmem:[#allocation4 + $0x448] sm:$0xff]  ;;  %v1971_v10 = vld [vmem:[#allocation4 + $0x440] sm:$0xff] }
 0x431   :  { %2936 = vmatpush1.bf16.msra.mxu0 %v2179_v9  ;;  %v2372_v62 = vunpack.c.h.s8.bf16 %v1972_v43  ;;  %v2356_v18 = vunpack.c.l.s8.bf16 %v1972_v43  ;;  %v1956_v40 = vld [vmem:[#allocation4 + $0x3c8] sm:$0xff]  ;;  %v2099_v9 = vunpack.c.l.s8.bf16 %v1843_v11  ;;  %v2067_v48 = vld [vmem:[#allocation4 + $0x740] sm:$0xff]  ;;  %v2291_v43 = vunpack.c.l.s8.bf16 %v1939_v15 }
 0x432   :  { %v3475_v49 = vmax.f32 %v3459_v29, 0.0  ;;  %v3460_v32 = vadd.f32 %v3386_v47, %v3360_v25  ;;  %2977 = vmatpush1.bf16.msra.mxu1 %v2435_v8  ;;  %2937 = vmatprep.subr.bf16.mxu0 %v2164_v19  ;;  %v2371_v47 = vunpack.c.h.s8.bf16 %v1971_v10  ;;  %v2084_v24 = vld [vmem:[#allocation4 + $0x7c8] sm:$0xff]  ;;  %v2355_v8 = vunpack.c.l.s8.bf16 %v1971_v10  ;;  %v1955_v19 = vld [vmem:[#allocation4 + $0x3c0] sm:$0xff] }
 0x433   :  { %2978 = vmatprep.subr.bf16.mxu1 %v2420_v28  ;;  %v2340_v27 = vunpack.c.h.s8.bf16 %v1956_v40  ;;  %v2596_v22 = vunpack.c.h.s8.bf16 %v2084_v24  ;;  %v2083_v28 = vld [vmem:[#allocation4 + $0x7c0] sm:$0xff]  ;;  %v2339_v29 = vunpack.c.h.s8.bf16 %v1955_v19  ;;  %v2324_v53 = vunpack.c.l.s8.bf16 %v1956_v40  ;;  %v2036_v40 = vld [vmem:[#allocation4 + $0x648] sm:$0xff] }
 0x434   :  { %v9166_v13 = vpack.c.bf16 %v3475_v49, %v3475_v49  ;;  %v3476_v63 = vmax.f32 %v3460_v32, 0.0  ;;  %v2595_v25 = vunpack.c.h.s8.bf16 %v2083_v28  ;;  %v2580_v31 = vunpack.c.l.s8.bf16 %v2084_v24  ;;  %v1940_v49 = vld [vmem:[#allocation4 + $0x348] sm:$0xff]  ;;  %v2051_v11 = vld [vmem:[#allocation4 + $0x6c0] sm:$0xff] }
 0x435   :  { %2938 = vmatpush1.bf16.msra.mxu0 %v2163_v34  ;;  %v2068_v32 = vld [vmem:[#allocation4 + $0x748] sm:$0xff]  ;;  %v2323_v34 = vunpack.c.l.s8.bf16 %v1955_v19  ;;  %v2035_v19 = vld [vmem:[#allocation4 + $0x640] sm:$0xff] }
 0x436   :  { %v9168_v41 = vpack.c.bf16 %v3476_v63, %v3476_v63  ;;  %2979 = vmatpush1.bf16.msra.mxu1 %v2419_v51  ;;  %2939 = vmatprep.subr.bf16.mxu0 %v2148_v1  ;;  %v2579_v51 = vunpack.c.l.s8.bf16 %v2083_v28  ;;  %v2308_v1 = vunpack.c.h.s8.bf16 %v1940_v49  ;;  %v2307_v63 = vunpack.c.h.s8.bf16 %v1939_v15  ;;  %v2021_v15 = vld [vmem:[#allocation4 + $0x5d0] sm:$0xff] }
 0x437   :  { %2980 = vmatprep.subr.bf16.mxu1 %v2404_v7  ;;  %v2564_v7 = vunpack.c.h.s8.bf16 %v2068_v32 }
 0x439   :  { %2940 = vmatpush1.bf16.msra.mxu0 %v2147_v44  ;;  %v2563_v44 = vunpack.c.h.s8.bf16 %v2067_v48 }
 0x43a   :  { %2981 = vmatpush1.bf16.msra.mxu1 %v2403_v57  ;;  %2941 = vmatprep.subr.bf16.mxu0 %v2132_v50  ;;  %v2292_v57 = vunpack.c.l.s8.bf16 %v1940_v49  ;;  %v2548_v50 = vunpack.c.l.s8.bf16 %v2068_v32  ;;  %v2022_v49 = vld [vmem:[#allocation4 + $0x5d8] sm:$0xff] }
 0x43b   :  { %2982 = vmatprep.subr.bf16.mxu1 %v2388_v58  ;;  %v1924_v58 = vld [vmem:[#allocation4 + $0x2c8] sm:$0xff] }
 0x43d   :  { %2942 = vmatpush1.bf16.msra.mxu0 %v2131_v56  ;;  %v2547_v56 = vunpack.c.l.s8.bf16 %v2067_v48 }
 0x43e   :  { %2983 = vmatpush1.bf16.msra.mxu1 %v2387_v33  ;;  %2943 = vmatprep.subr.bf16.mxu0 %v2116_v6  ;;  %v2276_v33 = vunpack.c.h.s8.bf16 %v1924_v58  ;;  %v2532_v6 = vunpack.c.h.s8.bf16 %v2052_v61 }
 0x43f   :  { %2984 = vmatprep.subr.bf16.mxu1 %v2372_v62  ;;  %v1923_v62 = vld [vmem:[#allocation4 + $0x2c0] sm:$0xff] }
 0x440   :  { %v2275_v10 = vunpack.c.h.s8.bf16 %v1923_v62  ;;  %v2259_v24 = vunpack.c.l.s8.bf16 %v1923_v62  ;;  %v2453_v62 = vunpack.c.l.s8.bf16 %v2021_v15 }
 0x441   :  { %2944 = vmatpush1.bf16.msra.mxu0 %v2115_v46  ;;  %v2531_v46 = vunpack.c.h.s8.bf16 %v2051_v11 }
 0x442   :  { %2985 = vmatpush1.bf16.msra.mxu1 %v2371_v47  ;;  %2945 = vmatprep.subr.bf16.mxu0 %v2100_v38  ;;  %v2260_v47 = vunpack.c.l.s8.bf16 %v1924_v58  ;;  %v2516_v38 = vunpack.c.l.s8.bf16 %v2052_v61  ;;  %v2006_v58 = vld [vmem:[#allocation4 + $0x558] sm:$0xff] }
 0x443   :  { %2986 = vmatprep.subr.bf16.mxu1 %v2356_v18  ;;  %v1908_v18 = vld [vmem:[#allocation4 + $0x248] sm:$0xff] }
 0x445   :  { %2946 = vmatpush1.bf16.msra.mxu0 %v2099_v9  ;;  %v2515_v9 = vunpack.c.l.s8.bf16 %v2051_v11  ;;  %v3390_v11 = vrot.slane %v9150_v0, %v8758_v55 }
 0x446   :  { %2987 = vmatpush1.bf16.msra.mxu1 %v2355_v8  ;;  %2947 = vmatprep.subr.bf16.mxu0 %v2340_v27  ;;  %v2244_v8 = vunpack.c.h.s8.bf16 %v1908_v18  ;;  %v2500_v27 = vunpack.c.h.s8.bf16 %v2036_v40 }
 0x447   :  { %2988 = vmatprep.subr.bf16.mxu1 %v2596_v22  ;;  %v1907_v22 = vld [vmem:[#allocation4 + $0x240] sm:$0xff] }
 0x448   :  { %v2243_v28 = vunpack.c.h.s8.bf16 %v1907_v22  ;;  %v2227_v32 = vunpack.c.l.s8.bf16 %v1907_v22 }
 0x449   :  { %2948 = vmatpush2.bf16.msra.mxu0 %v2339_v29  ;;  %v2499_v29 = vunpack.c.h.s8.bf16 %v2035_v19 }
 0x44a   :  { %2989 = vmatpush2.bf16.msra.mxu1 %v2595_v25  ;;  %2949 = vmatprep.subr.bf16.mxu0 %v2324_v53  ;;  %v2228_v25 = vunpack.c.l.s8.bf16 %v1908_v18  ;;  %v2484_v53 = vunpack.c.l.s8.bf16 %v2036_v40  ;;  %v1877_v18 = vld [vmem:[#allocation4 + $0x150] sm:$0xff] }
 0x44b   :  { %2990 = vmatprep.subr.bf16.mxu1 %v2580_v31  ;;  %v1894_v31 = vld [vmem:[#allocation4 + $0x1d8] sm:$0xff]  ;;  %v2005_v40 = vld [vmem:[#allocation4 + $0x550] sm:$0xff] }
 0x44d   :  { %2950 = vmatpush2.bf16.msra.mxu0 %v2323_v34  ;;  %v2483_v34 = vunpack.c.l.s8.bf16 %v2035_v19 }
 0x44e   :  { %2991 = vmatpush2.bf16.msra.mxu1 %v2579_v51  ;;  %2951 = vmatprep.subr.bf16.mxu0 %v2308_v1  ;;  %v2214_v51 = vunpack.c.h.s8.bf16 %v1894_v31  ;;  %v2470_v1 = vunpack.c.h.s8.bf16 %v2022_v49 }
 0x44f   :  { %2992 = vmatprep.subr.bf16.mxu1 %v2564_v7  ;;  %v1893_v7 = vld [vmem:[#allocation4 + $0x1d0] sm:$0xff] }
 0x450   :  { %v2213_v48 = vunpack.c.h.s8.bf16 %v1893_v7 }
 0x451   :  { %2952 = vmatpush2.bf16.msra.mxu0 %v2307_v63  ;;  %v2469_v63 = vunpack.c.h.s8.bf16 %v2021_v15 }
 0x452   :  { %2993 = vmatpush2.bf16.msra.mxu1 %v2563_v44  ;;  %2953 = vmatprep.subr.bf16.mxu0 %v2292_v57  ;;  %v2198_v44 = vunpack.c.l.s8.bf16 %v1894_v31  ;;  %v2454_v57 = vunpack.c.l.s8.bf16 %v2022_v49 }
 0x453   :  { %2994 = vmatprep.subr.bf16.mxu1 %v2548_v50  ;;  %v1878_v50 = vld [vmem:[#allocation4 + $0x158] sm:$0xff] }
 0x454   :  { %v2166_v49 = vunpack.c.l.s8.bf16 %v1878_v50 }
 0x455   :  { %2954 = vmatpush2.bf16.msra.mxu0 %v2291_v43 }
 0x456   :  { %2995 = vmatpush2.bf16.msra.mxu1 %v2547_v56  ;;  %2955 = vmatprep.subr.bf16.mxu0 %v2276_v33  ;;  %v3290_v33 = vrot.slane %v9148_v42, %v8758_v55 }
 0x457   :  { %2996 = vmatprep.subr.bf16.mxu1 %v2532_v6  ;;  %v2197_v6 = vunpack.c.l.s8.bf16 %v1893_v7  ;;  %v1990_v7 = vld [vmem:[#allocation4 + $0x4d8] sm:$0xff] }
 0x459   :  { %2956 = vmatpush2.bf16.msra.mxu0 %v2275_v10 }
 0x45a   :  { %2997 = vmatpush2.bf16.msra.mxu1 %v2531_v46  ;;  %2957 = vmatprep.subr.bf16.mxu0 %v2260_v47  ;;  %v2182_v47 = vunpack.c.h.s8.bf16 %v1878_v50 }
 0x45b   :  { %2998 = vmatprep.subr.bf16.mxu1 %v2516_v38  ;;  %v2438_v38 = vunpack.c.h.s8.bf16 %v2006_v58 }
 0x45d   :  { %2958 = vmatpush2.bf16.msra.mxu0 %v2259_v24 }
 0x45e   :  { %2999 = vmatpush2.bf16.msra.mxu1 %v2515_v9  ;;  %2959 = vmatprep.subr.bf16.mxu0 %v2244_v8  ;;  %v3294_v8 = vrot.slane %v9148_v42, %v8764_v60 }
 0x45f   :  { %3000 = vmatprep.subr.bf16.mxu1 %v2500_v27  ;;  %v3394_v27 = vrot.slane %v9150_v0, %v8764_v60 }
 0x461   :  { %2960 = vmatpush2.bf16.msra.mxu0 %v2243_v28 }
 0x462   :  { %3001 = vmatpush2.bf16.msra.mxu1 %v2499_v29  ;;  %2961 = vmatprep.subr.bf16.mxu0 %v2228_v25  ;;  %v2181_v25 = vunpack.c.h.s8.bf16 %v1877_v18 }
 0x463   :  { %3002 = vmatprep.subr.bf16.mxu1 %v2484_v53 }
 0x465   :  { %2962 = vmatpush2.bf16.msra.mxu0 %v2227_v32  ;;  %v2422_v32 = vunpack.c.l.s8.bf16 %v2006_v58 }
 0x466   :  { %3003 = vmatpush2.bf16.msra.mxu1 %v2483_v34  ;;  %3013 = vmatprep.subr.bf16.mxu0 %v2214_v51 }
 0x467   :  { %3054 = vmatprep.subr.bf16.mxu1 %v2470_v1  ;;  %v1862_v1 = vld [vmem:[#allocation4 + $0xd8] sm:$0xff] }
 0x468   :  { %v2719_v61 = vpop.f32.mrf.mxu0  ;;  %2964 = vmatmul.mubr.bf16.vlgmr.msra.gmra.mxu0 %v9088_v17 }
 0x469   :  { %v2760_v43 = vpop.f32.mrf.mxu1  ;;  %3005 = vmatmul.mubr.bf16.vlgmr.msra.gmra.mxu1 %v9096_v3  ;;  %3014 = vmatpush1.bf16.msra.mxu0 %v2213_v48 }
 0x46a   :  { %v2761_v56 = vadd.f32 %v2760_v43, %v2719_v61  ;;  %3055 = vmatpush1.bf16.msra.mxu1 %v2469_v63  ;;  %v2721_v10 = vpop.f32.mrf.mxu0  ;;  %3015 = vmatprep.subr.bf16.mxu0 %v2198_v44  ;;  %v2165_v63 = vunpack.c.l.s8.bf16 %v1877_v18  ;;  %v2150_v44 = vunpack.c.h.s8.bf16 %v1862_v1  ;;  %v1861_v61 = vld [vmem:[#allocation4 + $0xd0] sm:$0xff] }
 0x46b   :  { %v2762_v46 = vpop.f32.mrf.mxu1  ;;  %3056 = vmatprep.subr.bf16.mxu1 %v2454_v57  ;;  %3045 = vmatprep.mubr.bf16.mxu0 %v9092_v4  ;;  %v2406_v57 = vunpack.c.h.s8.bf16 %v1990_v7  ;;  %v1989_v43 = vld [vmem:[#allocation4 + $0x4d0] sm:$0xff] }
 0x46c   :  { %v3261_v24 = vadd.f32 %v2761_v56, %v9104_v26  ;;  %v2763_v9 = vadd.f32 %v2762_v46, %v2721_v10  ;;  %3086 = vmatprep.mubr.bf16.mxu1 %v9100_v5  ;;  %v2723_v22 = vpop.f32.mrf.mxu0  ;;  %v2437_v26 = vunpack.c.h.s8.bf16 %v2005_v40  ;;  %v1846_v10 = vld [vmem:[#allocation4 + $0x58] sm:$0xff] }
 0x46d   :  { %v2764_v19 = vpop.f32.mrf.mxu1  ;;  %3016 = vmatpush1.bf16.msra.mxu0 %v2197_v6  ;;  %v2405_v6 = vunpack.c.h.s8.bf16 %v1989_v43  ;;  %v1974_v46 = vld [vmem:[#allocation4 + $0x458] sm:$0xff]  ;;  %v2118_v18 = vunpack.c.h.s8.bf16 %v1846_v10  ;;  %v2102_v22 = vunpack.c.l.s8.bf16 %v1846_v10 }
 0x46e   :  { %v3361_v28 = vmul.f32 %v3290_v33, %v3261_v24  ;;  %v3262_v29 = vadd.f32 %v2763_v9, %v9108_v36  ;;  %3057 = vmatpush1.bf16.msra.mxu1 %v2453_v62  ;;  %v2724_v53 = vpop.f32.mrf.mxu0  ;;  %3017 = vmatprep.subr.bf16.mxu0 %v2182_v47  ;;  %v2421_v36 = vunpack.c.l.s8.bf16 %v2005_v40  ;;  %v2149_v33 = vunpack.c.h.s8.bf16 %v1861_v61  ;;  %v1845_v24 = vld [vmem:[#allocation4 + $0x50] sm:$0xff]  ;;  %v2054_v10 = vld [vmem:[#allocation4 + $0x6d8] sm:$0xff] }
 0x46f   :  { %v2765_v31 = vpop.f32.mrf.mxu1  ;;  %3058 = vmatprep.subr.bf16.mxu1 %v2438_v38  ;;  %v2134_v62 = vunpack.c.l.s8.bf16 %v1862_v1  ;;  %v2133_v47 = vunpack.c.l.s8.bf16 %v1861_v61  ;;  %v2389_v38 = vunpack.c.l.s8.bf16 %v1989_v43  ;;  %v2374_v40 = vunpack.c.h.s8.bf16 %v1974_v46  ;;  %v1973_v9 = vld [vmem:[#allocation4 + $0x450] sm:$0xff] }
 0x470   :  { %v3461_v34 = vadd.f32 %v3390_v11, %v3361_v28  ;;  %v3362_v51 = vmul.f32 %v3294_v8, %v3262_v29  ;;  %v2390_v11 = vunpack.c.l.s8.bf16 %v1990_v7  ;;  %v2117_v8 = vunpack.c.h.s8.bf16 %v1845_v24  ;;  %v1958_v28 = vld [vmem:[#allocation4 + $0x3d8] sm:$0xff]  ;;  %v1941_v61 = vld [vmem:[#allocation4 + $0x350] sm:$0xff] }
 0x471   :  { %3018 = vmatpush1.bf16.msra.mxu0 %v2181_v25  ;;  %v2358_v19 = vunpack.c.l.s8.bf16 %v1974_v46  ;;  %v2086_v29 = vld [vmem:[#allocation4 + $0x7d8] sm:$0xff]  ;;  %v2101_v25 = vunpack.c.l.s8.bf16 %v1845_v24  ;;  %v2342_v53 = vunpack.c.h.s8.bf16 %v1958_v28  ;;  %v2326_v1 = vunpack.c.l.s8.bf16 %v1958_v28  ;;  %v2069_v43 = vld [vmem:[#allocation4 + $0x750] sm:$0xff] }
 0x472   :  { %v3477_v15 = vmax.f32 %v3461_v34, 0.0  ;;  %v3462_v48 = vadd.f32 %v3394_v27, %v3362_v51  ;;  %3059 = vmatpush1.bf16.msra.mxu1 %v2437_v26  ;;  %3019 = vmatprep.subr.bf16.mxu0 %v2166_v49  ;;  %v2373_v27 = vunpack.c.h.s8.bf16 %v1973_v9  ;;  %v2357_v26 = vunpack.c.l.s8.bf16 %v1973_v9  ;;  %v1957_v49 = vld [vmem:[#allocation4 + $0x3d0] sm:$0xff]  ;;  %v2038_v28 = vld [vmem:[#allocation4 + $0x658] sm:$0xff] }
 0x473   :  { %3060 = vmatprep.subr.bf16.mxu1 %v2422_v32  ;;  %v2598_v31 = vunpack.c.h.s8.bf16 %v2086_v29  ;;  %v2085_v32 = vld [vmem:[#allocation4 + $0x7d0] sm:$0xff]  ;;  %v2341_v34 = vunpack.c.h.s8.bf16 %v1957_v49  ;;  %v2582_v7 = vunpack.c.l.s8.bf16 %v2086_v29  ;;  %v2293_v46 = vunpack.c.l.s8.bf16 %v1941_v61 }
 0x474   :  { %v9184_v56 = vpack.c.bf16 %v3477_v15, %v3477_v15  ;;  %v3478_v50 = vmax.f32 %v3462_v48, 0.0  ;;  %v2597_v51 = vunpack.c.h.s8.bf16 %v2085_v32  ;;  %v1942_v15 = vld [vmem:[#allocation4 + $0x358] sm:$0xff]  ;;  %v2053_v24 = vld [vmem:[#allocation4 + $0x6d0] sm:$0xff] }
 0x475   :  { %3020 = vmatpush1.bf16.msra.mxu0 %v2165_v63  ;;  %v2070_v48 = vld [vmem:[#allocation4 + $0x758] sm:$0xff]  ;;  %v2325_v63 = vunpack.c.l.s8.bf16 %v1957_v49  ;;  %v2037_v49 = vld [vmem:[#allocation4 + $0x650] sm:$0xff] }
 0x476   :  { %v9186_v58 = vpack.c.bf16 %v3478_v50, %v3478_v50  ;;  %3061 = vmatpush1.bf16.msra.mxu1 %v2421_v36  ;;  %3021 = vmatprep.subr.bf16.mxu0 %v2150_v44  ;;  %v2581_v36 = vunpack.c.l.s8.bf16 %v2085_v32  ;;  %v2310_v44 = vunpack.c.h.s8.bf16 %v1942_v15  ;;  %v2309_v50 = vunpack.c.h.s8.bf16 %v1941_v61  ;;  %v2023_v61 = vld [vmem:[#allocation4 + $0x5e0] sm:$0xff] }
 0x477   :  { %3062 = vmatprep.subr.bf16.mxu1 %v2406_v57  ;;  %v2566_v57 = vunpack.c.h.s8.bf16 %v2070_v48 }
 0x479   :  { %3022 = vmatpush1.bf16.msra.mxu0 %v2149_v33  ;;  %v2565_v33 = vunpack.c.h.s8.bf16 %v2069_v43 }
 0x47a   :  { %3063 = vmatpush1.bf16.msra.mxu1 %v2405_v6  ;;  %3023 = vmatprep.subr.bf16.mxu0 %v2134_v62  ;;  %v2294_v6 = vunpack.c.l.s8.bf16 %v1942_v15  ;;  %v2550_v62 = vunpack.c.l.s8.bf16 %v2070_v48  ;;  %v2024_v15 = vld [vmem:[#allocation4 + $0x5e8] sm:$0xff] }
 0x47b   :  { %3064 = vmatprep.subr.bf16.mxu1 %v2390_v11  ;;  %v1926_v11 = vld [vmem:[#allocation4 + $0x2d8] sm:$0xff] }
 0x47d   :  { %3024 = vmatpush1.bf16.msra.mxu0 %v2133_v47  ;;  %v2549_v47 = vunpack.c.l.s8.bf16 %v2069_v43  ;;  %v9189_v43 = vsub.s32 4, %v8752_v45 }
 0x47e   :  { %3065 = vmatpush1.bf16.msra.mxu1 %v2389_v38  ;;  %3025 = vmatprep.subr.bf16.mxu0 %v2118_v18  ;;  %v2278_v38 = vunpack.c.h.s8.bf16 %v1926_v11  ;;  %v2534_v18 = vunpack.c.h.s8.bf16 %v2054_v10 }
 0x47f   :  { %3066 = vmatprep.subr.bf16.mxu1 %v2374_v40  ;;  %v1925_v40 = vld [vmem:[#allocation4 + $0x2d0] sm:$0xff] }
 0x480   :  { %v2277_v9 = vunpack.c.h.s8.bf16 %v1925_v40  ;;  %v2261_v29 = vunpack.c.l.s8.bf16 %v1925_v40  ;;  %v3298_v40 = vrot.slane %v9148_v42, %v9189_v43 }
 0x481   :  { %3026 = vmatpush1.bf16.msra.mxu0 %v2117_v8  ;;  %v2533_v8 = vunpack.c.h.s8.bf16 %v2053_v24 }
 0x482   :  { %3067 = vmatpush1.bf16.msra.mxu1 %v2373_v27  ;;  %3027 = vmatprep.subr.bf16.mxu0 %v2102_v22  ;;  %v2262_v27 = vunpack.c.l.s8.bf16 %v1926_v11  ;;  %v2518_v22 = vunpack.c.l.s8.bf16 %v2054_v10  ;;  %v9192_v11 = vsub.s32 5, %v8752_v45  ;;  %v1880_v10 = vld [vmem:[#allocation4 + $0x168] sm:$0xff] }
 0x483   :  { %3068 = vmatprep.subr.bf16.mxu1 %v2358_v19  ;;  %v1910_v19 = vld [vmem:[#allocation4 + $0x258] sm:$0xff] }
 0x485   :  { %3028 = vmatpush1.bf16.msra.mxu0 %v2101_v25  ;;  %v2517_v25 = vunpack.c.l.s8.bf16 %v2053_v24 }
 0x486   :  { %3069 = vmatpush1.bf16.msra.mxu1 %v2357_v26  ;;  %3029 = vmatprep.subr.bf16.mxu0 %v2342_v53  ;;  %v2246_v26 = vunpack.c.h.s8.bf16 %v1910_v19  ;;  %v2502_v53 = vunpack.c.h.s8.bf16 %v2038_v28 }
 0x487   :  { %3070 = vmatprep.subr.bf16.mxu1 %v2598_v31  ;;  %v1909_v31 = vld [vmem:[#allocation4 + $0x250] sm:$0xff] }
 0x488   :  { %v2245_v32 = vunpack.c.h.s8.bf16 %v1909_v31  ;;  %v2229_v48 = vunpack.c.l.s8.bf16 %v1909_v31  ;;  %v3302_v31 = vrot.slane %v9148_v42, %v9192_v11  ;;  %v2168_v42 = vunpack.c.l.s8.bf16 %v1880_v10 }
 0x489   :  { %3030 = vmatpush2.bf16.msra.mxu0 %v2341_v34  ;;  %v2501_v34 = vunpack.c.h.s8.bf16 %v2037_v49 }
 0x48a   :  { %3071 = vmatpush2.bf16.msra.mxu1 %v2597_v51  ;;  %3031 = vmatprep.subr.bf16.mxu0 %v2326_v1  ;;  %v2230_v51 = vunpack.c.l.s8.bf16 %v1910_v19  ;;  %v2486_v1 = vunpack.c.l.s8.bf16 %v2038_v28  ;;  %v2184_v19 = vunpack.c.h.s8.bf16 %v1880_v10 }
 0x48b   :  { %3072 = vmatprep.subr.bf16.mxu1 %v2582_v7  ;;  %v1896_v7 = vld [vmem:[#allocation4 + $0x1e8] sm:$0xff] }
 0x48d   :  { %3032 = vmatpush2.bf16.msra.mxu0 %v2325_v63  ;;  %v2485_v63 = vunpack.c.l.s8.bf16 %v2037_v49  ;;  %v3402_v49 = vrot.slane %v9150_v0, %v9192_v11 }
 0x48e   :  { %3073 = vmatpush2.bf16.msra.mxu1 %v2581_v36  ;;  %3033 = vmatprep.subr.bf16.mxu0 %v2310_v44  ;;  %v2216_v36 = vunpack.c.h.s8.bf16 %v1896_v7  ;;  %v2472_v44 = vunpack.c.h.s8.bf16 %v2024_v15 }
 0x48f   :  { %3074 = vmatprep.subr.bf16.mxu1 %v2566_v57  ;;  %v1895_v57 = vld [vmem:[#allocation4 + $0x1e0] sm:$0xff] }
 0x490   :  { %v2199_v24 = vunpack.c.l.s8.bf16 %v1895_v57 }
 0x491   :  { %3034 = vmatpush2.bf16.msra.mxu0 %v2309_v50  ;;  %v2215_v50 = vunpack.c.h.s8.bf16 %v1895_v57  ;;  %v1864_v57 = vld [vmem:[#allocation4 + $0xe8] sm:$0xff] }
 0x492   :  { %3075 = vmatpush2.bf16.msra.mxu1 %v2565_v33  ;;  %3035 = vmatprep.subr.bf16.mxu0 %v2294_v6  ;;  %v2471_v33 = vunpack.c.h.s8.bf16 %v2023_v61  ;;  %v2200_v6 = vunpack.c.l.s8.bf16 %v1896_v7 }
 0x493   :  { %3076 = vmatprep.subr.bf16.mxu1 %v2550_v62  ;;  %v2456_v62 = vunpack.c.l.s8.bf16 %v2024_v15 }
 0x495   :  { %3036 = vmatpush2.bf16.msra.mxu0 %v2293_v46  ;;  %v2008_v46 = vld [vmem:[#allocation4 + $0x568] sm:$0xff] }
 0x496   :  { %3077 = vmatpush2.bf16.msra.mxu1 %v2549_v47  ;;  %3037 = vmatprep.subr.bf16.mxu0 %v2278_v38  ;;  %v2440_v28 = vunpack.c.h.s8.bf16 %v2008_v46 }
 0x497   :  { %3078 = vmatprep.subr.bf16.mxu1 %v2534_v18 }
 0x499   :  { %3038 = vmatpush2.bf16.msra.mxu0 %v2277_v9  ;;  %v2455_v9 = vunpack.c.l.s8.bf16 %v2023_v61  ;;  %v1992_v61 = vld [vmem:[#allocation4 + $0x4e8] sm:$0xff] }
 0x49a   :  { %3079 = vmatpush2.bf16.msra.mxu1 %v2533_v8  ;;  %3039 = vmatprep.subr.bf16.mxu0 %v2262_v27  ;;  %v3398_v8 = vrot.slane %v9150_v0, %v9189_v43 }
 0x49b   :  { %3080 = vmatprep.subr.bf16.mxu1 %v2518_v22 }
 0x49d   :  { %3040 = vmatpush2.bf16.msra.mxu0 %v2261_v29  ;;  %v1879_v29 = vld [vmem:[#allocation4 + $0x160] sm:$0xff] }
 0x49e   :  { %3081 = vmatpush2.bf16.msra.mxu1 %v2517_v25  ;;  %3041 = vmatprep.subr.bf16.mxu0 %v2246_v26  ;;  %v2007_v25 = vld [vmem:[#allocation4 + $0x560] sm:$0xff]  ;;  %v2183_v7 = vunpack.c.h.s8.bf16 %v1879_v29 }
 0x49f   :  { %3082 = vmatprep.subr.bf16.mxu1 %v2502_v53 }
 0x4a1   :  { %3042 = vmatpush2.bf16.msra.mxu0 %v2245_v32 }
 0x4a2   :  { %3083 = vmatpush2.bf16.msra.mxu1 %v2501_v34  ;;  %3043 = vmatprep.subr.bf16.mxu0 %v2230_v51 }
 0x4a3   :  { %3084 = vmatprep.subr.bf16.mxu1 %v2486_v1 }
 0x4a5   :  { %3044 = vmatpush2.bf16.msra.mxu0 %v2229_v48 }
 0x4a6   :  { %3085 = vmatpush2.bf16.msra.mxu1 %v2485_v63  ;;  %3095 = vmatprep.subr.bf16.mxu0 %v2216_v36  ;;  %v2424_v63 = vunpack.c.l.s8.bf16 %v2008_v46 }
 0x4a7   :  { %3136 = vmatprep.subr.bf16.mxu1 %v2472_v44 }
 0x4a8   :  { %v2801_v47 = vpop.f32.mrf.mxu0  ;;  %3046 = vmatmul.mubr.bf16.vlgmr.msra.gmra.mxu0 %v9088_v17 }
 0x4a9   :  { %v2842_v38 = vpop.f32.mrf.mxu1  ;;  %3087 = vmatmul.mubr.bf16.vlgmr.msra.gmra.mxu1 %v9096_v3  ;;  %3096 = vmatpush1.bf16.msra.mxu0 %v2215_v50 }
 0x4aa   :  { %v2843_v18 = vadd.f32 %v2842_v38, %v2801_v47  ;;  %3137 = vmatpush1.bf16.msra.mxu1 %v2471_v33  ;;  %v2803_v27 = vpop.f32.mrf.mxu0  ;;  %3097 = vmatprep.subr.bf16.mxu0 %v2200_v6  ;;  %v2167_v33 = vunpack.c.l.s8.bf16 %v1879_v29  ;;  %v2152_v6 = vunpack.c.h.s8.bf16 %v1864_v57  ;;  %v1863_v47 = vld [vmem:[#allocation4 + $0xe0] sm:$0xff] }
 0x4ab   :  { %v2844_v22 = vpop.f32.mrf.mxu1  ;;  %3138 = vmatprep.subr.bf16.mxu1 %v2456_v62  ;;  %3127 = vmatprep.mubr.bf16.mxu0 %v9092_v4  ;;  %v2408_v62 = vunpack.c.h.s8.bf16 %v1992_v61  ;;  %v1991_v38 = vld [vmem:[#allocation4 + $0x4e0] sm:$0xff] }
 0x4ac   :  { %v3263_v26 = vadd.f32 %v2843_v18, %v9110_v12  ;;  %v2845_v53 = vadd.f32 %v2844_v22, %v2803_v27  ;;  %3168 = vmatprep.mubr.bf16.mxu1 %v9100_v5  ;;  %v2805_v32 = vpop.f32.mrf.mxu0  ;;  %v2439_v12 = vunpack.c.h.s8.bf16 %v2007_v25  ;;  %v1848_v27 = vld [vmem:[#allocation4 + $0x68] sm:$0xff] }
 0x4ad   :  { %v2846_v34 = vpop.f32.mrf.mxu1  ;;  %3098 = vmatpush1.bf16.msra.mxu0 %v2199_v24  ;;  %v2407_v24 = vunpack.c.h.s8.bf16 %v1991_v38  ;;  %v1976_v22 = vld [vmem:[#allocation4 + $0x468] sm:$0xff]  ;;  %v2120_v29 = vunpack.c.h.s8.bf16 %v1848_v27  ;;  %v2104_v32 = vunpack.c.l.s8.bf16 %v1848_v27 }
 0x4ae   :  { %v3363_v51 = vmul.f32 %v3298_v40, %v3263_v26  ;;  %v3264_v1 = vadd.f32 %v2845_v53, %v9114_v14  ;;  %3139 = vmatpush1.bf16.msra.mxu1 %v2455_v9  ;;  %v2806_v15 = vpop.f32.mrf.mxu0  ;;  %3099 = vmatprep.subr.bf16.mxu0 %v2184_v19  ;;  %v2423_v14 = vunpack.c.l.s8.bf16 %v2007_v25  ;;  %v2151_v40 = vunpack.c.h.s8.bf16 %v1863_v47  ;;  %v1847_v26 = vld [vmem:[#allocation4 + $0x60] sm:$0xff]  ;;  %v2056_v27 = vld [vmem:[#allocation4 + $0x6e8] sm:$0xff] }
 0x4af   :  { %v2847_v48 = vpop.f32.mrf.mxu1  ;;  %3140 = vmatprep.subr.bf16.mxu1 %v2440_v28  ;;  %v2136_v9 = vunpack.c.l.s8.bf16 %v1864_v57  ;;  %v2135_v19 = vunpack.c.l.s8.bf16 %v1863_v47  ;;  %v2391_v28 = vunpack.c.l.s8.bf16 %v1991_v38  ;;  %v2376_v25 = vunpack.c.h.s8.bf16 %v1976_v22  ;;  %v1975_v53 = vld [vmem:[#allocation4 + $0x460] sm:$0xff] }
 0x4b0   :  { %v3463_v36 = vadd.f32 %v3398_v8, %v3363_v51  ;;  %v3364_v44 = vmul.f32 %v3302_v31, %v3264_v1  ;;  %v2392_v8 = vunpack.c.l.s8.bf16 %v1992_v61  ;;  %v2119_v31 = vunpack.c.h.s8.bf16 %v1847_v26  ;;  %v1960_v51 = vld [vmem:[#allocation4 + $0x3e8] sm:$0xff]  ;;  %v1943_v47 = vld [vmem:[#allocation4 + $0x360] sm:$0xff] }
 0x4b1   :  { %3100 = vmatpush1.bf16.msra.mxu0 %v2183_v7  ;;  %v2360_v34 = vunpack.c.l.s8.bf16 %v1976_v22  ;;  %v2088_v1 = vld [vmem:[#allocation4 + $0x7e8] sm:$0xff]  ;;  %v2103_v7 = vunpack.c.l.s8.bf16 %v1847_v26  ;;  %v2344_v15 = vunpack.c.h.s8.bf16 %v1960_v51  ;;  %v2328_v57 = vunpack.c.l.s8.bf16 %v1960_v51  ;;  %v2071_v38 = vld [vmem:[#allocation4 + $0x760] sm:$0xff] }
 0x4b2   :  { %v3479_v0 = vmax.f32 %v3463_v36, 0.0  ;;  %v3464_v50 = vadd.f32 %v3402_v49, %v3364_v44  ;;  %3141 = vmatpush1.bf16.msra.mxu1 %v2439_v12  ;;  %3101 = vmatprep.subr.bf16.mxu0 %v2168_v42  ;;  %v2375_v49 = vunpack.c.h.s8.bf16 %v1975_v53  ;;  %v2359_v12 = vunpack.c.l.s8.bf16 %v1975_v53  ;;  %v1959_v42 = vld [vmem:[#allocation4 + $0x3e0] sm:$0xff]  ;;  %v2040_v51 = vld [vmem:[#allocation4 + $0x668] sm:$0xff] }
 0x4b3   :  { %3142 = vmatprep.subr.bf16.mxu1 %v2424_v63  ;;  %v2600_v48 = vunpack.c.h.s8.bf16 %v2088_v1  ;;  %v2087_v63 = vld [vmem:[#allocation4 + $0x7e0] sm:$0xff]  ;;  %v2343_v36 = vunpack.c.h.s8.bf16 %v1959_v42  ;;  %v2584_v61 = vunpack.c.l.s8.bf16 %v2088_v1  ;;  %v2295_v22 = vunpack.c.l.s8.bf16 %v1943_v47 }
 0x4b4   :  { %v9208_v18 = vpack.c.bf16 %v3479_v0, %v3479_v0  ;;  %v3480_v10 = vmax.f32 %v3464_v50, 0.0  ;;  %v2599_v44 = vunpack.c.h.s8.bf16 %v2087_v63  ;;  %v1944_v0 = vld [vmem:[#allocation4 + $0x368] sm:$0xff]  ;;  %v2055_v26 = vld [vmem:[#allocation4 + $0x6e0] sm:$0xff] }
 0x4b5   :  { %3102 = vmatpush1.bf16.msra.mxu0 %v2167_v33  ;;  %v2072_v50 = vld [vmem:[#allocation4 + $0x768] sm:$0xff]  ;;  %v2327_v33 = vunpack.c.l.s8.bf16 %v1959_v42  ;;  %v2039_v42 = vld [vmem:[#allocation4 + $0x660] sm:$0xff] }
 0x4b6   :  { %v9210_v46 = vpack.c.bf16 %v3480_v10, %v3480_v10  ;;  %3143 = vmatpush1.bf16.msra.mxu1 %v2423_v14  ;;  %3103 = vmatprep.subr.bf16.mxu0 %v2152_v6  ;;  %v2583_v14 = vunpack.c.l.s8.bf16 %v2087_v63  ;;  %v2312_v6 = vunpack.c.h.s8.bf16 %v1944_v0  ;;  %v2311_v10 = vunpack.c.h.s8.bf16 %v1943_v47  ;;  %v2025_v47 = vld [vmem:[#allocation4 + $0x5f0] sm:$0xff] }
 0x4b7   :  { %3144 = vmatprep.subr.bf16.mxu1 %v2408_v62  ;;  %v2568_v62 = vunpack.c.h.s8.bf16 %v2072_v50 }
 0x4b9   :  { %3104 = vmatpush1.bf16.msra.mxu0 %v2151_v40  ;;  %v2567_v40 = vunpack.c.h.s8.bf16 %v2071_v38 }
 0x4ba   :  { %3145 = vmatpush1.bf16.msra.mxu1 %v2407_v24  ;;  %3105 = vmatprep.subr.bf16.mxu0 %v2136_v9  ;;  %v2296_v24 = vunpack.c.l.s8.bf16 %v1944_v0  ;;  %v2552_v9 = vunpack.c.l.s8.bf16 %v2072_v50  ;;  %v2026_v0 = vld [vmem:[#allocation4 + $0x5f8] sm:$0xff] }
 0x4bb   :  { %3146 = vmatprep.subr.bf16.mxu1 %v2392_v8  ;;  %v1928_v8 = vld [vmem:[#allocation4 + $0x2e8] sm:$0xff] }
 0x4bd   :  { %3106 = vmatpush1.bf16.msra.mxu0 %v2135_v19  ;;  %v2551_v19 = vunpack.c.l.s8.bf16 %v2071_v38  ;;  %v9213_v38 = vsub.s32 6, %v8752_v45 }
 0x4be   :  { %3147 = vmatpush1.bf16.msra.mxu1 %v2391_v28  ;;  %3107 = vmatprep.subr.bf16.mxu0 %v2120_v29  ;;  %v2280_v28 = vunpack.c.h.s8.bf16 %v1928_v8  ;;  %v2536_v29 = vunpack.c.h.s8.bf16 %v2056_v27 }
 0x4bf   :  { %3148 = vmatprep.subr.bf16.mxu1 %v2376_v25  ;;  %v1927_v25 = vld [vmem:[#allocation4 + $0x2e0] sm:$0xff] }
 0x4c0   :  { %v2279_v53 = vunpack.c.h.s8.bf16 %v1927_v25  ;;  %v2263_v1 = vunpack.c.l.s8.bf16 %v1927_v25  ;;  %v7893_v25 = vld [vmem:[#allocation19] sm:$0xff] }
 0x4c1   :  { %3108 = vmatpush1.bf16.msra.mxu0 %v2119_v31  ;;  %v2535_v31 = vunpack.c.h.s8.bf16 %v2055_v26 }
 0x4c2   :  { %3149 = vmatpush1.bf16.msra.mxu1 %v2375_v49  ;;  %3109 = vmatprep.subr.bf16.mxu0 %v2104_v32  ;;  %v2264_v49 = vunpack.c.l.s8.bf16 %v1928_v8  ;;  %v2520_v32 = vunpack.c.l.s8.bf16 %v2056_v27  ;;  %v9216_v8 = vsub.s32 7, %v8752_v45  ;;  %v1882_v27 = vld [vmem:[#allocation4 + $0x178] sm:$0xff] }
 0x4c3   :  { %3150 = vmatprep.subr.bf16.mxu1 %v2360_v34  ;;  %v1912_v34 = vld [vmem:[#allocation4 + $0x268] sm:$0xff] }
 0x4c5   :  { %3110 = vmatpush1.bf16.msra.mxu0 %v2103_v7  ;;  %v2519_v7 = vunpack.c.l.s8.bf16 %v2055_v26  ;;  %v3306_v26 = vrot.slane %v7893_v25, %v9213_v38 }
 0x4c6   :  { %3151 = vmatpush1.bf16.msra.mxu1 %v2359_v12  ;;  %3111 = vmatprep.subr.bf16.mxu0 %v2344_v15  ;;  %v2248_v12 = vunpack.c.h.s8.bf16 %v1912_v34  ;;  %v2504_v15 = vunpack.c.h.s8.bf16 %v2040_v51 }
 0x4c7   :  { %3152 = vmatprep.subr.bf16.mxu1 %v2600_v48  ;;  %v1911_v48 = vld [vmem:[#allocation4 + $0x260] sm:$0xff] }
 0x4c8   :  { %v2247_v63 = vunpack.c.h.s8.bf16 %v1911_v48  ;;  %v2231_v50 = vunpack.c.l.s8.bf16 %v1911_v48 }
 0x4c9   :  { %3112 = vmatpush2.bf16.msra.mxu0 %v2343_v36  ;;  %v2503_v36 = vunpack.c.h.s8.bf16 %v2039_v42 }
 0x4ca   :  { %3153 = vmatpush2.bf16.msra.mxu1 %v2599_v44  ;;  %3113 = vmatprep.subr.bf16.mxu0 %v2328_v57  ;;  %v2232_v44 = vunpack.c.l.s8.bf16 %v1912_v34  ;;  %v2488_v57 = vunpack.c.l.s8.bf16 %v2040_v51  ;;  %v2186_v51 = vunpack.c.h.s8.bf16 %v1882_v27 }
 0x4cb   :  { %3154 = vmatprep.subr.bf16.mxu1 %v2584_v61  ;;  %v1898_v61 = vld [vmem:[#allocation4 + $0x1f8] sm:$0xff] }
 0x4cd   :  { %3114 = vmatpush2.bf16.msra.mxu0 %v2327_v33  ;;  %v2487_v33 = vunpack.c.l.s8.bf16 %v2039_v42  ;;  %v3310_v42 = vrot.slane %v7893_v25, %v9216_v8 }
 0x4ce   :  { %3155 = vmatpush2.bf16.msra.mxu1 %v2583_v14  ;;  %3115 = vmatprep.subr.bf16.mxu0 %v2312_v6  ;;  %v2218_v14 = vunpack.c.h.s8.bf16 %v1898_v61  ;;  %v2474_v6 = vunpack.c.h.s8.bf16 %v2026_v0 }
 0x4cf   :  { %3156 = vmatprep.subr.bf16.mxu1 %v2568_v62  ;;  %v1897_v62 = vld [vmem:[#allocation4 + $0x1f0] sm:$0xff] }
 0x4d1   :  { %3116 = vmatpush2.bf16.msra.mxu0 %v2311_v10  ;;  %v2217_v10 = vunpack.c.h.s8.bf16 %v1897_v62 }
 0x4d2   :  { %3157 = vmatpush2.bf16.msra.mxu1 %v2567_v40  ;;  %3117 = vmatprep.subr.bf16.mxu0 %v2296_v24  ;;  %v2473_v40 = vunpack.c.h.s8.bf16 %v2025_v47  ;;  %v2202_v24 = vunpack.c.l.s8.bf16 %v1898_v61 }
 0x4d3   :  { %3158 = vmatprep.subr.bf16.mxu1 %v2552_v9  ;;  %v2458_v9 = vunpack.c.l.s8.bf16 %v2026_v0 }
 0x4d5   :  { %3118 = vmatpush2.bf16.msra.mxu0 %v2295_v22  ;;  %v2010_v22 = vld [vmem:[#allocation4 + $0x578] sm:$0xff] }
 0x4d6   :  { %3159 = vmatpush2.bf16.msra.mxu1 %v2551_v19  ;;  %3119 = vmatprep.subr.bf16.mxu0 %v2280_v28 }
 0x4d7   :  { %3160 = vmatprep.subr.bf16.mxu1 %v2536_v29 }
 0x4d9   :  { %3120 = vmatpush2.bf16.msra.mxu0 %v2279_v53  ;;  %v2201_v53 = vunpack.c.l.s8.bf16 %v1897_v62 }
 0x4da   :  { %3161 = vmatpush2.bf16.msra.mxu1 %v2535_v31  ;;  %3121 = vmatprep.subr.bf16.mxu0 %v2264_v49  ;;  %v2457_v31 = vunpack.c.l.s8.bf16 %v2025_v47  ;;  %v7894_v49 = vld [vmem:[#allocation21] sm:$0xff] }
 0x4db   :  { %3162 = vmatprep.subr.bf16.mxu1 %v2520_v32  ;;  %v3406_v45 = vrot.slane %v7894_v49, %v9213_v38  ;;  %v1994_v47 = vld [vmem:[#allocation4 + $0x4f8] sm:$0xff] }
 0x4dd   :  { %3122 = vmatpush2.bf16.msra.mxu0 %v2263_v1  ;;  %v2442_v1 = vunpack.c.h.s8.bf16 %v2010_v22 }
 0x4de   :  { %3163 = vmatpush2.bf16.msra.mxu1 %v2519_v7  ;;  %3123 = vmatprep.subr.bf16.mxu0 %v2248_v12  ;;  %v1881_v7 = vld [vmem:[#allocation4 + $0x170] sm:$0xff] }
 0x4df   :  { %3164 = vmatprep.subr.bf16.mxu1 %v2504_v15  ;;  %v2009_v12 = vld [vmem:[#allocation4 + $0x570] sm:$0xff]  ;;  %v2185_v0 = vunpack.c.h.s8.bf16 %v1881_v7 }
 0x4e1   :  { %3124 = vmatpush2.bf16.msra.mxu0 %v2247_v63  ;;  %v3410_v63 = vrot.slane %v7894_v49, %v9216_v8  ;;  %v2394_v49 = vunpack.c.l.s8.bf16 %v1994_v47 }
 0x4e2   :  { %3165 = vmatpush2.bf16.msra.mxu1 %v2503_v36  ;;  %3125 = vmatprep.subr.bf16.mxu0 %v2232_v44 }
 0x4e3   :  { %3166 = vmatprep.subr.bf16.mxu1 %v2488_v57 }
 0x4e5   :  { %3126 = vmatpush2.bf16.msra.mxu0 %v2231_v50  ;;  %v2441_v50 = vunpack.c.h.s8.bf16 %v2009_v12 }
 0x4e6   :  { %3167 = vmatpush2.bf16.msra.mxu1 %v2487_v33  ;;  %3177 = vmatprep.subr.bf16.mxu0 %v2218_v14  ;;  %v2170_v14 = vunpack.c.l.s8.bf16 %v1882_v27 }
 0x4e7   :  { %3218 = vmatprep.subr.bf16.mxu1 %v2474_v6  ;;  %v2426_v6 = vunpack.c.l.s8.bf16 %v2010_v22 }
 0x4e8   :  { %v2883_v19 = vpop.f32.mrf.mxu0  ;;  %3128 = vmatmul.mubr.bf16.vlgmr.msra.gmra.mxu0 %v9088_v17 }
 0x4e9   :  { %v2924_v28 = vpop.f32.mrf.mxu1  ;;  %3169 = vmatmul.mubr.bf16.vlgmr.msra.gmra.mxu1 %v9096_v3  ;;  %3178 = vmatpush1.bf16.msra.mxu0 %v2217_v10 }
 0x4ea   :  { %v2925_v29 = vadd.f32 %v2924_v28, %v2883_v19  ;;  %3219 = vmatpush1.bf16.msra.mxu1 %v2473_v40  ;;  %v2885_v32 = vpop.f32.mrf.mxu0  ;;  %3179 = vmatprep.subr.bf16.mxu0 %v2202_v24  ;;  %v2169_v24 = vunpack.c.l.s8.bf16 %v1881_v7  ;;  %v2410_v19 = vunpack.c.h.s8.bf16 %v1994_v47  ;;  %v1865_v28 = vld [vmem:[#allocation4 + $0xf0] sm:$0xff]  ;;  %v1946_v47 = vld [vmem:[#allocation4 + $0x378] sm:$0xff] }
 0x4eb   :  { %v2926_v34 = vpop.f32.mrf.mxu1  ;;  %3220 = vmatprep.subr.bf16.mxu1 %v2458_v9  ;;  %3209 = vmatprep.mubr.bf16.mxu0 %v9092_v4 }
 0x4ec   :  { %v3265_v15 = vadd.f32 %v2925_v29, %v9112_v20  ;;  %v2927_v48 = vadd.f32 %v2926_v34, %v2885_v32  ;;  %3250 = vmatprep.mubr.bf16.mxu1 %v9100_v5  ;;  %v2887_v36 = vpop.f32.mrf.mxu0  ;;  %v1866_v5 = vld [vmem:[#allocation4 + $0xf8] sm:$0xff]  ;;  %v1993_v29 = vld [vmem:[#allocation4 + $0x4f0] sm:$0xff]  ;;  %v2137_v34 = vunpack.c.l.s8.bf16 %v1865_v28 }
 0x4ed   :  { %v2928_v44 = vpop.f32.mrf.mxu1  ;;  %3180 = vmatpush1.bf16.msra.mxu0 %v2201_v53  ;;  %v2154_v9 = vunpack.c.h.s8.bf16 %v1866_v5  ;;  %v2409_v53 = vunpack.c.h.s8.bf16 %v1993_v29  ;;  %v1978_v32 = vld [vmem:[#allocation4 + $0x478] sm:$0xff] }
 0x4ee   :  { %v3365_v57 = vmul.f32 %v3306_v26, %v3265_v15  ;;  %v3266_v61 = vadd.f32 %v2927_v48, %v9116_v23  ;;  %3221 = vmatpush1.bf16.msra.mxu1 %v2457_v31  ;;  %v2888_v33 = vpop.f32.mrf.mxu0  ;;  %3181 = vmatprep.subr.bf16.mxu0 %v2186_v51  ;;  %v2425_v23 = vunpack.c.l.s8.bf16 %v2009_v12  ;;  %v2153_v26 = vunpack.c.h.s8.bf16 %v1865_v28  ;;  %v1849_v12 = vld [vmem:[#allocation4 + $0x70] sm:$0xff]  ;;  %v1962_v44 = vld [vmem:[#allocation4 + $0x3f8] sm:$0xff] }
 0x4ef   :  { %v2929_v20 = vpop.f32.mrf.mxu1  ;;  %3222 = vmatprep.subr.bf16.mxu1 %v2442_v1  ;;  %v2138_v31 = vunpack.c.l.s8.bf16 %v1866_v5  ;;  %v2393_v51 = vunpack.c.l.s8.bf16 %v1993_v29  ;;  %v2378_v7 = vunpack.c.h.s8.bf16 %v1978_v32  ;;  %v1977_v15 = vld [vmem:[#allocation4 + $0x470] sm:$0xff]  ;;  %v2121_v48 = vunpack.c.h.s8.bf16 %v1849_v12 }
 0x4f0   :  { %v3465_v4 = vadd.f32 %v3406_v45, %v3365_v57  ;;  %v3366_v62 = vmul.f32 %v3310_v42, %v3266_v61  ;;  %v1850_v45 = vld [vmem:[#allocation4 + $0x78] sm:$0xff]  ;;  %v2377_v42 = vunpack.c.h.s8.bf16 %v1977_v15  ;;  %v2362_v36 = vunpack.c.l.s8.bf16 %v1978_v32  ;;  %v1961_v20 = vld [vmem:[#allocation4 + $0x3f0] sm:$0xff] }
 0x4f1   :  { %3182 = vmatpush1.bf16.msra.mxu0 %v2185_v0  ;;  %v2122_v1 = vunpack.c.h.s8.bf16 %v1850_v45  ;;  %v2090_v57 = vld [vmem:[#allocation4 + $0x7f8] sm:$0xff]  ;;  %v2105_v61 = vunpack.c.l.s8.bf16 %v1849_v12  ;;  %v2361_v0 = vunpack.c.l.s8.bf16 %v1977_v15  ;;  %v2073_v28 = vld [vmem:[#allocation4 + $0x770] sm:$0xff] }
 0x4f2   :  { %v3481_v10 = vmax.f32 %v3465_v4, 0.0  ;;  %v3466_v40 = vadd.f32 %v3410_v63, %v3366_v62  ;;  %3223 = vmatpush1.bf16.msra.mxu1 %v2441_v50  ;;  %3183 = vmatprep.subr.bf16.mxu0 %v2170_v14  ;;  %v2106_v63 = vunpack.c.l.s8.bf16 %v1850_v45  ;;  %v2346_v50 = vunpack.c.h.s8.bf16 %v1962_v44  ;;  %v2089_v14 = vld [vmem:[#allocation4 + $0x7f0] sm:$0xff] }
 0x4f3   :  { %3224 = vmatprep.subr.bf16.mxu1 %v2426_v6  ;;  %v2602_v33 = vunpack.c.h.s8.bf16 %v2090_v57  ;;  %v2345_v6 = vunpack.c.h.s8.bf16 %v1961_v20  ;;  %v2601_v4 = vunpack.c.h.s8.bf16 %v2089_v14  ;;  %v2330_v62 = vunpack.c.l.s8.bf16 %v1962_v44 }
 0x4f4   :  { %v9228_v25 = vpack.c.bf16 %v3481_v10, %v3481_v10  ;;  %v3482_v27 = vmax.f32 %v3466_v40, 0.0  ;;  %v2586_v5 = vunpack.c.l.s8.bf16 %v2090_v57  ;;  %v2074_v10 = vld [vmem:[#allocation4 + $0x778] sm:$0xff]  ;;  %v2329_v40 = vunpack.c.l.s8.bf16 %v1961_v20 }
 0x4f5   :  { %3184 = vmatpush1.bf16.msra.mxu0 %v2169_v24  ;;  %v2585_v24 = vunpack.c.l.s8.bf16 %v2089_v14  ;;  %v2553_v32 = vunpack.c.l.s8.bf16 %v2073_v28 }
 0x4f6   :  { %v9230_v22 = vpack.c.bf16 %v3482_v27, %v3482_v27  ;;  %3225 = vmatpush1.bf16.msra.mxu1 %v2425_v23  ;;  %3185 = vmatprep.subr.bf16.mxu0 %v2154_v9  ;;  %v2314_v23 = vunpack.c.h.s8.bf16 %v1946_v47  ;;  %v2570_v9 = vunpack.c.h.s8.bf16 %v2074_v10  ;;  %v2569_v27 = vunpack.c.h.s8.bf16 %v2073_v28 }
 0x4f7   :  { %3226 = vmatprep.subr.bf16.mxu1 %v2410_v19  ;;  %v1945_v19 = vld [vmem:[#allocation4 + $0x370] sm:$0xff] }
 0x4f8   :  { %v2313_v29 = vunpack.c.h.s8.bf16 %v1945_v19  ;;  %v2297_v45 = vunpack.c.l.s8.bf16 %v1945_v19 }
 0x4f9   :  { %3186 = vmatpush1.bf16.msra.mxu0 %v2153_v26  ;;  %v2298_v26 = vunpack.c.l.s8.bf16 %v1946_v47  ;;  %v9232_v47 = vld [vmem:[#allocation19 + $0x8] sm:$0xff] }
 0x4fa   :  { %3227 = vmatpush1.bf16.msra.mxu1 %v2409_v53  ;;  %3187 = vmatprep.subr.bf16.mxu0 %v2138_v31  ;;  %v2554_v53 = vunpack.c.l.s8.bf16 %v2074_v10  ;;  %v1930_v31 = vld [vmem:[#allocation4 + $0x2f8] sm:$0xff] }
 0x4fb   :  { %3228 = vmatprep.subr.bf16.mxu1 %v2394_v49  ;;  %v2058_v49 = vld [vmem:[#allocation4 + $0x6f8] sm:$0xff] }
 0x4fd   :  { %3188 = vmatpush1.bf16.msra.mxu0 %v2137_v34  ;;  %v2282_v34 = vunpack.c.h.s8.bf16 %v1930_v31 }
 0x4fe   :  { %3229 = vmatpush1.bf16.msra.mxu1 %v2393_v51  ;;  %3189 = vmatprep.subr.bf16.mxu0 %v2122_v1  ;;  %v2538_v51 = vunpack.c.h.s8.bf16 %v2058_v49  ;;  %v1929_v1 = vld [vmem:[#allocation4 + $0x2f0] sm:$0xff] }
 0x4ff   :  { %3230 = vmatprep.subr.bf16.mxu1 %v2378_v7  ;;  %v2057_v7 = vld [vmem:[#allocation4 + $0x6f0] sm:$0xff]  ;;  %v2281_v12 = vunpack.c.h.s8.bf16 %v1929_v1  ;;  %v2265_v44 = vunpack.c.l.s8.bf16 %v1929_v1 }
 0x500   :  { %v2537_v15 = vunpack.c.h.s8.bf16 %v2057_v7  ;;  %v2521_v57 = vunpack.c.l.s8.bf16 %v2057_v7 }
 0x501   :  { %3190 = vmatpush1.bf16.msra.mxu0 %v2121_v48  ;;  %v2266_v48 = vunpack.c.l.s8.bf16 %v1930_v31 }
 0x502   :  { %3231 = vmatpush1.bf16.msra.mxu1 %v2377_v42  ;;  %3191 = vmatprep.subr.bf16.mxu0 %v2106_v63  ;;  %v2522_v42 = vunpack.c.l.s8.bf16 %v2058_v49  ;;  %v1914_v63 = vld [vmem:[#allocation4 + $0x278] sm:$0xff] }
 0x503   :  { %3232 = vmatprep.subr.bf16.mxu1 %v2362_v36  ;;  %v2042_v36 = vld [vmem:[#allocation4 + $0x678] sm:$0xff] }
 0x505   :  { %3192 = vmatpush1.bf16.msra.mxu0 %v2105_v61  ;;  %v2250_v61 = vunpack.c.h.s8.bf16 %v1914_v63 }
 0x506   :  { %3233 = vmatpush1.bf16.msra.mxu1 %v2361_v0  ;;  %3193 = vmatprep.subr.bf16.mxu0 %v2346_v50  ;;  %v2506_v0 = vunpack.c.h.s8.bf16 %v2042_v36  ;;  %v1913_v50 = vld [vmem:[#allocation4 + $0x270] sm:$0xff] }
 0x507   :  { %3234 = vmatprep.subr.bf16.mxu1 %v2602_v33  ;;  %v2041_v33 = vld [vmem:[#allocation4 + $0x670] sm:$0xff]  ;;  %v2249_v20 = vunpack.c.h.s8.bf16 %v1913_v50 }
 0x508   :  { %v2505_v14 = vunpack.c.h.s8.bf16 %v2041_v33 }
 0x509   :  { %3194 = vmatpush2.bf16.msra.mxu0 %v2345_v6  ;;  %v2234_v6 = vunpack.c.l.s8.bf16 %v1914_v63 }
 0x50a   :  { %3235 = vmatpush2.bf16.msra.mxu1 %v2601_v4  ;;  %3195 = vmatprep.subr.bf16.mxu0 %v2330_v62  ;;  %v2490_v4 = vunpack.c.l.s8.bf16 %v2042_v36  ;;  %v2233_v62 = vunpack.c.l.s8.bf16 %v1913_v50 }
 0x50b   :  { %3236 = vmatprep.subr.bf16.mxu1 %v2586_v5  ;;  %v2489_v5 = vunpack.c.l.s8.bf16 %v2041_v33  ;;  %v3326_v33 = vrot.slane %v9232_v47, %v8764_v60 }
 0x50d   :  { %3196 = vmatpush2.bf16.msra.mxu0 %v2329_v40 }
 0x50e   :  { %3237 = vmatpush2.bf16.msra.mxu1 %v2585_v24  ;;  %3197 = vmatprep.subr.bf16.mxu0 %v2314_v23  ;;  %v9234_v24 = vld [vmem:[#allocation21 + $0x8] sm:$0xff] }
 0x50f   :  { %3238 = vmatprep.subr.bf16.mxu1 %v2570_v9  ;;  %v3314_v9 = vrot.slane %v9232_v47, %v8755_v54 }
 0x511   :  { %3198 = vmatpush2.bf16.msra.mxu0 %v2313_v29 }
 0x512   :  { %3239 = vmatpush2.bf16.msra.mxu1 %v2569_v27  ;;  %3199 = vmatprep.subr.bf16.mxu0 %v2298_v26  ;;  %v3414_v27 = vrot.slane %v9234_v24, %v8755_v54 }
 0x513   :  { %3240 = vmatprep.subr.bf16.mxu1 %v2554_v53  ;;  %v3318_v53 = vrot.slane %v9232_v47, %v8761_v59 }
 0x515   :  { %3200 = vmatpush2.bf16.msra.mxu0 %v2297_v45  ;;  %v3418_v45 = vrot.slane %v9234_v24, %v8761_v59 }
 0x516   :  { %3241 = vmatpush2.bf16.msra.mxu1 %v2553_v32  ;;  %3201 = vmatprep.subr.bf16.mxu0 %v2282_v34 }
 0x517   :  { %3242 = vmatprep.subr.bf16.mxu1 %v2538_v51 }
 0x519   :  { %3202 = vmatpush2.bf16.msra.mxu0 %v2281_v12 }
 0x51a   :  { %3243 = vmatpush2.bf16.msra.mxu1 %v2537_v15  ;;  %3203 = vmatprep.subr.bf16.mxu0 %v2266_v48 }
 0x51b   :  { %3244 = vmatprep.subr.bf16.mxu1 %v2522_v42 }
 0x51d   :  { %3204 = vmatpush2.bf16.msra.mxu0 %v2265_v44 }
 0x51e   :  { %3245 = vmatpush2.bf16.msra.mxu1 %v2521_v57  ;;  %3205 = vmatprep.subr.bf16.mxu0 %v2250_v61 }
 0x51f   :  { %3246 = vmatprep.subr.bf16.mxu1 %v2506_v0  ;;  %v3422_v0 = vrot.slane %v9234_v24, %v8758_v55 }
 0x521   :  { %3206 = vmatpush2.bf16.msra.mxu0 %v2249_v20 }
 0x522   :  { %3247 = vmatpush2.bf16.msra.mxu1 %v2505_v14  ;;  %3207 = vmatprep.subr.bf16.mxu0 %v2234_v6 }
 0x523   :  { %3248 = vmatprep.subr.bf16.mxu1 %v2490_v4 }
 0x525   :  { %3208 = vmatpush2.bf16.msra.mxu0 %v2233_v62  ;;  %v3426_v62 = vrot.slane %v9234_v24, %v8764_v60 }
 0x526   :  { %3249 = vmatpush2.bf16.msra.mxu1 %v2489_v5 }
 0x528   :  { %v2965_v10 = vpop.f32.mrf.mxu0  ;;  %3210 = vmatmul.mubr.bf16.vlgmr.msra.gmra.mxu0 %v9088_v17 }
 0x529   :  { %v3006_v40 = vpop.f32.mrf.mxu1  ;;  %3251 = vmatmul.mubr.bf16.vlgmr.msra.gmra.mxu1 %v9096_v3 }
 0x52a   :  { %v3007_v23 = vadd.f32 %v3006_v40, %v2965_v10  ;;  %v2967_v19 = vpop.f32.mrf.mxu0 }
 0x52b   :  { %v3008_v28 = vpop.f32.mrf.mxu1 }
 0x52c   :  { %v3267_v29 = vadd.f32 %v3007_v23, %v9118_v35  ;;  %v3009_v26 = vadd.f32 %v3008_v28, %v2967_v19  ;;  %v2969_v31 = vpop.f32.mrf.mxu0 }
 0x52d   :  { %v3010_v49 = vpop.f32.mrf.mxu1 }
 0x52e   :  { %v3367_v17 = vmul.f32 %v3314_v9, %v3267_v29  ;;  %v3268_v3 = vadd.f32 %v3009_v26, %v9122_v37  ;;  %v2970_v32 = vpop.f32.mrf.mxu0  ;;  %v3322_v37 = vrot.slane %v9232_v47, %v8758_v55 }
 0x52f   :  { %v3011_v34 = vpop.f32.mrf.mxu1  ;;  %v3334_v32 = vrot.slane %v9232_v47, %v9192_v11 }
 0x530   :  { %v3467_v51 = vadd.f32 %v3414_v27, %v3367_v17  ;;  %v3368_v1 = vmul.f32 %v3318_v53, %v3268_v3  ;;  %v3430_v3 = vrot.slane %v9234_v24, %v9189_v43 }
 0x532   :  { %v3483_v35 = vmax.f32 %v3467_v51, 0.0  ;;  %v3468_v7 = vadd.f32 %v3418_v45, %v3368_v1 }
 0x534   :  { %v9248_v12 = vpack.c.bf16 %v3483_v35, %v3483_v35  ;;  %v3484_v15 = vmax.f32 %v3468_v7, 0.0  ;;  %v3434_v7 = vrot.slane %v9234_v24, %v9192_v11 }
 0x536   :  { %v9250_v48 = vpack.c.bf16 %v3484_v15, %v3484_v15 }
 0x568   :  { %v3047_v42 = vpop.f32.mrf.mxu0 }
 0x569   :  { %v3088_v63 = vpop.f32.mrf.mxu1 }
 0x56a   :  { %v3089_v36 = vadd.f32 %v3088_v63, %v3047_v42  ;;  %v3049_v44 = vpop.f32.mrf.mxu0 }
 0x56b   :  { %v3090_v57 = vpop.f32.mrf.mxu1 }
 0x56c   :  { %v3269_v61 = vadd.f32 %v3089_v36, %v9120_v2  ;;  %v3091_v50 = vadd.f32 %v3090_v57, %v3049_v44  ;;  %v3051_v20 = vpop.f32.mrf.mxu0 }
 0x56d   :  { %v3092_v14 = vpop.f32.mrf.mxu1 }
 0x56e   :  { %v3369_v6 = vmul.f32 %v3322_v37, %v3269_v61  ;;  %v3270_v4 = vadd.f32 %v3091_v50, %v9124_v39  ;;  %v3052_v5 = vpop.f32.mrf.mxu0  ;;  %v3330_v39 = vrot.slane %v9232_v47, %v9189_v43 }
 0x56f   :  { %v3093_v10 = vpop.f32.mrf.mxu1  ;;  %v3342_v5 = vrot.slane %v9232_v47, %v9216_v8 }
 0x570   :  { %v3469_v40 = vadd.f32 %v3422_v0, %v3369_v6  ;;  %v3370_v23 = vmul.f32 %v3326_v33, %v3270_v4  ;;  %v3438_v4 = vrot.slane %v9234_v24, %v9213_v38 }
 0x572   :  { %v3485_v2 = vmax.f32 %v3469_v40, 0.0  ;;  %v3470_v9 = vadd.f32 %v3426_v62, %v3370_v23 }
 0x574   :  { %v9262_v19 = vpack.c.bf16 %v3485_v2, %v3485_v2  ;;  %v3486_v28 = vmax.f32 %v3470_v9, 0.0  ;;  %v3442_v9 = vrot.slane %v9234_v24, %v9216_v8 }
 0x576   :  { %v9264_v29 = vpack.c.bf16 %v3486_v28, %v3486_v28 }
 0x5a8   :  { %v3129_v27 = vpop.f32.mrf.mxu0 }
 0x5a9   :  { %v3170_v26 = vpop.f32.mrf.mxu1 }
 0x5aa   :  { %v3171_v53 = vadd.f32 %v3170_v26, %v3129_v27  ;;  %v3131_v31 = vpop.f32.mrf.mxu0 }
 0x5ab   :  { %v3172_v49 = vpop.f32.mrf.mxu1 }
 0x5ac   :  { %v3271_v17 = vadd.f32 %v3171_v53, %v9126_v16  ;;  %v3173_v45 = vadd.f32 %v3172_v49, %v3131_v31  ;;  %v3133_v34 = vpop.f32.mrf.mxu0 }
 0x5ad   :  { %v3174_v51 = vpop.f32.mrf.mxu1 }
 0x5ae   :  { %v3371_v1 = vmul.f32 %v3330_v39, %v3271_v17  ;;  %v3272_v35 = vadd.f32 %v3173_v45, %v9130_v30  ;;  %v3134_v15 = vpop.f32.mrf.mxu0  ;;  %v3338_v30 = vrot.slane %v9232_v47, %v9213_v38 }
 0x5af   :  { %v3175_v42 = vpop.f32.mrf.mxu1 }
 0x5b0   :  { %v3471_v63 = vadd.f32 %v3430_v3, %v3371_v1  ;;  %v3372_v36 = vmul.f32 %v3334_v32, %v3272_v35 }
 0x5b2   :  { %v3487_v16 = vmax.f32 %v3471_v63, 0.0  ;;  %v3472_v37 = vadd.f32 %v3434_v7, %v3372_v36 }
 0x5b4   :  { %v9276_v44 = vpack.c.bf16 %v3487_v16, %v3487_v16  ;;  %v3488_v57 = vmax.f32 %v3472_v37, 0.0 }
 0x5b6   :  { %v9278_v61 = vpack.c.bf16 %v3488_v57, %v3488_v57 }
 0x5e8   :  { %v3211_v0 = vpop.f32.mrf.mxu0 }
 0x5e9   :  { %v3252_v50 = vpop.f32.mrf.mxu1 }
 0x5ea   :  { %v3253_v33 = vadd.f32 %v3252_v50, %v3211_v0  ;;  %v3213_v20 = vpop.f32.mrf.mxu0 }
 0x5eb   :  { %v3254_v14 = vpop.f32.mrf.mxu1 }
 0x5ec   :  { %v3273_v6 = vadd.f32 %v3253_v33, %v9128_v21  ;;  %v3255_v62 = vadd.f32 %v3254_v14, %v3213_v20  ;;  %v3215_v10 = vpop.f32.mrf.mxu0 }
 0x5ed   :  { %v3256_v40 = vpop.f32.mrf.mxu1 }
 0x5ee   :  { %v3373_v23 = vmul.f32 %v3338_v30, %v3273_v6  ;;  %v3274_v2 = vadd.f32 %v3255_v62, %v9132_v52  ;;  %v3216_v28 = vpop.f32.mrf.mxu0 }
 0x5ef   :  { %v3257_v27 = vpop.f32.mrf.mxu1 }
 0x5f0   :  { %v3473_v26 = vadd.f32 %v3438_v4, %v3373_v23  ;;  %v3374_v53 = vmul.f32 %v3342_v5, %v3274_v2 }
 0x5f2   :  { %v3489_v21 = vmax.f32 %v3473_v26, 0.0  ;;  %v3474_v39 = vadd.f32 %v3442_v9, %v3374_v53 }
 0x5f4   :  { %v9290_v31 = vpack.c.bf16 %v3489_v21, %v3489_v21  ;;  %v3490_v49 = vmax.f32 %v3474_v39, 0.0 }
 0x5f6   :  { %v9292_v17 = vpack.c.bf16 %v3490_v49, %v3490_v49 }
 0x5f7   :  { %8427 = dma.done.wait [#allocation10 + $0x3], 65536 }
 0x5f8   :  { %8428 = vsyncadd [#allocation10 + $0x3], 4294901760  ;;  %5083 = vmatprep.mubr.bf16.mxu0 %v9168_v41  ;;  %5124 = vmatprep.mubr.bf16.mxu1 %v9186_v58  ;;  %v3540_v52 = vld [vmem:[#allocation5 + $0xc8] sm:$0xff]  ;;  %v3539_v24 = vld [vmem:[#allocation5 + $0xc0] sm:$0xff] }
 0x5f9   :  { %v3604_v47 = vld [vmem:[#allocation5 + $0x2c8] sm:$0xff]  ;;  %v4076_v3 = vunpack.c.l.s8.bf16 %v3540_v52  ;;  %v4084_v45 = vunpack.c.h.s8.bf16 %v3540_v52  ;;  %v3603_v51 = vld [vmem:[#allocation5 + $0x2c0] sm:$0xff]  ;;  %v4083_v1 = vunpack.c.h.s8.bf16 %v3539_v24  ;;  %v4075_v42 = vunpack.c.l.s8.bf16 %v3539_v24 }
 0x5fa   :  { %v4204_v32 = vunpack.c.l.s8.bf16 %v3604_v47  ;;  %v4212_v34 = vunpack.c.h.s8.bf16 %v3604_v47  ;;  %v4211_v35 = vunpack.c.h.s8.bf16 %v3603_v51  ;;  %v3532_v7 = vld [vmem:[#allocation5 + $0x88] sm:$0xff]  ;;  %v4203_v63 = vunpack.c.l.s8.bf16 %v3603_v51  ;;  %v3531_v37 = vld [vmem:[#allocation5 + $0x80] sm:$0xff] }
 0x5fb   :  { %v3596_v15 = vld [vmem:[#allocation5 + $0x288] sm:$0xff]  ;;  %5051 = vmatprep.subr.bf16.mxu0 %v4084_v45  ;;  %v4068_v36 = vunpack.c.h.s8.bf16 %v3532_v7  ;;  %v3595_v57 = vld [vmem:[#allocation5 + $0x280] sm:$0xff]  ;;  %v4067_v0 = vunpack.c.h.s8.bf16 %v3531_v37  ;;  %v4060_v33 = vunpack.c.l.s8.bf16 %v3532_v7  ;;  %v4059_v6 = vunpack.c.l.s8.bf16 %v3531_v37 }
 0x5fc   :  { %5092 = vmatprep.subr.bf16.mxu1 %v4212_v34  ;;  %5052 = vmatpush1.bf16.msra.mxu0 %v4083_v1  ;;  %v4196_v16 = vunpack.c.h.s8.bf16 %v3596_v15  ;;  %v4195_v50 = vunpack.c.h.s8.bf16 %v3595_v57  ;;  %v4188_v30 = vunpack.c.l.s8.bf16 %v3596_v15  ;;  %v3524_v20 = vld [vmem:[#allocation5 + $0x48] sm:$0xff]  ;;  %v4187_v4 = vunpack.c.l.s8.bf16 %v3595_v57  ;;  %v3523_v10 = vld [vmem:[#allocation5 + $0x40] sm:$0xff] }
 0x5fd   :  { %5093 = vmatpush1.bf16.msra.mxu1 %v4211_v35  ;;  %5053 = vmatprep.subr.bf16.mxu0 %v4076_v3  ;;  %v3588_v14 = vld [vmem:[#allocation5 + $0x248] sm:$0xff]  ;;  %v4052_v62 = vunpack.c.h.s8.bf16 %v3524_v20  ;;  %v3587_v40 = vld [vmem:[#allocation5 + $0x240] sm:$0xff]  ;;  %v4051_v23 = vunpack.c.h.s8.bf16 %v3523_v10  ;;  %v4044_v9 = vunpack.c.l.s8.bf16 %v3524_v20  ;;  %v4043_v53 = vunpack.c.l.s8.bf16 %v3523_v10 }
 0x5fe   :  { %5094 = vmatprep.subr.bf16.mxu1 %v4204_v32  ;;  %v4180_v5 = vunpack.c.h.s8.bf16 %v3588_v14  ;;  %v4179_v2 = vunpack.c.h.s8.bf16 %v3587_v40  ;;  %v4172_v28 = vunpack.c.l.s8.bf16 %v3588_v14  ;;  %v3516_v27 = vld [vmem:[#allocation5 + $0x8] sm:$0xff]  ;;  %v4171_v21 = vunpack.c.l.s8.bf16 %v3587_v40  ;;  %v3515_v52 = vld [vmem:[#allocation5] sm:$0xff] }
 0x5ff   :  { %v3580_v26 = vld [vmem:[#allocation5 + $0x208] sm:$0xff]  ;;  %v4036_v39 = vunpack.c.h.s8.bf16 %v3516_v27  ;;  %v3579_v47 = vld [vmem:[#allocation5 + $0x200] sm:$0xff]  ;;  %v4035_v24 = vunpack.c.h.s8.bf16 %v3515_v52  ;;  %v4028_v45 = vunpack.c.l.s8.bf16 %v3516_v27  ;;  %v4027_v1 = vunpack.c.l.s8.bf16 %v3515_v52 }
 0x600   :  { %5054 = vmatpush1.bf16.msra.mxu0 %v4075_v42  ;;  %v4164_v49 = vunpack.c.h.s8.bf16 %v3580_v26  ;;  %v4163_v3 = vunpack.c.h.s8.bf16 %v3579_v47  ;;  %v4156_v32 = vunpack.c.l.s8.bf16 %v3580_v26  ;;  %v3572_v34 = vld [vmem:[#allocation5 + $0x1c8] sm:$0xff]  ;;  %v4155_v35 = vunpack.c.l.s8.bf16 %v3579_v47  ;;  %v3571_v42 = vld [vmem:[#allocation5 + $0x1c0] sm:$0xff] }
 0x601   :  { %5095 = vmatpush1.bf16.msra.mxu1 %v4203_v63  ;;  %5055 = vmatprep.subr.bf16.mxu0 %v4068_v36  ;;  %v3636_v51 = vld [vmem:[#allocation5 + $0x3c8] sm:$0xff]  ;;  %v4148_v7 = vunpack.c.h.s8.bf16 %v3572_v34  ;;  %v3635_v63 = vld [vmem:[#allocation5 + $0x3c0] sm:$0xff]  ;;  %v4147_v36 = vunpack.c.h.s8.bf16 %v3571_v42  ;;  %v4140_v37 = vunpack.c.l.s8.bf16 %v3572_v34 }
 0x602   :  { %5096 = vmatprep.subr.bf16.mxu1 %v4196_v16  ;;  %v4276_v15 = vunpack.c.h.s8.bf16 %v3636_v51  ;;  %v4275_v16 = vunpack.c.h.s8.bf16 %v3635_v63  ;;  %v4268_v57 = vunpack.c.l.s8.bf16 %v3636_v51 }
 0x604   :  { %5056 = vmatpush1.bf16.msra.mxu0 %v4067_v0  ;;  %v3564_v0 = vld [vmem:[#allocation5 + $0x188] sm:$0xff] }
 0x605   :  { %5097 = vmatpush1.bf16.msra.mxu1 %v4195_v50  ;;  %5057 = vmatprep.subr.bf16.mxu0 %v4060_v33  ;;  %v3628_v50 = vld [vmem:[#allocation5 + $0x388] sm:$0xff]  ;;  %v4139_v33 = vunpack.c.l.s8.bf16 %v3571_v42  ;;  %v4132_v20 = vunpack.c.h.s8.bf16 %v3564_v0  ;;  %v4124_v10 = vunpack.c.l.s8.bf16 %v3564_v0 }
 0x606   :  { %5098 = vmatprep.subr.bf16.mxu1 %v4188_v30  ;;  %v4267_v30 = vunpack.c.l.s8.bf16 %v3635_v63  ;;  %v4260_v14 = vunpack.c.h.s8.bf16 %v3628_v50  ;;  %v4252_v40 = vunpack.c.l.s8.bf16 %v3628_v50 }
 0x608   :  { %5058 = vmatpush1.bf16.msra.mxu0 %v4059_v6  ;;  %v3563_v6 = vld [vmem:[#allocation5 + $0x180] sm:$0xff] }
 0x609   :  { %5099 = vmatpush1.bf16.msra.mxu1 %v4187_v4  ;;  %5059 = vmatprep.subr.bf16.mxu0 %v4052_v62  ;;  %v3627_v4 = vld [vmem:[#allocation5 + $0x380] sm:$0xff]  ;;  %v4131_v62 = vunpack.c.h.s8.bf16 %v3563_v6 }
 0x60a   :  { %5100 = vmatprep.subr.bf16.mxu1 %v4180_v5  ;;  %v4259_v5 = vunpack.c.h.s8.bf16 %v3627_v4 }
 0x60c   :  { %5060 = vmatpush1.bf16.msra.mxu0 %v4051_v23  ;;  %v3556_v23 = vld [vmem:[#allocation5 + $0x148] sm:$0xff] }
 0x60d   :  { %5101 = vmatpush1.bf16.msra.mxu1 %v4179_v2  ;;  %5061 = vmatprep.subr.bf16.mxu0 %v4044_v9  ;;  %v3620_v2 = vld [vmem:[#allocation5 + $0x348] sm:$0xff]  ;;  %v4123_v9 = vunpack.c.l.s8.bf16 %v3563_v6  ;;  %v4116_v27 = vunpack.c.h.s8.bf16 %v3556_v23  ;;  %v4108_v52 = vunpack.c.l.s8.bf16 %v3556_v23 }
 0x60e   :  { %5102 = vmatprep.subr.bf16.mxu1 %v4172_v28  ;;  %v4251_v28 = vunpack.c.l.s8.bf16 %v3627_v4  ;;  %v4244_v26 = vunpack.c.h.s8.bf16 %v3620_v2  ;;  %v4236_v47 = vunpack.c.l.s8.bf16 %v3620_v2 }
 0x610   :  { %5062 = vmatpush1.bf16.msra.mxu0 %v4043_v53  ;;  %v3555_v53 = vld [vmem:[#allocation5 + $0x140] sm:$0xff] }
 0x611   :  { %5103 = vmatpush1.bf16.msra.mxu1 %v4171_v21  ;;  %5063 = vmatprep.subr.bf16.mxu0 %v4036_v39  ;;  %v3619_v21 = vld [vmem:[#allocation5 + $0x340] sm:$0xff]  ;;  %v4115_v39 = vunpack.c.h.s8.bf16 %v3555_v53 }
 0x612   :  { %5104 = vmatprep.subr.bf16.mxu1 %v4164_v49  ;;  %v4243_v49 = vunpack.c.h.s8.bf16 %v3619_v21 }
 0x614   :  { %5064 = vmatpush1.bf16.msra.mxu0 %v4035_v24  ;;  %v3548_v24 = vld [vmem:[#allocation5 + $0x108] sm:$0xff] }
 0x615   :  { %5105 = vmatpush1.bf16.msra.mxu1 %v4163_v3  ;;  %5065 = vmatprep.subr.bf16.mxu0 %v4028_v45  ;;  %v3612_v3 = vld [vmem:[#allocation5 + $0x308] sm:$0xff]  ;;  %v4107_v45 = vunpack.c.l.s8.bf16 %v3555_v53  ;;  %v4100_v34 = vunpack.c.h.s8.bf16 %v3548_v24  ;;  %v4092_v42 = vunpack.c.l.s8.bf16 %v3548_v24 }
 0x616   :  { %5106 = vmatprep.subr.bf16.mxu1 %v4156_v32  ;;  %v4235_v32 = vunpack.c.l.s8.bf16 %v3619_v21  ;;  %v4228_v51 = vunpack.c.h.s8.bf16 %v3612_v3  ;;  %v4220_v63 = vunpack.c.l.s8.bf16 %v3612_v3 }
 0x618   :  { %5066 = vmatpush1.bf16.msra.mxu0 %v4027_v1  ;;  %v3547_v1 = vld [vmem:[#allocation5 + $0x100] sm:$0xff] }
 0x619   :  { %5107 = vmatpush1.bf16.msra.mxu1 %v4155_v35  ;;  %5067 = vmatprep.subr.bf16.mxu0 %v4148_v7  ;;  %v3611_v35 = vld [vmem:[#allocation5 + $0x300] sm:$0xff]  ;;  %v4099_v7 = vunpack.c.h.s8.bf16 %v3547_v1 }
 0x61a   :  { %5108 = vmatprep.subr.bf16.mxu1 %v4276_v15  ;;  %v4227_v15 = vunpack.c.h.s8.bf16 %v3611_v35 }
 0x61c   :  { %5068 = vmatpush2.bf16.msra.mxu0 %v4147_v36  ;;  %v3668_v36 = vld [vmem:[#allocation5 + $0x4c8] sm:$0xff] }
 0x61d   :  { %5109 = vmatpush2.bf16.msra.mxu1 %v4275_v16  ;;  %5069 = vmatprep.subr.bf16.mxu0 %v4140_v37  ;;  %v3732_v16 = vld [vmem:[#allocation5 + $0x6c8] sm:$0xff]  ;;  %v4091_v37 = vunpack.c.l.s8.bf16 %v3547_v1  ;;  %v4340_v0 = vunpack.c.h.s8.bf16 %v3668_v36  ;;  %v4332_v6 = vunpack.c.l.s8.bf16 %v3668_v36 }
 0x61e   :  { %5110 = vmatprep.subr.bf16.mxu1 %v4268_v57  ;;  %v4219_v57 = vunpack.c.l.s8.bf16 %v3611_v35  ;;  %v4468_v50 = vunpack.c.h.s8.bf16 %v3732_v16  ;;  %v4460_v4 = vunpack.c.l.s8.bf16 %v3732_v16 }
 0x620   :  { %5070 = vmatpush2.bf16.msra.mxu0 %v4139_v33  ;;  %v3667_v33 = vld [vmem:[#allocation5 + $0x4c0] sm:$0xff] }
 0x621   :  { %5111 = vmatpush2.bf16.msra.mxu1 %v4267_v30  ;;  %5071 = vmatprep.subr.bf16.mxu0 %v4132_v20  ;;  %v3731_v30 = vld [vmem:[#allocation5 + $0x6c0] sm:$0xff]  ;;  %v4339_v20 = vunpack.c.h.s8.bf16 %v3667_v33 }
 0x622   :  { %5112 = vmatprep.subr.bf16.mxu1 %v4260_v14  ;;  %v4467_v14 = vunpack.c.h.s8.bf16 %v3731_v30 }
 0x624   :  { %5072 = vmatpush2.bf16.msra.mxu0 %v4131_v62  ;;  %v3660_v62 = vld [vmem:[#allocation5 + $0x488] sm:$0xff] }
 0x625   :  { %5113 = vmatpush2.bf16.msra.mxu1 %v4259_v5  ;;  %5073 = vmatprep.subr.bf16.mxu0 %v4124_v10  ;;  %v3724_v5 = vld [vmem:[#allocation5 + $0x688] sm:$0xff]  ;;  %v4331_v10 = vunpack.c.l.s8.bf16 %v3667_v33  ;;  %v4324_v23 = vunpack.c.h.s8.bf16 %v3660_v62  ;;  %v4316_v53 = vunpack.c.l.s8.bf16 %v3660_v62 }
 0x626   :  { %5114 = vmatprep.subr.bf16.mxu1 %v4252_v40  ;;  %v4459_v40 = vunpack.c.l.s8.bf16 %v3731_v30  ;;  %v4452_v2 = vunpack.c.h.s8.bf16 %v3724_v5  ;;  %v4444_v21 = vunpack.c.l.s8.bf16 %v3724_v5 }
 0x628   :  { %5074 = vmatpush2.bf16.msra.mxu0 %v4123_v9  ;;  %v3659_v9 = vld [vmem:[#allocation5 + $0x480] sm:$0xff] }
 0x629   :  { %5115 = vmatpush2.bf16.msra.mxu1 %v4251_v28  ;;  %5075 = vmatprep.subr.bf16.mxu0 %v4116_v27  ;;  %v3723_v28 = vld [vmem:[#allocation5 + $0x680] sm:$0xff]  ;;  %v4323_v27 = vunpack.c.h.s8.bf16 %v3659_v9 }
 0x62a   :  { %5116 = vmatprep.subr.bf16.mxu1 %v4244_v26  ;;  %v4451_v26 = vunpack.c.h.s8.bf16 %v3723_v28 }
 0x62c   :  { %5076 = vmatpush2.bf16.msra.mxu0 %v4115_v39  ;;  %v3652_v39 = vld [vmem:[#allocation5 + $0x448] sm:$0xff] }
 0x62d   :  { %5117 = vmatpush2.bf16.msra.mxu1 %v4243_v49  ;;  %5077 = vmatprep.subr.bf16.mxu0 %v4108_v52  ;;  %v3716_v49 = vld [vmem:[#allocation5 + $0x648] sm:$0xff]  ;;  %v4315_v52 = vunpack.c.l.s8.bf16 %v3659_v9  ;;  %v4308_v24 = vunpack.c.h.s8.bf16 %v3652_v39  ;;  %v4300_v1 = vunpack.c.l.s8.bf16 %v3652_v39 }
 0x62e   :  { %5118 = vmatprep.subr.bf16.mxu1 %v4236_v47  ;;  %v4443_v47 = vunpack.c.l.s8.bf16 %v3723_v28  ;;  %v4436_v3 = vunpack.c.h.s8.bf16 %v3716_v49  ;;  %v4428_v35 = vunpack.c.l.s8.bf16 %v3716_v49 }
 0x630   :  { %5078 = vmatpush2.bf16.msra.mxu0 %v4107_v45  ;;  %v3651_v45 = vld [vmem:[#allocation5 + $0x440] sm:$0xff] }
 0x631   :  { %5119 = vmatpush2.bf16.msra.mxu1 %v4235_v32  ;;  %5079 = vmatprep.subr.bf16.mxu0 %v4100_v34  ;;  %v3715_v32 = vld [vmem:[#allocation5 + $0x640] sm:$0xff]  ;;  %v4307_v34 = vunpack.c.h.s8.bf16 %v3651_v45 }
 0x632   :  { %5120 = vmatprep.subr.bf16.mxu1 %v4228_v51  ;;  %v4435_v51 = vunpack.c.h.s8.bf16 %v3715_v32 }
 0x634   :  { %5080 = vmatpush2.bf16.msra.mxu0 %v4099_v7  ;;  %v3644_v7 = vld [vmem:[#allocation5 + $0x408] sm:$0xff] }
 0x635   :  { %5121 = vmatpush2.bf16.msra.mxu1 %v4227_v15  ;;  %5081 = vmatprep.subr.bf16.mxu0 %v4092_v42  ;;  %v3708_v15 = vld [vmem:[#allocation5 + $0x608] sm:$0xff]  ;;  %v4299_v42 = vunpack.c.l.s8.bf16 %v3651_v45  ;;  %v4292_v36 = vunpack.c.h.s8.bf16 %v3644_v7  ;;  %v4284_v33 = vunpack.c.l.s8.bf16 %v3644_v7 }
 0x636   :  { %5122 = vmatprep.subr.bf16.mxu1 %v4220_v63  ;;  %v4427_v63 = vunpack.c.l.s8.bf16 %v3715_v32  ;;  %v4420_v16 = vunpack.c.h.s8.bf16 %v3708_v15  ;;  %v4412_v30 = vunpack.c.l.s8.bf16 %v3708_v15 }
 0x638   :  { %5082 = vmatpush2.bf16.msra.mxu0 %v4091_v37  ;;  %v3643_v37 = vld [vmem:[#allocation5 + $0x400] sm:$0xff] }
 0x639   :  { %5123 = vmatpush2.bf16.msra.mxu1 %v4219_v57  ;;  %5133 = vmatprep.subr.bf16.mxu0 %v4340_v0  ;;  %v3707_v57 = vld [vmem:[#allocation5 + $0x600] sm:$0xff]  ;;  %v4291_v0 = vunpack.c.h.s8.bf16 %v3643_v37 }
 0x63a   :  { %5174 = vmatprep.subr.bf16.mxu1 %v4468_v50  ;;  %v4419_v50 = vunpack.c.h.s8.bf16 %v3707_v57 }
 0x63b   :  { %5084 = vmatmul.mubr.bf16.vlgmr.msra.gmra.mxu0 %v9166_v13 }
 0x63c   :  { %5125 = vmatmul.mubr.bf16.vlgmr.msra.gmra.mxu1 %v9184_v56  ;;  %5134 = vmatpush1.bf16.msra.mxu0 %v4339_v20  ;;  %v3700_v20 = vld [vmem:[#allocation5 + $0x5c8] sm:$0xff] }
 0x63d   :  { %5175 = vmatpush1.bf16.msra.mxu1 %v4467_v14  ;;  %5135 = vmatprep.subr.bf16.mxu0 %v4332_v6  ;;  %v3764_v14 = vld [vmem:[#allocation5 + $0x7c8] sm:$0xff]  ;;  %v4283_v6 = vunpack.c.l.s8.bf16 %v3643_v37  ;;  %v4404_v62 = vunpack.c.h.s8.bf16 %v3700_v20  ;;  %v4396_v9 = vunpack.c.l.s8.bf16 %v3700_v20 }
 0x63e   :  { %5176 = vmatprep.subr.bf16.mxu1 %v4460_v4  ;;  %5165 = vmatprep.mubr.bf16.mxu0 %v9210_v46  ;;  %v4411_v4 = vunpack.c.l.s8.bf16 %v3707_v57  ;;  %v4532_v5 = vunpack.c.h.s8.bf16 %v3764_v14  ;;  %v4524_v28 = vunpack.c.l.s8.bf16 %v3764_v14 }
 0x63f   :  { %5206 = vmatprep.mubr.bf16.mxu1 %v9230_v22 }
 0x640   :  { %5136 = vmatpush1.bf16.msra.mxu0 %v4331_v10  ;;  %v3699_v10 = vld [vmem:[#allocation5 + $0x5c0] sm:$0xff] }
 0x641   :  { %5177 = vmatpush1.bf16.msra.mxu1 %v4459_v40  ;;  %5137 = vmatprep.subr.bf16.mxu0 %v4324_v23  ;;  %v3763_v40 = vld [vmem:[#allocation5 + $0x7c0] sm:$0xff]  ;;  %v4403_v23 = vunpack.c.h.s8.bf16 %v3699_v10 }
 0x642   :  { %5178 = vmatprep.subr.bf16.mxu1 %v4452_v2  ;;  %v4531_v2 = vunpack.c.h.s8.bf16 %v3763_v40 }
 0x644   :  { %5138 = vmatpush1.bf16.msra.mxu0 %v4323_v27  ;;  %v3692_v27 = vld [vmem:[#allocation5 + $0x588] sm:$0xff] }
 0x645   :  { %5179 = vmatpush1.bf16.msra.mxu1 %v4451_v26  ;;  %5139 = vmatprep.subr.bf16.mxu0 %v4316_v53  ;;  %v3756_v26 = vld [vmem:[#allocation5 + $0x788] sm:$0xff]  ;;  %v4395_v53 = vunpack.c.l.s8.bf16 %v3699_v10  ;;  %v4388_v39 = vunpack.c.h.s8.bf16 %v3692_v27  ;;  %v4380_v45 = vunpack.c.l.s8.bf16 %v3692_v27 }
 0x646   :  { %5180 = vmatprep.subr.bf16.mxu1 %v4444_v21  ;;  %v4523_v21 = vunpack.c.l.s8.bf16 %v3763_v40  ;;  %v4516_v49 = vunpack.c.h.s8.bf16 %v3756_v26  ;;  %v4508_v32 = vunpack.c.l.s8.bf16 %v3756_v26 }
 0x648   :  { %5140 = vmatpush1.bf16.msra.mxu0 %v4315_v52  ;;  %v3691_v52 = vld [vmem:[#allocation5 + $0x580] sm:$0xff] }
 0x649   :  { %5181 = vmatpush1.bf16.msra.mxu1 %v4443_v47  ;;  %5141 = vmatprep.subr.bf16.mxu0 %v4308_v24  ;;  %v3755_v47 = vld [vmem:[#allocation5 + $0x780] sm:$0xff]  ;;  %v4387_v24 = vunpack.c.h.s8.bf16 %v3691_v52 }
 0x64a   :  { %5182 = vmatprep.subr.bf16.mxu1 %v4436_v3  ;;  %v4515_v3 = vunpack.c.h.s8.bf16 %v3755_v47 }
 0x64c   :  { %5142 = vmatpush1.bf16.msra.mxu0 %v4307_v34  ;;  %v3684_v34 = vld [vmem:[#allocation5 + $0x548] sm:$0xff] }
 0x64d   :  { %5183 = vmatpush1.bf16.msra.mxu1 %v4435_v51  ;;  %5143 = vmatprep.subr.bf16.mxu0 %v4300_v1  ;;  %v3748_v51 = vld [vmem:[#allocation5 + $0x748] sm:$0xff]  ;;  %v4379_v1 = vunpack.c.l.s8.bf16 %v3691_v52  ;;  %v4372_v7 = vunpack.c.h.s8.bf16 %v3684_v34  ;;  %v4364_v37 = vunpack.c.l.s8.bf16 %v3684_v34 }
 0x64e   :  { %5184 = vmatprep.subr.bf16.mxu1 %v4428_v35  ;;  %v4507_v35 = vunpack.c.l.s8.bf16 %v3755_v47  ;;  %v4500_v15 = vunpack.c.h.s8.bf16 %v3748_v51  ;;  %v4492_v57 = vunpack.c.l.s8.bf16 %v3748_v51 }
 0x650   :  { %5144 = vmatpush1.bf16.msra.mxu0 %v4299_v42  ;;  %v3683_v42 = vld [vmem:[#allocation5 + $0x540] sm:$0xff] }
 0x651   :  { %5185 = vmatpush1.bf16.msra.mxu1 %v4427_v63  ;;  %5145 = vmatprep.subr.bf16.mxu0 %v4292_v36  ;;  %v3747_v63 = vld [vmem:[#allocation5 + $0x740] sm:$0xff]  ;;  %v4371_v36 = vunpack.c.h.s8.bf16 %v3683_v42 }
 0x652   :  { %5186 = vmatprep.subr.bf16.mxu1 %v4420_v16  ;;  %v4499_v16 = vunpack.c.h.s8.bf16 %v3747_v63 }
 0x654   :  { %5146 = vmatpush1.bf16.msra.mxu0 %v4291_v0  ;;  %v3676_v0 = vld [vmem:[#allocation5 + $0x508] sm:$0xff] }
 0x655   :  { %5187 = vmatpush1.bf16.msra.mxu1 %v4419_v50  ;;  %5147 = vmatprep.subr.bf16.mxu0 %v4284_v33  ;;  %v3740_v50 = vld [vmem:[#allocation5 + $0x708] sm:$0xff]  ;;  %v4363_v33 = vunpack.c.l.s8.bf16 %v3683_v42  ;;  %v4356_v20 = vunpack.c.h.s8.bf16 %v3676_v0  ;;  %v4348_v10 = vunpack.c.l.s8.bf16 %v3676_v0 }
 0x656   :  { %5188 = vmatprep.subr.bf16.mxu1 %v4412_v30  ;;  %v4491_v30 = vunpack.c.l.s8.bf16 %v3747_v63  ;;  %v4484_v14 = vunpack.c.h.s8.bf16 %v3740_v50  ;;  %v4476_v40 = vunpack.c.l.s8.bf16 %v3740_v50 }
 0x658   :  { %5148 = vmatpush1.bf16.msra.mxu0 %v4283_v6  ;;  %v3675_v6 = vld [vmem:[#allocation5 + $0x500] sm:$0xff] }
 0x659   :  { %5189 = vmatpush1.bf16.msra.mxu1 %v4411_v4  ;;  %5149 = vmatprep.subr.bf16.mxu0 %v4404_v62  ;;  %v3739_v4 = vld [vmem:[#allocation5 + $0x700] sm:$0xff]  ;;  %v4355_v62 = vunpack.c.h.s8.bf16 %v3675_v6 }
 0x65a   :  { %5190 = vmatprep.subr.bf16.mxu1 %v4532_v5  ;;  %v4483_v5 = vunpack.c.h.s8.bf16 %v3739_v4 }
 0x65c   :  { %5150 = vmatpush2.bf16.msra.mxu0 %v4403_v23  ;;  %v3796_v23 = vld [vmem:[#allocation5 + $0x8c8] sm:$0xff] }
 0x65d   :  { %5191 = vmatpush2.bf16.msra.mxu1 %v4531_v2  ;;  %5151 = vmatprep.subr.bf16.mxu0 %v4396_v9  ;;  %v3860_v2 = vld [vmem:[#allocation5 + $0xac8] sm:$0xff]  ;;  %v4347_v9 = vunpack.c.l.s8.bf16 %v3675_v6  ;;  %v4596_v27 = vunpack.c.h.s8.bf16 %v3796_v23  ;;  %v4588_v52 = vunpack.c.l.s8.bf16 %v3796_v23 }
 0x65e   :  { %5192 = vmatprep.subr.bf16.mxu1 %v4524_v28  ;;  %v4475_v28 = vunpack.c.l.s8.bf16 %v3739_v4  ;;  %v4724_v26 = vunpack.c.h.s8.bf16 %v3860_v2  ;;  %v4716_v47 = vunpack.c.l.s8.bf16 %v3860_v2 }
 0x660   :  { %5152 = vmatpush2.bf16.msra.mxu0 %v4395_v53  ;;  %v3795_v53 = vld [vmem:[#allocation5 + $0x8c0] sm:$0xff] }
 0x661   :  { %5193 = vmatpush2.bf16.msra.mxu1 %v4523_v21  ;;  %5153 = vmatprep.subr.bf16.mxu0 %v4388_v39  ;;  %v3859_v21 = vld [vmem:[#allocation5 + $0xac0] sm:$0xff]  ;;  %v4595_v39 = vunpack.c.h.s8.bf16 %v3795_v53 }
 0x662   :  { %5194 = vmatprep.subr.bf16.mxu1 %v4516_v49  ;;  %v4723_v49 = vunpack.c.h.s8.bf16 %v3859_v21 }
 0x664   :  { %5154 = vmatpush2.bf16.msra.mxu0 %v4387_v24  ;;  %v3788_v24 = vld [vmem:[#allocation5 + $0x888] sm:$0xff] }
 0x665   :  { %5195 = vmatpush2.bf16.msra.mxu1 %v4515_v3  ;;  %5155 = vmatprep.subr.bf16.mxu0 %v4380_v45  ;;  %v3852_v3 = vld [vmem:[#allocation5 + $0xa88] sm:$0xff]  ;;  %v4587_v45 = vunpack.c.l.s8.bf16 %v3795_v53  ;;  %v4580_v34 = vunpack.c.h.s8.bf16 %v3788_v24  ;;  %v4572_v42 = vunpack.c.l.s8.bf16 %v3788_v24 }
 0x666   :  { %5196 = vmatprep.subr.bf16.mxu1 %v4508_v32  ;;  %v4715_v32 = vunpack.c.l.s8.bf16 %v3859_v21  ;;  %v4708_v51 = vunpack.c.h.s8.bf16 %v3852_v3  ;;  %v4700_v63 = vunpack.c.l.s8.bf16 %v3852_v3 }
 0x668   :  { %5156 = vmatpush2.bf16.msra.mxu0 %v4379_v1  ;;  %v3787_v1 = vld [vmem:[#allocation5 + $0x880] sm:$0xff] }
 0x669   :  { %5197 = vmatpush2.bf16.msra.mxu1 %v4507_v35  ;;  %5157 = vmatprep.subr.bf16.mxu0 %v4372_v7  ;;  %v3851_v35 = vld [vmem:[#allocation5 + $0xa80] sm:$0xff]  ;;  %v4579_v7 = vunpack.c.h.s8.bf16 %v3787_v1 }
 0x66a   :  { %5198 = vmatprep.subr.bf16.mxu1 %v4500_v15  ;;  %v4707_v15 = vunpack.c.h.s8.bf16 %v3851_v35 }
 0x66c   :  { %5158 = vmatpush2.bf16.msra.mxu0 %v4371_v36  ;;  %v3780_v36 = vld [vmem:[#allocation5 + $0x848] sm:$0xff] }
 0x66d   :  { %5199 = vmatpush2.bf16.msra.mxu1 %v4499_v16  ;;  %5159 = vmatprep.subr.bf16.mxu0 %v4364_v37  ;;  %v3844_v16 = vld [vmem:[#allocation5 + $0xa48] sm:$0xff]  ;;  %v4571_v37 = vunpack.c.l.s8.bf16 %v3787_v1  ;;  %v4564_v0 = vunpack.c.h.s8.bf16 %v3780_v36  ;;  %v4556_v6 = vunpack.c.l.s8.bf16 %v3780_v36 }
 0x66e   :  { %5200 = vmatprep.subr.bf16.mxu1 %v4492_v57  ;;  %v4699_v57 = vunpack.c.l.s8.bf16 %v3851_v35  ;;  %v4692_v50 = vunpack.c.h.s8.bf16 %v3844_v16  ;;  %v4684_v4 = vunpack.c.l.s8.bf16 %v3844_v16 }
 0x670   :  { %5160 = vmatpush2.bf16.msra.mxu0 %v4363_v33  ;;  %v3779_v33 = vld [vmem:[#allocation5 + $0x840] sm:$0xff] }
 0x671   :  { %5201 = vmatpush2.bf16.msra.mxu1 %v4491_v30  ;;  %5161 = vmatprep.subr.bf16.mxu0 %v4356_v20  ;;  %v3843_v30 = vld [vmem:[#allocation5 + $0xa40] sm:$0xff]  ;;  %v4563_v20 = vunpack.c.h.s8.bf16 %v3779_v33 }
 0x672   :  { %5202 = vmatprep.subr.bf16.mxu1 %v4484_v14  ;;  %v4691_v14 = vunpack.c.h.s8.bf16 %v3843_v30 }
 0x674   :  { %5162 = vmatpush2.bf16.msra.mxu0 %v4355_v62  ;;  %v3772_v62 = vld [vmem:[#allocation5 + $0x808] sm:$0xff] }
 0x675   :  { %5203 = vmatpush2.bf16.msra.mxu1 %v4483_v5  ;;  %5163 = vmatprep.subr.bf16.mxu0 %v4348_v10  ;;  %v3836_v5 = vld [vmem:[#allocation5 + $0xa08] sm:$0xff]  ;;  %v4555_v10 = vunpack.c.l.s8.bf16 %v3779_v33  ;;  %v4548_v23 = vunpack.c.h.s8.bf16 %v3772_v62  ;;  %v4540_v53 = vunpack.c.l.s8.bf16 %v3772_v62 }
 0x676   :  { %5204 = vmatprep.subr.bf16.mxu1 %v4476_v40  ;;  %v4683_v40 = vunpack.c.l.s8.bf16 %v3843_v30  ;;  %v4676_v2 = vunpack.c.h.s8.bf16 %v3836_v5  ;;  %v4668_v21 = vunpack.c.l.s8.bf16 %v3836_v5 }
 0x678   :  { %5164 = vmatpush2.bf16.msra.mxu0 %v4347_v9  ;;  %v3771_v9 = vld [vmem:[#allocation5 + $0x800] sm:$0xff] }
 0x679   :  { %5205 = vmatpush2.bf16.msra.mxu1 %v4475_v28  ;;  %5215 = vmatprep.subr.bf16.mxu0 %v4596_v27  ;;  %v3835_v28 = vld [vmem:[#allocation5 + $0xa00] sm:$0xff]  ;;  %v4547_v27 = vunpack.c.h.s8.bf16 %v3771_v9 }
 0x67a   :  { %5256 = vmatprep.subr.bf16.mxu1 %v4724_v26  ;;  %v4675_v26 = vunpack.c.h.s8.bf16 %v3835_v28 }
 0x67b   :  { %5166 = vmatmul.mubr.bf16.vlgmr.msra.gmra.mxu0 %v9208_v18 }
 0x67c   :  { %5207 = vmatmul.mubr.bf16.vlgmr.msra.gmra.mxu1 %v9228_v25  ;;  %5216 = vmatpush1.bf16.msra.mxu0 %v4595_v39  ;;  %v3828_v39 = vld [vmem:[#allocation5 + $0x9c8] sm:$0xff] }
 0x67d   :  { %5257 = vmatpush1.bf16.msra.mxu1 %v4723_v49  ;;  %5217 = vmatprep.subr.bf16.mxu0 %v4588_v52  ;;  %v3892_v49 = vld [vmem:[#allocation5 + $0xbc8] sm:$0xff]  ;;  %v4539_v52 = vunpack.c.l.s8.bf16 %v3771_v9  ;;  %v4660_v24 = vunpack.c.h.s8.bf16 %v3828_v39  ;;  %v4652_v1 = vunpack.c.l.s8.bf16 %v3828_v39 }
 0x67e   :  { %5258 = vmatprep.subr.bf16.mxu1 %v4716_v47  ;;  %5247 = vmatprep.mubr.bf16.mxu0 %v9250_v48  ;;  %v4667_v47 = vunpack.c.l.s8.bf16 %v3835_v28  ;;  %v4788_v3 = vunpack.c.h.s8.bf16 %v3892_v49  ;;  %v4780_v35 = vunpack.c.l.s8.bf16 %v3892_v49 }
 0x67f   :  { %5288 = vmatprep.mubr.bf16.mxu1 %v9264_v29 }
 0x680   :  { %5218 = vmatpush1.bf16.msra.mxu0 %v4587_v45  ;;  %v3827_v45 = vld [vmem:[#allocation5 + $0x9c0] sm:$0xff] }
 0x681   :  { %5259 = vmatpush1.bf16.msra.mxu1 %v4715_v32  ;;  %5219 = vmatprep.subr.bf16.mxu0 %v4580_v34  ;;  %v3891_v32 = vld [vmem:[#allocation5 + $0xbc0] sm:$0xff]  ;;  %v4659_v34 = vunpack.c.h.s8.bf16 %v3827_v45 }
 0x682   :  { %5260 = vmatprep.subr.bf16.mxu1 %v4708_v51  ;;  %v4787_v51 = vunpack.c.h.s8.bf16 %v3891_v32 }
 0x684   :  { %5220 = vmatpush1.bf16.msra.mxu0 %v4579_v7  ;;  %v3820_v7 = vld [vmem:[#allocation5 + $0x988] sm:$0xff] }
 0x685   :  { %5261 = vmatpush1.bf16.msra.mxu1 %v4707_v15  ;;  %5221 = vmatprep.subr.bf16.mxu0 %v4572_v42  ;;  %v3884_v15 = vld [vmem:[#allocation5 + $0xb88] sm:$0xff]  ;;  %v4651_v42 = vunpack.c.l.s8.bf16 %v3827_v45  ;;  %v4644_v36 = vunpack.c.h.s8.bf16 %v3820_v7  ;;  %v4636_v33 = vunpack.c.l.s8.bf16 %v3820_v7 }
 0x686   :  { %5262 = vmatprep.subr.bf16.mxu1 %v4700_v63  ;;  %v4779_v63 = vunpack.c.l.s8.bf16 %v3891_v32  ;;  %v4772_v16 = vunpack.c.h.s8.bf16 %v3884_v15  ;;  %v4764_v30 = vunpack.c.l.s8.bf16 %v3884_v15 }
 0x688   :  { %5222 = vmatpush1.bf16.msra.mxu0 %v4571_v37  ;;  %v3819_v37 = vld [vmem:[#allocation5 + $0x980] sm:$0xff] }
 0x689   :  { %5263 = vmatpush1.bf16.msra.mxu1 %v4699_v57  ;;  %5223 = vmatprep.subr.bf16.mxu0 %v4564_v0  ;;  %v3883_v57 = vld [vmem:[#allocation5 + $0xb80] sm:$0xff]  ;;  %v4643_v0 = vunpack.c.h.s8.bf16 %v3819_v37 }
 0x68a   :  { %5264 = vmatprep.subr.bf16.mxu1 %v4692_v50  ;;  %v4771_v50 = vunpack.c.h.s8.bf16 %v3883_v57 }
 0x68c   :  { %5224 = vmatpush1.bf16.msra.mxu0 %v4563_v20  ;;  %v3812_v20 = vld [vmem:[#allocation5 + $0x948] sm:$0xff] }
 0x68d   :  { %5265 = vmatpush1.bf16.msra.mxu1 %v4691_v14  ;;  %5225 = vmatprep.subr.bf16.mxu0 %v4556_v6  ;;  %v3876_v14 = vld [vmem:[#allocation5 + $0xb48] sm:$0xff]  ;;  %v4635_v6 = vunpack.c.l.s8.bf16 %v3819_v37  ;;  %v4628_v62 = vunpack.c.h.s8.bf16 %v3812_v20  ;;  %v4620_v9 = vunpack.c.l.s8.bf16 %v3812_v20 }
 0x68e   :  { %5266 = vmatprep.subr.bf16.mxu1 %v4684_v4  ;;  %v4763_v4 = vunpack.c.l.s8.bf16 %v3883_v57  ;;  %v4756_v5 = vunpack.c.h.s8.bf16 %v3876_v14  ;;  %v4748_v28 = vunpack.c.l.s8.bf16 %v3876_v14 }
 0x690   :  { %5226 = vmatpush1.bf16.msra.mxu0 %v4555_v10  ;;  %v3811_v10 = vld [vmem:[#allocation5 + $0x940] sm:$0xff] }
 0x691   :  { %5267 = vmatpush1.bf16.msra.mxu1 %v4683_v40  ;;  %5227 = vmatprep.subr.bf16.mxu0 %v4548_v23  ;;  %v3875_v40 = vld [vmem:[#allocation5 + $0xb40] sm:$0xff]  ;;  %v4627_v23 = vunpack.c.h.s8.bf16 %v3811_v10 }
 0x692   :  { %5268 = vmatprep.subr.bf16.mxu1 %v4676_v2  ;;  %v4755_v2 = vunpack.c.h.s8.bf16 %v3875_v40 }
 0x694   :  { %5228 = vmatpush1.bf16.msra.mxu0 %v4547_v27  ;;  %v3804_v27 = vld [vmem:[#allocation5 + $0x908] sm:$0xff] }
 0x695   :  { %5269 = vmatpush1.bf16.msra.mxu1 %v4675_v26  ;;  %5229 = vmatprep.subr.bf16.mxu0 %v4540_v53  ;;  %v3868_v26 = vld [vmem:[#allocation5 + $0xb08] sm:$0xff]  ;;  %v4619_v53 = vunpack.c.l.s8.bf16 %v3811_v10  ;;  %v4612_v39 = vunpack.c.h.s8.bf16 %v3804_v27  ;;  %v4604_v45 = vunpack.c.l.s8.bf16 %v3804_v27 }
 0x696   :  { %5270 = vmatprep.subr.bf16.mxu1 %v4668_v21  ;;  %v4747_v21 = vunpack.c.l.s8.bf16 %v3875_v40  ;;  %v4740_v49 = vunpack.c.h.s8.bf16 %v3868_v26  ;;  %v4732_v32 = vunpack.c.l.s8.bf16 %v3868_v26 }
 0x698   :  { %5230 = vmatpush1.bf16.msra.mxu0 %v4539_v52  ;;  %v3803_v52 = vld [vmem:[#allocation5 + $0x900] sm:$0xff] }
 0x699   :  { %5271 = vmatpush1.bf16.msra.mxu1 %v4667_v47  ;;  %5231 = vmatprep.subr.bf16.mxu0 %v4660_v24  ;;  %v3867_v47 = vld [vmem:[#allocation5 + $0xb00] sm:$0xff]  ;;  %v4611_v24 = vunpack.c.h.s8.bf16 %v3803_v52 }
 0x69a   :  { %5272 = vmatprep.subr.bf16.mxu1 %v4788_v3  ;;  %v4739_v3 = vunpack.c.h.s8.bf16 %v3867_v47 }
 0x69c   :  { %5232 = vmatpush2.bf16.msra.mxu0 %v4659_v34  ;;  %v3924_v34 = vld [vmem:[#allocation5 + $0xcc8] sm:$0xff] }
 0x69d   :  { %5273 = vmatpush2.bf16.msra.mxu1 %v4787_v51  ;;  %5233 = vmatprep.subr.bf16.mxu0 %v4652_v1  ;;  %v3988_v51 = vld [vmem:[#allocation5 + $0xec8] sm:$0xff]  ;;  %v4603_v1 = vunpack.c.l.s8.bf16 %v3803_v52  ;;  %v4852_v7 = vunpack.c.h.s8.bf16 %v3924_v34  ;;  %v4844_v37 = vunpack.c.l.s8.bf16 %v3924_v34 }
 0x69e   :  { %5274 = vmatprep.subr.bf16.mxu1 %v4780_v35  ;;  %v4731_v35 = vunpack.c.l.s8.bf16 %v3867_v47  ;;  %v4980_v15 = vunpack.c.h.s8.bf16 %v3988_v51  ;;  %v4972_v57 = vunpack.c.l.s8.bf16 %v3988_v51 }
 0x6a0   :  { %5234 = vmatpush2.bf16.msra.mxu0 %v4651_v42  ;;  %v3923_v42 = vld [vmem:[#allocation5 + $0xcc0] sm:$0xff] }
 0x6a1   :  { %5275 = vmatpush2.bf16.msra.mxu1 %v4779_v63  ;;  %5235 = vmatprep.subr.bf16.mxu0 %v4644_v36  ;;  %v3987_v63 = vld [vmem:[#allocation5 + $0xec0] sm:$0xff]  ;;  %v4851_v36 = vunpack.c.h.s8.bf16 %v3923_v42 }
 0x6a2   :  { %5276 = vmatprep.subr.bf16.mxu1 %v4772_v16  ;;  %v4979_v16 = vunpack.c.h.s8.bf16 %v3987_v63 }
 0x6a4   :  { %5236 = vmatpush2.bf16.msra.mxu0 %v4643_v0  ;;  %v3916_v0 = vld [vmem:[#allocation5 + $0xc88] sm:$0xff] }
 0x6a5   :  { %5277 = vmatpush2.bf16.msra.mxu1 %v4771_v50  ;;  %5237 = vmatprep.subr.bf16.mxu0 %v4636_v33  ;;  %v3980_v50 = vld [vmem:[#allocation5 + $0xe88] sm:$0xff]  ;;  %v4843_v33 = vunpack.c.l.s8.bf16 %v3923_v42  ;;  %v4836_v20 = vunpack.c.h.s8.bf16 %v3916_v0  ;;  %v4828_v10 = vunpack.c.l.s8.bf16 %v3916_v0 }
 0x6a6   :  { %5278 = vmatprep.subr.bf16.mxu1 %v4764_v30  ;;  %v4971_v30 = vunpack.c.l.s8.bf16 %v3987_v63  ;;  %v4964_v14 = vunpack.c.h.s8.bf16 %v3980_v50  ;;  %v4956_v40 = vunpack.c.l.s8.bf16 %v3980_v50 }
 0x6a8   :  { %5238 = vmatpush2.bf16.msra.mxu0 %v4635_v6  ;;  %v3915_v6 = vld [vmem:[#allocation5 + $0xc80] sm:$0xff] }
 0x6a9   :  { %5279 = vmatpush2.bf16.msra.mxu1 %v4763_v4  ;;  %5239 = vmatprep.subr.bf16.mxu0 %v4628_v62  ;;  %v3979_v4 = vld [vmem:[#allocation5 + $0xe80] sm:$0xff]  ;;  %v4835_v62 = vunpack.c.h.s8.bf16 %v3915_v6 }
 0x6aa   :  { %5280 = vmatprep.subr.bf16.mxu1 %v4756_v5  ;;  %v4963_v5 = vunpack.c.h.s8.bf16 %v3979_v4 }
 0x6ac   :  { %5240 = vmatpush2.bf16.msra.mxu0 %v4627_v23  ;;  %v3908_v23 = vld [vmem:[#allocation5 + $0xc48] sm:$0xff] }
 0x6ad   :  { %5281 = vmatpush2.bf16.msra.mxu1 %v4755_v2  ;;  %5241 = vmatprep.subr.bf16.mxu0 %v4620_v9  ;;  %v3972_v2 = vld [vmem:[#allocation5 + $0xe48] sm:$0xff]  ;;  %v4827_v9 = vunpack.c.l.s8.bf16 %v3915_v6  ;;  %v4820_v27 = vunpack.c.h.s8.bf16 %v3908_v23  ;;  %v4812_v52 = vunpack.c.l.s8.bf16 %v3908_v23 }
 0x6ae   :  { %5282 = vmatprep.subr.bf16.mxu1 %v4748_v28  ;;  %v4955_v28 = vunpack.c.l.s8.bf16 %v3979_v4  ;;  %v4948_v26 = vunpack.c.h.s8.bf16 %v3972_v2  ;;  %v4940_v47 = vunpack.c.l.s8.bf16 %v3972_v2 }
 0x6b0   :  { %5242 = vmatpush2.bf16.msra.mxu0 %v4619_v53  ;;  %v3907_v53 = vld [vmem:[#allocation5 + $0xc40] sm:$0xff] }
 0x6b1   :  { %5283 = vmatpush2.bf16.msra.mxu1 %v4747_v21  ;;  %5243 = vmatprep.subr.bf16.mxu0 %v4612_v39  ;;  %v3971_v21 = vld [vmem:[#allocation5 + $0xe40] sm:$0xff]  ;;  %v4819_v39 = vunpack.c.h.s8.bf16 %v3907_v53 }
 0x6b2   :  { %5284 = vmatprep.subr.bf16.mxu1 %v4740_v49  ;;  %v4947_v49 = vunpack.c.h.s8.bf16 %v3971_v21 }
 0x6b4   :  { %5244 = vmatpush2.bf16.msra.mxu0 %v4611_v24  ;;  %v3900_v24 = vld [vmem:[#allocation5 + $0xc08] sm:$0xff] }
 0x6b5   :  { %5285 = vmatpush2.bf16.msra.mxu1 %v4739_v3  ;;  %5245 = vmatprep.subr.bf16.mxu0 %v4604_v45  ;;  %v3964_v3 = vld [vmem:[#allocation5 + $0xe08] sm:$0xff]  ;;  %v4811_v45 = vunpack.c.l.s8.bf16 %v3907_v53  ;;  %v4804_v34 = vunpack.c.h.s8.bf16 %v3900_v24  ;;  %v4796_v42 = vunpack.c.l.s8.bf16 %v3900_v24 }
 0x6b6   :  { %5286 = vmatprep.subr.bf16.mxu1 %v4732_v32  ;;  %v4939_v32 = vunpack.c.l.s8.bf16 %v3971_v21  ;;  %v4932_v51 = vunpack.c.h.s8.bf16 %v3964_v3  ;;  %v4924_v63 = vunpack.c.l.s8.bf16 %v3964_v3 }
 0x6b8   :  { %5246 = vmatpush2.bf16.msra.mxu0 %v4603_v1  ;;  %v3899_v1 = vld [vmem:[#allocation5 + $0xc00] sm:$0xff] }
 0x6b9   :  { %5287 = vmatpush2.bf16.msra.mxu1 %v4731_v35  ;;  %5297 = vmatprep.subr.bf16.mxu0 %v4852_v7  ;;  %v3963_v35 = vld [vmem:[#allocation5 + $0xe00] sm:$0xff]  ;;  %v4803_v7 = vunpack.c.h.s8.bf16 %v3899_v1 }
 0x6ba   :  { %5338 = vmatprep.subr.bf16.mxu1 %v4980_v15  ;;  %v4931_v15 = vunpack.c.h.s8.bf16 %v3963_v35 }
 0x6bb   :  { %5248 = vmatmul.mubr.bf16.vlgmr.msra.gmra.mxu0 %v9248_v12 }
 0x6bc   :  { %5289 = vmatmul.mubr.bf16.vlgmr.msra.gmra.mxu1 %v9262_v19  ;;  %5298 = vmatpush1.bf16.msra.mxu0 %v4851_v36  ;;  %v3956_v36 = vld [vmem:[#allocation5 + $0xdc8] sm:$0xff] }
 0x6bd   :  { %5339 = vmatpush1.bf16.msra.mxu1 %v4979_v16  ;;  %5299 = vmatprep.subr.bf16.mxu0 %v4844_v37  ;;  %v4020_v16 = vld [vmem:[#allocation5 + $0xfc8] sm:$0xff]  ;;  %v4795_v37 = vunpack.c.l.s8.bf16 %v3899_v1  ;;  %v4916_v0 = vunpack.c.h.s8.bf16 %v3956_v36  ;;  %v4908_v6 = vunpack.c.l.s8.bf16 %v3956_v36 }
 0x6be   :  { %5340 = vmatprep.subr.bf16.mxu1 %v4972_v57  ;;  %5329 = vmatprep.mubr.bf16.mxu0 %v9278_v61  ;;  %v4923_v57 = vunpack.c.l.s8.bf16 %v3963_v35  ;;  %v5044_v50 = vunpack.c.h.s8.bf16 %v4020_v16  ;;  %v5036_v4 = vunpack.c.l.s8.bf16 %v4020_v16 }
 0x6bf   :  { %5370 = vmatprep.mubr.bf16.mxu1 %v9292_v17 }
 0x6c0   :  { %5300 = vmatpush1.bf16.msra.mxu0 %v4843_v33  ;;  %v3955_v33 = vld [vmem:[#allocation5 + $0xdc0] sm:$0xff] }
 0x6c1   :  { %5341 = vmatpush1.bf16.msra.mxu1 %v4971_v30  ;;  %5301 = vmatprep.subr.bf16.mxu0 %v4836_v20  ;;  %v4019_v30 = vld [vmem:[#allocation5 + $0xfc0] sm:$0xff]  ;;  %v4915_v20 = vunpack.c.h.s8.bf16 %v3955_v33 }
 0x6c2   :  { %5342 = vmatprep.subr.bf16.mxu1 %v4964_v14  ;;  %v5043_v14 = vunpack.c.h.s8.bf16 %v4019_v30 }
 0x6c4   :  { %5302 = vmatpush1.bf16.msra.mxu0 %v4835_v62  ;;  %v3948_v62 = vld [vmem:[#allocation5 + $0xd88] sm:$0xff] }
 0x6c5   :  { %5343 = vmatpush1.bf16.msra.mxu1 %v4963_v5  ;;  %5303 = vmatprep.subr.bf16.mxu0 %v4828_v10  ;;  %v4012_v5 = vld [vmem:[#allocation5 + $0xf88] sm:$0xff]  ;;  %v4907_v10 = vunpack.c.l.s8.bf16 %v3955_v33  ;;  %v4900_v23 = vunpack.c.h.s8.bf16 %v3948_v62  ;;  %v4892_v53 = vunpack.c.l.s8.bf16 %v3948_v62 }
 0x6c6   :  { %5344 = vmatprep.subr.bf16.mxu1 %v4956_v40  ;;  %v5035_v40 = vunpack.c.l.s8.bf16 %v4019_v30  ;;  %v5028_v2 = vunpack.c.h.s8.bf16 %v4012_v5  ;;  %v5020_v21 = vunpack.c.l.s8.bf16 %v4012_v5 }
 0x6c8   :  { %5304 = vmatpush1.bf16.msra.mxu0 %v4827_v9  ;;  %v3947_v9 = vld [vmem:[#allocation5 + $0xd80] sm:$0xff] }
 0x6c9   :  { %5345 = vmatpush1.bf16.msra.mxu1 %v4955_v28  ;;  %5305 = vmatprep.subr.bf16.mxu0 %v4820_v27  ;;  %v4011_v28 = vld [vmem:[#allocation5 + $0xf80] sm:$0xff]  ;;  %v4899_v27 = vunpack.c.h.s8.bf16 %v3947_v9 }
 0x6ca   :  { %5346 = vmatprep.subr.bf16.mxu1 %v4948_v26  ;;  %v5027_v26 = vunpack.c.h.s8.bf16 %v4011_v28 }
 0x6cc   :  { %5306 = vmatpush1.bf16.msra.mxu0 %v4819_v39  ;;  %v3940_v39 = vld [vmem:[#allocation5 + $0xd48] sm:$0xff] }
 0x6cd   :  { %5347 = vmatpush1.bf16.msra.mxu1 %v4947_v49  ;;  %5307 = vmatprep.subr.bf16.mxu0 %v4812_v52  ;;  %v4004_v49 = vld [vmem:[#allocation5 + $0xf48] sm:$0xff]  ;;  %v4891_v52 = vunpack.c.l.s8.bf16 %v3947_v9  ;;  %v4884_v24 = vunpack.c.h.s8.bf16 %v3940_v39  ;;  %v4876_v1 = vunpack.c.l.s8.bf16 %v3940_v39 }
 0x6ce   :  { %5348 = vmatprep.subr.bf16.mxu1 %v4940_v47  ;;  %v5019_v47 = vunpack.c.l.s8.bf16 %v4011_v28  ;;  %v5012_v3 = vunpack.c.h.s8.bf16 %v4004_v49  ;;  %v5004_v35 = vunpack.c.l.s8.bf16 %v4004_v49 }
 0x6d0   :  { %5308 = vmatpush1.bf16.msra.mxu0 %v4811_v45  ;;  %v3939_v45 = vld [vmem:[#allocation5 + $0xd40] sm:$0xff] }
 0x6d1   :  { %5349 = vmatpush1.bf16.msra.mxu1 %v4939_v32  ;;  %5309 = vmatprep.subr.bf16.mxu0 %v4804_v34  ;;  %v4003_v32 = vld [vmem:[#allocation5 + $0xf40] sm:$0xff]  ;;  %v4883_v34 = vunpack.c.h.s8.bf16 %v3939_v45 }
 0x6d2   :  { %5350 = vmatprep.subr.bf16.mxu1 %v4932_v51  ;;  %v5011_v51 = vunpack.c.h.s8.bf16 %v4003_v32 }
 0x6d4   :  { %5310 = vmatpush1.bf16.msra.mxu0 %v4803_v7  ;;  %v3932_v7 = vld [vmem:[#allocation5 + $0xd08] sm:$0xff] }
 0x6d5   :  { %5351 = vmatpush1.bf16.msra.mxu1 %v4931_v15  ;;  %5311 = vmatprep.subr.bf16.mxu0 %v4796_v42  ;;  %v3996_v15 = vld [vmem:[#allocation5 + $0xf08] sm:$0xff]  ;;  %v4875_v42 = vunpack.c.l.s8.bf16 %v3939_v45  ;;  %v4868_v36 = vunpack.c.h.s8.bf16 %v3932_v7  ;;  %v4860_v33 = vunpack.c.l.s8.bf16 %v3932_v7 }
 0x6d6   :  { %5352 = vmatprep.subr.bf16.mxu1 %v4924_v63  ;;  %v5003_v63 = vunpack.c.l.s8.bf16 %v4003_v32  ;;  %v4996_v16 = vunpack.c.h.s8.bf16 %v3996_v15  ;;  %v4988_v30 = vunpack.c.l.s8.bf16 %v3996_v15  ;;  %v3533_v32 = vld [vmem:[#allocation5 + $0x90] sm:$0xff] }
 0x6d7   :  { %v4069_v7 = vunpack.c.h.s8.bf16 %v3533_v32 }
 0x6d8   :  { %5312 = vmatpush1.bf16.msra.mxu0 %v4795_v37  ;;  %v3931_v37 = vld [vmem:[#allocation5 + $0xd00] sm:$0xff] }
 0x6d9   :  { %5353 = vmatpush1.bf16.msra.mxu1 %v4923_v57  ;;  %5313 = vmatprep.subr.bf16.mxu0 %v4916_v0  ;;  %v3995_v57 = vld [vmem:[#allocation5 + $0xf00] sm:$0xff]  ;;  %v4867_v0 = vunpack.c.h.s8.bf16 %v3931_v37 }
 0x6da   :  { %5354 = vmatprep.subr.bf16.mxu1 %v5044_v50  ;;  %v4995_v50 = vunpack.c.h.s8.bf16 %v3995_v57 }
 0x6dc   :  { %5314 = vmatpush2.bf16.msra.mxu0 %v4915_v20  ;;  %v3542_v20 = vld [vmem:[#allocation5 + $0xd8] sm:$0xff] }
 0x6dd   :  { %5355 = vmatpush2.bf16.msra.mxu1 %v5043_v14  ;;  %5315 = vmatprep.subr.bf16.mxu0 %v4908_v6  ;;  %v3606_v14 = vld [vmem:[#allocation5 + $0x2d8] sm:$0xff]  ;;  %v4859_v6 = vunpack.c.l.s8.bf16 %v3931_v37  ;;  %v4086_v62 = vunpack.c.h.s8.bf16 %v3542_v20  ;;  %v4078_v9 = vunpack.c.l.s8.bf16 %v3542_v20  ;;  %v3525_v20 = vld [vmem:[#allocation5 + $0x50] sm:$0xff] }
 0x6de   :  { %5356 = vmatprep.subr.bf16.mxu1 %v5036_v4  ;;  %v4987_v4 = vunpack.c.l.s8.bf16 %v3995_v57  ;;  %v4214_v5 = vunpack.c.h.s8.bf16 %v3606_v14  ;;  %v4206_v28 = vunpack.c.l.s8.bf16 %v3606_v14  ;;  %v3526_v37 = vld [vmem:[#allocation5 + $0x58] sm:$0xff]  ;;  %v3589_v14 = vld [vmem:[#allocation5 + $0x250] sm:$0xff] }
 0x6df   :  { %v3590_v57 = vld [vmem:[#allocation5 + $0x258] sm:$0xff] }
 0x6e0   :  { %5316 = vmatpush2.bf16.msra.mxu0 %v4907_v10  ;;  %v3541_v10 = vld [vmem:[#allocation5 + $0xd0] sm:$0xff] }
 0x6e1   :  { %5357 = vmatpush2.bf16.msra.mxu1 %v5035_v40  ;;  %5317 = vmatprep.subr.bf16.mxu0 %v4900_v23  ;;  %v3605_v40 = vld [vmem:[#allocation5 + $0x2d0] sm:$0xff]  ;;  %v4085_v23 = vunpack.c.h.s8.bf16 %v3541_v10  ;;  %v4077_v49 = vunpack.c.l.s8.bf16 %v3541_v10  ;;  %v3518_v10 = vld [vmem:[#allocation5 + $0x18] sm:$0xff] }
 0x6e2   :  { %5358 = vmatprep.subr.bf16.mxu1 %v5028_v2  ;;  %v4213_v2 = vunpack.c.h.s8.bf16 %v3605_v40 }
 0x6e4   :  { %5318 = vmatpush2.bf16.msra.mxu0 %v4899_v27  ;;  %v3534_v27 = vld [vmem:[#allocation5 + $0x98] sm:$0xff] }
 0x6e5   :  { %5359 = vmatpush2.bf16.msra.mxu1 %v5027_v26  ;;  %5319 = vmatprep.subr.bf16.mxu0 %v4892_v53  ;;  %v3598_v26 = vld [vmem:[#allocation5 + $0x298] sm:$0xff] }
 0x6e6   :  { %5360 = vmatprep.subr.bf16.mxu1 %v5020_v21  ;;  %v4198_v45 = vunpack.c.h.s8.bf16 %v3598_v26 }
 0x6e8   :  { %5320 = vmatpush2.bf16.msra.mxu0 %v4891_v52  ;;  %v4205_v52 = vunpack.c.l.s8.bf16 %v3605_v40  ;;  %v3582_v40 = vld [vmem:[#allocation5 + $0x218] sm:$0xff] }
 0x6e9   :  { %5361 = vmatpush2.bf16.msra.mxu1 %v5019_v47  ;;  %5321 = vmatprep.subr.bf16.mxu0 %v4884_v24 }
 0x6ea   :  { %5362 = vmatprep.subr.bf16.mxu1 %v5012_v3  ;;  %v4070_v3 = vunpack.c.h.s8.bf16 %v3534_v27 }
 0x6ec   :  { %5322 = vmatpush2.bf16.msra.mxu0 %v4883_v34  ;;  %v3597_v34 = vld [vmem:[#allocation5 + $0x290] sm:$0xff] }
 0x6ed   :  { %5363 = vmatpush2.bf16.msra.mxu1 %v5011_v51  ;;  %5323 = vmatprep.subr.bf16.mxu0 %v4876_v1  ;;  %v4197_v15 = vunpack.c.h.s8.bf16 %v3597_v34 }
 0x6ee   :  { %5364 = vmatprep.subr.bf16.mxu1 %v5004_v35 }
 0x6f0   :  { %5324 = vmatpush2.bf16.msra.mxu0 %v4875_v42 }
 0x6f1   :  { %5365 = vmatpush2.bf16.msra.mxu1 %v5003_v63  ;;  %5325 = vmatprep.subr.bf16.mxu0 %v4868_v36  ;;  %v4062_v36 = vunpack.c.l.s8.bf16 %v3534_v27  ;;  %v3517_v27 = vld [vmem:[#allocation5 + $0x10] sm:$0xff] }
 0x6f2   :  { %5366 = vmatprep.subr.bf16.mxu1 %v4996_v16  ;;  %v4190_v16 = vunpack.c.l.s8.bf16 %v3598_v26  ;;  %v3581_v26 = vld [vmem:[#allocation5 + $0x210] sm:$0xff] }
 0x6f4   :  { %5326 = vmatpush2.bf16.msra.mxu0 %v4867_v0  ;;  %v4061_v0 = vunpack.c.l.s8.bf16 %v3533_v32 }
 0x6f5   :  { %5367 = vmatpush2.bf16.msra.mxu1 %v4995_v50  ;;  %5327 = vmatprep.subr.bf16.mxu0 %v4860_v33  ;;  %v4189_v50 = vunpack.c.l.s8.bf16 %v3597_v34  ;;  %v4054_v33 = vunpack.c.h.s8.bf16 %v3526_v37 }
 0x6f6   :  { %5368 = vmatprep.subr.bf16.mxu1 %v4988_v30  ;;  %v4182_v30 = vunpack.c.h.s8.bf16 %v3590_v57 }
 0x6f8   :  { %5328 = vmatpush2.bf16.msra.mxu0 %v4859_v6  ;;  %v4053_v6 = vunpack.c.h.s8.bf16 %v3525_v20 }
 0x6f9   :  { %5369 = vmatpush2.bf16.msra.mxu1 %v4987_v4  ;;  %5379 = vmatprep.subr.bf16.mxu0 %v4086_v62  ;;  %v4181_v4 = vunpack.c.h.s8.bf16 %v3589_v14  ;;  %v4046_v62 = vunpack.c.l.s8.bf16 %v3526_v37 }
 0x6fa   :  { %5420 = vmatprep.subr.bf16.mxu1 %v4214_v5  ;;  %v4174_v5 = vunpack.c.l.s8.bf16 %v3590_v57 }
 0x6fb   :  { %v5085_v53 = vpop.f32.mrf.mxu0  ;;  %5330 = vmatmul.mubr.bf16.vlgmr.msra.gmra.mxu0 %v9276_v44 }
 0x6fc   :  { %v5126_v21 = vpop.f32.mrf.mxu1  ;;  %5371 = vmatmul.mubr.bf16.vlgmr.msra.gmra.mxu1 %v9290_v31  ;;  %5380 = vmatpush1.bf16.msra.mxu0 %v4085_v23  ;;  %v4045_v23 = vunpack.c.l.s8.bf16 %v3525_v20 }
 0x6fd   :  { %v9310_v39 = vadd.f32 %v5126_v21, %v5085_v53  ;;  %5421 = vmatpush1.bf16.msra.mxu1 %v4213_v2  ;;  %v5087_v47 = vpop.f32.mrf.mxu0  ;;  %5381 = vmatprep.subr.bf16.mxu0 %v4078_v9  ;;  %v4173_v2 = vunpack.c.l.s8.bf16 %v3589_v14  ;;  %v4038_v9 = vunpack.c.h.s8.bf16 %v3518_v10  ;;  %v4037_v53 = vunpack.c.h.s8.bf16 %v3517_v27 }
 0x6fe   :  { %v5128_v24 = vpop.f32.mrf.mxu1  ;;  %5422 = vmatprep.subr.bf16.mxu1 %v4206_v28  ;;  %5411 = vmatprep.mubr.bf16.mxu0 %v9168_v41  ;;  %v4166_v28 = vunpack.c.h.s8.bf16 %v3582_v40  ;;  %v4165_v21 = vunpack.c.h.s8.bf16 %v3581_v26 }
 0x6ff   :  { %v9312_v51 = vadd.f32 %v5128_v24, %v5087_v47  ;;  %5452 = vmatprep.mubr.bf16.mxu1 %v9186_v58  ;;  %v5089_v1 = vpop.f32.mrf.mxu0  ;;  %v3574_v47 = vld [vmem:[#allocation5 + $0x1d8] sm:$0xff] }
 0x700   :  { %v5130_v35 = vpop.f32.mrf.mxu1  ;;  %5382 = vmatpush1.bf16.msra.mxu0 %v4077_v49  ;;  %v4030_v49 = vunpack.c.l.s8.bf16 %v3518_v10  ;;  %v3638_v24 = vld [vmem:[#allocation5 + $0x3d8] sm:$0xff]  ;;  %v4150_v32 = vunpack.c.h.s8.bf16 %v3574_v47  ;;  %v3573_v1 = vld [vmem:[#allocation5 + $0x1d0] sm:$0xff] }
 0x701   :  { %5423 = vmatpush1.bf16.msra.mxu1 %v4205_v52  ;;  %v5090_v42 = vpop.f32.mrf.mxu0  ;;  %5383 = vmatprep.subr.bf16.mxu0 %v4070_v3  ;;  %v4158_v52 = vunpack.c.l.s8.bf16 %v3582_v40  ;;  %v4029_v3 = vunpack.c.l.s8.bf16 %v3517_v27  ;;  %v4278_v34 = vunpack.c.h.s8.bf16 %v3638_v24  ;;  %v3637_v35 = vld [vmem:[#allocation5 + $0x3d0] sm:$0xff]  ;;  %v4141_v37 = vunpack.c.l.s8.bf16 %v3573_v1 }
 0x702   :  { %v5131_v63 = vpop.f32.mrf.mxu1  ;;  %5424 = vmatprep.subr.bf16.mxu1 %v4198_v45  ;;  %v4157_v45 = vunpack.c.l.s8.bf16 %v3581_v26  ;;  %v4142_v42 = vunpack.c.l.s8.bf16 %v3574_v47  ;;  %v4269_v57 = vunpack.c.l.s8.bf16 %v3637_v35 }
 0x703   :  { %v4270_v63 = vunpack.c.l.s8.bf16 %v3638_v24 }
 0x704   :  { %5384 = vmatpush1.bf16.msra.mxu0 %v4069_v7  ;;  %v4149_v7 = vunpack.c.h.s8.bf16 %v3573_v1 }
 0x705   :  { %5425 = vmatpush1.bf16.msra.mxu1 %v4197_v15  ;;  %5385 = vmatprep.subr.bf16.mxu0 %v4062_v36  ;;  %v4277_v15 = vunpack.c.h.s8.bf16 %v3637_v35  ;;  %v3566_v36 = vld [vmem:[#allocation5 + $0x198] sm:$0xff] }
 0x706   :  { %5426 = vmatprep.subr.bf16.mxu1 %v4190_v16  ;;  %v3630_v16 = vld [vmem:[#allocation5 + $0x398] sm:$0xff] }
 0x708   :  { %5386 = vmatpush1.bf16.msra.mxu0 %v4061_v0  ;;  %v4134_v0 = vunpack.c.h.s8.bf16 %v3566_v36 }
 0x709   :  { %5427 = vmatpush1.bf16.msra.mxu1 %v4189_v50  ;;  %5387 = vmatprep.subr.bf16.mxu0 %v4054_v33  ;;  %v4262_v50 = vunpack.c.h.s8.bf16 %v3630_v16  ;;  %v3565_v33 = vld [vmem:[#allocation5 + $0x190] sm:$0xff] }
 0x70a   :  { %5428 = vmatprep.subr.bf16.mxu1 %v4182_v30  ;;  %v3629_v30 = vld [vmem:[#allocation5 + $0x390] sm:$0xff]  ;;  %v4133_v20 = vunpack.c.h.s8.bf16 %v3565_v33  ;;  %v4125_v10 = vunpack.c.l.s8.bf16 %v3565_v33 }
 0x70b   :  { %v4261_v14 = vunpack.c.h.s8.bf16 %v3629_v30  ;;  %v4253_v40 = vunpack.c.l.s8.bf16 %v3629_v30 }
 0x70c   :  { %5388 = vmatpush1.bf16.msra.mxu0 %v4053_v6  ;;  %v4126_v6 = vunpack.c.l.s8.bf16 %v3566_v36 }
 0x70d   :  { %5429 = vmatpush1.bf16.msra.mxu1 %v4181_v4  ;;  %5389 = vmatprep.subr.bf16.mxu0 %v4046_v62  ;;  %v4254_v4 = vunpack.c.l.s8.bf16 %v3630_v16  ;;  %v3558_v62 = vld [vmem:[#allocation5 + $0x158] sm:$0xff] }
 0x70e   :  { %5430 = vmatprep.subr.bf16.mxu1 %v4174_v5  ;;  %v3622_v5 = vld [vmem:[#allocation5 + $0x358] sm:$0xff] }
 0x710   :  { %5390 = vmatpush1.bf16.msra.mxu0 %v4045_v23  ;;  %v4118_v23 = vunpack.c.h.s8.bf16 %v3558_v62 }
 0x711   :  { %5431 = vmatpush1.bf16.msra.mxu1 %v4173_v2  ;;  %5391 = vmatprep.subr.bf16.mxu0 %v4038_v9  ;;  %v4246_v2 = vunpack.c.h.s8.bf16 %v3622_v5  ;;  %v3557_v9 = vld [vmem:[#allocation5 + $0x150] sm:$0xff] }
 0x712   :  { %5432 = vmatprep.subr.bf16.mxu1 %v4166_v28  ;;  %v3621_v28 = vld [vmem:[#allocation5 + $0x350] sm:$0xff]  ;;  %v4117_v27 = vunpack.c.h.s8.bf16 %v3557_v9  ;;  %v4109_v47 = vunpack.c.l.s8.bf16 %v3557_v9 }
 0x713   :  { %v4245_v26 = vunpack.c.h.s8.bf16 %v3621_v28  ;;  %v4237_v24 = vunpack.c.l.s8.bf16 %v3621_v28 }
 0x714   :  { %5392 = vmatpush1.bf16.msra.mxu0 %v4037_v53  ;;  %v4110_v53 = vunpack.c.l.s8.bf16 %v3558_v62 }
 0x715   :  { %5433 = vmatpush1.bf16.msra.mxu1 %v4165_v21  ;;  %5393 = vmatprep.subr.bf16.mxu0 %v4030_v49  ;;  %v4238_v21 = vunpack.c.l.s8.bf16 %v3622_v5  ;;  %v3550_v49 = vld [vmem:[#allocation5 + $0x118] sm:$0xff] }
 0x716   :  { %5434 = vmatprep.subr.bf16.mxu1 %v4158_v52  ;;  %v3614_v52 = vld [vmem:[#allocation5 + $0x318] sm:$0xff] }
 0x718   :  { %5394 = vmatpush1.bf16.msra.mxu0 %v4029_v3  ;;  %v4102_v3 = vunpack.c.h.s8.bf16 %v3550_v49 }
 0x719   :  { %5435 = vmatpush1.bf16.msra.mxu1 %v4157_v45  ;;  %5395 = vmatprep.subr.bf16.mxu0 %v4150_v32  ;;  %v4230_v45 = vunpack.c.h.s8.bf16 %v3614_v52  ;;  %v3549_v32 = vld [vmem:[#allocation5 + $0x110] sm:$0xff] }
 0x71a   :  { %5436 = vmatprep.subr.bf16.mxu1 %v4278_v34  ;;  %v3613_v34 = vld [vmem:[#allocation5 + $0x310] sm:$0xff]  ;;  %v4101_v1 = vunpack.c.h.s8.bf16 %v3549_v32  ;;  %v4093_v36 = vunpack.c.l.s8.bf16 %v3549_v32 }
 0x71b   :  { %v4229_v35 = vunpack.c.h.s8.bf16 %v3613_v34  ;;  %v4221_v16 = vunpack.c.l.s8.bf16 %v3613_v34 }
 0x71c   :  { %5396 = vmatpush2.bf16.msra.mxu0 %v4149_v7  ;;  %v4094_v7 = vunpack.c.l.s8.bf16 %v3550_v49 }
 0x71d   :  { %5437 = vmatpush2.bf16.msra.mxu1 %v4277_v15  ;;  %5397 = vmatprep.subr.bf16.mxu0 %v4142_v42  ;;  %v4222_v15 = vunpack.c.l.s8.bf16 %v3614_v52  ;;  %v3670_v42 = vld [vmem:[#allocation5 + $0x4d8] sm:$0xff] }
 0x71e   :  { %5438 = vmatprep.subr.bf16.mxu1 %v4270_v63  ;;  %v3734_v63 = vld [vmem:[#allocation5 + $0x6d8] sm:$0xff] }
 0x720   :  { %5398 = vmatpush2.bf16.msra.mxu0 %v4141_v37  ;;  %v4342_v37 = vunpack.c.h.s8.bf16 %v3670_v42 }
 0x721   :  { %5439 = vmatpush2.bf16.msra.mxu1 %v4269_v57  ;;  %5399 = vmatprep.subr.bf16.mxu0 %v4134_v0  ;;  %v4470_v57 = vunpack.c.h.s8.bf16 %v3734_v63  ;;  %v3669_v0 = vld [vmem:[#allocation5 + $0x4d0] sm:$0xff] }
 0x722   :  { %5440 = vmatprep.subr.bf16.mxu1 %v4262_v50  ;;  %v3733_v50 = vld [vmem:[#allocation5 + $0x6d0] sm:$0xff]  ;;  %v4341_v33 = vunpack.c.h.s8.bf16 %v3669_v0 }
 0x723   :  { %v4469_v30 = vunpack.c.h.s8.bf16 %v3733_v50 }
 0x724   :  { %5400 = vmatpush2.bf16.msra.mxu0 %v4133_v20  ;;  %v4334_v20 = vunpack.c.l.s8.bf16 %v3670_v42 }
 0x725   :  { %5441 = vmatpush2.bf16.msra.mxu1 %v4261_v14  ;;  %5401 = vmatprep.subr.bf16.mxu0 %v4126_v6  ;;  %v4462_v14 = vunpack.c.l.s8.bf16 %v3734_v63  ;;  %v3662_v6 = vld [vmem:[#allocation5 + $0x498] sm:$0xff] }
 0x726   :  { %5442 = vmatprep.subr.bf16.mxu1 %v4254_v4  ;;  %v3726_v4 = vld [vmem:[#allocation5 + $0x698] sm:$0xff]  ;;  %v4326_v28 = vunpack.c.h.s8.bf16 %v3662_v6  ;;  %v4318_v34 = vunpack.c.l.s8.bf16 %v3662_v6 }
 0x728   :  { %5402 = vmatpush2.bf16.msra.mxu0 %v4125_v10 }
 0x729   :  { %5443 = vmatpush2.bf16.msra.mxu1 %v4253_v40  ;;  %5403 = vmatprep.subr.bf16.mxu0 %v4118_v23  ;;  %v4333_v40 = vunpack.c.l.s8.bf16 %v3669_v0  ;;  %v4461_v23 = vunpack.c.l.s8.bf16 %v3733_v50 }
 0x72a   :  { %5444 = vmatprep.subr.bf16.mxu1 %v4246_v2 }
 0x72c   :  { %5404 = vmatpush2.bf16.msra.mxu0 %v4117_v27  ;;  %v4454_v27 = vunpack.c.h.s8.bf16 %v3726_v4 }
 0x72d   :  { %5445 = vmatpush2.bf16.msra.mxu1 %v4245_v26  ;;  %5405 = vmatprep.subr.bf16.mxu0 %v4110_v53  ;;  %v3661_v26 = vld [vmem:[#allocation5 + $0x490] sm:$0xff] }
 0x72e   :  { %5446 = vmatprep.subr.bf16.mxu1 %v4238_v21  ;;  %v3725_v53 = vld [vmem:[#allocation5 + $0x690] sm:$0xff] }
 0x730   :  { %5406 = vmatpush2.bf16.msra.mxu0 %v4109_v47 }
 0x731   :  { %5447 = vmatpush2.bf16.msra.mxu1 %v4237_v24  ;;  %5407 = vmatprep.subr.bf16.mxu0 %v4102_v3  ;;  %v4325_v24 = vunpack.c.h.s8.bf16 %v3661_v26  ;;  %v4453_v3 = vunpack.c.h.s8.bf16 %v3725_v53 }
 0x732   :  { %5448 = vmatprep.subr.bf16.mxu1 %v4230_v45 }
 0x734   :  { %5408 = vmatpush2.bf16.msra.mxu0 %v4101_v1  ;;  %v4446_v1 = vunpack.c.l.s8.bf16 %v3726_v4 }
 0x735   :  { %5449 = vmatpush2.bf16.msra.mxu1 %v4229_v35  ;;  %5409 = vmatprep.subr.bf16.mxu0 %v4094_v7  ;;  %v3654_v35 = vld [vmem:[#allocation5 + $0x458] sm:$0xff]  ;;  %v4317_v7 = vunpack.c.l.s8.bf16 %v3661_v26 }
 0x736   :  { %5450 = vmatprep.subr.bf16.mxu1 %v4222_v15  ;;  %v4445_v15 = vunpack.c.l.s8.bf16 %v3725_v53  ;;  %v4310_v42 = vunpack.c.h.s8.bf16 %v3654_v35  ;;  %v4302_v0 = vunpack.c.l.s8.bf16 %v3654_v35 }
 0x738   :  { %5410 = vmatpush2.bf16.msra.mxu0 %v4093_v36  ;;  %v3653_v36 = vld [vmem:[#allocation5 + $0x450] sm:$0xff] }
 0x739   :  { %5451 = vmatpush2.bf16.msra.mxu1 %v4221_v16  ;;  %5461 = vmatprep.subr.bf16.mxu0 %v4342_v37  ;;  %v3717_v16 = vld [vmem:[#allocation5 + $0x650] sm:$0xff]  ;;  %v4309_v37 = vunpack.c.h.s8.bf16 %v3653_v36 }
 0x73a   :  { %5502 = vmatprep.subr.bf16.mxu1 %v4470_v57  ;;  %v4437_v57 = vunpack.c.h.s8.bf16 %v3717_v16 }
 0x73b   :  { %v5167_v62 = vpop.f32.mrf.mxu0  ;;  %5412 = vmatmul.mubr.bf16.vlgmr.msra.gmra.mxu0 %v9166_v13 }
 0x73c   :  { %v5208_v5 = vpop.f32.mrf.mxu1  ;;  %5453 = vmatmul.mubr.bf16.vlgmr.msra.gmra.mxu1 %v9184_v56  ;;  %v5168_v10 = vadd.f32 %v5167_v62, %v9310_v39  ;;  %5462 = vmatpush1.bf16.msra.mxu0 %v4341_v33  ;;  %v3646_v33 = vld [vmem:[#allocation5 + $0x418] sm:$0xff]  ;;  %v3645_v62 = vld [vmem:[#allocation5 + $0x410] sm:$0xff] }
 0x73d   :  { %5503 = vmatpush1.bf16.msra.mxu1 %v4469_v30  ;;  %v5169_v2 = vpop.f32.mrf.mxu0  ;;  %5463 = vmatprep.subr.bf16.mxu0 %v4334_v20  ;;  %v3710_v30 = vld [vmem:[#allocation5 + $0x618] sm:$0xff]  ;;  %v4301_v20 = vunpack.c.l.s8.bf16 %v3653_v36  ;;  %v4294_v6 = vunpack.c.h.s8.bf16 %v3646_v33 }
 0x73e   :  { %v5210_v9 = vpop.f32.mrf.mxu1  ;;  %5504 = vmatprep.subr.bf16.mxu1 %v4462_v14  ;;  %v9319_v21 = vadd.f32 %v5208_v5, %v5168_v10  ;;  %v5170_v49 = vadd.f32 %v5169_v2, %v9312_v51  ;;  %5493 = vmatprep.mubr.bf16.mxu0 %v9210_v46  ;;  %v3718_v51 = vld [vmem:[#allocation5 + $0x658] sm:$0xff]  ;;  %v4429_v14 = vunpack.c.l.s8.bf16 %v3717_v16  ;;  %v4422_v4 = vunpack.c.h.s8.bf16 %v3710_v30  ;;  %v3709_v5 = vld [vmem:[#allocation5 + $0x610] sm:$0xff] }
 0x73f   :  { %5534 = vmatprep.mubr.bf16.mxu1 %v9230_v22  ;;  %v5171_v39 = vpop.f32.mrf.mxu0  ;;  %v4438_v63 = vunpack.c.h.s8.bf16 %v3718_v51  ;;  %v4430_v50 = vunpack.c.l.s8.bf16 %v3718_v51  ;;  %v4293_v10 = vunpack.c.h.s8.bf16 %v3645_v62  ;;  %v4414_v2 = vunpack.c.l.s8.bf16 %v3710_v30 }
 0x740   :  { %v5212_v52 = vpop.f32.mrf.mxu1  ;;  %v9324_v47 = vadd.f32 %v5210_v9, %v5170_v49  ;;  %5464 = vmatpush1.bf16.msra.mxu0 %v4333_v40  ;;  %v4421_v40 = vunpack.c.h.s8.bf16 %v3709_v5  ;;  %v3702_v9 = vld [vmem:[#allocation5 + $0x5d8] sm:$0xff]  ;;  %v4413_v26 = vunpack.c.l.s8.bf16 %v3709_v5  ;;  %v3701_v39 = vld [vmem:[#allocation5 + $0x5d0] sm:$0xff] }
 0x741   :  { %5505 = vmatpush1.bf16.msra.mxu1 %v4461_v23  ;;  %v5172_v45 = vpop.f32.mrf.mxu0  ;;  %5465 = vmatprep.subr.bf16.mxu0 %v4326_v28  ;;  %v4286_v23 = vunpack.c.l.s8.bf16 %v3646_v33  ;;  %v3766_v28 = vld [vmem:[#allocation5 + $0x7d8] sm:$0xff]  ;;  %v4406_v53 = vunpack.c.h.s8.bf16 %v3702_v9  ;;  %v3765_v52 = vld [vmem:[#allocation5 + $0x7d0] sm:$0xff]  ;;  %v4397_v35 = vunpack.c.l.s8.bf16 %v3701_v39 }
 0x742   :  { %v5213_v32 = vpop.f32.mrf.mxu1  ;;  %5506 = vmatprep.subr.bf16.mxu1 %v4454_v27  ;;  %v4285_v27 = vunpack.c.l.s8.bf16 %v3645_v62  ;;  %v4534_v49 = vunpack.c.h.s8.bf16 %v3766_v28  ;;  %v4398_v45 = vunpack.c.l.s8.bf16 %v3702_v9  ;;  %v4525_v51 = vunpack.c.l.s8.bf16 %v3765_v52 }
 0x743   :  { %v4526_v32 = vunpack.c.l.s8.bf16 %v3766_v28 }
 0x744   :  { %5466 = vmatpush1.bf16.msra.mxu0 %v4325_v24  ;;  %v4405_v24 = vunpack.c.h.s8.bf16 %v3701_v39 }
 0x745   :  { %5507 = vmatpush1.bf16.msra.mxu1 %v4453_v3  ;;  %5467 = vmatprep.subr.bf16.mxu0 %v4318_v34  ;;  %v4533_v3 = vunpack.c.h.s8.bf16 %v3765_v52  ;;  %v3694_v34 = vld [vmem:[#allocation5 + $0x598] sm:$0xff] }
 0x746   :  { %5508 = vmatprep.subr.bf16.mxu1 %v4446_v1  ;;  %v3758_v1 = vld [vmem:[#allocation5 + $0x798] sm:$0xff] }
 0x748   :  { %5468 = vmatpush1.bf16.msra.mxu0 %v4317_v7  ;;  %v4390_v7 = vunpack.c.h.s8.bf16 %v3694_v34 }
 0x749   :  { %5509 = vmatpush1.bf16.msra.mxu1 %v4445_v15  ;;  %5469 = vmatprep.subr.bf16.mxu0 %v4310_v42  ;;  %v4518_v15 = vunpack.c.h.s8.bf16 %v3758_v1  ;;  %v3693_v42 = vld [vmem:[#allocation5 + $0x590] sm:$0xff] }
 0x74a   :  { %5510 = vmatprep.subr.bf16.mxu1 %v4438_v63  ;;  %v3757_v63 = vld [vmem:[#allocation5 + $0x790] sm:$0xff]  ;;  %v4389_v36 = vunpack.c.h.s8.bf16 %v3693_v42  ;;  %v4381_v33 = vunpack.c.l.s8.bf16 %v3693_v42 }
 0x74b   :  { %v4517_v16 = vunpack.c.h.s8.bf16 %v3757_v63  ;;  %v4509_v30 = vunpack.c.l.s8.bf16 %v3757_v63 }
 0x74c   :  { %5470 = vmatpush1.bf16.msra.mxu0 %v4309_v37  ;;  %v4382_v37 = vunpack.c.l.s8.bf16 %v3694_v34 }
 0x74d   :  { %5511 = vmatpush1.bf16.msra.mxu1 %v4437_v57  ;;  %5471 = vmatprep.subr.bf16.mxu0 %v4302_v0  ;;  %v4510_v57 = vunpack.c.l.s8.bf16 %v3758_v1  ;;  %v3686_v0 = vld [vmem:[#allocation5 + $0x558] sm:$0xff] }
 0x74e   :  { %5512 = vmatprep.subr.bf16.mxu1 %v4430_v50  ;;  %v3750_v50 = vld [vmem:[#allocation5 + $0x758] sm:$0xff] }
 0x750   :  { %5472 = vmatpush1.bf16.msra.mxu0 %v4301_v20  ;;  %v4374_v20 = vunpack.c.h.s8.bf16 %v3686_v0 }
 0x751   :  { %5513 = vmatpush1.bf16.msra.mxu1 %v4429_v14  ;;  %5473 = vmatprep.subr.bf16.mxu0 %v4294_v6  ;;  %v4502_v14 = vunpack.c.h.s8.bf16 %v3750_v50  ;;  %v3685_v6 = vld [vmem:[#allocation5 + $0x550] sm:$0xff] }
 0x752   :  { %5514 = vmatprep.subr.bf16.mxu1 %v4422_v4  ;;  %v3749_v4 = vld [vmem:[#allocation5 + $0x750] sm:$0xff]  ;;  %v4373_v62 = vunpack.c.h.s8.bf16 %v3685_v6  ;;  %v4365_v9 = vunpack.c.l.s8.bf16 %v3685_v6 }
 0x753   :  { %v4501_v5 = vunpack.c.h.s8.bf16 %v3749_v4  ;;  %v4493_v28 = vunpack.c.l.s8.bf16 %v3749_v4 }
 0x754   :  { %5474 = vmatpush1.bf16.msra.mxu0 %v4293_v10  ;;  %v4366_v10 = vunpack.c.l.s8.bf16 %v3686_v0 }
 0x755   :  { %5515 = vmatpush1.bf16.msra.mxu1 %v4421_v40  ;;  %5475 = vmatprep.subr.bf16.mxu0 %v4286_v23  ;;  %v4494_v40 = vunpack.c.l.s8.bf16 %v3750_v50  ;;  %v3678_v23 = vld [vmem:[#allocation5 + $0x518] sm:$0xff] }
 0x756   :  { %5516 = vmatprep.subr.bf16.mxu1 %v4414_v2  ;;  %v3742_v2 = vld [vmem:[#allocation5 + $0x718] sm:$0xff] }
 0x758   :  { %5476 = vmatpush1.bf16.msra.mxu0 %v4285_v27  ;;  %v4358_v27 = vunpack.c.h.s8.bf16 %v3678_v23 }
 0x759   :  { %5517 = vmatpush1.bf16.msra.mxu1 %v4413_v26  ;;  %5477 = vmatprep.subr.bf16.mxu0 %v4406_v53  ;;  %v4486_v26 = vunpack.c.h.s8.bf16 %v3742_v2  ;;  %v3677_v53 = vld [vmem:[#allocation5 + $0x510] sm:$0xff] }
 0x75a   :  { %5518 = vmatprep.subr.bf16.mxu1 %v4534_v49  ;;  %v3741_v49 = vld [vmem:[#allocation5 + $0x710] sm:$0xff]  ;;  %v4357_v39 = vunpack.c.h.s8.bf16 %v3677_v53  ;;  %v4349_v34 = vunpack.c.l.s8.bf16 %v3677_v53 }
 0x75b   :  { %v4485_v52 = vunpack.c.h.s8.bf16 %v3741_v49  ;;  %v4477_v1 = vunpack.c.l.s8.bf16 %v3741_v49 }
 0x75c   :  { %5478 = vmatpush2.bf16.msra.mxu0 %v4405_v24  ;;  %v4350_v24 = vunpack.c.l.s8.bf16 %v3678_v23 }
 0x75d   :  { %5519 = vmatpush2.bf16.msra.mxu1 %v4533_v3  ;;  %5479 = vmatprep.subr.bf16.mxu0 %v4398_v45  ;;  %v4478_v3 = vunpack.c.l.s8.bf16 %v3742_v2  ;;  %v3798_v45 = vld [vmem:[#allocation5 + $0x8d8] sm:$0xff] }
 0x75e   :  { %5520 = vmatprep.subr.bf16.mxu1 %v4526_v32  ;;  %v3862_v32 = vld [vmem:[#allocation5 + $0xad8] sm:$0xff] }
 0x760   :  { %5480 = vmatpush2.bf16.msra.mxu0 %v4397_v35  ;;  %v4598_v35 = vunpack.c.h.s8.bf16 %v3798_v45 }
 0x761   :  { %5521 = vmatpush2.bf16.msra.mxu1 %v4525_v51  ;;  %5481 = vmatprep.subr.bf16.mxu0 %v4390_v7  ;;  %v4726_v51 = vunpack.c.h.s8.bf16 %v3862_v32  ;;  %v3797_v7 = vld [vmem:[#allocation5 + $0x8d0] sm:$0xff] }
 0x762   :  { %5522 = vmatprep.subr.bf16.mxu1 %v4518_v15  ;;  %v3861_v15 = vld [vmem:[#allocation5 + $0xad0] sm:$0xff]  ;;  %v4597_v42 = vunpack.c.h.s8.bf16 %v3797_v7 }
 0x763   :  { %v4725_v63 = vunpack.c.h.s8.bf16 %v3861_v15 }
 0x764   :  { %5482 = vmatpush2.bf16.msra.mxu0 %v4389_v36  ;;  %v4590_v36 = vunpack.c.l.s8.bf16 %v3798_v45 }
 0x765   :  { %5523 = vmatpush2.bf16.msra.mxu1 %v4517_v16  ;;  %5483 = vmatprep.subr.bf16.mxu0 %v4382_v37  ;;  %v4718_v16 = vunpack.c.l.s8.bf16 %v3862_v32  ;;  %v3790_v37 = vld [vmem:[#allocation5 + $0x898] sm:$0xff] }
 0x766   :  { %5524 = vmatprep.subr.bf16.mxu1 %v4510_v57  ;;  %v3854_v57 = vld [vmem:[#allocation5 + $0xa98] sm:$0xff]  ;;  %v4582_v4 = vunpack.c.h.s8.bf16 %v3790_v37  ;;  %v4574_v49 = vunpack.c.l.s8.bf16 %v3790_v37 }
 0x768   :  { %5484 = vmatpush2.bf16.msra.mxu0 %v4381_v33 }
 0x769   :  { %5525 = vmatpush2.bf16.msra.mxu1 %v4509_v30  ;;  %5485 = vmatprep.subr.bf16.mxu0 %v4374_v20  ;;  %v4589_v30 = vunpack.c.l.s8.bf16 %v3797_v7  ;;  %v4717_v20 = vunpack.c.l.s8.bf16 %v3861_v15 }
 0x76a   :  { %5526 = vmatprep.subr.bf16.mxu1 %v4502_v14 }
 0x76c   :  { %5486 = vmatpush2.bf16.msra.mxu0 %v4373_v62  ;;  %v4710_v62 = vunpack.c.h.s8.bf16 %v3854_v57 }
 0x76d   :  { %5527 = vmatpush2.bf16.msra.mxu1 %v4501_v5  ;;  %5487 = vmatprep.subr.bf16.mxu0 %v4366_v10  ;;  %v3789_v5 = vld [vmem:[#allocation5 + $0x890] sm:$0xff] }
 0x76e   :  { %5528 = vmatprep.subr.bf16.mxu1 %v4494_v40  ;;  %v3853_v10 = vld [vmem:[#allocation5 + $0xa90] sm:$0xff] }
 0x770   :  { %5488 = vmatpush2.bf16.msra.mxu0 %v4365_v9 }
 0x771   :  { %5529 = vmatpush2.bf16.msra.mxu1 %v4493_v28  ;;  %5489 = vmatprep.subr.bf16.mxu0 %v4358_v27  ;;  %v4581_v28 = vunpack.c.h.s8.bf16 %v3789_v5  ;;  %v4709_v27 = vunpack.c.h.s8.bf16 %v3853_v10 }
 0x772   :  { %5530 = vmatprep.subr.bf16.mxu1 %v4486_v26 }
 0x774   :  { %5490 = vmatpush2.bf16.msra.mxu0 %v4357_v39  ;;  %v4702_v39 = vunpack.c.l.s8.bf16 %v3854_v57 }
 0x775   :  { %5531 = vmatpush2.bf16.msra.mxu1 %v4485_v52  ;;  %5491 = vmatprep.subr.bf16.mxu0 %v4350_v24  ;;  %v3782_v52 = vld [vmem:[#allocation5 + $0x858] sm:$0xff]  ;;  %v4573_v24 = vunpack.c.l.s8.bf16 %v3789_v5 }
 0x776   :  { %5532 = vmatprep.subr.bf16.mxu1 %v4478_v3  ;;  %v4701_v3 = vunpack.c.l.s8.bf16 %v3853_v10  ;;  %v4566_v45 = vunpack.c.h.s8.bf16 %v3782_v52  ;;  %v4558_v7 = vunpack.c.l.s8.bf16 %v3782_v52 }
 0x778   :  { %5492 = vmatpush2.bf16.msra.mxu0 %v4349_v34  ;;  %v3781_v34 = vld [vmem:[#allocation5 + $0x850] sm:$0xff] }
 0x779   :  { %5533 = vmatpush2.bf16.msra.mxu1 %v4477_v1  ;;  %5543 = vmatprep.subr.bf16.mxu0 %v4598_v35  ;;  %v3845_v1 = vld [vmem:[#allocation5 + $0xa50] sm:$0xff]  ;;  %v4565_v35 = vunpack.c.h.s8.bf16 %v3781_v34 }
 0x77a   :  { %5584 = vmatprep.subr.bf16.mxu1 %v4726_v51  ;;  %v4693_v51 = vunpack.c.h.s8.bf16 %v3845_v1 }
 0x77b   :  { %v5249_v0 = vpop.f32.mrf.mxu0  ;;  %5494 = vmatmul.mubr.bf16.vlgmr.msra.gmra.mxu0 %v9208_v18 }
 0x77c   :  { %v5290_v50 = vpop.f32.mrf.mxu1  ;;  %5535 = vmatmul.mubr.bf16.vlgmr.msra.gmra.mxu1 %v9228_v25  ;;  %v5250_v33 = vadd.f32 %v5249_v0, %v9319_v21  ;;  %5544 = vmatpush1.bf16.msra.mxu0 %v4597_v42  ;;  %v3774_v42 = vld [vmem:[#allocation5 + $0x818] sm:$0xff]  ;;  %v3773_v0 = vld [vmem:[#allocation5 + $0x810] sm:$0xff] }
 0x77d   :  { %5585 = vmatpush1.bf16.msra.mxu1 %v4725_v63  ;;  %v5251_v14 = vpop.f32.mrf.mxu0  ;;  %5545 = vmatprep.subr.bf16.mxu0 %v4590_v36  ;;  %v3838_v63 = vld [vmem:[#allocation5 + $0xa18] sm:$0xff]  ;;  %v4557_v36 = vunpack.c.l.s8.bf16 %v3781_v34  ;;  %v4550_v37 = vunpack.c.h.s8.bf16 %v3774_v42 }
 0x77e   :  { %v5292_v6 = vpop.f32.mrf.mxu1  ;;  %5586 = vmatprep.subr.bf16.mxu1 %v4718_v16  ;;  %v9329_v40 = vadd.f32 %v5290_v50, %v5250_v33  ;;  %v5252_v23 = vadd.f32 %v5251_v14, %v9324_v47  ;;  %5575 = vmatprep.mubr.bf16.mxu0 %v9250_v48  ;;  %v3846_v47 = vld [vmem:[#allocation5 + $0xa58] sm:$0xff]  ;;  %v4685_v16 = vunpack.c.l.s8.bf16 %v3845_v1  ;;  %v4678_v57 = vunpack.c.h.s8.bf16 %v3838_v63  ;;  %v3837_v50 = vld [vmem:[#allocation5 + $0xa10] sm:$0xff] }
 0x77f   :  { %5616 = vmatprep.mubr.bf16.mxu1 %v9264_v29  ;;  %v5253_v21 = vpop.f32.mrf.mxu0  ;;  %v4694_v32 = vunpack.c.h.s8.bf16 %v3846_v47  ;;  %v4686_v15 = vunpack.c.l.s8.bf16 %v3846_v47  ;;  %v4549_v33 = vunpack.c.h.s8.bf16 %v3773_v0  ;;  %v4670_v14 = vunpack.c.l.s8.bf16 %v3838_v63 }
 0x780   :  { %v5294_v2 = vpop.f32.mrf.mxu1  ;;  %v9334_v9 = vadd.f32 %v5292_v6, %v5252_v23  ;;  %5546 = vmatpush1.bf16.msra.mxu0 %v4589_v30  ;;  %v4677_v30 = vunpack.c.h.s8.bf16 %v3837_v50  ;;  %v3830_v6 = vld [vmem:[#allocation5 + $0x9d8] sm:$0xff]  ;;  %v4669_v5 = vunpack.c.l.s8.bf16 %v3837_v50  ;;  %v3829_v21 = vld [vmem:[#allocation5 + $0x9d0] sm:$0xff] }
 0x781   :  { %5587 = vmatpush1.bf16.msra.mxu1 %v4717_v20  ;;  %v5254_v26 = vpop.f32.mrf.mxu0  ;;  %5547 = vmatprep.subr.bf16.mxu0 %v4582_v4  ;;  %v4542_v20 = vunpack.c.l.s8.bf16 %v3774_v42  ;;  %v3894_v4 = vld [vmem:[#allocation5 + $0xbd8] sm:$0xff]  ;;  %v4662_v10 = vunpack.c.h.s8.bf16 %v3830_v6  ;;  %v3893_v2 = vld [vmem:[#allocation5 + $0xbd0] sm:$0xff]  ;;  %v4653_v52 = vunpack.c.l.s8.bf16 %v3829_v21 }
 0x782   :  { %v5295_v53 = vpop.f32.mrf.mxu1  ;;  %5588 = vmatprep.subr.bf16.mxu1 %v4710_v62  ;;  %v4541_v62 = vunpack.c.l.s8.bf16 %v3773_v0  ;;  %v4790_v23 = vunpack.c.h.s8.bf16 %v3894_v4  ;;  %v4654_v26 = vunpack.c.l.s8.bf16 %v3830_v6  ;;  %v4781_v47 = vunpack.c.l.s8.bf16 %v3893_v2 }
 0x783   :  { %v4782_v53 = vunpack.c.l.s8.bf16 %v3894_v4 }
 0x784   :  { %5548 = vmatpush1.bf16.msra.mxu0 %v4581_v28  ;;  %v4661_v28 = vunpack.c.h.s8.bf16 %v3829_v21 }
 0x785   :  { %5589 = vmatpush1.bf16.msra.mxu1 %v4709_v27  ;;  %5549 = vmatprep.subr.bf16.mxu0 %v4574_v49  ;;  %v4789_v27 = vunpack.c.h.s8.bf16 %v3893_v2  ;;  %v3822_v49 = vld [vmem:[#allocation5 + $0x998] sm:$0xff] }
 0x786   :  { %5590 = vmatprep.subr.bf16.mxu1 %v4702_v39  ;;  %v3886_v39 = vld [vmem:[#allocation5 + $0xb98] sm:$0xff] }
 0x788   :  { %5550 = vmatpush1.bf16.msra.mxu0 %v4573_v24  ;;  %v4646_v24 = vunpack.c.h.s8.bf16 %v3822_v49 }
 0x789   :  { %5591 = vmatpush1.bf16.msra.mxu1 %v4701_v3  ;;  %5551 = vmatprep.subr.bf16.mxu0 %v4566_v45  ;;  %v4774_v3 = vunpack.c.h.s8.bf16 %v3886_v39  ;;  %v3821_v45 = vld [vmem:[#allocation5 + $0x990] sm:$0xff] }
 0x78a   :  { %5592 = vmatprep.subr.bf16.mxu1 %v4694_v32  ;;  %v3885_v32 = vld [vmem:[#allocation5 + $0xb90] sm:$0xff]  ;;  %v4645_v34 = vunpack.c.h.s8.bf16 %v3821_v45  ;;  %v4637_v42 = vunpack.c.l.s8.bf16 %v3821_v45 }
 0x78b   :  { %v4773_v1 = vunpack.c.h.s8.bf16 %v3885_v32  ;;  %v4765_v63 = vunpack.c.l.s8.bf16 %v3885_v32 }
 0x78c   :  { %5552 = vmatpush1.bf16.msra.mxu0 %v4565_v35  ;;  %v4638_v35 = vunpack.c.l.s8.bf16 %v3822_v49 }
 0x78d   :  { %5593 = vmatpush1.bf16.msra.mxu1 %v4693_v51  ;;  %5553 = vmatprep.subr.bf16.mxu0 %v4558_v7  ;;  %v4766_v51 = vunpack.c.l.s8.bf16 %v3886_v39  ;;  %v3814_v7 = vld [vmem:[#allocation5 + $0x958] sm:$0xff] }
 0x78e   :  { %5594 = vmatprep.subr.bf16.mxu1 %v4686_v15  ;;  %v3878_v15 = vld [vmem:[#allocation5 + $0xb58] sm:$0xff] }
 0x790   :  { %5554 = vmatpush1.bf16.msra.mxu0 %v4557_v36  ;;  %v4630_v36 = vunpack.c.h.s8.bf16 %v3814_v7 }
 0x791   :  { %5595 = vmatpush1.bf16.msra.mxu1 %v4685_v16  ;;  %5555 = vmatprep.subr.bf16.mxu0 %v4550_v37  ;;  %v4758_v16 = vunpack.c.h.s8.bf16 %v3878_v15  ;;  %v3813_v37 = vld [vmem:[#allocation5 + $0x950] sm:$0xff] }
 0x792   :  { %5596 = vmatprep.subr.bf16.mxu1 %v4678_v57  ;;  %v3877_v57 = vld [vmem:[#allocation5 + $0xb50] sm:$0xff]  ;;  %v4629_v0 = vunpack.c.h.s8.bf16 %v3813_v37  ;;  %v4621_v6 = vunpack.c.l.s8.bf16 %v3813_v37 }
 0x793   :  { %v4757_v50 = vunpack.c.h.s8.bf16 %v3877_v57  ;;  %v4749_v4 = vunpack.c.l.s8.bf16 %v3877_v57 }
 0x794   :  { %5556 = vmatpush1.bf16.msra.mxu0 %v4549_v33  ;;  %v4622_v33 = vunpack.c.l.s8.bf16 %v3814_v7  ;;  %v3918_v7 = vld [vmem:[#allocation5 + $0xc98] sm:$0xff] }
 0x795   :  { %5597 = vmatpush1.bf16.msra.mxu1 %v4677_v30  ;;  %5557 = vmatprep.subr.bf16.mxu0 %v4542_v20  ;;  %v4750_v30 = vunpack.c.l.s8.bf16 %v3878_v15  ;;  %v3806_v20 = vld [vmem:[#allocation5 + $0x918] sm:$0xff] }
 0x796   :  { %5598 = vmatprep.subr.bf16.mxu1 %v4670_v14  ;;  %v3870_v14 = vld [vmem:[#allocation5 + $0xb18] sm:$0xff] }
 0x797   :  { %v3982_v15 = vld [vmem:[#allocation5 + $0xe98] sm:$0xff] }
 0x798   :  { %5558 = vmatpush1.bf16.msra.mxu0 %v4541_v62  ;;  %v4614_v62 = vunpack.c.h.s8.bf16 %v3806_v20 }
 0x799   :  { %5599 = vmatpush1.bf16.msra.mxu1 %v4669_v5  ;;  %5559 = vmatprep.subr.bf16.mxu0 %v4662_v10  ;;  %v4742_v5 = vunpack.c.h.s8.bf16 %v3870_v14  ;;  %v3805_v10 = vld [vmem:[#allocation5 + $0x910] sm:$0xff] }
 0x79a   :  { %5600 = vmatprep.subr.bf16.mxu1 %v4790_v23  ;;  %v3869_v23 = vld [vmem:[#allocation5 + $0xb10] sm:$0xff]  ;;  %v4613_v21 = vunpack.c.h.s8.bf16 %v3805_v10  ;;  %v4605_v49 = vunpack.c.l.s8.bf16 %v3805_v10 }
 0x79b   :  { %v4741_v2 = vunpack.c.h.s8.bf16 %v3869_v23  ;;  %v4733_v39 = vunpack.c.l.s8.bf16 %v3869_v23 }
 0x79c   :  { %5560 = vmatpush2.bf16.msra.mxu0 %v4661_v28  ;;  %v4606_v28 = vunpack.c.l.s8.bf16 %v3806_v20  ;;  %v4966_v20 = vunpack.c.h.s8.bf16 %v3982_v15 }
 0x79d   :  { %5601 = vmatpush2.bf16.msra.mxu1 %v4789_v27  ;;  %5561 = vmatprep.subr.bf16.mxu0 %v4654_v26  ;;  %v4734_v27 = vunpack.c.l.s8.bf16 %v3870_v14  ;;  %v3926_v26 = vld [vmem:[#allocation5 + $0xcd8] sm:$0xff]  ;;  %v3917_v14 = vld [vmem:[#allocation5 + $0xc90] sm:$0xff] }
 0x79e   :  { %5602 = vmatprep.subr.bf16.mxu1 %v4782_v53  ;;  %v3990_v53 = vld [vmem:[#allocation5 + $0xed8] sm:$0xff] }
 0x7a0   :  { %5562 = vmatpush2.bf16.msra.mxu0 %v4653_v52  ;;  %v4854_v52 = vunpack.c.h.s8.bf16 %v3926_v26 }
 0x7a1   :  { %5603 = vmatpush2.bf16.msra.mxu1 %v4781_v47  ;;  %5563 = vmatprep.subr.bf16.mxu0 %v4646_v24  ;;  %v4982_v47 = vunpack.c.h.s8.bf16 %v3990_v53  ;;  %v3925_v24 = vld [vmem:[#allocation5 + $0xcd0] sm:$0xff] }
 0x7a2   :  { %5604 = vmatprep.subr.bf16.mxu1 %v4774_v3  ;;  %v3989_v3 = vld [vmem:[#allocation5 + $0xed0] sm:$0xff]  ;;  %v4853_v45 = vunpack.c.h.s8.bf16 %v3925_v24  ;;  %v4845_v37 = vunpack.c.l.s8.bf16 %v3925_v24  ;;  %v3974_v24 = vld [vmem:[#allocation5 + $0xe58] sm:$0xff] }
 0x7a3   :  { %v4981_v32 = vunpack.c.h.s8.bf16 %v3989_v3  ;;  %v4973_v57 = vunpack.c.l.s8.bf16 %v3989_v3 }
 0x7a4   :  { %5564 = vmatpush2.bf16.msra.mxu0 %v4645_v34  ;;  %v6363_v34 = vld [vmem:[#allocation22] sm:$0xff] }
 0x7a5   :  { %5605 = vmatpush2.bf16.msra.mxu1 %v4773_v1  ;;  %5565 = vmatprep.subr.bf16.mxu0 %v4638_v35  ;;  %v4846_v1 = vunpack.c.l.s8.bf16 %v3926_v26  ;;  %v4974_v35 = vunpack.c.l.s8.bf16 %v3990_v53 }
 0x7a6   :  { %5606 = vmatprep.subr.bf16.mxu1 %v4766_v51  ;;  %v6413_v51 = vld [vmem:[#allocation24] sm:$0xff] }
 0x7a8   :  { %5566 = vmatpush2.bf16.msra.mxu0 %v4637_v42 }
 0x7a9   :  { %5607 = vmatpush2.bf16.msra.mxu1 %v4765_v63  ;;  %5567 = vmatprep.subr.bf16.mxu0 %v4630_v36 }
 0x7aa   :  { %5608 = vmatprep.subr.bf16.mxu1 %v4758_v16  ;;  %v6368_v16 = vrot.slane %v6363_v34, %v8755_v54 }
 0x7ac   :  { %5568 = vmatpush2.bf16.msra.mxu0 %v4629_v0  ;;  %v6418_v0 = vrot.slane %v6413_v51, %v8755_v54 }
 0x7ad   :  { %5609 = vmatpush2.bf16.msra.mxu1 %v4757_v50  ;;  %5569 = vmatprep.subr.bf16.mxu0 %v4622_v33 }
 0x7ae   :  { %5610 = vmatprep.subr.bf16.mxu1 %v4750_v30  ;;  %v4838_v30 = vunpack.c.h.s8.bf16 %v3918_v7 }
 0x7b0   :  { %5570 = vmatpush2.bf16.msra.mxu0 %v4621_v6  ;;  %v3981_v6 = vld [vmem:[#allocation5 + $0xe90] sm:$0xff] }
 0x7b1   :  { %5611 = vmatpush2.bf16.msra.mxu1 %v4749_v4  ;;  %5571 = vmatprep.subr.bf16.mxu0 %v4614_v62 }
 0x7b2   :  { %5612 = vmatprep.subr.bf16.mxu1 %v4742_v5  ;;  %v6422_v5 = vrot.slane %v6413_v51, %v8761_v59  ;;  %v3909_v51 = vld [vmem:[#allocation5 + $0xc50] sm:$0xff] }
 0x7b4   :  { %5572 = vmatpush2.bf16.msra.mxu0 %v4613_v21 }
 0x7b5   :  { %5613 = vmatpush2.bf16.msra.mxu1 %v4741_v2  ;;  %5573 = vmatprep.subr.bf16.mxu0 %v4606_v28  ;;  %v4837_v28 = vunpack.c.h.s8.bf16 %v3917_v14 }
 0x7b6   :  { %5614 = vmatprep.subr.bf16.mxu1 %v4734_v27  ;;  %v4965_v27 = vunpack.c.h.s8.bf16 %v3981_v6 }
 0x7b8   :  { %5574 = vmatpush2.bf16.msra.mxu0 %v4605_v49  ;;  %v4958_v49 = vunpack.c.l.s8.bf16 %v3982_v15 }
 0x7b9   :  { %5615 = vmatpush2.bf16.msra.mxu1 %v4733_v39  ;;  %5625 = vmatprep.subr.bf16.mxu0 %v4854_v52 }
 0x7ba   :  { %5666 = vmatprep.subr.bf16.mxu1 %v4982_v47  ;;  %v3910_v47 = vld [vmem:[#allocation5 + $0xc58] sm:$0xff] }
 0x7bb   :  { %v5331_v42 = vpop.f32.mrf.mxu0  ;;  %5576 = vmatmul.mubr.bf16.vlgmr.msra.gmra.mxu0 %v9248_v12 }
 0x7bc   :  { %v5372_v63 = vpop.f32.mrf.mxu1  ;;  %5617 = vmatmul.mubr.bf16.vlgmr.msra.gmra.mxu1 %v9262_v19  ;;  %v5332_v36 = vadd.f32 %v5331_v42, %v9329_v40  ;;  %5626 = vmatpush1.bf16.msra.mxu0 %v4853_v45  ;;  %v6372_v40 = vrot.slane %v6363_v34, %v8761_v59  ;;  %v4957_v34 = vunpack.c.l.s8.bf16 %v3981_v6  ;;  %v3973_v42 = vld [vmem:[#allocation5 + $0xe50] sm:$0xff] }
 0x7bd   :  { %5667 = vmatpush1.bf16.msra.mxu1 %v4981_v32  ;;  %v5333_v50 = vpop.f32.mrf.mxu0  ;;  %5627 = vmatprep.subr.bf16.mxu0 %v4846_v1  ;;  %v4829_v32 = vunpack.c.l.s8.bf16 %v3917_v14  ;;  %v4822_v1 = vunpack.c.h.s8.bf16 %v3910_v47  ;;  %v3901_v6 = vld [vmem:[#allocation5 + $0xc10] sm:$0xff] }
 0x7be   :  { %v5374_v33 = vpop.f32.mrf.mxu1  ;;  %5668 = vmatprep.subr.bf16.mxu1 %v4974_v35  ;;  %v5373_v4 = vadd.f32 %v5372_v63, %v5332_v36  ;;  %v5334_v62 = vadd.f32 %v5333_v50, %v9334_v9  ;;  %5657 = vmatprep.mubr.bf16.mxu0 %v9278_v61  ;;  %v4830_v9 = vunpack.c.l.s8.bf16 %v3918_v7  ;;  %v4950_v35 = vunpack.c.h.s8.bf16 %v3974_v24  ;;  %v3966_v50 = vld [vmem:[#allocation5 + $0xe18] sm:$0xff] }
 0x7bf   :  { %5698 = vmatprep.mubr.bf16.mxu1 %v9292_v17  ;;  %v5335_v10 = vpop.f32.mrf.mxu0  ;;  %v4821_v36 = vunpack.c.h.s8.bf16 %v3909_v51  ;;  %v4934_v14 = vunpack.c.h.s8.bf16 %v3966_v50 }
 0x7c0   :  { %v5376_v23 = vpop.f32.mrf.mxu1  ;;  %v6405_v21 = vmul.f32 %v6368_v16, %v5373_v4  ;;  %v5375_v2 = vadd.f32 %v5374_v33, %v5334_v62  ;;  %5628 = vmatpush1.bf16.msra.mxu0 %v4845_v37  ;;  %v4949_v16 = vunpack.c.h.s8.bf16 %v3973_v42  ;;  %v4814_v37 = vunpack.c.l.s8.bf16 %v3910_v47  ;;  %v3965_v4 = vld [vmem:[#allocation5 + $0xe10] sm:$0xff] }
 0x7c1   :  { %5669 = vmatpush1.bf16.msra.mxu1 %v4973_v57  ;;  %v5336_v26 = vpop.f32.mrf.mxu0  ;;  %5629 = vmatprep.subr.bf16.mxu0 %v4838_v30  ;;  %v4942_v57 = vunpack.c.l.s8.bf16 %v3974_v24  ;;  %v4813_v33 = vunpack.c.l.s8.bf16 %v3909_v51  ;;  %v4941_v30 = vunpack.c.l.s8.bf16 %v3973_v42  ;;  %v4805_v62 = vunpack.c.h.s8.bf16 %v3901_v6  ;;  %v3958_v23 = vld [vmem:[#allocation5 + $0xdd8] sm:$0xff]  ;;  %v4013_v51 = vld [vmem:[#allocation5 + $0xf90] sm:$0xff] }
 0x7c2   :  { %v5377_v53 = vpop.f32.mrf.mxu1  ;;  %5670 = vmatprep.subr.bf16.mxu1 %v4966_v20  ;;  %v6455_v39 = vadd.f32 %v6418_v0, %v6405_v21  ;;  %v6406_v52 = vmul.f32 %v6372_v40, %v5375_v2  ;;  %v3902_v0 = vld [vmem:[#allocation5 + $0xc18] sm:$0xff]  ;;  %v4933_v40 = vunpack.c.h.s8.bf16 %v3965_v4  ;;  %v4926_v10 = vunpack.c.l.s8.bf16 %v3966_v50 }
 0x7c3   :  { %v4806_v20 = vunpack.c.h.s8.bf16 %v3902_v0  ;;  %v4022_v21 = vld [vmem:[#allocation5 + $0xfd8] sm:$0xff]  ;;  %v4797_v2 = vunpack.c.l.s8.bf16 %v3901_v6  ;;  %v3957_v53 = vld [vmem:[#allocation5 + $0xdd0] sm:$0xff]  ;;  %v5021_v50 = vunpack.c.l.s8.bf16 %v4013_v51 }
 0x7c4   :  { %v6463_v3 = vmax.f32 %v6455_v39, 0.0  ;;  %v6456_v45 = vadd.f32 %v6422_v5, %v6406_v52  ;;  %5630 = vmatpush1.bf16.msra.mxu0 %v4837_v28  ;;  %v4798_v5 = vunpack.c.l.s8.bf16 %v3902_v0  ;;  %v4925_v28 = vunpack.c.l.s8.bf16 %v3965_v4  ;;  %v3950_v24 = vld [vmem:[#allocation5 + $0xd98] sm:$0xff] }
 0x7c5   :  { %5671 = vmatpush1.bf16.msra.mxu1 %v4965_v27  ;;  %5631 = vmatprep.subr.bf16.mxu0 %v4830_v9  ;;  %v4918_v27 = vunpack.c.h.s8.bf16 %v3958_v23  ;;  %v5046_v26 = vunpack.c.h.s8.bf16 %v4022_v21  ;;  %v4021_v9 = vld [vmem:[#allocation5 + $0xfd0] sm:$0xff]  ;;  %v4910_v52 = vunpack.c.l.s8.bf16 %v3958_v23  ;;  %v5038_v47 = vunpack.c.l.s8.bf16 %v4022_v21 }
 0x7c6   :  { %5672 = vmatprep.subr.bf16.mxu1 %v4958_v49  ;;  %v9346_v63 = vpack.c.bf16 %v6463_v3, %v6463_v3  ;;  %v6464_v7 = vmax.f32 %v6456_v45, 0.0  ;;  %v4917_v49 = vunpack.c.h.s8.bf16 %v3957_v53  ;;  %v5045_v39 = vunpack.c.h.s8.bf16 %v4021_v9  ;;  %v4014_v3 = vld [vmem:[#allocation5 + $0xf98] sm:$0xff] }
 0x7c7   :  { %v4909_v45 = vunpack.c.l.s8.bf16 %v3957_v53 }
 0x7c8   :  { %v9348_v15 = vpack.c.bf16 %v6464_v7, %v6464_v7  ;;  %5632 = vmatpush1.bf16.msra.mxu0 %v4829_v32  ;;  %v5037_v32 = vunpack.c.l.s8.bf16 %v4021_v9  ;;  %v5029_v7 = vunpack.c.h.s8.bf16 %v4013_v51 }
 0x7c9   :  { %5673 = vmatpush1.bf16.msra.mxu1 %v4957_v34  ;;  %5633 = vmatprep.subr.bf16.mxu0 %v4822_v1  ;;  %v4902_v34 = vunpack.c.h.s8.bf16 %v3950_v24  ;;  %v5030_v1 = vunpack.c.h.s8.bf16 %v4014_v3 }
 0x7ca   :  { %5674 = vmatprep.subr.bf16.mxu1 %v4950_v35  ;;  %v3949_v35 = vld [vmem:[#allocation5 + $0xd90] sm:$0xff] }
 0x7cb   :  { %v4901_v42 = vunpack.c.h.s8.bf16 %v3949_v35  ;;  %v4893_v0 = vunpack.c.l.s8.bf16 %v3949_v35 }
 0x7cc   :  { %5634 = vmatpush1.bf16.msra.mxu0 %v4821_v36  ;;  %v4894_v36 = vunpack.c.l.s8.bf16 %v3950_v24 }
 0x7cd   :  { %5675 = vmatpush1.bf16.msra.mxu1 %v4949_v16  ;;  %5635 = vmatprep.subr.bf16.mxu0 %v4814_v37  ;;  %v5022_v16 = vunpack.c.l.s8.bf16 %v4014_v3  ;;  %v3942_v37 = vld [vmem:[#allocation5 + $0xd58] sm:$0xff] }
 0x7ce   :  { %5676 = vmatprep.subr.bf16.mxu1 %v4942_v57  ;;  %v4006_v57 = vld [vmem:[#allocation5 + $0xf58] sm:$0xff] }
 0x7d0   :  { %5636 = vmatpush1.bf16.msra.mxu0 %v4813_v33  ;;  %v4886_v33 = vunpack.c.h.s8.bf16 %v3942_v37 }
 0x7d1   :  { %5677 = vmatpush1.bf16.msra.mxu1 %v4941_v30  ;;  %5637 = vmatprep.subr.bf16.mxu0 %v4806_v20  ;;  %v5014_v30 = vunpack.c.h.s8.bf16 %v4006_v57  ;;  %v3941_v20 = vld [vmem:[#allocation5 + $0xd50] sm:$0xff] }
 0x7d2   :  { %5678 = vmatprep.subr.bf16.mxu1 %v4934_v14  ;;  %v4005_v14 = vld [vmem:[#allocation5 + $0xf50] sm:$0xff]  ;;  %v4885_v6 = vunpack.c.h.s8.bf16 %v3941_v20  ;;  %v4877_v23 = vunpack.c.l.s8.bf16 %v3941_v20 }
 0x7d3   :  { %v5013_v4 = vunpack.c.h.s8.bf16 %v4005_v14  ;;  %v5005_v21 = vunpack.c.l.s8.bf16 %v4005_v14 }
 0x7d4   :  { %5638 = vmatpush1.bf16.msra.mxu0 %v4805_v62  ;;  %v4878_v62 = vunpack.c.l.s8.bf16 %v3942_v37 }
 0x7d5   :  { %5679 = vmatpush1.bf16.msra.mxu1 %v4933_v40  ;;  %5639 = vmatprep.subr.bf16.mxu0 %v4798_v5  ;;  %v5006_v40 = vunpack.c.l.s8.bf16 %v4006_v57  ;;  %v3934_v5 = vld [vmem:[#allocation5 + $0xd18] sm:$0xff] }
 0x7d6   :  { %5680 = vmatprep.subr.bf16.mxu1 %v4926_v10  ;;  %v3998_v10 = vld [vmem:[#allocation5 + $0xf18] sm:$0xff] }
 0x7d8   :  { %5640 = vmatpush1.bf16.msra.mxu0 %v4797_v2  ;;  %v4870_v2 = vunpack.c.h.s8.bf16 %v3934_v5 }
 0x7d9   :  { %5681 = vmatpush1.bf16.msra.mxu1 %v4925_v28  ;;  %5641 = vmatprep.subr.bf16.mxu0 %v4918_v27  ;;  %v4998_v28 = vunpack.c.h.s8.bf16 %v3998_v10  ;;  %v3933_v27 = vld [vmem:[#allocation5 + $0xd10] sm:$0xff] }
 0x7da   :  { %5682 = vmatprep.subr.bf16.mxu1 %v5046_v26  ;;  %v3997_v26 = vld [vmem:[#allocation5 + $0xf10] sm:$0xff]  ;;  %v4869_v53 = vunpack.c.h.s8.bf16 %v3933_v27  ;;  %v4861_v24 = vunpack.c.l.s8.bf16 %v3933_v27 }
 0x7db   :  { %v4997_v9 = vunpack.c.h.s8.bf16 %v3997_v26  ;;  %v4989_v3 = vunpack.c.l.s8.bf16 %v3997_v26 }
 0x7dc   :  { %5642 = vmatpush2.bf16.msra.mxu0 %v4917_v49  ;;  %v4862_v49 = vunpack.c.l.s8.bf16 %v3934_v5 }
 0x7dd   :  { %5683 = vmatpush2.bf16.msra.mxu1 %v5045_v39  ;;  %5643 = vmatprep.subr.bf16.mxu0 %v4910_v52  ;;  %v4990_v39 = vunpack.c.l.s8.bf16 %v3998_v10  ;;  %v3544_v52 = vld [vmem:[#allocation5 + $0xe8] sm:$0xff] }
 0x7de   :  { %5684 = vmatprep.subr.bf16.mxu1 %v5038_v47  ;;  %v3608_v47 = vld [vmem:[#allocation5 + $0x2e8] sm:$0xff] }
 0x7e0   :  { %5644 = vmatpush2.bf16.msra.mxu0 %v4909_v45  ;;  %v4088_v45 = vunpack.c.h.s8.bf16 %v3544_v52 }
 0x7e1   :  { %5685 = vmatpush2.bf16.msra.mxu1 %v5037_v32  ;;  %5645 = vmatprep.subr.bf16.mxu0 %v4902_v34  ;;  %v4216_v32 = vunpack.c.h.s8.bf16 %v3608_v47  ;;  %v3543_v34 = vld [vmem:[#allocation5 + $0xe0] sm:$0xff] }
 0x7e2   :  { %5686 = vmatprep.subr.bf16.mxu1 %v5030_v1  ;;  %v3607_v1 = vld [vmem:[#allocation5 + $0x2e0] sm:$0xff]  ;;  %v4087_v35 = vunpack.c.h.s8.bf16 %v3543_v34 }
 0x7e3   :  { %v4215_v51 = vunpack.c.h.s8.bf16 %v3607_v1 }
 0x7e4   :  { %5646 = vmatpush2.bf16.msra.mxu0 %v4901_v42  ;;  %v4080_v42 = vunpack.c.l.s8.bf16 %v3544_v52 }
 0x7e5   :  { %5687 = vmatpush2.bf16.msra.mxu1 %v5029_v7  ;;  %5647 = vmatprep.subr.bf16.mxu0 %v4894_v36  ;;  %v4208_v7 = vunpack.c.l.s8.bf16 %v3608_v47  ;;  %v3536_v36 = vld [vmem:[#allocation5 + $0xa8] sm:$0xff] }
 0x7e6   :  { %5688 = vmatprep.subr.bf16.mxu1 %v5022_v16  ;;  %v3600_v16 = vld [vmem:[#allocation5 + $0x2a8] sm:$0xff]  ;;  %v4072_v14 = vunpack.c.h.s8.bf16 %v3536_v36  ;;  %v4064_v27 = vunpack.c.l.s8.bf16 %v3536_v36 }
 0x7e7   :  { %v4192_v26 = vunpack.c.l.s8.bf16 %v3600_v16 }
 0x7e8   :  { %5648 = vmatpush2.bf16.msra.mxu0 %v4893_v0 }
 0x7e9   :  { %5689 = vmatpush2.bf16.msra.mxu1 %v5021_v50  ;;  %5649 = vmatprep.subr.bf16.mxu0 %v4886_v33  ;;  %v4079_v50 = vunpack.c.l.s8.bf16 %v3543_v34  ;;  %v4207_v33 = vunpack.c.l.s8.bf16 %v3607_v1 }
 0x7ea   :  { %5690 = vmatprep.subr.bf16.mxu1 %v5014_v30 }
 0x7ec   :  { %5650 = vmatpush2.bf16.msra.mxu0 %v4885_v6  ;;  %v4200_v6 = vunpack.c.h.s8.bf16 %v3600_v16 }
 0x7ed   :  { %5691 = vmatpush2.bf16.msra.mxu1 %v5013_v4  ;;  %5651 = vmatprep.subr.bf16.mxu0 %v4878_v62  ;;  %v3535_v4 = vld [vmem:[#allocation5 + $0xa0] sm:$0xff] }
 0x7ee   :  { %5692 = vmatprep.subr.bf16.mxu1 %v5006_v40  ;;  %v3599_v62 = vld [vmem:[#allocation5 + $0x2a0] sm:$0xff] }
 0x7f0   :  { %5652 = vmatpush2.bf16.msra.mxu0 %v4877_v23  ;;  %v4071_v23 = vunpack.c.h.s8.bf16 %v3535_v4 }
 0x7f1   :  { %5693 = vmatpush2.bf16.msra.mxu1 %v5005_v21  ;;  %5653 = vmatprep.subr.bf16.mxu0 %v4870_v2  ;;  %v4199_v21 = vunpack.c.h.s8.bf16 %v3599_v62 }
 0x7f2   :  { %5694 = vmatprep.subr.bf16.mxu1 %v4998_v28 }
 0x7f4   :  { %5654 = vmatpush2.bf16.msra.mxu0 %v4869_v53  ;;  %v3528_v53 = vld [vmem:[#allocation5 + $0x68] sm:$0xff] }
 0x7f5   :  { %5695 = vmatpush2.bf16.msra.mxu1 %v4997_v9  ;;  %5655 = vmatprep.subr.bf16.mxu0 %v4862_v49  ;;  %v3592_v9 = vld [vmem:[#allocation5 + $0x268] sm:$0xff]  ;;  %v4063_v49 = vunpack.c.l.s8.bf16 %v3535_v4  ;;  %v4056_v52 = vunpack.c.h.s8.bf16 %v3528_v53  ;;  %v4048_v34 = vunpack.c.l.s8.bf16 %v3528_v53 }
 0x7f6   :  { %5696 = vmatprep.subr.bf16.mxu1 %v4990_v39  ;;  %v4191_v39 = vunpack.c.l.s8.bf16 %v3599_v62  ;;  %v4184_v47 = vunpack.c.h.s8.bf16 %v3592_v9  ;;  %v4176_v1 = vunpack.c.l.s8.bf16 %v3592_v9  ;;  %v3568_v53 = vld [vmem:[#allocation5 + $0x1a8] sm:$0xff] }
 0x7f7   :  { %v3632_v9 = vld [vmem:[#allocation5 + $0x3a8] sm:$0xff] }
 0x7f8   :  { %5656 = vmatpush2.bf16.msra.mxu0 %v4861_v24  ;;  %v3527_v24 = vld [vmem:[#allocation5 + $0x60] sm:$0xff] }
 0x7f9   :  { %5697 = vmatpush2.bf16.msra.mxu1 %v4989_v3  ;;  %5707 = vmatprep.subr.bf16.mxu0 %v4088_v45  ;;  %v3591_v3 = vld [vmem:[#allocation5 + $0x260] sm:$0xff]  ;;  %v4055_v45 = vunpack.c.h.s8.bf16 %v3527_v24 }
 0x7fa   :  { %5748 = vmatprep.subr.bf16.mxu1 %v4216_v32  ;;  %v4183_v32 = vunpack.c.h.s8.bf16 %v3591_v3 }
 0x7fb   :  { %v5413_v37 = vpop.f32.mrf.mxu0  ;;  %5658 = vmatmul.mubr.bf16.vlgmr.msra.gmra.mxu0 %v9276_v44 }
 0x7fc   :  { %v5454_v57 = vpop.f32.mrf.mxu1  ;;  %5699 = vmatmul.mubr.bf16.vlgmr.msra.gmra.mxu1 %v9290_v31  ;;  %5708 = vmatpush1.bf16.msra.mxu0 %v4087_v35  ;;  %v3520_v35 = vld [vmem:[#allocation5 + $0x28] sm:$0xff] }
 0x7fd   :  { %v9352_v0 = vadd.f32 %v5454_v57, %v5413_v37  ;;  %5749 = vmatpush1.bf16.msra.mxu1 %v4215_v51  ;;  %v5415_v30 = vpop.f32.mrf.mxu0  ;;  %5709 = vmatprep.subr.bf16.mxu0 %v4080_v42  ;;  %v3584_v51 = vld [vmem:[#allocation5 + $0x228] sm:$0xff]  ;;  %v4047_v42 = vunpack.c.l.s8.bf16 %v3527_v24  ;;  %v4040_v36 = vunpack.c.h.s8.bf16 %v3520_v35  ;;  %v3519_v37 = vld [vmem:[#allocation5 + $0x20] sm:$0xff] }
 0x7fe   :  { %v5456_v20 = vpop.f32.mrf.mxu1  ;;  %5750 = vmatprep.subr.bf16.mxu1 %v4208_v7  ;;  %5739 = vmatprep.mubr.bf16.mxu0 %v9168_v41  ;;  %v4175_v7 = vunpack.c.l.s8.bf16 %v3591_v3  ;;  %v4168_v16 = vunpack.c.h.s8.bf16 %v3584_v51  ;;  %v3583_v57 = vld [vmem:[#allocation5 + $0x220] sm:$0xff]  ;;  %v4031_v4 = vunpack.c.l.s8.bf16 %v3519_v37 }
 0x7ff   :  { %v9354_v40 = vadd.f32 %v5456_v20, %v5415_v30  ;;  %5780 = vmatprep.mubr.bf16.mxu1 %v9186_v58  ;;  %v5417_v5 = vpop.f32.mrf.mxu0  ;;  %v4032_v30 = vunpack.c.l.s8.bf16 %v3520_v35  ;;  %v4160_v20 = vunpack.c.l.s8.bf16 %v3584_v51  ;;  %v4159_v62 = vunpack.c.l.s8.bf16 %v3583_v57  ;;  %v3567_v24 = vld [vmem:[#allocation5 + $0x1a0] sm:$0xff]  ;;  %v3560_v35 = vld [vmem:[#allocation5 + $0x168] sm:$0xff] }
 0x800   :  { %v5458_v10 = vpop.f32.mrf.mxu1  ;;  %5710 = vmatpush1.bf16.msra.mxu0 %v4079_v50  ;;  %v4039_v50 = vunpack.c.h.s8.bf16 %v3519_v37  ;;  %v3631_v3 = vld [vmem:[#allocation5 + $0x3a0] sm:$0xff]  ;;  %v3624_v51 = vld [vmem:[#allocation5 + $0x368] sm:$0xff] }
 0x801   :  { %5751 = vmatpush1.bf16.msra.mxu1 %v4207_v33  ;;  %v5418_v2 = vpop.f32.mrf.mxu0  ;;  %5711 = vmatprep.subr.bf16.mxu0 %v4072_v14  ;;  %v4167_v33 = vunpack.c.h.s8.bf16 %v3583_v57  ;;  %v3576_v14 = vld [vmem:[#allocation5 + $0x1e8] sm:$0xff]  ;;  %v3559_v37 = vld [vmem:[#allocation5 + $0x160] sm:$0xff] }
 0x802   :  { %v5459_v28 = vpop.f32.mrf.mxu1  ;;  %5752 = vmatprep.subr.bf16.mxu1 %v4200_v6  ;;  %v3640_v6 = vld [vmem:[#allocation5 + $0x3e8] sm:$0xff]  ;;  %v4152_v5 = vunpack.c.h.s8.bf16 %v3576_v14  ;;  %v3623_v57 = vld [vmem:[#allocation5 + $0x360] sm:$0xff] }
 0x803   :  { %v4280_v10 = vunpack.c.h.s8.bf16 %v3640_v6 }
 0x804   :  { %5712 = vmatpush1.bf16.msra.mxu0 %v4071_v23  ;;  %v3575_v23 = vld [vmem:[#allocation5 + $0x1e0] sm:$0xff] }
 0x805   :  { %5753 = vmatpush1.bf16.msra.mxu1 %v4199_v21  ;;  %5713 = vmatprep.subr.bf16.mxu0 %v4064_v27  ;;  %v3639_v21 = vld [vmem:[#allocation5 + $0x3e0] sm:$0xff]  ;;  %v4151_v2 = vunpack.c.h.s8.bf16 %v3575_v23  ;;  %v4144_v27 = vunpack.c.l.s8.bf16 %v3576_v14  ;;  %v3552_v14 = vld [vmem:[#allocation5 + $0x128] sm:$0xff] }
 0x806   :  { %5754 = vmatprep.subr.bf16.mxu1 %v4192_v26  ;;  %v4279_v28 = vunpack.c.h.s8.bf16 %v3639_v21  ;;  %v4272_v26 = vunpack.c.l.s8.bf16 %v3640_v6  ;;  %v3616_v6 = vld [vmem:[#allocation5 + $0x328] sm:$0xff] }
 0x808   :  { %5714 = vmatpush1.bf16.msra.mxu0 %v4063_v49  ;;  %v4143_v49 = vunpack.c.l.s8.bf16 %v3575_v23  ;;  %v3551_v23 = vld [vmem:[#allocation5 + $0x120] sm:$0xff] }
 0x809   :  { %5755 = vmatpush1.bf16.msra.mxu1 %v4191_v39  ;;  %5715 = vmatprep.subr.bf16.mxu0 %v4056_v52  ;;  %v4271_v39 = vunpack.c.l.s8.bf16 %v3639_v21  ;;  %v4136_v52 = vunpack.c.h.s8.bf16 %v3568_v53  ;;  %v3615_v21 = vld [vmem:[#allocation5 + $0x320] sm:$0xff] }
 0x80a   :  { %5756 = vmatprep.subr.bf16.mxu1 %v4184_v47  ;;  %v4264_v47 = vunpack.c.h.s8.bf16 %v3632_v9 }
 0x80c   :  { %5716 = vmatpush1.bf16.msra.mxu0 %v4055_v45  ;;  %v4135_v45 = vunpack.c.h.s8.bf16 %v3567_v24 }
 0x80d   :  { %5757 = vmatpush1.bf16.msra.mxu1 %v4183_v32  ;;  %5717 = vmatprep.subr.bf16.mxu0 %v4048_v34  ;;  %v4263_v32 = vunpack.c.h.s8.bf16 %v3631_v3  ;;  %v4128_v34 = vunpack.c.l.s8.bf16 %v3568_v53  ;;  %v3672_v53 = vld [vmem:[#allocation5 + $0x4e8] sm:$0xff] }
 0x80e   :  { %5758 = vmatprep.subr.bf16.mxu1 %v4176_v1  ;;  %v4256_v1 = vunpack.c.l.s8.bf16 %v3632_v9  ;;  %v3736_v9 = vld [vmem:[#allocation5 + $0x6e8] sm:$0xff] }
 0x810   :  { %5718 = vmatpush1.bf16.msra.mxu0 %v4047_v42  ;;  %v4127_v42 = vunpack.c.l.s8.bf16 %v3567_v24  ;;  %v3671_v24 = vld [vmem:[#allocation5 + $0x4e0] sm:$0xff] }
 0x811   :  { %5759 = vmatpush1.bf16.msra.mxu1 %v4175_v7  ;;  %5719 = vmatprep.subr.bf16.mxu0 %v4040_v36  ;;  %v4255_v7 = vunpack.c.l.s8.bf16 %v3631_v3  ;;  %v4120_v36 = vunpack.c.h.s8.bf16 %v3560_v35  ;;  %v3735_v3 = vld [vmem:[#allocation5 + $0x6e0] sm:$0xff] }
 0x812   :  { %5760 = vmatprep.subr.bf16.mxu1 %v4168_v16  ;;  %v4248_v16 = vunpack.c.h.s8.bf16 %v3624_v51 }
 0x814   :  { %5720 = vmatpush1.bf16.msra.mxu0 %v4039_v50  ;;  %v4119_v50 = vunpack.c.h.s8.bf16 %v3559_v37 }
 0x815   :  { %5761 = vmatpush1.bf16.msra.mxu1 %v4167_v33  ;;  %5721 = vmatprep.subr.bf16.mxu0 %v4032_v30  ;;  %v4247_v33 = vunpack.c.h.s8.bf16 %v3623_v57  ;;  %v4112_v30 = vunpack.c.l.s8.bf16 %v3560_v35  ;;  %v3664_v35 = vld [vmem:[#allocation5 + $0x4a8] sm:$0xff] }
 0x816   :  { %5762 = vmatprep.subr.bf16.mxu1 %v4160_v20  ;;  %v4240_v20 = vunpack.c.l.s8.bf16 %v3624_v51  ;;  %v3728_v51 = vld [vmem:[#allocation5 + $0x6a8] sm:$0xff] }
 0x818   :  { %5722 = vmatpush1.bf16.msra.mxu0 %v4031_v4  ;;  %v4111_v4 = vunpack.c.l.s8.bf16 %v3559_v37  ;;  %v4463_v37 = vunpack.c.l.s8.bf16 %v3735_v3 }
 0x819   :  { %5763 = vmatpush1.bf16.msra.mxu1 %v4159_v62  ;;  %5723 = vmatprep.subr.bf16.mxu0 %v4152_v5  ;;  %v4239_v62 = vunpack.c.l.s8.bf16 %v3623_v57  ;;  %v4104_v5 = vunpack.c.h.s8.bf16 %v3552_v14 }
 0x81a   :  { %5764 = vmatprep.subr.bf16.mxu1 %v4280_v10  ;;  %v4232_v10 = vunpack.c.h.s8.bf16 %v3616_v6 }
 0x81c   :  { %5724 = vmatpush2.bf16.msra.mxu0 %v4151_v2  ;;  %v4103_v2 = vunpack.c.h.s8.bf16 %v3551_v23 }
 0x81d   :  { %5765 = vmatpush2.bf16.msra.mxu1 %v4279_v28  ;;  %5725 = vmatprep.subr.bf16.mxu0 %v4144_v27  ;;  %v4231_v28 = vunpack.c.h.s8.bf16 %v3615_v21  ;;  %v4096_v27 = vunpack.c.l.s8.bf16 %v3552_v14  ;;  %v3727_v14 = vld [vmem:[#allocation5 + $0x6a0] sm:$0xff] }
 0x81e   :  { %5766 = vmatprep.subr.bf16.mxu1 %v4272_v26  ;;  %v4224_v26 = vunpack.c.l.s8.bf16 %v3616_v6 }
 0x820   :  { %5726 = vmatpush2.bf16.msra.mxu0 %v4143_v49  ;;  %v4095_v49 = vunpack.c.l.s8.bf16 %v3551_v23  ;;  %v4455_v23 = vunpack.c.h.s8.bf16 %v3727_v14 }
 0x821   :  { %5767 = vmatpush2.bf16.msra.mxu1 %v4271_v39  ;;  %5727 = vmatprep.subr.bf16.mxu0 %v4136_v52  ;;  %v4223_v39 = vunpack.c.l.s8.bf16 %v3615_v21  ;;  %v4344_v52 = vunpack.c.h.s8.bf16 %v3672_v53 }
 0x822   :  { %5768 = vmatprep.subr.bf16.mxu1 %v4264_v47  ;;  %v4472_v47 = vunpack.c.h.s8.bf16 %v3736_v9 }
 0x824   :  { %5728 = vmatpush2.bf16.msra.mxu0 %v4135_v45  ;;  %v4343_v45 = vunpack.c.h.s8.bf16 %v3671_v24 }
 0x825   :  { %5769 = vmatpush2.bf16.msra.mxu1 %v4263_v32  ;;  %5729 = vmatprep.subr.bf16.mxu0 %v4128_v34  ;;  %v4471_v32 = vunpack.c.h.s8.bf16 %v3735_v3  ;;  %v4336_v34 = vunpack.c.l.s8.bf16 %v3672_v53 }
 0x826   :  { %5770 = vmatprep.subr.bf16.mxu1 %v4256_v1  ;;  %v4464_v1 = vunpack.c.l.s8.bf16 %v3736_v9  ;;  %v4447_v9 = vunpack.c.l.s8.bf16 %v3727_v14 }
 0x828   :  { %5730 = vmatpush2.bf16.msra.mxu0 %v4127_v42 }
 0x829   :  { %5771 = vmatpush2.bf16.msra.mxu1 %v4255_v7  ;;  %5731 = vmatprep.subr.bf16.mxu0 %v4120_v36 }
 0x82a   :  { %5772 = vmatprep.subr.bf16.mxu1 %v4248_v16  ;;  %v4335_v16 = vunpack.c.l.s8.bf16 %v3671_v24 }
 0x82c   :  { %5732 = vmatpush2.bf16.msra.mxu0 %v4119_v50 }
 0x82d   :  { %5773 = vmatpush2.bf16.msra.mxu1 %v4247_v33  ;;  %5733 = vmatprep.subr.bf16.mxu0 %v4112_v30  ;;  %v4328_v33 = vunpack.c.h.s8.bf16 %v3664_v35  ;;  %v4456_v30 = vunpack.c.h.s8.bf16 %v3728_v51 }
 0x82e   :  { %5774 = vmatprep.subr.bf16.mxu1 %v4240_v20  ;;  %v3663_v20 = vld [vmem:[#allocation5 + $0x4a0] sm:$0xff] }
 0x82f   :  { %v4319_v53 = vunpack.c.l.s8.bf16 %v3663_v20 }
 0x830   :  { %5734 = vmatpush2.bf16.msra.mxu0 %v4111_v4 }
 0x831   :  { %5775 = vmatpush2.bf16.msra.mxu1 %v4239_v62  ;;  %5735 = vmatprep.subr.bf16.mxu0 %v4104_v5 }
 0x832   :  { %5776 = vmatprep.subr.bf16.mxu1 %v4232_v10  ;;  %v4327_v10 = vunpack.c.h.s8.bf16 %v3663_v20  ;;  %v3768_v20 = vld [vmem:[#allocation5 + $0x7e8] sm:$0xff] }
 0x834   :  { %5736 = vmatpush2.bf16.msra.mxu0 %v4103_v2 }
 0x835   :  { %5777 = vmatpush2.bf16.msra.mxu1 %v4231_v28  ;;  %5737 = vmatprep.subr.bf16.mxu0 %v4096_v27  ;;  %v4320_v28 = vunpack.c.l.s8.bf16 %v3664_v35  ;;  %v4448_v27 = vunpack.c.l.s8.bf16 %v3728_v51 }
 0x836   :  { %5778 = vmatprep.subr.bf16.mxu1 %v4224_v26  ;;  %v3656_v26 = vld [vmem:[#allocation5 + $0x468] sm:$0xff] }
 0x838   :  { %5738 = vmatpush2.bf16.msra.mxu0 %v4095_v49  ;;  %v4312_v49 = vunpack.c.h.s8.bf16 %v3656_v26 }
 0x839   :  { %5779 = vmatpush2.bf16.msra.mxu1 %v4223_v39  ;;  %5789 = vmatprep.subr.bf16.mxu0 %v4344_v52  ;;  %v3655_v52 = vld [vmem:[#allocation5 + $0x460] sm:$0xff] }
 0x83a   :  { %5830 = vmatprep.subr.bf16.mxu1 %v4472_v47  ;;  %v3719_v47 = vld [vmem:[#allocation5 + $0x660] sm:$0xff]  ;;  %v4311_v24 = vunpack.c.h.s8.bf16 %v3655_v52  ;;  %v4303_v35 = vunpack.c.l.s8.bf16 %v3655_v52 }
 0x83b   :  { %v5495_v42 = vpop.f32.mrf.mxu0  ;;  %5740 = vmatmul.mubr.bf16.vlgmr.msra.gmra.mxu0 %v9166_v13  ;;  %v4439_v3 = vunpack.c.h.s8.bf16 %v3719_v47  ;;  %v4431_v51 = vunpack.c.l.s8.bf16 %v3719_v47  ;;  %v3695_v52 = vld [vmem:[#allocation5 + $0x5a0] sm:$0xff] }
 0x83c   :  { %v5536_v7 = vpop.f32.mrf.mxu1  ;;  %5781 = vmatmul.mubr.bf16.vlgmr.msra.gmra.mxu1 %v9184_v56  ;;  %v5496_v36 = vadd.f32 %v5495_v42, %v9352_v0  ;;  %5790 = vmatpush1.bf16.msra.mxu0 %v4343_v45  ;;  %v4304_v45 = vunpack.c.l.s8.bf16 %v3656_v26  ;;  %v3696_v26 = vld [vmem:[#allocation5 + $0x5a8] sm:$0xff]  ;;  %v3759_v47 = vld [vmem:[#allocation5 + $0x7a0] sm:$0xff] }
 0x83d   :  { %5831 = vmatpush1.bf16.msra.mxu1 %v4471_v32  ;;  %v5497_v57 = vpop.f32.mrf.mxu0  ;;  %5791 = vmatprep.subr.bf16.mxu0 %v4336_v34  ;;  %v3648_v34 = vld [vmem:[#allocation5 + $0x428] sm:$0xff] }
 0x83e   :  { %v5538_v50 = vpop.f32.mrf.mxu1  ;;  %5832 = vmatprep.subr.bf16.mxu1 %v4464_v1  ;;  %v9361_v6 = vadd.f32 %v5536_v7, %v5496_v36  ;;  %v5498_v4 = vadd.f32 %v5497_v57, %v9354_v40  ;;  %5821 = vmatprep.mubr.bf16.mxu0 %v9210_v46  ;;  %v3720_v40 = vld [vmem:[#allocation5 + $0x668] sm:$0xff]  ;;  %v4296_v42 = vunpack.c.h.s8.bf16 %v3648_v34  ;;  %v3647_v36 = vld [vmem:[#allocation5 + $0x420] sm:$0xff] }
 0x83f   :  { %5862 = vmatprep.mubr.bf16.mxu1 %v9230_v22  ;;  %v5499_v0 = vpop.f32.mrf.mxu0  ;;  %v4440_v39 = vunpack.c.h.s8.bf16 %v3720_v40  ;;  %v4432_v32 = vunpack.c.l.s8.bf16 %v3720_v40  ;;  %v3712_v1 = vld [vmem:[#allocation5 + $0x628] sm:$0xff]  ;;  %v4287_v14 = vunpack.c.l.s8.bf16 %v3647_v36 }
 0x840   :  { %v5540_v62 = vpop.f32.mrf.mxu1  ;;  %v9366_v5 = vadd.f32 %v5538_v50, %v5498_v4  ;;  %5792 = vmatpush1.bf16.msra.mxu0 %v4335_v16  ;;  %v4424_v7 = vunpack.c.h.s8.bf16 %v3712_v1  ;;  %v3711_v16 = vld [vmem:[#allocation5 + $0x620] sm:$0xff]  ;;  %v4288_v50 = vunpack.c.l.s8.bf16 %v3648_v34  ;;  %v3760_v40 = vld [vmem:[#allocation5 + $0x7a8] sm:$0xff] }
 0x841   :  { %5833 = vmatpush1.bf16.msra.mxu1 %v4463_v37  ;;  %v5500_v21 = vpop.f32.mrf.mxu0  ;;  %5793 = vmatprep.subr.bf16.mxu0 %v4328_v33  ;;  %v4295_v37 = vunpack.c.h.s8.bf16 %v3647_v36  ;;  %v4423_v57 = vunpack.c.h.s8.bf16 %v3711_v16  ;;  %v4416_v33 = vunpack.c.l.s8.bf16 %v3712_v1  ;;  %v4415_v4 = vunpack.c.l.s8.bf16 %v3711_v16  ;;  %v3688_v34 = vld [vmem:[#allocation5 + $0x568] sm:$0xff]  ;;  %v3687_v36 = vld [vmem:[#allocation5 + $0x560] sm:$0xff] }
 0x842   :  { %v5541_v2 = vpop.f32.mrf.mxu1  ;;  %5834 = vmatprep.subr.bf16.mxu1 %v4456_v30  ;;  %v3704_v30 = vld [vmem:[#allocation5 + $0x5e8] sm:$0xff]  ;;  %v4536_v62 = vunpack.c.h.s8.bf16 %v3768_v20  ;;  %v3751_v16 = vld [vmem:[#allocation5 + $0x760] sm:$0xff] }
 0x843   :  { %v4408_v0 = vunpack.c.h.s8.bf16 %v3704_v30  ;;  %v3752_v1 = vld [vmem:[#allocation5 + $0x768] sm:$0xff] }
 0x844   :  { %5794 = vmatpush1.bf16.msra.mxu0 %v4327_v10  ;;  %v3703_v10 = vld [vmem:[#allocation5 + $0x5e0] sm:$0xff] }
 0x845   :  { %5835 = vmatpush1.bf16.msra.mxu1 %v4455_v23  ;;  %5795 = vmatprep.subr.bf16.mxu0 %v4320_v28  ;;  %v3767_v23 = vld [vmem:[#allocation5 + $0x7e0] sm:$0xff]  ;;  %v4407_v21 = vunpack.c.h.s8.bf16 %v3703_v10  ;;  %v4400_v28 = vunpack.c.l.s8.bf16 %v3704_v30  ;;  %v3680_v30 = vld [vmem:[#allocation5 + $0x528] sm:$0xff] }
 0x846   :  { %5836 = vmatprep.subr.bf16.mxu1 %v4448_v27  ;;  %v4535_v2 = vunpack.c.h.s8.bf16 %v3767_v23  ;;  %v4528_v27 = vunpack.c.l.s8.bf16 %v3768_v20  ;;  %v3744_v20 = vld [vmem:[#allocation5 + $0x728] sm:$0xff] }
 0x848   :  { %5796 = vmatpush1.bf16.msra.mxu0 %v4319_v53  ;;  %v4399_v53 = vunpack.c.l.s8.bf16 %v3703_v10  ;;  %v3679_v10 = vld [vmem:[#allocation5 + $0x520] sm:$0xff] }
 0x849   :  { %5837 = vmatpush1.bf16.msra.mxu1 %v4447_v9  ;;  %5797 = vmatprep.subr.bf16.mxu0 %v4312_v49  ;;  %v4527_v9 = vunpack.c.l.s8.bf16 %v3767_v23  ;;  %v4392_v49 = vunpack.c.h.s8.bf16 %v3696_v26  ;;  %v3743_v23 = vld [vmem:[#allocation5 + $0x720] sm:$0xff] }
 0x84a   :  { %5838 = vmatprep.subr.bf16.mxu1 %v4440_v39  ;;  %v4520_v39 = vunpack.c.h.s8.bf16 %v3760_v40 }
 0x84c   :  { %5798 = vmatpush1.bf16.msra.mxu0 %v4311_v24  ;;  %v4391_v24 = vunpack.c.h.s8.bf16 %v3695_v52 }
 0x84d   :  { %5839 = vmatpush1.bf16.msra.mxu1 %v4439_v3  ;;  %5799 = vmatprep.subr.bf16.mxu0 %v4304_v45  ;;  %v4519_v3 = vunpack.c.h.s8.bf16 %v3759_v47  ;;  %v4384_v45 = vunpack.c.l.s8.bf16 %v3696_v26  ;;  %v3800_v26 = vld [vmem:[#allocation5 + $0x8e8] sm:$0xff] }
 0x84e   :  { %5840 = vmatprep.subr.bf16.mxu1 %v4432_v32  ;;  %v4512_v32 = vunpack.c.l.s8.bf16 %v3760_v40  ;;  %v3864_v40 = vld [vmem:[#allocation5 + $0xae8] sm:$0xff] }
 0x850   :  { %5800 = vmatpush1.bf16.msra.mxu0 %v4303_v35  ;;  %v4383_v35 = vunpack.c.l.s8.bf16 %v3695_v52  ;;  %v3799_v52 = vld [vmem:[#allocation5 + $0x8e0] sm:$0xff] }
 0x851   :  { %5841 = vmatpush1.bf16.msra.mxu1 %v4431_v51  ;;  %5801 = vmatprep.subr.bf16.mxu0 %v4296_v42  ;;  %v4511_v51 = vunpack.c.l.s8.bf16 %v3759_v47  ;;  %v4376_v42 = vunpack.c.h.s8.bf16 %v3688_v34  ;;  %v3863_v47 = vld [vmem:[#allocation5 + $0xae0] sm:$0xff] }
 0x852   :  { %5842 = vmatprep.subr.bf16.mxu1 %v4424_v7  ;;  %v4504_v7 = vunpack.c.h.s8.bf16 %v3752_v1 }
 0x854   :  { %5802 = vmatpush1.bf16.msra.mxu0 %v4295_v37  ;;  %v4375_v37 = vunpack.c.h.s8.bf16 %v3687_v36 }
 0x855   :  { %5843 = vmatpush1.bf16.msra.mxu1 %v4423_v57  ;;  %5803 = vmatprep.subr.bf16.mxu0 %v4288_v50  ;;  %v4503_v57 = vunpack.c.h.s8.bf16 %v3751_v16  ;;  %v4368_v50 = vunpack.c.l.s8.bf16 %v3688_v34  ;;  %v3792_v34 = vld [vmem:[#allocation5 + $0x8a8] sm:$0xff] }
 0x856   :  { %5844 = vmatprep.subr.bf16.mxu1 %v4416_v33  ;;  %v4496_v33 = vunpack.c.l.s8.bf16 %v3752_v1  ;;  %v3856_v1 = vld [vmem:[#allocation5 + $0xaa8] sm:$0xff] }
 0x858   :  { %5804 = vmatpush1.bf16.msra.mxu0 %v4287_v14  ;;  %v4367_v14 = vunpack.c.l.s8.bf16 %v3687_v36  ;;  %v4719_v36 = vunpack.c.l.s8.bf16 %v3863_v47 }
 0x859   :  { %5845 = vmatpush1.bf16.msra.mxu1 %v4415_v4  ;;  %5805 = vmatprep.subr.bf16.mxu0 %v4408_v0  ;;  %v4495_v4 = vunpack.c.l.s8.bf16 %v3751_v16  ;;  %v4360_v0 = vunpack.c.h.s8.bf16 %v3680_v30 }
 0x85a   :  { %5846 = vmatprep.subr.bf16.mxu1 %v4536_v62  ;;  %v4488_v62 = vunpack.c.h.s8.bf16 %v3744_v20 }
 0x85c   :  { %5806 = vmatpush2.bf16.msra.mxu0 %v4407_v21  ;;  %v4359_v21 = vunpack.c.h.s8.bf16 %v3679_v10 }
 0x85d   :  { %5847 = vmatpush2.bf16.msra.mxu1 %v4535_v2  ;;  %5807 = vmatprep.subr.bf16.mxu0 %v4400_v28  ;;  %v4487_v2 = vunpack.c.h.s8.bf16 %v3743_v23  ;;  %v4352_v28 = vunpack.c.l.s8.bf16 %v3680_v30  ;;  %v3855_v30 = vld [vmem:[#allocation5 + $0xaa0] sm:$0xff] }
 0x85e   :  { %5848 = vmatprep.subr.bf16.mxu1 %v4528_v27  ;;  %v4480_v27 = vunpack.c.l.s8.bf16 %v3744_v20 }
 0x860   :  { %5808 = vmatpush2.bf16.msra.mxu0 %v4399_v53  ;;  %v4351_v53 = vunpack.c.l.s8.bf16 %v3679_v10  ;;  %v4711_v10 = vunpack.c.h.s8.bf16 %v3855_v30 }
 0x861   :  { %5849 = vmatpush2.bf16.msra.mxu1 %v4527_v9  ;;  %5809 = vmatprep.subr.bf16.mxu0 %v4392_v49  ;;  %v4479_v9 = vunpack.c.l.s8.bf16 %v3743_v23  ;;  %v4600_v49 = vunpack.c.h.s8.bf16 %v3800_v26 }
 0x862   :  { %5850 = vmatprep.subr.bf16.mxu1 %v4520_v39  ;;  %v4728_v39 = vunpack.c.h.s8.bf16 %v3864_v40 }
 0x864   :  { %5810 = vmatpush2.bf16.msra.mxu0 %v4391_v24  ;;  %v4599_v24 = vunpack.c.h.s8.bf16 %v3799_v52 }
 0x865   :  { %5851 = vmatpush2.bf16.msra.mxu1 %v4519_v3  ;;  %5811 = vmatprep.subr.bf16.mxu0 %v4384_v45  ;;  %v4727_v3 = vunpack.c.h.s8.bf16 %v3863_v47  ;;  %v4592_v45 = vunpack.c.l.s8.bf16 %v3800_v26 }
 0x866   :  { %5852 = vmatprep.subr.bf16.mxu1 %v4512_v32  ;;  %v4720_v32 = vunpack.c.l.s8.bf16 %v3864_v40  ;;  %v4703_v40 = vunpack.c.l.s8.bf16 %v3855_v30 }
 0x868   :  { %5812 = vmatpush2.bf16.msra.mxu0 %v4383_v35 }
 0x869   :  { %5853 = vmatpush2.bf16.msra.mxu1 %v4511_v51  ;;  %5813 = vmatprep.subr.bf16.mxu0 %v4376_v42 }
 0x86a   :  { %5854 = vmatprep.subr.bf16.mxu1 %v4504_v7  ;;  %v4591_v7 = vunpack.c.l.s8.bf16 %v3799_v52 }
 0x86c   :  { %5814 = vmatpush2.bf16.msra.mxu0 %v4375_v37 }
 0x86d   :  { %5855 = vmatpush2.bf16.msra.mxu1 %v4503_v57  ;;  %5815 = vmatprep.subr.bf16.mxu0 %v4368_v50  ;;  %v4584_v57 = vunpack.c.h.s8.bf16 %v3792_v34  ;;  %v4712_v50 = vunpack.c.h.s8.bf16 %v3856_v1 }
 0x86e   :  { %5856 = vmatprep.subr.bf16.mxu1 %v4496_v33  ;;  %v3791_v33 = vld [vmem:[#allocation5 + $0x8a0] sm:$0xff] }
 0x86f   :  { %v4575_v26 = vunpack.c.l.s8.bf16 %v3791_v33 }
 0x870   :  { %5816 = vmatpush2.bf16.msra.mxu0 %v4367_v14 }
 0x871   :  { %5857 = vmatpush2.bf16.msra.mxu1 %v4495_v4  ;;  %5817 = vmatprep.subr.bf16.mxu0 %v4360_v0 }
 0x872   :  { %5858 = vmatprep.subr.bf16.mxu1 %v4488_v62  ;;  %v4583_v62 = vunpack.c.h.s8.bf16 %v3791_v33  ;;  %v3896_v33 = vld [vmem:[#allocation5 + $0xbe8] sm:$0xff] }
 0x874   :  { %5818 = vmatpush2.bf16.msra.mxu0 %v4359_v21 }
 0x875   :  { %5859 = vmatpush2.bf16.msra.mxu1 %v4487_v2  ;;  %5819 = vmatprep.subr.bf16.mxu0 %v4352_v28  ;;  %v4576_v2 = vunpack.c.l.s8.bf16 %v3792_v34  ;;  %v4704_v28 = vunpack.c.l.s8.bf16 %v3856_v1 }
 0x876   :  { %5860 = vmatprep.subr.bf16.mxu1 %v4480_v27  ;;  %v3784_v27 = vld [vmem:[#allocation5 + $0x868] sm:$0xff] }
 0x878   :  { %5820 = vmatpush2.bf16.msra.mxu0 %v4351_v53  ;;  %v4568_v53 = vunpack.c.h.s8.bf16 %v3784_v27 }
 0x879   :  { %5861 = vmatpush2.bf16.msra.mxu1 %v4479_v9  ;;  %5871 = vmatprep.subr.bf16.mxu0 %v4600_v49  ;;  %v3783_v49 = vld [vmem:[#allocation5 + $0x860] sm:$0xff] }
 0x87a   :  { %5912 = vmatprep.subr.bf16.mxu1 %v4728_v39  ;;  %v3847_v39 = vld [vmem:[#allocation5 + $0xa60] sm:$0xff]  ;;  %v4567_v52 = vunpack.c.h.s8.bf16 %v3783_v49  ;;  %v4559_v34 = vunpack.c.l.s8.bf16 %v3783_v49 }
 0x87b   :  { %v5577_v35 = vpop.f32.mrf.mxu0  ;;  %5822 = vmatmul.mubr.bf16.vlgmr.msra.gmra.mxu0 %v9208_v18  ;;  %v4695_v47 = vunpack.c.h.s8.bf16 %v3847_v39  ;;  %v4687_v1 = vunpack.c.l.s8.bf16 %v3847_v39  ;;  %v3823_v49 = vld [vmem:[#allocation5 + $0x9a0] sm:$0xff] }
 0x87c   :  { %v5618_v51 = vpop.f32.mrf.mxu1  ;;  %5863 = vmatmul.mubr.bf16.vlgmr.msra.gmra.mxu1 %v9228_v25  ;;  %v5578_v42 = vadd.f32 %v5577_v35, %v9361_v6  ;;  %5872 = vmatpush1.bf16.msra.mxu0 %v4599_v24  ;;  %v4560_v24 = vunpack.c.l.s8.bf16 %v3784_v27  ;;  %v3824_v27 = vld [vmem:[#allocation5 + $0x9a8] sm:$0xff]  ;;  %v3887_v39 = vld [vmem:[#allocation5 + $0xba0] sm:$0xff] }
 0x87d   :  { %5913 = vmatpush1.bf16.msra.mxu1 %v4727_v3  ;;  %v5579_v16 = vpop.f32.mrf.mxu0  ;;  %5873 = vmatprep.subr.bf16.mxu0 %v4592_v45  ;;  %v3776_v45 = vld [vmem:[#allocation5 + $0x828] sm:$0xff] }
 0x87e   :  { %v5620_v37 = vpop.f32.mrf.mxu1  ;;  %5914 = vmatprep.subr.bf16.mxu1 %v4720_v32  ;;  %v9371_v20 = vadd.f32 %v5618_v51, %v5578_v42  ;;  %v5580_v14 = vadd.f32 %v5579_v16, %v9366_v5  ;;  %5903 = vmatprep.mubr.bf16.mxu0 %v9250_v48  ;;  %v3848_v5 = vld [vmem:[#allocation5 + $0xa68] sm:$0xff]  ;;  %v4552_v35 = vunpack.c.h.s8.bf16 %v3776_v45  ;;  %v3775_v42 = vld [vmem:[#allocation5 + $0x820] sm:$0xff] }
 0x87f   :  { %5944 = vmatprep.mubr.bf16.mxu1 %v9264_v29  ;;  %v5581_v6 = vpop.f32.mrf.mxu0  ;;  %v4696_v9 = vunpack.c.h.s8.bf16 %v3848_v5  ;;  %v4688_v3 = vunpack.c.l.s8.bf16 %v3848_v5  ;;  %v3840_v32 = vld [vmem:[#allocation5 + $0xa28] sm:$0xff]  ;;  %v4543_v30 = vunpack.c.l.s8.bf16 %v3775_v42 }
 0x880   :  { %v5622_v4 = vpop.f32.mrf.mxu1  ;;  %v9376_v0 = vadd.f32 %v5620_v37, %v5580_v14  ;;  %5874 = vmatpush1.bf16.msra.mxu0 %v4591_v7  ;;  %v4680_v51 = vunpack.c.h.s8.bf16 %v3840_v32  ;;  %v3839_v7 = vld [vmem:[#allocation5 + $0xa20] sm:$0xff]  ;;  %v4544_v37 = vunpack.c.l.s8.bf16 %v3776_v45  ;;  %v3888_v5 = vld [vmem:[#allocation5 + $0xba8] sm:$0xff] }
 0x881   :  { %5915 = vmatpush1.bf16.msra.mxu1 %v4719_v36  ;;  %v5582_v23 = vpop.f32.mrf.mxu0  ;;  %5875 = vmatprep.subr.bf16.mxu0 %v4584_v57  ;;  %v4551_v36 = vunpack.c.h.s8.bf16 %v3775_v42  ;;  %v4679_v16 = vunpack.c.h.s8.bf16 %v3839_v7  ;;  %v4672_v57 = vunpack.c.l.s8.bf16 %v3840_v32  ;;  %v4671_v14 = vunpack.c.l.s8.bf16 %v3839_v7  ;;  %v3816_v45 = vld [vmem:[#allocation5 + $0x968] sm:$0xff]  ;;  %v3815_v42 = vld [vmem:[#allocation5 + $0x960] sm:$0xff] }
 0x882   :  { %v5623_v21 = vpop.f32.mrf.mxu1  ;;  %5916 = vmatprep.subr.bf16.mxu1 %v4712_v50  ;;  %v3832_v50 = vld [vmem:[#allocation5 + $0x9e8] sm:$0xff]  ;;  %v4792_v4 = vunpack.c.h.s8.bf16 %v3896_v33  ;;  %v3879_v7 = vld [vmem:[#allocation5 + $0xb60] sm:$0xff] }
 0x883   :  { %v4664_v6 = vunpack.c.h.s8.bf16 %v3832_v50  ;;  %v3880_v32 = vld [vmem:[#allocation5 + $0xb68] sm:$0xff] }
 0x884   :  { %5876 = vmatpush1.bf16.msra.mxu0 %v4583_v62  ;;  %v3831_v62 = vld [vmem:[#allocation5 + $0x9e0] sm:$0xff] }
 0x885   :  { %5917 = vmatpush1.bf16.msra.mxu1 %v4711_v10  ;;  %5877 = vmatprep.subr.bf16.mxu0 %v4576_v2  ;;  %v3895_v10 = vld [vmem:[#allocation5 + $0xbe0] sm:$0xff]  ;;  %v4663_v23 = vunpack.c.h.s8.bf16 %v3831_v62  ;;  %v4656_v2 = vunpack.c.l.s8.bf16 %v3832_v50  ;;  %v3808_v50 = vld [vmem:[#allocation5 + $0x928] sm:$0xff] }
 0x886   :  { %5918 = vmatprep.subr.bf16.mxu1 %v4704_v28  ;;  %v4791_v21 = vunpack.c.h.s8.bf16 %v3895_v10  ;;  %v4784_v28 = vunpack.c.l.s8.bf16 %v3896_v33  ;;  %v3872_v33 = vld [vmem:[#allocation5 + $0xb28] sm:$0xff] }
 0x888   :  { %5878 = vmatpush1.bf16.msra.mxu0 %v4575_v26  ;;  %v4655_v26 = vunpack.c.l.s8.bf16 %v3831_v62  ;;  %v3807_v62 = vld [vmem:[#allocation5 + $0x920] sm:$0xff] }
 0x889   :  { %5919 = vmatpush1.bf16.msra.mxu1 %v4703_v40  ;;  %5879 = vmatprep.subr.bf16.mxu0 %v4568_v53  ;;  %v4783_v40 = vunpack.c.l.s8.bf16 %v3895_v10  ;;  %v4648_v53 = vunpack.c.h.s8.bf16 %v3824_v27  ;;  %v3871_v10 = vld [vmem:[#allocation5 + $0xb20] sm:$0xff] }
 0x88a   :  { %5920 = vmatprep.subr.bf16.mxu1 %v4696_v9  ;;  %v4776_v9 = vunpack.c.h.s8.bf16 %v3888_v5 }
 0x88c   :  { %5880 = vmatpush1.bf16.msra.mxu0 %v4567_v52  ;;  %v4647_v52 = vunpack.c.h.s8.bf16 %v3823_v49 }
 0x88d   :  { %5921 = vmatpush1.bf16.msra.mxu1 %v4695_v47  ;;  %5881 = vmatprep.subr.bf16.mxu0 %v4560_v24  ;;  %v4775_v47 = vunpack.c.h.s8.bf16 %v3887_v39  ;;  %v4640_v24 = vunpack.c.l.s8.bf16 %v3824_v27  ;;  %v3928_v27 = vld [vmem:[#allocation5 + $0xce8] sm:$0xff] }
 0x88e   :  { %5922 = vmatprep.subr.bf16.mxu1 %v4688_v3  ;;  %v4768_v3 = vunpack.c.l.s8.bf16 %v3888_v5  ;;  %v3992_v5 = vld [vmem:[#allocation5 + $0xee8] sm:$0xff] }
 0x890   :  { %5882 = vmatpush1.bf16.msra.mxu0 %v4559_v34  ;;  %v4639_v34 = vunpack.c.l.s8.bf16 %v3823_v49  ;;  %v3927_v49 = vld [vmem:[#allocation5 + $0xce0] sm:$0xff] }
 0x891   :  { %5923 = vmatpush1.bf16.msra.mxu1 %v4687_v1  ;;  %5883 = vmatprep.subr.bf16.mxu0 %v4552_v35  ;;  %v4767_v1 = vunpack.c.l.s8.bf16 %v3887_v39  ;;  %v4632_v35 = vunpack.c.h.s8.bf16 %v3816_v45  ;;  %v3991_v39 = vld [vmem:[#allocation5 + $0xee0] sm:$0xff] }
 0x892   :  { %5924 = vmatprep.subr.bf16.mxu1 %v4680_v51  ;;  %v4760_v51 = vunpack.c.h.s8.bf16 %v3880_v32 }
 0x894   :  { %5884 = vmatpush1.bf16.msra.mxu0 %v4551_v36  ;;  %v4631_v36 = vunpack.c.h.s8.bf16 %v3815_v42 }
 0x895   :  { %5925 = vmatpush1.bf16.msra.mxu1 %v4679_v16  ;;  %5885 = vmatprep.subr.bf16.mxu0 %v4544_v37  ;;  %v4759_v16 = vunpack.c.h.s8.bf16 %v3879_v7  ;;  %v4624_v37 = vunpack.c.l.s8.bf16 %v3816_v45  ;;  %v3920_v45 = vld [vmem:[#allocation5 + $0xca8] sm:$0xff] }
 0x896   :  { %5926 = vmatprep.subr.bf16.mxu1 %v4672_v57  ;;  %v4752_v57 = vunpack.c.l.s8.bf16 %v3880_v32  ;;  %v3984_v32 = vld [vmem:[#allocation5 + $0xea8] sm:$0xff] }
 0x898   :  { %5886 = vmatpush1.bf16.msra.mxu0 %v4543_v30  ;;  %v4623_v30 = vunpack.c.l.s8.bf16 %v3815_v42 }
 0x899   :  { %5927 = vmatpush1.bf16.msra.mxu1 %v4671_v14  ;;  %5887 = vmatprep.subr.bf16.mxu0 %v4664_v6  ;;  %v4751_v14 = vunpack.c.l.s8.bf16 %v3879_v7  ;;  %v4616_v6 = vunpack.c.h.s8.bf16 %v3808_v50  ;;  %v4847_v7 = vunpack.c.l.s8.bf16 %v3927_v49 }
 0x89a   :  { %5928 = vmatprep.subr.bf16.mxu1 %v4792_v4  ;;  %v4744_v4 = vunpack.c.h.s8.bf16 %v3872_v33 }
 0x89c   :  { %5888 = vmatpush2.bf16.msra.mxu0 %v4663_v23  ;;  %v4615_v23 = vunpack.c.h.s8.bf16 %v3807_v62 }
 0x89d   :  { %5929 = vmatpush2.bf16.msra.mxu1 %v4791_v21  ;;  %5889 = vmatprep.subr.bf16.mxu0 %v4656_v2  ;;  %v4743_v21 = vunpack.c.h.s8.bf16 %v3871_v10  ;;  %v4608_v2 = vunpack.c.l.s8.bf16 %v3808_v50 }
 0x89e   :  { %5930 = vmatprep.subr.bf16.mxu1 %v4784_v28  ;;  %v4736_v28 = vunpack.c.l.s8.bf16 %v3872_v33  ;;  %v4840_v33 = vunpack.c.h.s8.bf16 %v3920_v45 }
 0x8a0   :  { %5890 = vmatpush2.bf16.msra.mxu0 %v4655_v26  ;;  %v4607_v26 = vunpack.c.l.s8.bf16 %v3807_v62 }
 0x8a1   :  { %5931 = vmatpush2.bf16.msra.mxu1 %v4783_v40  ;;  %5891 = vmatprep.subr.bf16.mxu0 %v4648_v53  ;;  %v4735_v40 = vunpack.c.l.s8.bf16 %v3871_v10  ;;  %v4856_v53 = vunpack.c.h.s8.bf16 %v3928_v27 }
 0x8a2   :  { %5932 = vmatprep.subr.bf16.mxu1 %v4776_v9  ;;  %v4984_v9 = vunpack.c.h.s8.bf16 %v3992_v5 }
 0x8a4   :  { %5892 = vmatpush2.bf16.msra.mxu0 %v4647_v52  ;;  %v4855_v52 = vunpack.c.h.s8.bf16 %v3927_v49 }
 0x8a5   :  { %5933 = vmatpush2.bf16.msra.mxu1 %v4775_v47  ;;  %5893 = vmatprep.subr.bf16.mxu0 %v4640_v24  ;;  %v4983_v47 = vunpack.c.h.s8.bf16 %v3991_v39  ;;  %v4848_v24 = vunpack.c.l.s8.bf16 %v3928_v27 }
 0x8a6   :  { %5934 = vmatprep.subr.bf16.mxu1 %v4768_v3  ;;  %v4976_v3 = vunpack.c.l.s8.bf16 %v3992_v5 }
 0x8a8   :  { %5894 = vmatpush2.bf16.msra.mxu0 %v4639_v34 }
 0x8a9   :  { %5935 = vmatpush2.bf16.msra.mxu1 %v4767_v1  ;;  %5895 = vmatprep.subr.bf16.mxu0 %v4632_v35 }
 0x8aa   :  { %5936 = vmatprep.subr.bf16.mxu1 %v4760_v51  ;;  %v7895_v51 = vld [vmem:[#allocation22] sm:$0xff] }
 0x8ab   :  { %v6376_v42 = vrot.slane %v7895_v51, %v8758_v55  ;;  %v6380_v62 = vrot.slane %v7895_v51, %v8764_v60  ;;  %v3911_v51 = vld [vmem:[#allocation5 + $0xc60] sm:$0xff] }
 0x8ac   :  { %5896 = vmatpush2.bf16.msra.mxu0 %v4631_v36  ;;  %v4975_v36 = vunpack.c.l.s8.bf16 %v3991_v39  ;;  %v3912_v39 = vld [vmem:[#allocation5 + $0xc68] sm:$0xff] }
 0x8ad   :  { %5937 = vmatpush2.bf16.msra.mxu1 %v4759_v16  ;;  %5897 = vmatprep.subr.bf16.mxu0 %v4624_v37  ;;  %v7896_v16 = vld [vmem:[#allocation24] sm:$0xff] }
 0x8ae   :  { %5938 = vmatprep.subr.bf16.mxu1 %v4752_v57  ;;  %v6426_v37 = vrot.slane %v7896_v16, %v8758_v55  ;;  %v6430_v10 = vrot.slane %v7896_v16, %v8764_v60 }
 0x8b0   :  { %5898 = vmatpush2.bf16.msra.mxu0 %v4623_v30  ;;  %v4968_v30 = vunpack.c.h.s8.bf16 %v3984_v32 }
 0x8b1   :  { %5939 = vmatpush2.bf16.msra.mxu1 %v4751_v14  ;;  %5899 = vmatprep.subr.bf16.mxu0 %v4616_v6  ;;  %v3919_v14 = vld [vmem:[#allocation5 + $0xca0] sm:$0xff] }
 0x8b2   :  { %5940 = vmatprep.subr.bf16.mxu1 %v4744_v4  ;;  %v3983_v6 = vld [vmem:[#allocation5 + $0xea0] sm:$0xff]  ;;  %v4839_v27 = vunpack.c.h.s8.bf16 %v3919_v14 }
 0x8b3   :  { %v4967_v5 = vunpack.c.h.s8.bf16 %v3983_v6 }
 0x8b4   :  { %5900 = vmatpush2.bf16.msra.mxu0 %v4615_v23 }
 0x8b5   :  { %5941 = vmatpush2.bf16.msra.mxu1 %v4743_v21  ;;  %5901 = vmatprep.subr.bf16.mxu0 %v4608_v2 }
 0x8b6   :  { %5942 = vmatprep.subr.bf16.mxu1 %v4736_v28 }
 0x8b8   :  { %5902 = vmatpush2.bf16.msra.mxu0 %v4607_v26 }
 0x8b9   :  { %5943 = vmatpush2.bf16.msra.mxu1 %v4735_v40  ;;  %5953 = vmatprep.subr.bf16.mxu0 %v4856_v53  ;;  %v4960_v53 = vunpack.c.l.s8.bf16 %v3984_v32 }
 0x8ba   :  { %5994 = vmatprep.subr.bf16.mxu1 %v4984_v9 }
 0x8bb   :  { %v5659_v34 = vpop.f32.mrf.mxu0  ;;  %5904 = vmatmul.mubr.bf16.vlgmr.msra.gmra.mxu0 %v9248_v12 }
 0x8bc   :  { %v5700_v1 = vpop.f32.mrf.mxu1  ;;  %5945 = vmatmul.mubr.bf16.vlgmr.msra.gmra.mxu1 %v9262_v19  ;;  %v5660_v35 = vadd.f32 %v5659_v34, %v9371_v20  ;;  %5954 = vmatpush1.bf16.msra.mxu0 %v4855_v52  ;;  %v3976_v52 = vld [vmem:[#allocation5 + $0xe68] sm:$0xff]  ;;  %v4959_v34 = vunpack.c.l.s8.bf16 %v3983_v6 }
 0x8bd   :  { %5995 = vmatpush1.bf16.msra.mxu1 %v4983_v47  ;;  %v5661_v57 = vpop.f32.mrf.mxu0  ;;  %5955 = vmatprep.subr.bf16.mxu0 %v4848_v24 }
 0x8be   :  { %v5702_v50 = vpop.f32.mrf.mxu1  ;;  %5996 = vmatprep.subr.bf16.mxu1 %v4976_v3  ;;  %v5701_v4 = vadd.f32 %v5700_v1, %v5660_v35  ;;  %v5662_v20 = vadd.f32 %v5661_v57, %v9376_v0  ;;  %5985 = vmatprep.mubr.bf16.mxu0 %v9278_v61  ;;  %v4832_v0 = vunpack.c.l.s8.bf16 %v3920_v45  ;;  %v4831_v3 = vunpack.c.l.s8.bf16 %v3919_v14 }
 0x8bf   :  { %6026 = vmatprep.mubr.bf16.mxu1 %v9292_v17  ;;  %v5663_v23 = vpop.f32.mrf.mxu0  ;;  %v4824_v1 = vunpack.c.h.s8.bf16 %v3912_v39  ;;  %v4952_v35 = vunpack.c.h.s8.bf16 %v3976_v52  ;;  %v4944_v57 = vunpack.c.l.s8.bf16 %v3976_v52 }
 0x8c0   :  { %v5704_v21 = vpop.f32.mrf.mxu1  ;;  %v6407_v2 = vmul.f32 %v6376_v42, %v5701_v4  ;;  %v5703_v28 = vadd.f32 %v5702_v50, %v5662_v20  ;;  %5956 = vmatpush1.bf16.msra.mxu0 %v4847_v7  ;;  %v3975_v42 = vld [vmem:[#allocation5 + $0xe60] sm:$0xff]  ;;  %v3904_v50 = vld [vmem:[#allocation5 + $0xc28] sm:$0xff] }
 0x8c1   :  { %5997 = vmatpush1.bf16.msra.mxu1 %v4975_v36  ;;  %v5664_v26 = vpop.f32.mrf.mxu0  ;;  %5957 = vmatprep.subr.bf16.mxu0 %v4840_v33  ;;  %v4823_v36 = vunpack.c.h.s8.bf16 %v3911_v51  ;;  %v4951_v16 = vunpack.c.h.s8.bf16 %v3975_v42  ;;  %v3968_v33 = vld [vmem:[#allocation5 + $0xe28] sm:$0xff]  ;;  %v4943_v14 = vunpack.c.l.s8.bf16 %v3975_v42  ;;  %v4808_v6 = vunpack.c.h.s8.bf16 %v3904_v50  ;;  %v3903_v20 = vld [vmem:[#allocation5 + $0xc20] sm:$0xff] }
 0x8c2   :  { %v5705_v40 = vpop.f32.mrf.mxu1  ;;  %5998 = vmatprep.subr.bf16.mxu1 %v4968_v30  ;;  %v6457_v9 = vadd.f32 %v6426_v37, %v6407_v2  ;;  %v6408_v49 = vmul.f32 %v6380_v62, %v5703_v28  ;;  %v4816_v37 = vunpack.c.l.s8.bf16 %v3912_v39  ;;  %v4815_v30 = vunpack.c.l.s8.bf16 %v3911_v51  ;;  %v3967_v62 = vld [vmem:[#allocation5 + $0xe20] sm:$0xff]  ;;  %v3960_v28 = vld [vmem:[#allocation5 + $0xde8] sm:$0xff] }
 0x8c3   :  { %v4936_v4 = vunpack.c.h.s8.bf16 %v3968_v33  ;;  %v4935_v23 = vunpack.c.h.s8.bf16 %v3967_v62  ;;  %v4800_v21 = vunpack.c.l.s8.bf16 %v3904_v50  ;;  %v4928_v2 = vunpack.c.l.s8.bf16 %v3968_v33  ;;  %v3951_v42 = vld [vmem:[#allocation5 + $0xda0] sm:$0xff]  ;;  %v3944_v50 = vld [vmem:[#allocation5 + $0xd68] sm:$0xff] }
 0x8c4   :  { %v6465_v47 = vmax.f32 %v6457_v9, 0.0  ;;  %v6458_v24 = vadd.f32 %v6430_v10, %v6408_v49  ;;  %5958 = vmatpush1.bf16.msra.mxu0 %v4839_v27  ;;  %v4807_v10 = vunpack.c.h.s8.bf16 %v3903_v20  ;;  %v4024_v27 = vld [vmem:[#allocation5 + $0xfe8] sm:$0xff]  ;;  %v4927_v26 = vunpack.c.l.s8.bf16 %v3967_v62  ;;  %v4023_v9 = vld [vmem:[#allocation5 + $0xfe0] sm:$0xff] }
 0x8c5   :  { %5999 = vmatpush1.bf16.msra.mxu1 %v4967_v5  ;;  %5959 = vmatprep.subr.bf16.mxu0 %v4832_v0  ;;  %v4799_v5 = vunpack.c.l.s8.bf16 %v3903_v20  ;;  %v4920_v40 = vunpack.c.h.s8.bf16 %v3960_v28  ;;  %v5048_v0 = vunpack.c.h.s8.bf16 %v4024_v27  ;;  %v5047_v39 = vunpack.c.h.s8.bf16 %v4023_v9  ;;  %v4008_v33 = vld [vmem:[#allocation5 + $0xf68] sm:$0xff]  ;;  %v3943_v20 = vld [vmem:[#allocation5 + $0xd60] sm:$0xff] }
 0x8c6   :  { %6000 = vmatprep.subr.bf16.mxu1 %v4960_v53  ;;  %v9388_v7 = vpack.c.bf16 %v6465_v47, %v6465_v47  ;;  %v6466_v45 = vmax.f32 %v6458_v24, 0.0  ;;  %v3959_v53 = vld [vmem:[#allocation5 + $0xde0] sm:$0xff]  ;;  %v4912_v52 = vunpack.c.l.s8.bf16 %v3960_v28  ;;  %v5040_v47 = vunpack.c.l.s8.bf16 %v4024_v27  ;;  %v3952_v24 = vld [vmem:[#allocation5 + $0xda8] sm:$0xff] }
 0x8c7   :  { %v4919_v49 = vunpack.c.h.s8.bf16 %v3959_v53  ;;  %v4007_v62 = vld [vmem:[#allocation5 + $0xf60] sm:$0xff]  ;;  %v3936_v28 = vld [vmem:[#allocation5 + $0xd28] sm:$0xff] }
 0x8c8   :  { %v9390_v32 = vpack.c.bf16 %v6466_v45, %v6466_v45  ;;  %5960 = vmatpush1.bf16.msra.mxu0 %v4831_v3  ;;  %v4016_v3 = vld [vmem:[#allocation5 + $0xfa8] sm:$0xff]  ;;  %v4015_v45 = vld [vmem:[#allocation5 + $0xfa0] sm:$0xff] }
 0x8c9   :  { %6001 = vmatpush1.bf16.msra.mxu1 %v4959_v34  ;;  %5961 = vmatprep.subr.bf16.mxu0 %v4824_v1  ;;  %v4911_v34 = vunpack.c.l.s8.bf16 %v3959_v53  ;;  %v5039_v1 = vunpack.c.l.s8.bf16 %v4023_v9  ;;  %v5032_v51 = vunpack.c.h.s8.bf16 %v4016_v3  ;;  %v4000_v27 = vld [vmem:[#allocation5 + $0xf28] sm:$0xff]  ;;  %v3935_v53 = vld [vmem:[#allocation5 + $0xd20] sm:$0xff] }
 0x8ca   :  { %6002 = vmatprep.subr.bf16.mxu1 %v4952_v35  ;;  %v4904_v35 = vunpack.c.h.s8.bf16 %v3952_v24  ;;  %v3999_v9 = vld [vmem:[#allocation5 + $0xf20] sm:$0xff] }
 0x8cc   :  { %5962 = vmatpush1.bf16.msra.mxu0 %v4823_v36  ;;  %v4903_v36 = vunpack.c.h.s8.bf16 %v3951_v42 }
 0x8cd   :  { %6003 = vmatpush1.bf16.msra.mxu1 %v4951_v16  ;;  %5963 = vmatprep.subr.bf16.mxu0 %v4816_v37  ;;  %v5031_v16 = vunpack.c.h.s8.bf16 %v4015_v45  ;;  %v4896_v37 = vunpack.c.l.s8.bf16 %v3952_v24  ;;  %v3546_v24 = vld [vmem:[#allocation5 + $0xf8] sm:$0xff] }
 0x8ce   :  { %6004 = vmatprep.subr.bf16.mxu1 %v4944_v57  ;;  %v5024_v57 = vunpack.c.l.s8.bf16 %v4016_v3  ;;  %v3610_v3 = vld [vmem:[#allocation5 + $0x2f8] sm:$0xff] }
 0x8d0   :  { %5964 = vmatpush1.bf16.msra.mxu0 %v4815_v30  ;;  %v4895_v30 = vunpack.c.l.s8.bf16 %v3951_v42  ;;  %v3545_v42 = vld [vmem:[#allocation5 + $0xf0] sm:$0xff] }
 0x8d1   :  { %6005 = vmatpush1.bf16.msra.mxu1 %v4943_v14  ;;  %5965 = vmatprep.subr.bf16.mxu0 %v4808_v6  ;;  %v5023_v14 = vunpack.c.l.s8.bf16 %v4015_v45  ;;  %v4888_v6 = vunpack.c.h.s8.bf16 %v3944_v50  ;;  %v3609_v45 = vld [vmem:[#allocation5 + $0x2f0] sm:$0xff] }
 0x8d2   :  { %6006 = vmatprep.subr.bf16.mxu1 %v4936_v4  ;;  %v5016_v4 = vunpack.c.h.s8.bf16 %v4008_v33 }
 0x8d4   :  { %5966 = vmatpush1.bf16.msra.mxu0 %v4807_v10  ;;  %v4887_v10 = vunpack.c.h.s8.bf16 %v3943_v20 }
 0x8d5   :  { %6007 = vmatpush1.bf16.msra.mxu1 %v4935_v23  ;;  %5967 = vmatprep.subr.bf16.mxu0 %v4800_v21  ;;  %v5015_v23 = vunpack.c.h.s8.bf16 %v4007_v62  ;;  %v4880_v21 = vunpack.c.l.s8.bf16 %v3944_v50  ;;  %v3538_v50 = vld [vmem:[#allocation5 + $0xb8] sm:$0xff] }
 0x8d6   :  { %6008 = vmatprep.subr.bf16.mxu1 %v4928_v2  ;;  %v5008_v2 = vunpack.c.l.s8.bf16 %v4008_v33  ;;  %v3602_v33 = vld [vmem:[#allocation5 + $0x2b8] sm:$0xff] }
 0x8d8   :  { %5968 = vmatpush1.bf16.msra.mxu0 %v4799_v5  ;;  %v4879_v5 = vunpack.c.l.s8.bf16 %v3943_v20  ;;  %v4209_v20 = vunpack.c.l.s8.bf16 %v3609_v45 }
 0x8d9   :  { %6009 = vmatpush1.bf16.msra.mxu1 %v4927_v26  ;;  %5969 = vmatprep.subr.bf16.mxu0 %v4920_v40  ;;  %v5007_v26 = vunpack.c.l.s8.bf16 %v4007_v62  ;;  %v4872_v40 = vunpack.c.h.s8.bf16 %v3936_v28 }
 0x8da   :  { %6010 = vmatprep.subr.bf16.mxu1 %v5048_v0  ;;  %v5000_v0 = vunpack.c.h.s8.bf16 %v4000_v27 }
 0x8dc   :  { %5970 = vmatpush2.bf16.msra.mxu0 %v4919_v49  ;;  %v4871_v49 = vunpack.c.h.s8.bf16 %v3935_v53 }
 0x8dd   :  { %6011 = vmatpush2.bf16.msra.mxu1 %v5047_v39  ;;  %5971 = vmatprep.subr.bf16.mxu0 %v4912_v52  ;;  %v4999_v39 = vunpack.c.h.s8.bf16 %v3999_v9  ;;  %v4864_v52 = vunpack.c.l.s8.bf16 %v3936_v28  ;;  %v3601_v28 = vld [vmem:[#allocation5 + $0x2b0] sm:$0xff] }
 0x8de   :  { %6012 = vmatprep.subr.bf16.mxu1 %v5040_v47  ;;  %v4992_v47 = vunpack.c.l.s8.bf16 %v4000_v27 }
 0x8e0   :  { %5972 = vmatpush2.bf16.msra.mxu0 %v4911_v34  ;;  %v4863_v34 = vunpack.c.l.s8.bf16 %v3935_v53 }
 0x8e1   :  { %6013 = vmatpush2.bf16.msra.mxu1 %v5039_v1  ;;  %5973 = vmatprep.subr.bf16.mxu0 %v4904_v35  ;;  %v4991_v1 = vunpack.c.l.s8.bf16 %v3999_v9  ;;  %v4090_v35 = vunpack.c.h.s8.bf16 %v3546_v24 }
 0x8e2   :  { %6014 = vmatprep.subr.bf16.mxu1 %v5032_v51  ;;  %v4218_v51 = vunpack.c.h.s8.bf16 %v3610_v3 }
 0x8e4   :  { %5974 = vmatpush2.bf16.msra.mxu0 %v4903_v36  ;;  %v4089_v36 = vunpack.c.h.s8.bf16 %v3545_v42 }
 0x8e5   :  { %6015 = vmatpush2.bf16.msra.mxu1 %v5031_v16  ;;  %5975 = vmatprep.subr.bf16.mxu0 %v4896_v37  ;;  %v4217_v16 = vunpack.c.h.s8.bf16 %v3609_v45  ;;  %v4082_v37 = vunpack.c.l.s8.bf16 %v3546_v24 }
 0x8e6   :  { %6016 = vmatprep.subr.bf16.mxu1 %v5024_v57  ;;  %v4210_v57 = vunpack.c.l.s8.bf16 %v3610_v3 }
 0x8e8   :  { %5976 = vmatpush2.bf16.msra.mxu0 %v4895_v30 }
 0x8e9   :  { %6017 = vmatpush2.bf16.msra.mxu1 %v5023_v14  ;;  %5977 = vmatprep.subr.bf16.mxu0 %v4888_v6 }
 0x8ea   :  { %6018 = vmatprep.subr.bf16.mxu1 %v5016_v4  ;;  %v4081_v4 = vunpack.c.l.s8.bf16 %v3545_v42 }
 0x8ec   :  { %5978 = vmatpush2.bf16.msra.mxu0 %v4887_v10 }
 0x8ed   :  { %6019 = vmatpush2.bf16.msra.mxu1 %v5015_v23  ;;  %5979 = vmatprep.subr.bf16.mxu0 %v4880_v21  ;;  %v4074_v23 = vunpack.c.h.s8.bf16 %v3538_v50  ;;  %v4202_v21 = vunpack.c.h.s8.bf16 %v3602_v33 }
 0x8ee   :  { %6020 = vmatprep.subr.bf16.mxu1 %v5008_v2  ;;  %v3537_v2 = vld [vmem:[#allocation5 + $0xb0] sm:$0xff] }
 0x8ef   :  { %v4065_v24 = vunpack.c.l.s8.bf16 %v3537_v2 }
 0x8f0   :  { %5980 = vmatpush2.bf16.msra.mxu0 %v4879_v5 }
 0x8f1   :  { %6021 = vmatpush2.bf16.msra.mxu1 %v5007_v26  ;;  %5981 = vmatprep.subr.bf16.mxu0 %v4872_v40  ;;  %v4073_v40 = vunpack.c.h.s8.bf16 %v3537_v2 }
 0x8f2   :  { %6022 = vmatprep.subr.bf16.mxu1 %v5000_v0  ;;  %v4201_v0 = vunpack.c.h.s8.bf16 %v3601_v28 }
 0x8f4   :  { %5982 = vmatpush2.bf16.msra.mxu0 %v4871_v49  ;;  %v4066_v49 = vunpack.c.l.s8.bf16 %v3538_v50 }
 0x8f5   :  { %6023 = vmatpush2.bf16.msra.mxu1 %v4999_v39  ;;  %5983 = vmatprep.subr.bf16.mxu0 %v4864_v52  ;;  %v4194_v39 = vunpack.c.l.s8.bf16 %v3602_v33  ;;  %v3530_v52 = vld [vmem:[#allocation5 + $0x78] sm:$0xff] }
 0x8f6   :  { %6024 = vmatprep.subr.bf16.mxu1 %v4992_v47  ;;  %v3594_v47 = vld [vmem:[#allocation5 + $0x278] sm:$0xff]  ;;  %v4050_v42 = vunpack.c.l.s8.bf16 %v3530_v52 }
 0x8f7   :  { %v4186_v3 = vunpack.c.h.s8.bf16 %v3594_v47  ;;  %v4178_v45 = vunpack.c.l.s8.bf16 %v3594_v47  ;;  %v3634_v47 = vld [vmem:[#allocation5 + $0x3b8] sm:$0xff] }
 0x8f8   :  { %5984 = vmatpush2.bf16.msra.mxu0 %v4863_v34  ;;  %v3529_v34 = vld [vmem:[#allocation5 + $0x70] sm:$0xff] }
 0x8f9   :  { %6025 = vmatpush2.bf16.msra.mxu1 %v4991_v1  ;;  %6035 = vmatprep.subr.bf16.mxu0 %v4090_v35  ;;  %v3593_v1 = vld [vmem:[#allocation5 + $0x270] sm:$0xff]  ;;  %v4057_v35 = vunpack.c.h.s8.bf16 %v3529_v34 }
 0x8fa   :  { %6076 = vmatprep.subr.bf16.mxu1 %v4218_v51  ;;  %v4185_v51 = vunpack.c.h.s8.bf16 %v3593_v1 }
 0x8fb   :  { %v5741_v30 = vpop.f32.mrf.mxu0  ;;  %5986 = vmatmul.mubr.bf16.vlgmr.msra.gmra.mxu0 %v9276_v44 }
 0x8fc   :  { %v5782_v14 = vpop.f32.mrf.mxu1  ;;  %6027 = vmatmul.mubr.bf16.vlgmr.msra.gmra.mxu1 %v9290_v31  ;;  %6036 = vmatpush1.bf16.msra.mxu0 %v4089_v36  ;;  %v3522_v36 = vld [vmem:[#allocation5 + $0x38] sm:$0xff] }
 0x8fd   :  { %v9394_v6 = vadd.f32 %v5782_v14, %v5741_v30  ;;  %6077 = vmatpush1.bf16.msra.mxu1 %v4217_v16  ;;  %v5743_v62 = vpop.f32.mrf.mxu0  ;;  %6037 = vmatprep.subr.bf16.mxu0 %v4082_v37  ;;  %v3586_v16 = vld [vmem:[#allocation5 + $0x238] sm:$0xff]  ;;  %v4049_v37 = vunpack.c.l.s8.bf16 %v3529_v34  ;;  %v4042_v50 = vunpack.c.h.s8.bf16 %v3522_v36  ;;  %v3521_v30 = vld [vmem:[#allocation5 + $0x30] sm:$0xff] }
 0x8fe   :  { %v5784_v10 = vpop.f32.mrf.mxu1  ;;  %6078 = vmatprep.subr.bf16.mxu1 %v4210_v57  ;;  %6067 = vmatprep.mubr.bf16.mxu0 %v9168_v41  ;;  %v4193_v41 = vunpack.c.l.s8.bf16 %v3601_v28  ;;  %v4177_v57 = vunpack.c.l.s8.bf16 %v3593_v1  ;;  %v4170_v33 = vunpack.c.h.s8.bf16 %v3586_v16  ;;  %v3585_v14 = vld [vmem:[#allocation5 + $0x230] sm:$0xff]  ;;  %v4033_v2 = vunpack.c.l.s8.bf16 %v3521_v30 }
 0x8ff   :  { %v9396_v27 = vadd.f32 %v5784_v10, %v5743_v62  ;;  %6108 = vmatprep.mubr.bf16.mxu1 %v9186_v58  ;;  %v5745_v5 = vpop.f32.mrf.mxu0  ;;  %v4058_v58 = vunpack.c.h.s8.bf16 %v3530_v52  ;;  %v4034_v62 = vunpack.c.l.s8.bf16 %v3522_v36  ;;  %v4162_v10 = vunpack.c.l.s8.bf16 %v3586_v16  ;;  %v3570_v52 = vld [vmem:[#allocation5 + $0x1b8] sm:$0xff]  ;;  %v3569_v34 = vld [vmem:[#allocation5 + $0x1b0] sm:$0xff] }
 0x900   :  { %v5786_v26 = vpop.f32.mrf.mxu1  ;;  %6038 = vmatpush1.bf16.msra.mxu0 %v4081_v4  ;;  %v4041_v4 = vunpack.c.h.s8.bf16 %v3521_v30  ;;  %v4161_v28 = vunpack.c.l.s8.bf16 %v3585_v14  ;;  %v3633_v1 = vld [vmem:[#allocation5 + $0x3b0] sm:$0xff]  ;;  %v3562_v36 = vld [vmem:[#allocation5 + $0x178] sm:$0xff] }
 0x901   :  { %6079 = vmatpush1.bf16.msra.mxu1 %v4209_v20  ;;  %v5746_v53 = vpop.f32.mrf.mxu0  ;;  %6039 = vmatprep.subr.bf16.mxu0 %v4074_v23  ;;  %v4169_v20 = vunpack.c.h.s8.bf16 %v3585_v14  ;;  %v3578_v23 = vld [vmem:[#allocation5 + $0x1f8] sm:$0xff]  ;;  %v3561_v30 = vld [vmem:[#allocation5 + $0x170] sm:$0xff] }
 0x902   :  { %v5787_v9 = vpop.f32.mrf.mxu1  ;;  %6080 = vmatprep.subr.bf16.mxu1 %v4202_v21  ;;  %v3642_v21 = vld [vmem:[#allocation5 + $0x3f8] sm:$0xff]  ;;  %v4154_v5 = vunpack.c.h.s8.bf16 %v3578_v23  ;;  %v3625_v14 = vld [vmem:[#allocation5 + $0x370] sm:$0xff] }
 0x903   :  { %v4282_v26 = vunpack.c.h.s8.bf16 %v3642_v21  ;;  %v3626_v16 = vld [vmem:[#allocation5 + $0x378] sm:$0xff] }
 0x904   :  { %6040 = vmatpush1.bf16.msra.mxu0 %v4073_v40  ;;  %v3577_v40 = vld [vmem:[#allocation5 + $0x1f0] sm:$0xff] }
 0x905   :  { %6081 = vmatpush1.bf16.msra.mxu1 %v4201_v0  ;;  %6041 = vmatprep.subr.bf16.mxu0 %v4066_v49  ;;  %v3641_v0 = vld [vmem:[#allocation5 + $0x3f0] sm:$0xff]  ;;  %v4153_v53 = vunpack.c.h.s8.bf16 %v3577_v40  ;;  %v4146_v49 = vunpack.c.l.s8.bf16 %v3578_v23  ;;  %v3554_v23 = vld [vmem:[#allocation5 + $0x138] sm:$0xff] }
 0x906   :  { %6082 = vmatprep.subr.bf16.mxu1 %v4194_v39  ;;  %v4281_v9 = vunpack.c.h.s8.bf16 %v3641_v0  ;;  %v4274_v39 = vunpack.c.l.s8.bf16 %v3642_v21  ;;  %v3618_v21 = vld [vmem:[#allocation5 + $0x338] sm:$0xff] }
 0x908   :  { %6042 = vmatpush1.bf16.msra.mxu0 %v4065_v24  ;;  %v4145_v24 = vunpack.c.l.s8.bf16 %v3577_v40  ;;  %v3553_v40 = vld [vmem:[#allocation5 + $0x130] sm:$0xff] }
 0x909   :  { %6083 = vmatpush1.bf16.msra.mxu1 %v4193_v41  ;;  %6043 = vmatprep.subr.bf16.mxu0 %v4058_v58  ;;  %v4273_v41 = vunpack.c.l.s8.bf16 %v3641_v0  ;;  %v4138_v58 = vunpack.c.h.s8.bf16 %v3570_v52  ;;  %v3617_v0 = vld [vmem:[#allocation5 + $0x330] sm:$0xff] }
 0x90a   :  { %6084 = vmatprep.subr.bf16.mxu1 %v4186_v3  ;;  %v4266_v3 = vunpack.c.h.s8.bf16 %v3634_v47 }
 0x90c   :  { %6044 = vmatpush1.bf16.msra.mxu0 %v4057_v35  ;;  %v4137_v35 = vunpack.c.h.s8.bf16 %v3569_v34 }
 0x90d   :  { %6085 = vmatpush1.bf16.msra.mxu1 %v4185_v51  ;;  %6045 = vmatprep.subr.bf16.mxu0 %v4050_v42  ;;  %v4265_v51 = vunpack.c.h.s8.bf16 %v3633_v1  ;;  %v4130_v42 = vunpack.c.l.s8.bf16 %v3570_v52  ;;  %v3674_v52 = vld [vmem:[#allocation5 + $0x4f8] sm:$0xff] }
 0x90e   :  { %6086 = vmatprep.subr.bf16.mxu1 %v4178_v45  ;;  %v4258_v45 = vunpack.c.l.s8.bf16 %v3634_v47  ;;  %v3738_v47 = vld [vmem:[#allocation5 + $0x6f8] sm:$0xff] }
 0x910   :  { %6046 = vmatpush1.bf16.msra.mxu0 %v4049_v37  ;;  %v4129_v37 = vunpack.c.l.s8.bf16 %v3569_v34  ;;  %v3673_v34 = vld [vmem:[#allocation5 + $0x4f0] sm:$0xff] }
 0x911   :  { %6087 = vmatpush1.bf16.msra.mxu1 %v4177_v57  ;;  %6047 = vmatprep.subr.bf16.mxu0 %v4042_v50  ;;  %v4257_v57 = vunpack.c.l.s8.bf16 %v3633_v1  ;;  %v4122_v50 = vunpack.c.h.s8.bf16 %v3562_v36  ;;  %v3737_v1 = vld [vmem:[#allocation5 + $0x6f0] sm:$0xff] }
 0x912   :  { %6088 = vmatprep.subr.bf16.mxu1 %v4170_v33  ;;  %v4250_v33 = vunpack.c.h.s8.bf16 %v3626_v16 }
 0x914   :  { %6048 = vmatpush1.bf16.msra.mxu0 %v4041_v4  ;;  %v4121_v4 = vunpack.c.h.s8.bf16 %v3561_v30 }
 0x915   :  { %6089 = vmatpush1.bf16.msra.mxu1 %v4169_v20  ;;  %6049 = vmatprep.subr.bf16.mxu0 %v4034_v62  ;;  %v4249_v20 = vunpack.c.h.s8.bf16 %v3625_v14  ;;  %v4114_v62 = vunpack.c.l.s8.bf16 %v3562_v36  ;;  %v3666_v36 = vld [vmem:[#allocation5 + $0x4b8] sm:$0xff] }
 0x916   :  { %6090 = vmatprep.subr.bf16.mxu1 %v4162_v10  ;;  %v4242_v10 = vunpack.c.l.s8.bf16 %v3626_v16  ;;  %v3730_v16 = vld [vmem:[#allocation5 + $0x6b8] sm:$0xff] }
 0x918   :  { %6050 = vmatpush1.bf16.msra.mxu0 %v4033_v2  ;;  %v4113_v2 = vunpack.c.l.s8.bf16 %v3561_v30  ;;  %v4465_v30 = vunpack.c.l.s8.bf16 %v3737_v1 }
 0x919   :  { %6091 = vmatpush1.bf16.msra.mxu1 %v4161_v28  ;;  %6051 = vmatprep.subr.bf16.mxu0 %v4154_v5  ;;  %v4241_v28 = vunpack.c.l.s8.bf16 %v3625_v14  ;;  %v4106_v5 = vunpack.c.h.s8.bf16 %v3554_v23 }
 0x91a   :  { %6092 = vmatprep.subr.bf16.mxu1 %v4282_v26  ;;  %v4234_v26 = vunpack.c.h.s8.bf16 %v3618_v21 }
 0x91c   :  { %6052 = vmatpush2.bf16.msra.mxu0 %v4153_v53  ;;  %v4105_v53 = vunpack.c.h.s8.bf16 %v3553_v40 }
 0x91d   :  { %6093 = vmatpush2.bf16.msra.mxu1 %v4281_v9  ;;  %6053 = vmatprep.subr.bf16.mxu0 %v4146_v49  ;;  %v4233_v9 = vunpack.c.h.s8.bf16 %v3617_v0  ;;  %v4098_v49 = vunpack.c.l.s8.bf16 %v3554_v23  ;;  %v3729_v23 = vld [vmem:[#allocation5 + $0x6b0] sm:$0xff] }
 0x91e   :  { %6094 = vmatprep.subr.bf16.mxu1 %v4274_v39  ;;  %v4226_v39 = vunpack.c.l.s8.bf16 %v3618_v21 }
 0x920   :  { %6054 = vmatpush2.bf16.msra.mxu0 %v4145_v24  ;;  %v4097_v24 = vunpack.c.l.s8.bf16 %v3553_v40 }
 0x921   :  { %6095 = vmatpush2.bf16.msra.mxu1 %v4273_v41  ;;  %6055 = vmatprep.subr.bf16.mxu0 %v4138_v58  ;;  %v4225_v41 = vunpack.c.l.s8.bf16 %v3617_v0  ;;  %v4346_v58 = vunpack.c.h.s8.bf16 %v3674_v52  ;;  %v4322_v0 = vunpack.c.l.s8.bf16 %v3666_v36 }
 0x922   :  { %6096 = vmatprep.subr.bf16.mxu1 %v4266_v3  ;;  %v4474_v3 = vunpack.c.h.s8.bf16 %v3738_v47 }
 0x924   :  { %6056 = vmatpush2.bf16.msra.mxu0 %v4137_v35  ;;  %v4345_v35 = vunpack.c.h.s8.bf16 %v3673_v34 }
 0x925   :  { %6097 = vmatpush2.bf16.msra.mxu1 %v4265_v51  ;;  %6057 = vmatprep.subr.bf16.mxu0 %v4130_v42  ;;  %v4473_v51 = vunpack.c.h.s8.bf16 %v3737_v1  ;;  %v4338_v42 = vunpack.c.l.s8.bf16 %v3674_v52  ;;  %v3657_v52 = vld [vmem:[#allocation5 + $0x470] sm:$0xff]  ;;  %v3714_v1 = vld [vmem:[#allocation5 + $0x638] sm:$0xff] }
 0x926   :  { %6098 = vmatprep.subr.bf16.mxu1 %v4258_v45  ;;  %v4466_v45 = vunpack.c.l.s8.bf16 %v3738_v47  ;;  %v3721_v47 = vld [vmem:[#allocation5 + $0x670] sm:$0xff] }
 0x928   :  { %6058 = vmatpush2.bf16.msra.mxu0 %v4129_v37 }
 0x929   :  { %6099 = vmatpush2.bf16.msra.mxu1 %v4257_v57  ;;  %6059 = vmatprep.subr.bf16.mxu0 %v4122_v50 }
 0x92a   :  { %6100 = vmatprep.subr.bf16.mxu1 %v4250_v33  ;;  %v4337_v33 = vunpack.c.l.s8.bf16 %v3673_v34  ;;  %v3650_v34 = vld [vmem:[#allocation5 + $0x438] sm:$0xff] }
 0x92c   :  { %6060 = vmatpush2.bf16.msra.mxu0 %v4121_v4 }
 0x92d   :  { %6101 = vmatpush2.bf16.msra.mxu1 %v4249_v20  ;;  %6061 = vmatprep.subr.bf16.mxu0 %v4114_v62  ;;  %v4330_v20 = vunpack.c.h.s8.bf16 %v3666_v36  ;;  %v4458_v62 = vunpack.c.h.s8.bf16 %v3730_v16  ;;  %v3649_v36 = vld [vmem:[#allocation5 + $0x430] sm:$0xff] }
 0x92e   :  { %6102 = vmatprep.subr.bf16.mxu1 %v4242_v10  ;;  %v3665_v10 = vld [vmem:[#allocation5 + $0x4b0] sm:$0xff] }
 0x930   :  { %6062 = vmatpush2.bf16.msra.mxu0 %v4113_v2 }
 0x931   :  { %6103 = vmatpush2.bf16.msra.mxu1 %v4241_v28  ;;  %6063 = vmatprep.subr.bf16.mxu0 %v4106_v5  ;;  %v4329_v28 = vunpack.c.h.s8.bf16 %v3665_v10  ;;  %v4457_v5 = vunpack.c.h.s8.bf16 %v3729_v23 }
 0x932   :  { %6104 = vmatprep.subr.bf16.mxu1 %v4234_v26 }
 0x934   :  { %6064 = vmatpush2.bf16.msra.mxu0 %v4105_v53  ;;  %v4450_v53 = vunpack.c.l.s8.bf16 %v3730_v16  ;;  %v3713_v16 = vld [vmem:[#allocation5 + $0x630] sm:$0xff] }
 0x935   :  { %6105 = vmatpush2.bf16.msra.mxu1 %v4233_v9  ;;  %6065 = vmatprep.subr.bf16.mxu0 %v4098_v49  ;;  %v3658_v9 = vld [vmem:[#allocation5 + $0x478] sm:$0xff] }
 0x936   :  { %6106 = vmatprep.subr.bf16.mxu1 %v4226_v39  ;;  %v4314_v49 = vunpack.c.h.s8.bf16 %v3658_v9 }
 0x938   :  { %6066 = vmatpush2.bf16.msra.mxu0 %v4097_v24  ;;  %v4313_v24 = vunpack.c.h.s8.bf16 %v3657_v52 }
 0x939   :  { %6107 = vmatpush2.bf16.msra.mxu1 %v4225_v41  ;;  %6117 = vmatprep.subr.bf16.mxu0 %v4346_v58  ;;  %v4441_v41 = vunpack.c.h.s8.bf16 %v3721_v47  ;;  %v4306_v58 = vunpack.c.l.s8.bf16 %v3658_v9 }
 0x93a   :  { %6158 = vmatprep.subr.bf16.mxu1 %v4474_v3 }
 0x93b   :  { %v5823_v37 = vpop.f32.mrf.mxu0  ;;  %6068 = vmatmul.mubr.bf16.vlgmr.msra.gmra.mxu0 %v9166_v13 }
 0x93c   :  { %v5864_v57 = vpop.f32.mrf.mxu1  ;;  %6109 = vmatmul.mubr.bf16.vlgmr.msra.gmra.mxu1 %v9184_v56  ;;  %v5824_v50 = vadd.f32 %v5823_v37, %v9394_v6  ;;  %6118 = vmatpush1.bf16.msra.mxu0 %v4345_v35  ;;  %v4305_v35 = vunpack.c.l.s8.bf16 %v3657_v52  ;;  %v4297_v37 = vunpack.c.h.s8.bf16 %v3649_v36 }
 0x93d   :  { %6159 = vmatpush1.bf16.msra.mxu1 %v4473_v51  ;;  %v5825_v14 = vpop.f32.mrf.mxu0  ;;  %6119 = vmatprep.subr.bf16.mxu0 %v4338_v42  ;;  %v4433_v51 = vunpack.c.l.s8.bf16 %v3721_v47  ;;  %v4298_v42 = vunpack.c.h.s8.bf16 %v3650_v34 }
 0x93e   :  { %v5866_v4 = vpop.f32.mrf.mxu1  ;;  %6160 = vmatprep.subr.bf16.mxu1 %v4466_v45  ;;  %v9403_v21 = vadd.f32 %v5864_v57, %v5824_v50  ;;  %v5826_v13 = vadd.f32 %v5825_v14, %v9396_v27  ;;  %6149 = vmatprep.mubr.bf16.mxu0 %v9210_v46  ;;  %v3722_v27 = vld [vmem:[#allocation5 + $0x678] sm:$0xff]  ;;  %v4321_v46 = vunpack.c.l.s8.bf16 %v3665_v10  ;;  %v4426_v45 = vunpack.c.h.s8.bf16 %v3714_v1 }
 0x93f   :  { %6190 = vmatprep.mubr.bf16.mxu1 %v9230_v22  ;;  %v5827_v56 = vpop.f32.mrf.mxu0  ;;  %v4449_v22 = vunpack.c.l.s8.bf16 %v3729_v23  ;;  %v4442_v39 = vunpack.c.h.s8.bf16 %v3722_v27  ;;  %v4434_v3 = vunpack.c.l.s8.bf16 %v3722_v27  ;;  %v4425_v57 = vunpack.c.h.s8.bf16 %v3713_v16  ;;  %v3770_v14 = vld [vmem:[#allocation5 + $0x7f8] sm:$0xff]  ;;  %v3705_v23 = vld [vmem:[#allocation5 + $0x5f0] sm:$0xff] }
 0x940   :  { %v5868_v6 = vpop.f32.mrf.mxu1  ;;  %v9408_v2 = vadd.f32 %v5866_v4, %v5826_v13  ;;  %6120 = vmatpush1.bf16.msra.mxu0 %v4337_v33  ;;  %v4290_v50 = vunpack.c.l.s8.bf16 %v3650_v34  ;;  %v4418_v33 = vunpack.c.l.s8.bf16 %v3714_v1  ;;  %v4289_v4 = vunpack.c.l.s8.bf16 %v3649_v36  ;;  %v3769_v13 = vld [vmem:[#allocation5 + $0x7f0] sm:$0xff] }
 0x941   :  { %6161 = vmatpush1.bf16.msra.mxu1 %v4465_v30  ;;  %v5828_v26 = vpop.f32.mrf.mxu0  ;;  %6121 = vmatprep.subr.bf16.mxu0 %v4330_v20  ;;  %v3706_v30 = vld [vmem:[#allocation5 + $0x5f8] sm:$0xff]  ;;  %v4417_v20 = vunpack.c.l.s8.bf16 %v3713_v16  ;;  %v4538_v10 = vunpack.c.h.s8.bf16 %v3770_v14  ;;  %v4409_v56 = vunpack.c.h.s8.bf16 %v3705_v23  ;;  %v4537_v6 = vunpack.c.h.s8.bf16 %v3769_v13 }
 0x942   :  { %v5869_v40 = vpop.f32.mrf.mxu1  ;;  %6162 = vmatprep.subr.bf16.mxu1 %v4458_v62  ;;  %v4410_v62 = vunpack.c.h.s8.bf16 %v3706_v30  ;;  %v3698_v26 = vld [vmem:[#allocation5 + $0x5b8] sm:$0xff] }
 0x943   :  { %v3762_v40 = vld [vmem:[#allocation5 + $0x7b8] sm:$0xff]  ;;  %v4394_v9 = vunpack.c.h.s8.bf16 %v3698_v26  ;;  %v4386_v52 = vunpack.c.l.s8.bf16 %v3698_v26 }
 0x944   :  { %6122 = vmatpush1.bf16.msra.mxu0 %v4329_v28  ;;  %v4402_v28 = vunpack.c.l.s8.bf16 %v3706_v30  ;;  %v4522_v27 = vunpack.c.h.s8.bf16 %v3762_v40  ;;  %v4514_v47 = vunpack.c.l.s8.bf16 %v3762_v40 }
 0x945   :  { %6163 = vmatpush1.bf16.msra.mxu1 %v4457_v5  ;;  %6123 = vmatprep.subr.bf16.mxu0 %v4322_v0  ;;  %v4530_v5 = vunpack.c.l.s8.bf16 %v3770_v14  ;;  %v4401_v0 = vunpack.c.l.s8.bf16 %v3705_v23 }
 0x946   :  { %6164 = vmatprep.subr.bf16.mxu1 %v4450_v53  ;;  %v4529_v53 = vunpack.c.l.s8.bf16 %v3769_v13 }
 0x948   :  { %6124 = vmatpush1.bf16.msra.mxu0 %v4321_v46  ;;  %v3697_v46 = vld [vmem:[#allocation5 + $0x5b0] sm:$0xff] }
 0x949   :  { %6165 = vmatpush1.bf16.msra.mxu1 %v4449_v22  ;;  %6125 = vmatprep.subr.bf16.mxu0 %v4314_v49  ;;  %v3761_v22 = vld [vmem:[#allocation5 + $0x7b0] sm:$0xff]  ;;  %v4393_v49 = vunpack.c.h.s8.bf16 %v3697_v46 }
 0x94a   :  { %6166 = vmatprep.subr.bf16.mxu1 %v4442_v39  ;;  %v4521_v39 = vunpack.c.h.s8.bf16 %v3761_v22 }
 0x94c   :  { %6126 = vmatpush1.bf16.msra.mxu0 %v4313_v24  ;;  %v3690_v24 = vld [vmem:[#allocation5 + $0x578] sm:$0xff] }
 0x94d   :  { %6167 = vmatpush1.bf16.msra.mxu1 %v4441_v41  ;;  %6127 = vmatprep.subr.bf16.mxu0 %v4306_v58  ;;  %v3754_v41 = vld [vmem:[#allocation5 + $0x778] sm:$0xff]  ;;  %v4385_v58 = vunpack.c.l.s8.bf16 %v3697_v46  ;;  %v4378_v34 = vunpack.c.h.s8.bf16 %v3690_v24  ;;  %v4370_v36 = vunpack.c.l.s8.bf16 %v3690_v24 }
 0x94e   :  { %6168 = vmatprep.subr.bf16.mxu1 %v4434_v3  ;;  %v4513_v3 = vunpack.c.l.s8.bf16 %v3761_v22  ;;  %v4506_v1 = vunpack.c.h.s8.bf16 %v3754_v41  ;;  %v4498_v16 = vunpack.c.l.s8.bf16 %v3754_v41 }
 0x950   :  { %6128 = vmatpush1.bf16.msra.mxu0 %v4305_v35  ;;  %v3689_v35 = vld [vmem:[#allocation5 + $0x570] sm:$0xff] }
 0x951   :  { %6169 = vmatpush1.bf16.msra.mxu1 %v4433_v51  ;;  %6129 = vmatprep.subr.bf16.mxu0 %v4298_v42  ;;  %v3753_v51 = vld [vmem:[#allocation5 + $0x770] sm:$0xff]  ;;  %v4377_v42 = vunpack.c.h.s8.bf16 %v3689_v35 }
 0x952   :  { %6170 = vmatprep.subr.bf16.mxu1 %v4426_v45  ;;  %v4505_v45 = vunpack.c.h.s8.bf16 %v3753_v51 }
 0x954   :  { %6130 = vmatpush1.bf16.msra.mxu0 %v4297_v37  ;;  %v3682_v37 = vld [vmem:[#allocation5 + $0x538] sm:$0xff] }
 0x955   :  { %6171 = vmatpush1.bf16.msra.mxu1 %v4425_v57  ;;  %6131 = vmatprep.subr.bf16.mxu0 %v4290_v50  ;;  %v3746_v57 = vld [vmem:[#allocation5 + $0x738] sm:$0xff]  ;;  %v4369_v50 = vunpack.c.l.s8.bf16 %v3689_v35  ;;  %v4362_v30 = vunpack.c.h.s8.bf16 %v3682_v37  ;;  %v4354_v23 = vunpack.c.l.s8.bf16 %v3682_v37 }
 0x956   :  { %6172 = vmatprep.subr.bf16.mxu1 %v4418_v33  ;;  %v4497_v33 = vunpack.c.l.s8.bf16 %v3753_v51  ;;  %v4490_v14 = vunpack.c.h.s8.bf16 %v3746_v57  ;;  %v4482_v13 = vunpack.c.l.s8.bf16 %v3746_v57  ;;  %v3793_v51 = vld [vmem:[#allocation5 + $0x8b0] sm:$0xff] }
 0x958   :  { %6132 = vmatpush1.bf16.msra.mxu0 %v4289_v4  ;;  %v3681_v4 = vld [vmem:[#allocation5 + $0x530] sm:$0xff] }
 0x959   :  { %6173 = vmatpush1.bf16.msra.mxu1 %v4417_v20  ;;  %6133 = vmatprep.subr.bf16.mxu0 %v4410_v62  ;;  %v3745_v20 = vld [vmem:[#allocation5 + $0x730] sm:$0xff]  ;;  %v4361_v62 = vunpack.c.h.s8.bf16 %v3681_v4 }
 0x95a   :  { %6174 = vmatprep.subr.bf16.mxu1 %v4538_v10  ;;  %v4489_v10 = vunpack.c.h.s8.bf16 %v3745_v20 }
 0x95c   :  { %6134 = vmatpush2.bf16.msra.mxu0 %v4409_v56  ;;  %v3802_v56 = vld [vmem:[#allocation5 + $0x8f8] sm:$0xff] }
 0x95d   :  { %6175 = vmatpush2.bf16.msra.mxu1 %v4537_v6  ;;  %6135 = vmatprep.subr.bf16.mxu0 %v4402_v28  ;;  %v3866_v6 = vld [vmem:[#allocation5 + $0xaf8] sm:$0xff]  ;;  %v4353_v28 = vunpack.c.l.s8.bf16 %v3681_v4  ;;  %v4602_v26 = vunpack.c.h.s8.bf16 %v3802_v56  ;;  %v4594_v46 = vunpack.c.l.s8.bf16 %v3802_v56 }
 0x95e   :  { %6176 = vmatprep.subr.bf16.mxu1 %v4530_v5  ;;  %v4481_v5 = vunpack.c.l.s8.bf16 %v3745_v20  ;;  %v4730_v40 = vunpack.c.h.s8.bf16 %v3866_v6  ;;  %v4722_v22 = vunpack.c.l.s8.bf16 %v3866_v6 }
 0x960   :  { %6136 = vmatpush2.bf16.msra.mxu0 %v4401_v0  ;;  %v3801_v0 = vld [vmem:[#allocation5 + $0x8f0] sm:$0xff] }
 0x961   :  { %6177 = vmatpush2.bf16.msra.mxu1 %v4529_v53  ;;  %6137 = vmatprep.subr.bf16.mxu0 %v4394_v9  ;;  %v3865_v53 = vld [vmem:[#allocation5 + $0xaf0] sm:$0xff]  ;;  %v4601_v9 = vunpack.c.h.s8.bf16 %v3801_v0  ;;  %v4593_v41 = vunpack.c.l.s8.bf16 %v3801_v0 }
 0x962   :  { %6178 = vmatprep.subr.bf16.mxu1 %v4522_v27  ;;  %v4729_v27 = vunpack.c.h.s8.bf16 %v3865_v53 }
 0x964   :  { %6138 = vmatpush2.bf16.msra.mxu0 %v4393_v49  ;;  %v3794_v49 = vld [vmem:[#allocation5 + $0x8b8] sm:$0xff] }
 0x965   :  { %6179 = vmatpush2.bf16.msra.mxu1 %v4521_v39  ;;  %6139 = vmatprep.subr.bf16.mxu0 %v4386_v52  ;;  %v3858_v39 = vld [vmem:[#allocation5 + $0xab8] sm:$0xff] }
 0x966   :  { %6180 = vmatprep.subr.bf16.mxu1 %v4514_v47  ;;  %v4714_v35 = vunpack.c.h.s8.bf16 %v3858_v39 }
 0x968   :  { %6140 = vmatpush2.bf16.msra.mxu0 %v4385_v58  ;;  %v4721_v58 = vunpack.c.l.s8.bf16 %v3865_v53 }
 0x969   :  { %6181 = vmatpush2.bf16.msra.mxu1 %v4513_v3  ;;  %6141 = vmatprep.subr.bf16.mxu0 %v4378_v34 }
 0x96a   :  { %6182 = vmatprep.subr.bf16.mxu1 %v4506_v1  ;;  %v4586_v1 = vunpack.c.h.s8.bf16 %v3794_v49 }
 0x96c   :  { %6142 = vmatpush2.bf16.msra.mxu0 %v4377_v42  ;;  %v3857_v42 = vld [vmem:[#allocation5 + $0xab0] sm:$0xff] }
 0x96d   :  { %6183 = vmatpush2.bf16.msra.mxu1 %v4505_v45  ;;  %6143 = vmatprep.subr.bf16.mxu0 %v4370_v36  ;;  %v4713_v37 = vunpack.c.h.s8.bf16 %v3857_v42 }
 0x96e   :  { %6184 = vmatprep.subr.bf16.mxu1 %v4498_v16  ;;  %v4585_v16 = vunpack.c.h.s8.bf16 %v3793_v51 }
 0x970   :  { %6144 = vmatpush2.bf16.msra.mxu0 %v4369_v50 }
 0x971   :  { %6185 = vmatpush2.bf16.msra.mxu1 %v4497_v33  ;;  %6145 = vmatprep.subr.bf16.mxu0 %v4362_v30  ;;  %v4578_v33 = vunpack.c.l.s8.bf16 %v3794_v49  ;;  %v4706_v30 = vunpack.c.l.s8.bf16 %v3858_v39 }
 0x972   :  { %6186 = vmatprep.subr.bf16.mxu1 %v4490_v14  ;;  %v3786_v14 = vld [vmem:[#allocation5 + $0x878] sm:$0xff] }
 0x973   :  { %v4570_v4 = vunpack.c.h.s8.bf16 %v3786_v14  ;;  %v4562_v56 = vunpack.c.l.s8.bf16 %v3786_v14 }
 0x974   :  { %6146 = vmatpush2.bf16.msra.mxu0 %v4361_v62  ;;  %v3785_v62 = vld [vmem:[#allocation5 + $0x870] sm:$0xff] }
 0x975   :  { %6187 = vmatpush2.bf16.msra.mxu1 %v4489_v10  ;;  %6147 = vmatprep.subr.bf16.mxu0 %v4354_v23  ;;  %v3849_v10 = vld [vmem:[#allocation5 + $0xa70] sm:$0xff]  ;;  %v4569_v23 = vunpack.c.h.s8.bf16 %v3785_v62 }
 0x976   :  { %6188 = vmatprep.subr.bf16.mxu1 %v4482_v13  ;;  %v4697_v13 = vunpack.c.h.s8.bf16 %v3849_v10 }
 0x978   :  { %6148 = vmatpush2.bf16.msra.mxu0 %v4353_v28  ;;  %v3778_v28 = vld [vmem:[#allocation5 + $0x838] sm:$0xff] }
 0x979   :  { %6189 = vmatpush2.bf16.msra.mxu1 %v4481_v5  ;;  %6199 = vmatprep.subr.bf16.mxu0 %v4602_v26  ;;  %v3842_v5 = vld [vmem:[#allocation5 + $0xa38] sm:$0xff]  ;;  %v4561_v26 = vunpack.c.l.s8.bf16 %v3785_v62  ;;  %v4554_v0 = vunpack.c.h.s8.bf16 %v3778_v28  ;;  %v4546_v49 = vunpack.c.l.s8.bf16 %v3778_v28 }
 0x97a   :  { %6240 = vmatprep.subr.bf16.mxu1 %v4730_v40  ;;  %v4689_v40 = vunpack.c.l.s8.bf16 %v3849_v10  ;;  %v4682_v53 = vunpack.c.h.s8.bf16 %v3842_v5  ;;  %v4674_v39 = vunpack.c.l.s8.bf16 %v3842_v5 }
 0x97b   :  { %v5905_v52 = vpop.f32.mrf.mxu0  ;;  %6150 = vmatmul.mubr.bf16.vlgmr.msra.gmra.mxu0 %v9208_v18 }
 0x97c   :  { %v5946_v47 = vpop.f32.mrf.mxu1  ;;  %6191 = vmatmul.mubr.bf16.vlgmr.msra.gmra.mxu1 %v9228_v25  ;;  %v5906_v24 = vadd.f32 %v5905_v52, %v9403_v21  ;;  %6200 = vmatpush1.bf16.msra.mxu0 %v4601_v9  ;;  %v3777_v9 = vld [vmem:[#allocation5 + $0x830] sm:$0xff]  ;;  %v3834_v52 = vld [vmem:[#allocation5 + $0x9f8] sm:$0xff] }
 0x97d   :  { %6241 = vmatpush1.bf16.msra.mxu1 %v4729_v27  ;;  %v5907_v3 = vpop.f32.mrf.mxu0  ;;  %6201 = vmatprep.subr.bf16.mxu0 %v4594_v46  ;;  %v3841_v27 = vld [vmem:[#allocation5 + $0xa30] sm:$0xff]  ;;  %v4553_v46 = vunpack.c.h.s8.bf16 %v3777_v9 }
 0x97e   :  { %v5948_v34 = vpop.f32.mrf.mxu1  ;;  %6242 = vmatprep.subr.bf16.mxu1 %v4722_v22  ;;  %v9413_v45 = vadd.f32 %v5946_v47, %v5906_v24  ;;  %v5908_v18 = vadd.f32 %v5907_v3, %v9408_v2  ;;  %6231 = vmatprep.mubr.bf16.mxu0 %v9250_v48  ;;  %v3850_v2 = vld [vmem:[#allocation5 + $0xa78] sm:$0xff]  ;;  %v4577_v48 = vunpack.c.l.s8.bf16 %v3793_v51  ;;  %v4681_v22 = vunpack.c.h.s8.bf16 %v3841_v27 }
 0x97f   :  { %6272 = vmatprep.mubr.bf16.mxu1 %v9264_v29  ;;  %v5909_v25 = vpop.f32.mrf.mxu0  ;;  %v4705_v29 = vunpack.c.l.s8.bf16 %v3857_v42  ;;  %v4698_v20 = vunpack.c.h.s8.bf16 %v3850_v2  ;;  %v4690_v6 = vunpack.c.l.s8.bf16 %v3850_v2  ;;  %v3898_v47 = vld [vmem:[#allocation5 + $0xbf8] sm:$0xff]  ;;  %v4545_v24 = vunpack.c.l.s8.bf16 %v3777_v9 }
 0x980   :  { %v5950_v21 = vpop.f32.mrf.mxu1  ;;  %v9418_v36 = vadd.f32 %v5948_v34, %v5908_v18  ;;  %6202 = vmatpush1.bf16.msra.mxu0 %v4593_v41  ;;  %v4673_v41 = vunpack.c.l.s8.bf16 %v3841_v27  ;;  %v4794_v3 = vunpack.c.h.s8.bf16 %v3898_v47  ;;  %v3833_v34 = vld [vmem:[#allocation5 + $0x9f0] sm:$0xff]  ;;  %v4658_v42 = vunpack.c.l.s8.bf16 %v3834_v52  ;;  %v3826_v25 = vld [vmem:[#allocation5 + $0x9b8] sm:$0xff] }
 0x981   :  { %6243 = vmatpush1.bf16.msra.mxu1 %v4721_v58  ;;  %v5910_v57 = vpop.f32.mrf.mxu0  ;;  %6203 = vmatprep.subr.bf16.mxu0 %v4586_v1  ;;  %v4666_v58 = vunpack.c.h.s8.bf16 %v3834_v52  ;;  %v3897_v1 = vld [vmem:[#allocation5 + $0xbf0] sm:$0xff]  ;;  %v4786_v18 = vunpack.c.l.s8.bf16 %v3898_v47  ;;  %v3890_v21 = vld [vmem:[#allocation5 + $0xbb8] sm:$0xff] }
 0x982   :  { %v5951_v50 = vpop.f32.mrf.mxu1  ;;  %6244 = vmatprep.subr.bf16.mxu1 %v4714_v35  ;;  %v4665_v35 = vunpack.c.h.s8.bf16 %v3833_v34  ;;  %v4793_v51 = vunpack.c.h.s8.bf16 %v3897_v1  ;;  %v4650_v57 = vunpack.c.h.s8.bf16 %v3826_v25 }
 0x983   :  { %v4778_v50 = vunpack.c.h.s8.bf16 %v3890_v21 }
 0x984   :  { %6204 = vmatpush1.bf16.msra.mxu0 %v4585_v16  ;;  %v4657_v16 = vunpack.c.l.s8.bf16 %v3833_v34 }
 0x985   :  { %6245 = vmatpush1.bf16.msra.mxu1 %v4713_v37  ;;  %6205 = vmatprep.subr.bf16.mxu0 %v4578_v33  ;;  %v4785_v37 = vunpack.c.l.s8.bf16 %v3897_v1  ;;  %v3825_v33 = vld [vmem:[#allocation5 + $0x9b0] sm:$0xff] }
 0x986   :  { %6246 = vmatprep.subr.bf16.mxu1 %v4706_v30  ;;  %v3889_v30 = vld [vmem:[#allocation5 + $0xbb0] sm:$0xff]  ;;  %v4649_v14 = vunpack.c.h.s8.bf16 %v3825_v33  ;;  %v4641_v62 = vunpack.c.l.s8.bf16 %v3825_v33 }
 0x987   :  { %v4777_v2 = vunpack.c.h.s8.bf16 %v3889_v30  ;;  %v4769_v10 = vunpack.c.l.s8.bf16 %v3889_v30 }
 0x988   :  { %6206 = vmatpush1.bf16.msra.mxu0 %v4577_v48  ;;  %v4642_v48 = vunpack.c.l.s8.bf16 %v3826_v25 }
 0x989   :  { %6247 = vmatpush1.bf16.msra.mxu1 %v4705_v29  ;;  %6207 = vmatprep.subr.bf16.mxu0 %v4570_v4  ;;  %v4770_v29 = vunpack.c.l.s8.bf16 %v3890_v21  ;;  %v3818_v4 = vld [vmem:[#allocation5 + $0x978] sm:$0xff] }
 0x98a   :  { %6248 = vmatprep.subr.bf16.mxu1 %v4698_v20  ;;  %v3882_v20 = vld [vmem:[#allocation5 + $0xb78] sm:$0xff] }
 0x98c   :  { %6208 = vmatpush1.bf16.msra.mxu0 %v4569_v23  ;;  %v4634_v23 = vunpack.c.h.s8.bf16 %v3818_v4 }
 0x98d   :  { %6249 = vmatpush1.bf16.msra.mxu1 %v4697_v13  ;;  %6209 = vmatprep.subr.bf16.mxu0 %v4562_v56  ;;  %v4762_v13 = vunpack.c.h.s8.bf16 %v3882_v20  ;;  %v3817_v56 = vld [vmem:[#allocation5 + $0x970] sm:$0xff] }
 0x98e   :  { %6250 = vmatprep.subr.bf16.mxu1 %v4690_v6  ;;  %v3881_v6 = vld [vmem:[#allocation5 + $0xb70] sm:$0xff]  ;;  %v4633_v28 = vunpack.c.h.s8.bf16 %v3817_v56  ;;  %v4625_v9 = vunpack.c.l.s8.bf16 %v3817_v56 }
 0x98f   :  { %v4761_v5 = vunpack.c.h.s8.bf16 %v3881_v6  ;;  %v4753_v27 = vunpack.c.l.s8.bf16 %v3881_v6 }
 0x990   :  { %6210 = vmatpush1.bf16.msra.mxu0 %v4561_v26  ;;  %v4626_v26 = vunpack.c.l.s8.bf16 %v3818_v4 }
 0x991   :  { %6251 = vmatpush1.bf16.msra.mxu1 %v4689_v40  ;;  %6211 = vmatprep.subr.bf16.mxu0 %v4554_v0  ;;  %v4754_v40 = vunpack.c.l.s8.bf16 %v3882_v20  ;;  %v3810_v0 = vld [vmem:[#allocation5 + $0x938] sm:$0xff]  ;;  %v9427_v20 = vld [vmem:[#allocation24] sm:$0xff] }
 0x992   :  { %6252 = vmatprep.subr.bf16.mxu1 %v4682_v53  ;;  %v3874_v53 = vld [vmem:[#allocation5 + $0xb38] sm:$0xff] }
 0x994   :  { %6212 = vmatpush1.bf16.msra.mxu0 %v4553_v46  ;;  %v4618_v46 = vunpack.c.h.s8.bf16 %v3810_v0 }
 0x995   :  { %6253 = vmatpush1.bf16.msra.mxu1 %v4681_v22  ;;  %6213 = vmatprep.subr.bf16.mxu0 %v4546_v49  ;;  %v4746_v22 = vunpack.c.h.s8.bf16 %v3874_v53  ;;  %v3809_v49 = vld [vmem:[#allocation5 + $0x930] sm:$0xff] }
 0x996   :  { %6254 = vmatprep.subr.bf16.mxu1 %v4674_v39  ;;  %v3873_v39 = vld [vmem:[#allocation5 + $0xb30] sm:$0xff]  ;;  %v4617_v52 = vunpack.c.h.s8.bf16 %v3809_v49  ;;  %v4609_v34 = vunpack.c.l.s8.bf16 %v3809_v49 }
 0x997   :  { %v4745_v47 = vunpack.c.h.s8.bf16 %v3873_v39  ;;  %v4737_v1 = vunpack.c.l.s8.bf16 %v3873_v39  ;;  %v3978_v39 = vld [vmem:[#allocation5 + $0xe78] sm:$0xff] }
 0x998   :  { %6214 = vmatpush1.bf16.msra.mxu0 %v4545_v24  ;;  %v4610_v24 = vunpack.c.l.s8.bf16 %v3810_v0 }
 0x999   :  { %6255 = vmatpush1.bf16.msra.mxu1 %v4673_v41  ;;  %6215 = vmatprep.subr.bf16.mxu0 %v4666_v58  ;;  %v4738_v41 = vunpack.c.l.s8.bf16 %v3874_v53  ;;  %v3930_v58 = vld [vmem:[#allocation5 + $0xcf8] sm:$0xff] }
 0x99a   :  { %6256 = vmatprep.subr.bf16.mxu1 %v4794_v3  ;;  %v3994_v3 = vld [vmem:[#allocation5 + $0xef8] sm:$0xff] }
 0x99c   :  { %6216 = vmatpush2.bf16.msra.mxu0 %v4665_v35  ;;  %v4858_v35 = vunpack.c.h.s8.bf16 %v3930_v58 }
 0x99d   :  { %6257 = vmatpush2.bf16.msra.mxu1 %v4793_v51  ;;  %6217 = vmatprep.subr.bf16.mxu0 %v4658_v42  ;;  %v4986_v51 = vunpack.c.h.s8.bf16 %v3994_v3  ;;  %v3929_v42 = vld [vmem:[#allocation5 + $0xcf0] sm:$0xff] }
 0x99e   :  { %6258 = vmatprep.subr.bf16.mxu1 %v4786_v18  ;;  %v3993_v18 = vld [vmem:[#allocation5 + $0xef0] sm:$0xff]  ;;  %v4857_v25 = vunpack.c.h.s8.bf16 %v3929_v42 }
 0x99f   :  { %v4985_v21 = vunpack.c.h.s8.bf16 %v3993_v18  ;;  %v4977_v4 = vunpack.c.l.s8.bf16 %v3993_v18 }
 0x9a0   :  { %6218 = vmatpush2.bf16.msra.mxu0 %v4657_v16  ;;  %v4850_v16 = vunpack.c.l.s8.bf16 %v3930_v58  ;;  %v4954_v58 = vunpack.c.h.s8.bf16 %v3978_v39 }
 0x9a1   :  { %6259 = vmatpush2.bf16.msra.mxu1 %v4785_v37  ;;  %6219 = vmatprep.subr.bf16.mxu0 %v4650_v57  ;;  %v4978_v37 = vunpack.c.l.s8.bf16 %v3994_v3  ;;  %v3922_v57 = vld [vmem:[#allocation5 + $0xcb8] sm:$0xff]  ;;  %v3913_v3 = vld [vmem:[#allocation5 + $0xc70] sm:$0xff] }
 0x9a2   :  { %6260 = vmatprep.subr.bf16.mxu1 %v4778_v50  ;;  %v3986_v50 = vld [vmem:[#allocation5 + $0xeb8] sm:$0xff] }
 0x9a4   :  { %6220 = vmatpush2.bf16.msra.mxu0 %v4649_v14 }
 0x9a5   :  { %6261 = vmatpush2.bf16.msra.mxu1 %v4777_v2  ;;  %6221 = vmatprep.subr.bf16.mxu0 %v4642_v48  ;;  %v9423_v2 = vld [vmem:[#allocation22] sm:$0xff] }
 0x9a6   :  { %6262 = vmatprep.subr.bf16.mxu1 %v4770_v29  ;;  %v6384_v48 = vrot.slane %v9423_v2, %v9189_v43  ;;  %v4849_v29 = vunpack.c.l.s8.bf16 %v3929_v42  ;;  %v4825_v42 = vunpack.c.h.s8.bf16 %v3913_v3 }
 0x9a8   :  { %6222 = vmatpush2.bf16.msra.mxu0 %v4641_v62  ;;  %v6434_v62 = vrot.slane %v9427_v20, %v9189_v43  ;;  %v6438_v43 = vrot.slane %v9427_v20, %v9192_v11 }
 0x9a9   :  { %6263 = vmatpush2.bf16.msra.mxu1 %v4769_v10  ;;  %6223 = vmatprep.subr.bf16.mxu0 %v4634_v23  ;;  %v3921_v23 = vld [vmem:[#allocation5 + $0xcb0] sm:$0xff] }
 0x9aa   :  { %6264 = vmatprep.subr.bf16.mxu1 %v4762_v13  ;;  %v3985_v13 = vld [vmem:[#allocation5 + $0xeb0] sm:$0xff]  ;;  %v4841_v53 = vunpack.c.h.s8.bf16 %v3921_v23 }
 0x9ac   :  { %6224 = vmatpush2.bf16.msra.mxu0 %v4633_v28  ;;  %v6388_v28 = vrot.slane %v9423_v2, %v9192_v11 }
 0x9ad   :  { %6265 = vmatpush2.bf16.msra.mxu1 %v4761_v5  ;;  %6225 = vmatprep.subr.bf16.mxu0 %v4626_v26 }
 0x9ae   :  { %6266 = vmatprep.subr.bf16.mxu1 %v4754_v40 }
 0x9b0   :  { %6226 = vmatpush2.bf16.msra.mxu0 %v4625_v9  ;;  %v4969_v9 = vunpack.c.h.s8.bf16 %v3985_v13 }
 0x9b1   :  { %6267 = vmatpush2.bf16.msra.mxu1 %v4753_v27  ;;  %6227 = vmatprep.subr.bf16.mxu0 %v4618_v46  ;;  %v4834_v46 = vunpack.c.l.s8.bf16 %v3922_v57 }
 0x9b2   :  { %6268 = vmatprep.subr.bf16.mxu1 %v4746_v22  ;;  %v4962_v22 = vunpack.c.l.s8.bf16 %v3986_v50 }
 0x9b4   :  { %6228 = vmatpush2.bf16.msra.mxu0 %v4617_v52 }
 0x9b5   :  { %6269 = vmatpush2.bf16.msra.mxu1 %v4745_v47  ;;  %6229 = vmatprep.subr.bf16.mxu0 %v4610_v24  ;;  %v4833_v47 = vunpack.c.l.s8.bf16 %v3921_v23  ;;  %v4961_v24 = vunpack.c.l.s8.bf16 %v3985_v13 }
 0x9b6   :  { %6270 = vmatprep.subr.bf16.mxu1 %v4738_v41 }
 0x9b8   :  { %6230 = vmatpush2.bf16.msra.mxu0 %v4609_v34  ;;  %v3977_v34 = vld [vmem:[#allocation5 + $0xe70] sm:$0xff] }
 0x9b9   :  { %6271 = vmatpush2.bf16.msra.mxu1 %v4737_v1  ;;  %6281 = vmatprep.subr.bf16.mxu0 %v4858_v35  ;;  %v4953_v18 = vunpack.c.h.s8.bf16 %v3977_v34 }
 0x9ba   :  { %6322 = vmatprep.subr.bf16.mxu1 %v4986_v51 }
 0x9bb   :  { %v5987_v33 = vpop.f32.mrf.mxu0  ;;  %6232 = vmatmul.mubr.bf16.vlgmr.msra.gmra.mxu0 %v9248_v12 }
 0x9bc   :  { %v6028_v30 = vpop.f32.mrf.mxu1  ;;  %6273 = vmatmul.mubr.bf16.vlgmr.msra.gmra.mxu1 %v9262_v19  ;;  %v5988_v14 = vadd.f32 %v5987_v33, %v9413_v45  ;;  %6282 = vmatpush1.bf16.msra.mxu0 %v4857_v25  ;;  %v4842_v19 = vunpack.c.h.s8.bf16 %v3922_v57  ;;  %v4970_v45 = vunpack.c.h.s8.bf16 %v3986_v50  ;;  %v4817_v57 = vunpack.c.l.s8.bf16 %v3913_v3 }
 0x9bd   :  { %6323 = vmatpush1.bf16.msra.mxu1 %v4985_v21  ;;  %v5989_v10 = vpop.f32.mrf.mxu0  ;;  %6283 = vmatprep.subr.bf16.mxu0 %v4850_v16  ;;  %v4946_v21 = vunpack.c.l.s8.bf16 %v3978_v39  ;;  %v3906_v16 = vld [vmem:[#allocation5 + $0xc38] sm:$0xff]  ;;  %v4945_v50 = vunpack.c.l.s8.bf16 %v3977_v34  ;;  %v3945_v34 = vld [vmem:[#allocation5 + $0xd70] sm:$0xff] }
 0x9be   :  { %v6030_v12 = vpop.f32.mrf.mxu1  ;;  %6324 = vmatprep.subr.bf16.mxu1 %v4978_v37  ;;  %v6029_v56 = vadd.f32 %v6028_v30, %v5988_v14  ;;  %v5990_v6 = vadd.f32 %v5989_v10, %v9418_v36  ;;  %6313 = vmatprep.mubr.bf16.mxu0 %v9278_v61  ;;  %v3970_v37 = vld [vmem:[#allocation5 + $0xe38] sm:$0xff]  ;;  %v4810_v33 = vunpack.c.h.s8.bf16 %v3906_v16  ;;  %v3905_v14 = vld [vmem:[#allocation5 + $0xc30] sm:$0xff] }
 0x9bf   :  { %6354 = vmatprep.mubr.bf16.mxu1 %v9292_v17  ;;  %v5991_v5 = vpop.f32.mrf.mxu0  ;;  %v3914_v17 = vld [vmem:[#allocation5 + $0xc78] sm:$0xff]  ;;  %v4938_v30 = vunpack.c.h.s8.bf16 %v3970_v37  ;;  %v4930_v10 = vunpack.c.l.s8.bf16 %v3970_v37 }
 0x9c0   :  { %v6032_v26 = vpop.f32.mrf.mxu1  ;;  %v6409_v40 = vmul.f32 %v6384_v48, %v6029_v56  ;;  %v6031_v0 = vadd.f32 %v6030_v12, %v5990_v6  ;;  %6284 = vmatpush1.bf16.msra.mxu0 %v4849_v29  ;;  %v4826_v41 = vunpack.c.h.s8.bf16 %v3914_v17  ;;  %v4818_v25 = vunpack.c.l.s8.bf16 %v3914_v17  ;;  %v3969_v48 = vld [vmem:[#allocation5 + $0xe30] sm:$0xff]  ;;  %v3962_v12 = vld [vmem:[#allocation5 + $0xdf8] sm:$0xff] }
 0x9c1   :  { %6325 = vmatpush1.bf16.msra.mxu1 %v4977_v4  ;;  %v5992_v27 = vpop.f32.mrf.mxu0  ;;  %6285 = vmatprep.subr.bf16.mxu0 %v4842_v19  ;;  %v4809_v29 = vunpack.c.h.s8.bf16 %v3905_v14  ;;  %v4937_v4 = vunpack.c.h.s8.bf16 %v3969_v48  ;;  %v4026_v19 = vld [vmem:[#allocation5 + $0xff8] sm:$0xff]  ;;  %v4929_v23 = vunpack.c.l.s8.bf16 %v3969_v48  ;;  %v4922_v13 = vunpack.c.h.s8.bf16 %v3962_v12  ;;  %v3961_v6 = vld [vmem:[#allocation5 + $0xdf0] sm:$0xff] }
 0x9c2   :  { %v6033_v36 = vpop.f32.mrf.mxu1  ;;  %6326 = vmatprep.subr.bf16.mxu1 %v4970_v45  ;;  %v6459_v61 = vadd.f32 %v6434_v62, %v6409_v40  ;;  %v6410_v49 = vmul.f32 %v6388_v28, %v6031_v0  ;;  %v4802_v62 = vunpack.c.l.s8.bf16 %v3906_v16  ;;  %v4801_v45 = vunpack.c.l.s8.bf16 %v3905_v14  ;;  %v4025_v28 = vld [vmem:[#allocation5 + $0xff0] sm:$0xff]  ;;  %v3954_v0 = vld [vmem:[#allocation5 + $0xdb8] sm:$0xff] }
 0x9c3   :  { %v5050_v56 = vunpack.c.h.s8.bf16 %v4026_v19  ;;  %v5049_v5 = vunpack.c.h.s8.bf16 %v4025_v28  ;;  %v4914_v26 = vunpack.c.l.s8.bf16 %v3962_v12  ;;  %v5042_v40 = vunpack.c.l.s8.bf16 %v4026_v19  ;;  %v3938_v16 = vld [vmem:[#allocation5 + $0xd38] sm:$0xff]  ;;  %v3937_v14 = vld [vmem:[#allocation5 + $0xd30] sm:$0xff] }
 0x9c4   :  { %v6467_v52 = vmax.f32 %v6459_v61, 0.0  ;;  %v6460_v11 = vadd.f32 %v6438_v43, %v6410_v49  ;;  %6286 = vmatpush1.bf16.msra.mxu0 %v4841_v53  ;;  %v4921_v43 = vunpack.c.h.s8.bf16 %v3961_v6  ;;  %v4018_v53 = vld [vmem:[#allocation5 + $0xfb8] sm:$0xff]  ;;  %v5041_v27 = vunpack.c.l.s8.bf16 %v4025_v28  ;;  %v4017_v61 = vld [vmem:[#allocation5 + $0xfb0] sm:$0xff] }
 0x9c5   :  { %6327 = vmatpush1.bf16.msra.mxu1 %v4969_v9  ;;  %6287 = vmatprep.subr.bf16.mxu0 %v4834_v46  ;;  %v4913_v9 = vunpack.c.l.s8.bf16 %v3961_v6  ;;  %v4906_v36 = vunpack.c.h.s8.bf16 %v3954_v0  ;;  %v5034_v46 = vunpack.c.h.s8.bf16 %v4018_v53  ;;  %v5033_v17 = vunpack.c.h.s8.bf16 %v4017_v61  ;;  %v4002_v37 = vld [vmem:[#allocation5 + $0xf38] sm:$0xff]  ;;  %v4001_v48 = vld [vmem:[#allocation5 + $0xf30] sm:$0xff] }
 0x9c6   :  { %6328 = vmatprep.subr.bf16.mxu1 %v4962_v22  ;;  %v9438_v1 = vpack.c.bf16 %v6467_v52, %v6467_v52  ;;  %v6468_v35 = vmax.f32 %v6460_v11, 0.0  ;;  %v3953_v22 = vld [vmem:[#allocation5 + $0xdb0] sm:$0xff]  ;;  %v4898_v39 = vunpack.c.l.s8.bf16 %v3954_v0  ;;  %v5026_v52 = vunpack.c.l.s8.bf16 %v4018_v53  ;;  %v3946_v11 = vld [vmem:[#allocation5 + $0xd78] sm:$0xff] }
 0x9c7   :  { %v4905_v49 = vunpack.c.h.s8.bf16 %v3953_v22  ;;  %v4865_v12 = vunpack.c.l.s8.bf16 %v3937_v14  ;;  %v4993_v19 = vunpack.c.l.s8.bf16 %v4001_v48 }
 0x9c8   :  { %v9440_v51 = vpack.c.bf16 %v6468_v35, %v6468_v35  ;;  %6288 = vmatpush1.bf16.msra.mxu0 %v4833_v47  ;;  %v4010_v47 = vld [vmem:[#allocation5 + $0xf78] sm:$0xff]  ;;  %v4009_v35 = vld [vmem:[#allocation5 + $0xf70] sm:$0xff] }
 0x9c9   :  { %6329 = vmatpush1.bf16.msra.mxu1 %v4961_v24  ;;  %6289 = vmatprep.subr.bf16.mxu0 %v4826_v41  ;;  %v4897_v24 = vunpack.c.l.s8.bf16 %v3953_v22  ;;  %v5025_v41 = vunpack.c.l.s8.bf16 %v4017_v61  ;;  %v5018_v3 = vunpack.c.h.s8.bf16 %v4010_v47 }
 0x9ca   :  { %6330 = vmatprep.subr.bf16.mxu1 %v4954_v58  ;;  %v4890_v58 = vunpack.c.h.s8.bf16 %v3946_v11 }
 0x9cc   :  { %6290 = vmatpush1.bf16.msra.mxu0 %v4825_v42  ;;  %v4889_v42 = vunpack.c.h.s8.bf16 %v3945_v34 }
 0x9cd   :  { %6331 = vmatpush1.bf16.msra.mxu1 %v4953_v18  ;;  %6291 = vmatprep.subr.bf16.mxu0 %v4818_v25  ;;  %v5017_v18 = vunpack.c.h.s8.bf16 %v4009_v35  ;;  %v4882_v25 = vunpack.c.l.s8.bf16 %v3946_v11 }
 0x9ce   :  { %6332 = vmatprep.subr.bf16.mxu1 %v4946_v21  ;;  %v5010_v21 = vunpack.c.l.s8.bf16 %v4010_v47 }
 0x9d0   :  { %6292 = vmatpush1.bf16.msra.mxu0 %v4817_v57  ;;  %v4881_v57 = vunpack.c.l.s8.bf16 %v3945_v34 }
 0x9d1   :  { %6333 = vmatpush1.bf16.msra.mxu1 %v4945_v50  ;;  %6293 = vmatprep.subr.bf16.mxu0 %v4810_v33  ;;  %v5009_v50 = vunpack.c.l.s8.bf16 %v4009_v35  ;;  %v4874_v33 = vunpack.c.h.s8.bf16 %v3938_v16 }
 0x9d2   :  { %6334 = vmatprep.subr.bf16.mxu1 %v4938_v30  ;;  %v5002_v30 = vunpack.c.h.s8.bf16 %v4002_v37 }
 0x9d4   :  { %6294 = vmatpush1.bf16.msra.mxu0 %v4809_v29  ;;  %v4873_v29 = vunpack.c.h.s8.bf16 %v3937_v14 }
 0x9d5   :  { %6335 = vmatpush1.bf16.msra.mxu1 %v4937_v4  ;;  %6295 = vmatprep.subr.bf16.mxu0 %v4802_v62  ;;  %v5001_v4 = vunpack.c.h.s8.bf16 %v4001_v48  ;;  %v4866_v62 = vunpack.c.l.s8.bf16 %v3938_v16  ;;  %v6396_v48 = vrot.slane %v9423_v2, %v9216_v8 }
 0x9d6   :  { %6336 = vmatprep.subr.bf16.mxu1 %v4930_v10  ;;  %v4994_v10 = vunpack.c.l.s8.bf16 %v4002_v37  ;;  %v6392_v37 = vrot.slane %v9423_v2, %v9213_v38 }
 0x9d8   :  { %6296 = vmatpush1.bf16.msra.mxu0 %v4801_v45 }
 0x9d9   :  { %6337 = vmatpush1.bf16.msra.mxu1 %v4929_v23  ;;  %6297 = vmatprep.subr.bf16.mxu0 %v4922_v13 }
 0x9da   :  { %6338 = vmatprep.subr.bf16.mxu1 %v5050_v56 }
 0x9dc   :  { %6298 = vmatpush2.bf16.msra.mxu0 %v4921_v43 }
 0x9dd   :  { %6339 = vmatpush2.bf16.msra.mxu1 %v5049_v5  ;;  %6299 = vmatprep.subr.bf16.mxu0 %v4914_v26 }
 0x9de   :  { %6340 = vmatprep.subr.bf16.mxu1 %v5042_v40 }
 0x9e0   :  { %6300 = vmatpush2.bf16.msra.mxu0 %v4913_v9 }
 0x9e1   :  { %6341 = vmatpush2.bf16.msra.mxu1 %v5041_v27  ;;  %6301 = vmatprep.subr.bf16.mxu0 %v4906_v36 }
 0x9e2   :  { %6342 = vmatprep.subr.bf16.mxu1 %v5034_v46 }
 0x9e4   :  { %6302 = vmatpush2.bf16.msra.mxu0 %v4905_v49 }
 0x9e5   :  { %6343 = vmatpush2.bf16.msra.mxu1 %v5033_v17  ;;  %6303 = vmatprep.subr.bf16.mxu0 %v4898_v39 }
 0x9e6   :  { %6344 = vmatprep.subr.bf16.mxu1 %v5026_v52 }
 0x9e8   :  { %6304 = vmatpush2.bf16.msra.mxu0 %v4897_v24 }
 0x9e9   :  { %6345 = vmatpush2.bf16.msra.mxu1 %v5025_v41  ;;  %6305 = vmatprep.subr.bf16.mxu0 %v4890_v58 }
 0x9ea   :  { %6346 = vmatprep.subr.bf16.mxu1 %v5018_v3 }
 0x9ec   :  { %6306 = vmatpush2.bf16.msra.mxu0 %v4889_v42 }
 0x9ed   :  { %6347 = vmatpush2.bf16.msra.mxu1 %v5017_v18  ;;  %6307 = vmatprep.subr.bf16.mxu0 %v4882_v25 }
 0x9ee   :  { %6348 = vmatprep.subr.bf16.mxu1 %v5010_v21 }
 0x9f0   :  { %6308 = vmatpush2.bf16.msra.mxu0 %v4881_v57 }
 0x9f1   :  { %6349 = vmatpush2.bf16.msra.mxu1 %v5009_v50  ;;  %6309 = vmatprep.subr.bf16.mxu0 %v4874_v33 }
 0x9f2   :  { %6350 = vmatprep.subr.bf16.mxu1 %v5002_v30  ;;  %v6442_v30 = vrot.slane %v9427_v20, %v9213_v38 }
 0x9f4   :  { %6310 = vmatpush2.bf16.msra.mxu0 %v4873_v29 }
 0x9f5   :  { %6351 = vmatpush2.bf16.msra.mxu1 %v5001_v4  ;;  %6311 = vmatprep.subr.bf16.mxu0 %v4866_v62 }
 0x9f6   :  { %6352 = vmatprep.subr.bf16.mxu1 %v4994_v10 }
 0x9f8   :  { %6312 = vmatpush2.bf16.msra.mxu0 %v4865_v12  ;;  %v6446_v12 = vrot.slane %v9427_v20, %v9216_v8 }
 0x9f9   :  { %6353 = vmatpush2.bf16.msra.mxu1 %v4993_v19 }
 0x9fb   :  { %v6069_v45 = vpop.f32.mrf.mxu0  ;;  %6314 = vmatmul.mubr.bf16.vlgmr.msra.gmra.mxu0 %v9276_v44 }
 0x9fc   :  { %v6110_v23 = vpop.f32.mrf.mxu1  ;;  %6355 = vmatmul.mubr.bf16.vlgmr.msra.gmra.mxu1 %v9290_v31 }
 0x9fd   :  { %v6111_v13 = vadd.f32 %v6110_v23, %v6069_v45  ;;  %v6071_v56 = vpop.f32.mrf.mxu0 }
 0x9fe   :  { %v6112_v6 = vpop.f32.mrf.mxu1 }
 0x9ff   :  { %v6113_v28 = vadd.f32 %v6112_v6, %v6071_v56  ;;  %v6073_v43 = vpop.f32.mrf.mxu0 }
 0xa00   :  { %v6114_v5 = vpop.f32.mrf.mxu1 }
 0xa01   :  { %v6074_v26 = vpop.f32.mrf.mxu0 }
 0xa02   :  { %v6115_v40 = vpop.f32.mrf.mxu1 }
 0xa3b   :  { %v6151_v0 = vpop.f32.mrf.mxu0 }
 0xa3c   :  { %v6192_v53 = vpop.f32.mrf.mxu1  ;;  %v6152_v9 = vadd.f32 %v6151_v0, %v6111_v13 }
 0xa3d   :  { %v6153_v27 = vpop.f32.mrf.mxu0 }
 0xa3e   :  { %v6194_v36 = vpop.f32.mrf.mxu1  ;;  %v6193_v46 = vadd.f32 %v6192_v53, %v6152_v9  ;;  %v6154_v22 = vadd.f32 %v6153_v27, %v6113_v28 }
 0xa3f   :  { %v6155_v61 = vpop.f32.mrf.mxu0 }
 0xa40   :  { %v6196_v49 = vpop.f32.mrf.mxu1  ;;  %v6195_v44 = vadd.f32 %v6194_v36, %v6154_v22 }
 0xa41   :  { %v6156_v17 = vpop.f32.mrf.mxu0 }
 0xa42   :  { %v6197_v31 = vpop.f32.mrf.mxu1 }
 0xa7b   :  { %v6233_v39 = vpop.f32.mrf.mxu0 }
 0xa7c   :  { %v6274_v52 = vpop.f32.mrf.mxu1  ;;  %v6234_v11 = vadd.f32 %v6233_v39, %v6193_v46 }
 0xa7d   :  { %v6235_v47 = vpop.f32.mrf.mxu0 }
 0xa7e   :  { %v6276_v24 = vpop.f32.mrf.mxu1  ;;  %v6275_v41 = vadd.f32 %v6274_v52, %v6234_v11  ;;  %v6236_v42 = vadd.f32 %v6235_v47, %v6195_v44 }
 0xa7f   :  { %v6237_v58 = vpop.f32.mrf.mxu0 }
 0xa80   :  { %v6278_v3 = vpop.f32.mrf.mxu1  ;;  %v6277_v21 = vadd.f32 %v6276_v24, %v6236_v42 }
 0xa81   :  { %v6238_v34 = vpop.f32.mrf.mxu0 }
 0xa82   :  { %v6279_v35 = vpop.f32.mrf.mxu1 }
 0xabb   :  { %v6315_v18 = vpop.f32.mrf.mxu0 }
 0xabc   :  { %v6356_v25 = vpop.f32.mrf.mxu1  ;;  %v6316_v16 = vadd.f32 %v6315_v18, %v6275_v41 }
 0xabd   :  { %v6317_v57 = vpop.f32.mrf.mxu0 }
 0xabe   :  { %v6358_v50 = vpop.f32.mrf.mxu1  ;;  %v6357_v33 = vadd.f32 %v6356_v25, %v6316_v16  ;;  %v6318_v14 = vadd.f32 %v6317_v57, %v6277_v21 }
 0xabf   :  { %v6319_v29 = vpop.f32.mrf.mxu0 }
 0xac0   :  { %v6360_v4 = vpop.f32.mrf.mxu1  ;;  %v6411_v62 = vmul.f32 %v6392_v37, %v6357_v33  ;;  %v6359_v10 = vadd.f32 %v6358_v50, %v6318_v14 }
 0xac1   :  { %v6320_v19 = vpop.f32.mrf.mxu0 }
 0xac2   :  { %v6361_v45 = vpop.f32.mrf.mxu1  ;;  %v6461_v23 = vadd.f32 %v6442_v30, %v6411_v62  ;;  %v6412_v13 = vmul.f32 %v6396_v48, %v6359_v10 }
 0xac4   :  { %v6469_v56 = vmax.f32 %v6461_v23, 0.0  ;;  %v6462_v6 = vadd.f32 %v6446_v12, %v6412_v13 }
 0xac6   :  { %v9452_v28 = vpack.c.bf16 %v6469_v56, %v6469_v56  ;;  %v6470_v38 = vmax.f32 %v6462_v6, 0.0 }
 0xac8   :  { %v9454_v43 = vpack.c.bf16 %v6470_v38, %v6470_v38 }
 0xac9   :  { %8429 = dma.done.wait [#allocation10 + $0x4], 16384 }
 0xaca   :  { %8430 = vsyncadd [#allocation10 + $0x4], 4294950912  ;;  %6903 = vmatprep.mubr.bf16.mxu0 %v9348_v15  ;;  %6944 = vmatprep.mubr.bf16.mxu1 %v9390_v32  ;;  %v6500_v2 = vld [vmem:[#allocation6 + $0x68] sm:$0xff]  ;;  %v6499_v8 = vld [vmem:[#allocation6 + $0x60] sm:$0xff] }
 0xacb   :  { %v6532_v5 = vld [vmem:[#allocation6 + $0x168] sm:$0xff]  ;;  %v6640_v20 = vunpack.c.l.s8.bf16 %v6500_v2  ;;  %v6644_v26 = vunpack.c.h.s8.bf16 %v6500_v2  ;;  %v6531_v53 = vld [vmem:[#allocation6 + $0x160] sm:$0xff]  ;;  %v6643_v9 = vunpack.c.h.s8.bf16 %v6499_v8  ;;  %v6639_v22 = vunpack.c.l.s8.bf16 %v6499_v8 }
 0xacc   :  { %v6704_v40 = vunpack.c.l.s8.bf16 %v6532_v5  ;;  %v6708_v0 = vunpack.c.h.s8.bf16 %v6532_v5  ;;  %v6707_v27 = vunpack.c.h.s8.bf16 %v6531_v53  ;;  %v6496_v36 = vld [vmem:[#allocation6 + $0x48] sm:$0xff]  ;;  %v6703_v61 = vunpack.c.l.s8.bf16 %v6531_v53  ;;  %v6495_v17 = vld [vmem:[#allocation6 + $0x40] sm:$0xff] }
 0xacd   :  { %v6528_v46 = vld [vmem:[#allocation6 + $0x148] sm:$0xff]  ;;  %6871 = vmatprep.subr.bf16.mxu0 %v6644_v26  ;;  %v6636_v49 = vunpack.c.h.s8.bf16 %v6496_v36  ;;  %v6527_v31 = vld [vmem:[#allocation6 + $0x140] sm:$0xff]  ;;  %v6635_v39 = vunpack.c.h.s8.bf16 %v6495_v17  ;;  %v6632_v11 = vunpack.c.l.s8.bf16 %v6496_v36  ;;  %v6631_v58 = vunpack.c.l.s8.bf16 %v6495_v17 }
 0xace   :  { %6912 = vmatprep.subr.bf16.mxu1 %v6708_v0  ;;  %6872 = vmatpush1.bf16.msra.mxu0 %v6643_v9  ;;  %v6700_v44 = vunpack.c.h.s8.bf16 %v6528_v46  ;;  %v6699_v52 = vunpack.c.h.s8.bf16 %v6527_v31  ;;  %v6696_v47 = vunpack.c.l.s8.bf16 %v6528_v46  ;;  %v6492_v24 = vld [vmem:[#allocation6 + $0x28] sm:$0xff]  ;;  %v6695_v3 = vunpack.c.l.s8.bf16 %v6527_v31  ;;  %v6491_v42 = vld [vmem:[#allocation6 + $0x20] sm:$0xff] }
 0xacf   :  { %6913 = vmatpush1.bf16.msra.mxu1 %v6707_v27  ;;  %6873 = vmatprep.subr.bf16.mxu0 %v6640_v20  ;;  %v6524_v41 = vld [vmem:[#allocation6 + $0x128] sm:$0xff]  ;;  %v6628_v34 = vunpack.c.h.s8.bf16 %v6492_v24  ;;  %v6523_v18 = vld [vmem:[#allocation6 + $0x120] sm:$0xff]  ;;  %v6627_v25 = vunpack.c.h.s8.bf16 %v6491_v42  ;;  %v6624_v16 = vunpack.c.l.s8.bf16 %v6492_v24  ;;  %v6623_v33 = vunpack.c.l.s8.bf16 %v6491_v42 }
 0xad0   :  { %6914 = vmatprep.subr.bf16.mxu1 %v6704_v40  ;;  %v6692_v35 = vunpack.c.h.s8.bf16 %v6524_v41  ;;  %v6691_v21 = vunpack.c.h.s8.bf16 %v6523_v18  ;;  %v6688_v37 = vunpack.c.l.s8.bf16 %v6524_v41  ;;  %v6488_v57 = vld [vmem:[#allocation6 + $0x8] sm:$0xff]  ;;  %v6687_v30 = vunpack.c.l.s8.bf16 %v6523_v18  ;;  %v6487_v29 = vld [vmem:[#allocation6] sm:$0xff] }
 0xad1   :  { %v6520_v50 = vld [vmem:[#allocation6 + $0x108] sm:$0xff]  ;;  %v6620_v14 = vunpack.c.h.s8.bf16 %v6488_v57  ;;  %v6519_v4 = vld [vmem:[#allocation6 + $0x100] sm:$0xff]  ;;  %v6619_v62 = vunpack.c.h.s8.bf16 %v6487_v29  ;;  %v6616_v12 = vunpack.c.l.s8.bf16 %v6488_v57  ;;  %v6615_v13 = vunpack.c.l.s8.bf16 %v6487_v29 }
 0xad2   :  { %6874 = vmatpush1.bf16.msra.mxu0 %v6639_v22  ;;  %v6684_v48 = vunpack.c.h.s8.bf16 %v6520_v50  ;;  %v6683_v10 = vunpack.c.h.s8.bf16 %v6519_v4  ;;  %v6680_v19 = vunpack.c.l.s8.bf16 %v6520_v50  ;;  %v6516_v45 = vld [vmem:[#allocation6 + $0xe8] sm:$0xff]  ;;  %v6679_v56 = vunpack.c.l.s8.bf16 %v6519_v4  ;;  %v6515_v2 = vld [vmem:[#allocation6 + $0xe0] sm:$0xff] }
 0xad3   :  { %6915 = vmatpush1.bf16.msra.mxu1 %v6703_v61  ;;  %6875 = vmatprep.subr.bf16.mxu0 %v6636_v49  ;;  %v6548_v23 = vld [vmem:[#allocation6 + $0x1e8] sm:$0xff]  ;;  %v6676_v6 = vunpack.c.h.s8.bf16 %v6516_v45  ;;  %v6547_v5 = vld [vmem:[#allocation6 + $0x1e0] sm:$0xff]  ;;  %v6675_v8 = vunpack.c.h.s8.bf16 %v6515_v2  ;;  %v6672_v26 = vunpack.c.l.s8.bf16 %v6516_v45  ;;  %v6671_v9 = vunpack.c.l.s8.bf16 %v6515_v2 }
 0xad4   :  { %6916 = vmatprep.subr.bf16.mxu1 %v6700_v44  ;;  %v6740_v38 = vunpack.c.h.s8.bf16 %v6548_v23  ;;  %v6739_v20 = vunpack.c.h.s8.bf16 %v6547_v5  ;;  %v6736_v40 = vunpack.c.l.s8.bf16 %v6548_v23  ;;  %v6512_v0 = vld [vmem:[#allocation6 + $0xc8] sm:$0xff]  ;;  %v6735_v27 = vunpack.c.l.s8.bf16 %v6547_v5  ;;  %v6511_v22 = vld [vmem:[#allocation6 + $0xc0] sm:$0xff] }
 0xad5   :  { %v6544_v53 = vld [vmem:[#allocation6 + $0x1c8] sm:$0xff]  ;;  %v6668_v36 = vunpack.c.h.s8.bf16 %v6512_v0  ;;  %v6543_v61 = vld [vmem:[#allocation6 + $0x1c0] sm:$0xff]  ;;  %v6667_v49 = vunpack.c.h.s8.bf16 %v6511_v22  ;;  %v6664_v17 = vunpack.c.l.s8.bf16 %v6512_v0 }
 0xad6   :  { %6876 = vmatpush1.bf16.msra.mxu0 %v6635_v39  ;;  %v6732_v46 = vunpack.c.h.s8.bf16 %v6544_v53  ;;  %v6731_v44 = vunpack.c.h.s8.bf16 %v6543_v61  ;;  %v6728_v31 = vunpack.c.l.s8.bf16 %v6544_v53  ;;  %v6508_v39 = vld [vmem:[#allocation6 + $0xa8] sm:$0xff] }
 0xad7   :  { %6917 = vmatpush1.bf16.msra.mxu1 %v6699_v52  ;;  %6877 = vmatprep.subr.bf16.mxu0 %v6632_v11  ;;  %v6540_v52 = vld [vmem:[#allocation6 + $0x1a8] sm:$0xff]  ;;  %v6663_v11 = vunpack.c.l.s8.bf16 %v6511_v22  ;;  %v6660_v24 = vunpack.c.h.s8.bf16 %v6508_v39  ;;  %v6656_v42 = vunpack.c.l.s8.bf16 %v6508_v39 }
 0xad8   :  { %6918 = vmatprep.subr.bf16.mxu1 %v6696_v47  ;;  %v6727_v47 = vunpack.c.l.s8.bf16 %v6543_v61  ;;  %v6724_v41 = vunpack.c.h.s8.bf16 %v6540_v52  ;;  %v6720_v18 = vunpack.c.l.s8.bf16 %v6540_v52 }
 0xada   :  { %6878 = vmatpush1.bf16.msra.mxu0 %v6631_v58  ;;  %v6507_v58 = vld [vmem:[#allocation6 + $0xa0] sm:$0xff] }
 0xadb   :  { %6919 = vmatpush1.bf16.msra.mxu1 %v6695_v3  ;;  %6879 = vmatprep.subr.bf16.mxu0 %v6628_v34  ;;  %v6539_v3 = vld [vmem:[#allocation6 + $0x1a0] sm:$0xff]  ;;  %v6659_v34 = vunpack.c.h.s8.bf16 %v6507_v58 }
 0xadc   :  { %6920 = vmatprep.subr.bf16.mxu1 %v6692_v35  ;;  %v6723_v35 = vunpack.c.h.s8.bf16 %v6539_v3 }
 0xade   :  { %6880 = vmatpush1.bf16.msra.mxu0 %v6627_v25  ;;  %v6504_v25 = vld [vmem:[#allocation6 + $0x88] sm:$0xff] }
 0xadf   :  { %6921 = vmatpush1.bf16.msra.mxu1 %v6691_v21  ;;  %6881 = vmatprep.subr.bf16.mxu0 %v6624_v16  ;;  %v6536_v21 = vld [vmem:[#allocation6 + $0x188] sm:$0xff]  ;;  %v6655_v16 = vunpack.c.l.s8.bf16 %v6507_v58  ;;  %v6652_v57 = vunpack.c.h.s8.bf16 %v6504_v25  ;;  %v6648_v29 = vunpack.c.l.s8.bf16 %v6504_v25 }
 0xae0   :  { %6922 = vmatprep.subr.bf16.mxu1 %v6688_v37  ;;  %v6719_v37 = vunpack.c.l.s8.bf16 %v6539_v3  ;;  %v6716_v50 = vunpack.c.h.s8.bf16 %v6536_v21  ;;  %v6712_v4 = vunpack.c.l.s8.bf16 %v6536_v21 }
 0xae2   :  { %6882 = vmatpush1.bf16.msra.mxu0 %v6623_v33  ;;  %v6503_v33 = vld [vmem:[#allocation6 + $0x80] sm:$0xff] }
 0xae3   :  { %6923 = vmatpush1.bf16.msra.mxu1 %v6687_v30  ;;  %6883 = vmatprep.subr.bf16.mxu0 %v6620_v14  ;;  %v6535_v30 = vld [vmem:[#allocation6 + $0x180] sm:$0xff]  ;;  %v6651_v14 = vunpack.c.h.s8.bf16 %v6503_v33 }
 0xae4   :  { %6924 = vmatprep.subr.bf16.mxu1 %v6684_v48  ;;  %v6715_v48 = vunpack.c.h.s8.bf16 %v6535_v30 }
 0xae6   :  { %6884 = vmatpush1.bf16.msra.mxu0 %v6619_v62  ;;  %v6564_v62 = vld [vmem:[#allocation6 + $0x268] sm:$0xff] }
 0xae7   :  { %6925 = vmatpush1.bf16.msra.mxu1 %v6683_v10  ;;  %6885 = vmatprep.subr.bf16.mxu0 %v6616_v12  ;;  %v6596_v10 = vld [vmem:[#allocation6 + $0x368] sm:$0xff]  ;;  %v6647_v12 = vunpack.c.l.s8.bf16 %v6503_v33  ;;  %v6772_v45 = vunpack.c.h.s8.bf16 %v6564_v62  ;;  %v6768_v2 = vunpack.c.l.s8.bf16 %v6564_v62 }
 0xae8   :  { %6926 = vmatprep.subr.bf16.mxu1 %v6680_v19  ;;  %v6711_v19 = vunpack.c.l.s8.bf16 %v6535_v30  ;;  %v6836_v23 = vunpack.c.h.s8.bf16 %v6596_v10  ;;  %v6832_v5 = vunpack.c.l.s8.bf16 %v6596_v10 }
 0xaea   :  { %6886 = vmatpush1.bf16.msra.mxu0 %v6615_v13  ;;  %v6563_v13 = vld [vmem:[#allocation6 + $0x260] sm:$0xff] }
 0xaeb   :  { %6927 = vmatpush1.bf16.msra.mxu1 %v6679_v56  ;;  %6887 = vmatprep.subr.bf16.mxu0 %v6676_v6  ;;  %v6595_v56 = vld [vmem:[#allocation6 + $0x360] sm:$0xff]  ;;  %v6771_v6 = vunpack.c.h.s8.bf16 %v6563_v13 }
 0xaec   :  { %6928 = vmatprep.subr.bf16.mxu1 %v6740_v38  ;;  %v6835_v38 = vunpack.c.h.s8.bf16 %v6595_v56 }
 0xaee   :  { %6888 = vmatpush2.bf16.msra.mxu0 %v6675_v8  ;;  %v6560_v8 = vld [vmem:[#allocation6 + $0x248] sm:$0xff] }
 0xaef   :  { %6929 = vmatpush2.bf16.msra.mxu1 %v6739_v20  ;;  %6889 = vmatprep.subr.bf16.mxu0 %v6672_v26  ;;  %v6592_v20 = vld [vmem:[#allocation6 + $0x348] sm:$0xff]  ;;  %v6767_v26 = vunpack.c.l.s8.bf16 %v6563_v13  ;;  %v6764_v0 = vunpack.c.h.s8.bf16 %v6560_v8  ;;  %v6760_v22 = vunpack.c.l.s8.bf16 %v6560_v8 }
 0xaf0   :  { %6930 = vmatprep.subr.bf16.mxu1 %v6736_v40  ;;  %v6831_v40 = vunpack.c.l.s8.bf16 %v6595_v56  ;;  %v6828_v53 = vunpack.c.h.s8.bf16 %v6592_v20  ;;  %v6824_v61 = vunpack.c.l.s8.bf16 %v6592_v20 }
 0xaf2   :  { %6890 = vmatpush2.bf16.msra.mxu0 %v6671_v9  ;;  %v6559_v9 = vld [vmem:[#allocation6 + $0x240] sm:$0xff] }
 0xaf3   :  { %6931 = vmatpush2.bf16.msra.mxu1 %v6735_v27  ;;  %6891 = vmatprep.subr.bf16.mxu0 %v6668_v36  ;;  %v6591_v27 = vld [vmem:[#allocation6 + $0x340] sm:$0xff]  ;;  %v6763_v36 = vunpack.c.h.s8.bf16 %v6559_v9 }
 0xaf4   :  { %6932 = vmatprep.subr.bf16.mxu1 %v6732_v46  ;;  %v6827_v46 = vunpack.c.h.s8.bf16 %v6591_v27 }
 0xaf6   :  { %6892 = vmatpush2.bf16.msra.mxu0 %v6667_v49  ;;  %v6556_v49 = vld [vmem:[#allocation6 + $0x228] sm:$0xff] }
 0xaf7   :  { %6933 = vmatpush2.bf16.msra.mxu1 %v6731_v44  ;;  %6893 = vmatprep.subr.bf16.mxu0 %v6664_v17  ;;  %v6588_v44 = vld [vmem:[#allocation6 + $0x328] sm:$0xff]  ;;  %v6759_v17 = vunpack.c.l.s8.bf16 %v6559_v9  ;;  %v6756_v39 = vunpack.c.h.s8.bf16 %v6556_v49  ;;  %v6752_v58 = vunpack.c.l.s8.bf16 %v6556_v49 }
 0xaf8   :  { %6934 = vmatprep.subr.bf16.mxu1 %v6728_v31  ;;  %v6823_v31 = vunpack.c.l.s8.bf16 %v6591_v27  ;;  %v6820_v52 = vunpack.c.h.s8.bf16 %v6588_v44  ;;  %v6816_v3 = vunpack.c.l.s8.bf16 %v6588_v44 }
 0xafa   :  { %6894 = vmatpush2.bf16.msra.mxu0 %v6663_v11  ;;  %v6555_v11 = vld [vmem:[#allocation6 + $0x220] sm:$0xff] }
 0xafb   :  { %6935 = vmatpush2.bf16.msra.mxu1 %v6727_v47  ;;  %6895 = vmatprep.subr.bf16.mxu0 %v6660_v24  ;;  %v6587_v47 = vld [vmem:[#allocation6 + $0x320] sm:$0xff]  ;;  %v6755_v24 = vunpack.c.h.s8.bf16 %v6555_v11 }
 0xafc   :  { %6936 = vmatprep.subr.bf16.mxu1 %v6724_v41  ;;  %v6819_v41 = vunpack.c.h.s8.bf16 %v6587_v47 }
 0xafe   :  { %6896 = vmatpush2.bf16.msra.mxu0 %v6659_v34  ;;  %v6552_v34 = vld [vmem:[#allocation6 + $0x208] sm:$0xff] }
 0xaff   :  { %6937 = vmatpush2.bf16.msra.mxu1 %v6723_v35  ;;  %6897 = vmatprep.subr.bf16.mxu0 %v6656_v42  ;;  %v6584_v35 = vld [vmem:[#allocation6 + $0x308] sm:$0xff]  ;;  %v6751_v42 = vunpack.c.l.s8.bf16 %v6555_v11  ;;  %v6748_v25 = vunpack.c.h.s8.bf16 %v6552_v34  ;;  %v6744_v33 = vunpack.c.l.s8.bf16 %v6552_v34 }
 0xb00   :  { %6938 = vmatprep.subr.bf16.mxu1 %v6720_v18  ;;  %v6815_v18 = vunpack.c.l.s8.bf16 %v6587_v47  ;;  %v6812_v21 = vunpack.c.h.s8.bf16 %v6584_v35  ;;  %v6808_v30 = vunpack.c.l.s8.bf16 %v6584_v35 }
 0xb02   :  { %6898 = vmatpush2.bf16.msra.mxu0 %v6655_v16  ;;  %v6551_v16 = vld [vmem:[#allocation6 + $0x200] sm:$0xff] }
 0xb03   :  { %6939 = vmatpush2.bf16.msra.mxu1 %v6719_v37  ;;  %6899 = vmatprep.subr.bf16.mxu0 %v6652_v57  ;;  %v6583_v37 = vld [vmem:[#allocation6 + $0x300] sm:$0xff]  ;;  %v6747_v57 = vunpack.c.h.s8.bf16 %v6551_v16 }
 0xb04   :  { %6940 = vmatprep.subr.bf16.mxu1 %v6716_v50  ;;  %v6811_v50 = vunpack.c.h.s8.bf16 %v6583_v37 }
 0xb06   :  { %6900 = vmatpush2.bf16.msra.mxu0 %v6651_v14  ;;  %v6580_v14 = vld [vmem:[#allocation6 + $0x2e8] sm:$0xff] }
 0xb07   :  { %6941 = vmatpush2.bf16.msra.mxu1 %v6715_v48  ;;  %6901 = vmatprep.subr.bf16.mxu0 %v6648_v29  ;;  %v6612_v48 = vld [vmem:[#allocation6 + $0x3e8] sm:$0xff]  ;;  %v6743_v29 = vunpack.c.l.s8.bf16 %v6551_v16  ;;  %v6804_v62 = vunpack.c.h.s8.bf16 %v6580_v14  ;;  %v6800_v13 = vunpack.c.l.s8.bf16 %v6580_v14 }
 0xb08   :  { %6942 = vmatprep.subr.bf16.mxu1 %v6712_v4  ;;  %v6807_v4 = vunpack.c.l.s8.bf16 %v6583_v37  ;;  %v6868_v10 = vunpack.c.h.s8.bf16 %v6612_v48  ;;  %v6864_v56 = vunpack.c.l.s8.bf16 %v6612_v48 }
 0xb0a   :  { %6902 = vmatpush2.bf16.msra.mxu0 %v6647_v12  ;;  %v6579_v12 = vld [vmem:[#allocation6 + $0x2e0] sm:$0xff] }
 0xb0b   :  { %6943 = vmatpush2.bf16.msra.mxu1 %v6711_v19  ;;  %6953 = vmatprep.subr.bf16.mxu0 %v6772_v45  ;;  %v6611_v19 = vld [vmem:[#allocation6 + $0x3e0] sm:$0xff]  ;;  %v6803_v45 = vunpack.c.h.s8.bf16 %v6579_v12 }
 0xb0c   :  { %6994 = vmatprep.subr.bf16.mxu1 %v6836_v23  ;;  %v6867_v23 = vunpack.c.h.s8.bf16 %v6611_v19 }
 0xb0d   :  { %6904 = vmatmul.mubr.bf16.vlgmr.msra.gmra.mxu0 %v9346_v63 }
 0xb0e   :  { %6945 = vmatmul.mubr.bf16.vlgmr.msra.gmra.mxu1 %v9388_v7  ;;  %6954 = vmatpush1.bf16.msra.mxu0 %v6771_v6  ;;  %v6576_v6 = vld [vmem:[#allocation6 + $0x2c8] sm:$0xff] }
 0xb0f   :  { %6995 = vmatpush1.bf16.msra.mxu1 %v6835_v38  ;;  %6955 = vmatprep.subr.bf16.mxu0 %v6768_v2  ;;  %v6608_v38 = vld [vmem:[#allocation6 + $0x3c8] sm:$0xff]  ;;  %v6799_v2 = vunpack.c.l.s8.bf16 %v6579_v12  ;;  %v6796_v8 = vunpack.c.h.s8.bf16 %v6576_v6  ;;  %v6792_v9 = vunpack.c.l.s8.bf16 %v6576_v6 }
 0xb10   :  { %6996 = vmatprep.subr.bf16.mxu1 %v6832_v5  ;;  %6985 = vmatprep.mubr.bf16.mxu0 %v9440_v51  ;;  %v6863_v5 = vunpack.c.l.s8.bf16 %v6611_v19  ;;  %v6860_v20 = vunpack.c.h.s8.bf16 %v6608_v38  ;;  %v6856_v27 = vunpack.c.l.s8.bf16 %v6608_v38 }
 0xb11   :  { %7026 = vmatprep.mubr.bf16.mxu1 %v9454_v43 }
 0xb12   :  { %6956 = vmatpush1.bf16.msra.mxu0 %v6767_v26  ;;  %v6575_v26 = vld [vmem:[#allocation6 + $0x2c0] sm:$0xff] }
 0xb13   :  { %6997 = vmatpush1.bf16.msra.mxu1 %v6831_v40  ;;  %6957 = vmatprep.subr.bf16.mxu0 %v6764_v0  ;;  %v6607_v40 = vld [vmem:[#allocation6 + $0x3c0] sm:$0xff]  ;;  %v6795_v0 = vunpack.c.h.s8.bf16 %v6575_v26 }
 0xb14   :  { %6998 = vmatprep.subr.bf16.mxu1 %v6828_v53  ;;  %v6859_v53 = vunpack.c.h.s8.bf16 %v6607_v40 }
 0xb16   :  { %6958 = vmatpush1.bf16.msra.mxu0 %v6763_v36  ;;  %v6572_v36 = vld [vmem:[#allocation6 + $0x2a8] sm:$0xff] }
 0xb17   :  { %6999 = vmatpush1.bf16.msra.mxu1 %v6827_v46  ;;  %6959 = vmatprep.subr.bf16.mxu0 %v6760_v22  ;;  %v6604_v46 = vld [vmem:[#allocation6 + $0x3a8] sm:$0xff]  ;;  %v6791_v22 = vunpack.c.l.s8.bf16 %v6575_v26  ;;  %v6788_v49 = vunpack.c.h.s8.bf16 %v6572_v36  ;;  %v6784_v11 = vunpack.c.l.s8.bf16 %v6572_v36 }
 0xb18   :  { %7000 = vmatprep.subr.bf16.mxu1 %v6824_v61  ;;  %v6855_v61 = vunpack.c.l.s8.bf16 %v6607_v40  ;;  %v6852_v44 = vunpack.c.h.s8.bf16 %v6604_v46  ;;  %v6848_v47 = vunpack.c.l.s8.bf16 %v6604_v46  ;;  %v6493_v46 = vld [vmem:[#allocation6 + $0x30] sm:$0xff] }
 0xb1a   :  { %6960 = vmatpush1.bf16.msra.mxu0 %v6759_v17  ;;  %v6571_v17 = vld [vmem:[#allocation6 + $0x2a0] sm:$0xff] }
 0xb1b   :  { %7001 = vmatpush1.bf16.msra.mxu1 %v6823_v31  ;;  %6961 = vmatprep.subr.bf16.mxu0 %v6756_v39  ;;  %v6603_v31 = vld [vmem:[#allocation6 + $0x3a0] sm:$0xff]  ;;  %v6787_v39 = vunpack.c.h.s8.bf16 %v6571_v17 }
 0xb1c   :  { %7002 = vmatprep.subr.bf16.mxu1 %v6820_v52  ;;  %v6851_v52 = vunpack.c.h.s8.bf16 %v6603_v31 }
 0xb1e   :  { %6962 = vmatpush1.bf16.msra.mxu0 %v6755_v24  ;;  %v6568_v24 = vld [vmem:[#allocation6 + $0x288] sm:$0xff] }
 0xb1f   :  { %7003 = vmatpush1.bf16.msra.mxu1 %v6819_v41  ;;  %6963 = vmatprep.subr.bf16.mxu0 %v6752_v58  ;;  %v6600_v41 = vld [vmem:[#allocation6 + $0x388] sm:$0xff]  ;;  %v6783_v58 = vunpack.c.l.s8.bf16 %v6571_v17  ;;  %v6780_v34 = vunpack.c.h.s8.bf16 %v6568_v24  ;;  %v6776_v16 = vunpack.c.l.s8.bf16 %v6568_v24  ;;  %v6490_v17 = vld [vmem:[#allocation6 + $0x18] sm:$0xff]  ;;  %v6489_v24 = vld [vmem:[#allocation6 + $0x10] sm:$0xff] }
 0xb20   :  { %7004 = vmatprep.subr.bf16.mxu1 %v6816_v3  ;;  %v6847_v3 = vunpack.c.l.s8.bf16 %v6603_v31  ;;  %v6844_v35 = vunpack.c.h.s8.bf16 %v6600_v41  ;;  %v6840_v37 = vunpack.c.l.s8.bf16 %v6600_v41  ;;  %v6522_v31 = vld [vmem:[#allocation6 + $0x118] sm:$0xff]  ;;  %v6521_v41 = vld [vmem:[#allocation6 + $0x110] sm:$0xff] }
 0xb22   :  { %6964 = vmatpush1.bf16.msra.mxu0 %v6751_v42  ;;  %v6567_v42 = vld [vmem:[#allocation6 + $0x280] sm:$0xff] }
 0xb23   :  { %7005 = vmatpush1.bf16.msra.mxu1 %v6815_v18  ;;  %6965 = vmatprep.subr.bf16.mxu0 %v6748_v25  ;;  %v6599_v18 = vld [vmem:[#allocation6 + $0x380] sm:$0xff]  ;;  %v6779_v25 = vunpack.c.h.s8.bf16 %v6567_v42 }
 0xb24   :  { %7006 = vmatprep.subr.bf16.mxu1 %v6812_v21  ;;  %v6843_v21 = vunpack.c.h.s8.bf16 %v6599_v18 }
 0xb26   :  { %6966 = vmatpush1.bf16.msra.mxu0 %v6747_v57  ;;  %v6502_v57 = vld [vmem:[#allocation6 + $0x78] sm:$0xff] }
 0xb27   :  { %7007 = vmatpush1.bf16.msra.mxu1 %v6811_v50  ;;  %6967 = vmatprep.subr.bf16.mxu0 %v6744_v33  ;;  %v6534_v50 = vld [vmem:[#allocation6 + $0x178] sm:$0xff]  ;;  %v6775_v33 = vunpack.c.l.s8.bf16 %v6567_v42  ;;  %v6646_v14 = vunpack.c.h.s8.bf16 %v6502_v57  ;;  %v6642_v12 = vunpack.c.l.s8.bf16 %v6502_v57  ;;  %v6517_v57 = vld [vmem:[#allocation6 + $0xf0] sm:$0xff] }
 0xb28   :  { %7008 = vmatprep.subr.bf16.mxu1 %v6808_v30  ;;  %v6839_v30 = vunpack.c.l.s8.bf16 %v6599_v18  ;;  %v6710_v48 = vunpack.c.h.s8.bf16 %v6534_v50  ;;  %v6706_v19 = vunpack.c.l.s8.bf16 %v6534_v50  ;;  %v6518_v42 = vld [vmem:[#allocation6 + $0xf8] sm:$0xff]  ;;  %v6549_v50 = vld [vmem:[#allocation6 + $0x1f0] sm:$0xff] }
 0xb29   :  { %v6550_v18 = vld [vmem:[#allocation6 + $0x1f8] sm:$0xff] }
 0xb2a   :  { %6968 = vmatpush1.bf16.msra.mxu0 %v6743_v29  ;;  %v6501_v29 = vld [vmem:[#allocation6 + $0x70] sm:$0xff] }
 0xb2b   :  { %7009 = vmatpush1.bf16.msra.mxu1 %v6807_v4  ;;  %6969 = vmatprep.subr.bf16.mxu0 %v6804_v62  ;;  %v6533_v4 = vld [vmem:[#allocation6 + $0x170] sm:$0xff]  ;;  %v6645_v62 = vunpack.c.h.s8.bf16 %v6501_v29 }
 0xb2c   :  { %7010 = vmatprep.subr.bf16.mxu1 %v6868_v10  ;;  %v6709_v10 = vunpack.c.h.s8.bf16 %v6533_v4 }
 0xb2e   :  { %6970 = vmatpush2.bf16.msra.mxu0 %v6803_v45  ;;  %v6498_v45 = vld [vmem:[#allocation6 + $0x58] sm:$0xff] }
 0xb2f   :  { %7011 = vmatpush2.bf16.msra.mxu1 %v6867_v23  ;;  %6971 = vmatprep.subr.bf16.mxu0 %v6800_v13  ;;  %v6530_v23 = vld [vmem:[#allocation6 + $0x158] sm:$0xff]  ;;  %v6641_v13 = vunpack.c.l.s8.bf16 %v6501_v29  ;;  %v6638_v6 = vunpack.c.h.s8.bf16 %v6498_v45  ;;  %v6634_v26 = vunpack.c.l.s8.bf16 %v6498_v45  ;;  %v6513_v45 = vld [vmem:[#allocation6 + $0xd0] sm:$0xff] }
 0xb30   :  { %7012 = vmatprep.subr.bf16.mxu1 %v6864_v56  ;;  %v6705_v56 = vunpack.c.l.s8.bf16 %v6533_v4  ;;  %v6702_v38 = vunpack.c.h.s8.bf16 %v6530_v23  ;;  %v6698_v40 = vunpack.c.l.s8.bf16 %v6530_v23  ;;  %v6514_v29 = vld [vmem:[#allocation6 + $0xd8] sm:$0xff]  ;;  %v6545_v23 = vld [vmem:[#allocation6 + $0x1d0] sm:$0xff] }
 0xb31   :  { %v6546_v4 = vld [vmem:[#allocation6 + $0x1d8] sm:$0xff] }
 0xb32   :  { %6972 = vmatpush2.bf16.msra.mxu0 %v6799_v2  ;;  %v6497_v2 = vld [vmem:[#allocation6 + $0x50] sm:$0xff] }
 0xb33   :  { %7013 = vmatpush2.bf16.msra.mxu1 %v6863_v5  ;;  %6973 = vmatprep.subr.bf16.mxu0 %v6796_v8  ;;  %v6529_v5 = vld [vmem:[#allocation6 + $0x150] sm:$0xff]  ;;  %v6637_v8 = vunpack.c.h.s8.bf16 %v6497_v2 }
 0xb34   :  { %7014 = vmatprep.subr.bf16.mxu1 %v6860_v20  ;;  %v6701_v20 = vunpack.c.h.s8.bf16 %v6529_v5 }
 0xb36   :  { %6974 = vmatpush2.bf16.msra.mxu0 %v6795_v0  ;;  %v6494_v0 = vld [vmem:[#allocation6 + $0x38] sm:$0xff] }
 0xb37   :  { %7015 = vmatpush2.bf16.msra.mxu1 %v6859_v53  ;;  %6975 = vmatprep.subr.bf16.mxu0 %v6792_v9  ;;  %v6526_v53 = vld [vmem:[#allocation6 + $0x138] sm:$0xff]  ;;  %v6633_v9 = vunpack.c.l.s8.bf16 %v6497_v2  ;;  %v6630_v36 = vunpack.c.h.s8.bf16 %v6494_v0 }
 0xb38   :  { %7016 = vmatprep.subr.bf16.mxu1 %v6856_v27  ;;  %v6697_v27 = vunpack.c.l.s8.bf16 %v6529_v5  ;;  %v6510_v2 = vld [vmem:[#allocation6 + $0xb8] sm:$0xff] }
 0xb39   :  { %v6542_v5 = vld [vmem:[#allocation6 + $0x1b8] sm:$0xff] }
 0xb3a   :  { %6976 = vmatpush2.bf16.msra.mxu0 %v6791_v22  ;;  %v6629_v22 = vunpack.c.h.s8.bf16 %v6493_v46 }
 0xb3b   :  { %7017 = vmatpush2.bf16.msra.mxu1 %v6855_v61  ;;  %6977 = vmatprep.subr.bf16.mxu0 %v6788_v49  ;;  %v6626_v49 = vunpack.c.l.s8.bf16 %v6494_v0  ;;  %v6509_v0 = vld [vmem:[#allocation6 + $0xb0] sm:$0xff] }
 0xb3c   :  { %7018 = vmatprep.subr.bf16.mxu1 %v6852_v44  ;;  %v6690_v44 = vunpack.c.l.s8.bf16 %v6526_v53 }
 0xb3e   :  { %6978 = vmatpush2.bf16.msra.mxu0 %v6787_v39  ;;  %v6625_v39 = vunpack.c.l.s8.bf16 %v6493_v46  ;;  %v6506_v46 = vld [vmem:[#allocation6 + $0x98] sm:$0xff] }
 0xb3f   :  { %7019 = vmatpush2.bf16.msra.mxu1 %v6851_v52  ;;  %6979 = vmatprep.subr.bf16.mxu0 %v6784_v11  ;;  %v6622_v11 = vunpack.c.h.s8.bf16 %v6490_v17 }
 0xb40   :  { %7020 = vmatprep.subr.bf16.mxu1 %v6848_v47  ;;  %v6686_v47 = vunpack.c.h.s8.bf16 %v6522_v31 }
 0xb42   :  { %6980 = vmatpush2.bf16.msra.mxu0 %v6783_v58  ;;  %v6621_v58 = vunpack.c.h.s8.bf16 %v6489_v24 }
 0xb43   :  { %7021 = vmatpush2.bf16.msra.mxu1 %v6847_v3  ;;  %6981 = vmatprep.subr.bf16.mxu0 %v6780_v34  ;;  %v6685_v3 = vunpack.c.h.s8.bf16 %v6521_v41  ;;  %v6618_v34 = vunpack.c.l.s8.bf16 %v6490_v17  ;;  %v6505_v17 = vld [vmem:[#allocation6 + $0x90] sm:$0xff] }
 0xb44   :  { %7022 = vmatprep.subr.bf16.mxu1 %v6844_v35  ;;  %v6682_v35 = vunpack.c.l.s8.bf16 %v6522_v31  ;;  %v6537_v31 = vld [vmem:[#allocation6 + $0x190] sm:$0xff] }
 0xb46   :  { %6982 = vmatpush2.bf16.msra.mxu0 %v6779_v25  ;;  %v6617_v25 = vunpack.c.l.s8.bf16 %v6489_v24  ;;  %v6566_v24 = vld [vmem:[#allocation6 + $0x278] sm:$0xff] }
 0xb47   :  { %7023 = vmatpush2.bf16.msra.mxu1 %v6843_v21  ;;  %6983 = vmatprep.subr.bf16.mxu0 %v6776_v16  ;;  %v6681_v21 = vunpack.c.l.s8.bf16 %v6521_v41  ;;  %v6678_v16 = vunpack.c.h.s8.bf16 %v6518_v42  ;;  %v6598_v41 = vld [vmem:[#allocation6 + $0x378] sm:$0xff] }
 0xb48   :  { %7024 = vmatprep.subr.bf16.mxu1 %v6840_v37  ;;  %v6742_v37 = vunpack.c.h.s8.bf16 %v6550_v18 }
 0xb4a   :  { %6984 = vmatpush2.bf16.msra.mxu0 %v6775_v33  ;;  %v6677_v33 = vunpack.c.h.s8.bf16 %v6517_v57 }
 0xb4b   :  { %7025 = vmatpush2.bf16.msra.mxu1 %v6839_v30  ;;  %7035 = vmatprep.subr.bf16.mxu0 %v6646_v14  ;;  %v6741_v30 = vunpack.c.h.s8.bf16 %v6549_v50  ;;  %v6674_v14 = vunpack.c.l.s8.bf16 %v6518_v42  ;;  %v6565_v42 = vld [vmem:[#allocation6 + $0x270] sm:$0xff] }
 0xb4c   :  { %7076 = vmatprep.subr.bf16.mxu1 %v6710_v48  ;;  %v6738_v48 = vunpack.c.l.s8.bf16 %v6550_v18  ;;  %v6597_v18 = vld [vmem:[#allocation6 + $0x370] sm:$0xff] }
 0xb4d   :  { %6986 = vmatmul.mubr.bf16.vlgmr.msra.gmra.mxu0 %v9438_v1 }
 0xb4e   :  { %7027 = vmatmul.mubr.bf16.vlgmr.msra.gmra.mxu1 %v9452_v28  ;;  %7036 = vmatpush1.bf16.msra.mxu0 %v6645_v62  ;;  %v6673_v62 = vunpack.c.l.s8.bf16 %v6517_v57  ;;  %v6562_v57 = vld [vmem:[#allocation6 + $0x258] sm:$0xff] }
 0xb4f   :  { %7077 = vmatpush1.bf16.msra.mxu1 %v6709_v10  ;;  %7037 = vmatprep.subr.bf16.mxu0 %v6642_v12  ;;  %v6737_v10 = vunpack.c.l.s8.bf16 %v6549_v50  ;;  %v6670_v12 = vunpack.c.h.s8.bf16 %v6514_v29  ;;  %v6594_v50 = vld [vmem:[#allocation6 + $0x358] sm:$0xff] }
 0xb50   :  { %7078 = vmatprep.subr.bf16.mxu1 %v6706_v19  ;;  %7067 = vmatprep.mubr.bf16.mxu0 %v9348_v15  ;;  %v6694_v15 = vunpack.c.h.s8.bf16 %v6526_v53  ;;  %v6734_v19 = vunpack.c.h.s8.bf16 %v6546_v4  ;;  %v6541_v53 = vld [vmem:[#allocation6 + $0x1b0] sm:$0xff] }
 0xb51   :  { %7108 = vmatprep.mubr.bf16.mxu1 %v9390_v32  ;;  %v6525_v32 = vld [vmem:[#allocation6 + $0x130] sm:$0xff] }
 0xb52   :  { %7038 = vmatpush1.bf16.msra.mxu0 %v6641_v13  ;;  %v6693_v61 = vunpack.c.h.s8.bf16 %v6525_v32  ;;  %v6689_v52 = vunpack.c.l.s8.bf16 %v6525_v32  ;;  %v6669_v13 = vunpack.c.h.s8.bf16 %v6513_v45  ;;  %v6538_v32 = vld [vmem:[#allocation6 + $0x198] sm:$0xff] }
 0xb53   :  { %7079 = vmatpush1.bf16.msra.mxu1 %v6705_v56  ;;  %7039 = vmatprep.subr.bf16.mxu0 %v6638_v6  ;;  %v6733_v56 = vunpack.c.h.s8.bf16 %v6545_v23  ;;  %v6666_v6 = vunpack.c.l.s8.bf16 %v6514_v29  ;;  %v6561_v29 = vld [vmem:[#allocation6 + $0x250] sm:$0xff] }
 0xb54   :  { %7080 = vmatprep.subr.bf16.mxu1 %v6702_v38  ;;  %v6730_v38 = vunpack.c.l.s8.bf16 %v6546_v4  ;;  %v6593_v4 = vld [vmem:[#allocation6 + $0x350] sm:$0xff] }
 0xb56   :  { %7040 = vmatpush1.bf16.msra.mxu0 %v6637_v8  ;;  %v6665_v8 = vunpack.c.l.s8.bf16 %v6513_v45  ;;  %v6761_v45 = vunpack.c.l.s8.bf16 %v6561_v29 }
 0xb57   :  { %7081 = vmatpush1.bf16.msra.mxu1 %v6701_v20  ;;  %7041 = vmatprep.subr.bf16.mxu0 %v6634_v26  ;;  %v6729_v20 = vunpack.c.l.s8.bf16 %v6545_v23  ;;  %v6662_v26 = vunpack.c.h.s8.bf16 %v6510_v2  ;;  %v6825_v23 = vunpack.c.l.s8.bf16 %v6593_v4 }
 0xb58   :  { %7082 = vmatprep.subr.bf16.mxu1 %v6698_v40  ;;  %v6726_v40 = vunpack.c.h.s8.bf16 %v6542_v5 }
 0xb5a   :  { %7042 = vmatpush1.bf16.msra.mxu0 %v6633_v9  ;;  %v6661_v9 = vunpack.c.h.s8.bf16 %v6509_v0 }
 0xb5b   :  { %7083 = vmatpush1.bf16.msra.mxu1 %v6697_v27  ;;  %7043 = vmatprep.subr.bf16.mxu0 %v6630_v36  ;;  %v6725_v27 = vunpack.c.h.s8.bf16 %v6541_v53  ;;  %v6658_v36 = vunpack.c.l.s8.bf16 %v6510_v2 }
 0xb5c   :  { %7084 = vmatprep.subr.bf16.mxu1 %v6694_v15  ;;  %v6722_v15 = vunpack.c.l.s8.bf16 %v6542_v5 }
 0xb5e   :  { %7044 = vmatpush1.bf16.msra.mxu0 %v6629_v22  ;;  %v6657_v22 = vunpack.c.l.s8.bf16 %v6509_v0 }
 0xb5f   :  { %7085 = vmatpush1.bf16.msra.mxu1 %v6693_v61  ;;  %7045 = vmatprep.subr.bf16.mxu0 %v6626_v49  ;;  %v6721_v61 = vunpack.c.l.s8.bf16 %v6541_v53  ;;  %v6654_v49 = vunpack.c.h.s8.bf16 %v6506_v46 }
 0xb60   :  { %7086 = vmatprep.subr.bf16.mxu1 %v6690_v44  ;;  %v6718_v44 = vunpack.c.h.s8.bf16 %v6538_v32 }
 0xb62   :  { %7046 = vmatpush1.bf16.msra.mxu0 %v6625_v39  ;;  %v6653_v39 = vunpack.c.h.s8.bf16 %v6505_v17 }
 0xb63   :  { %7087 = vmatpush1.bf16.msra.mxu1 %v6689_v52  ;;  %7047 = vmatprep.subr.bf16.mxu0 %v6622_v11  ;;  %v6717_v52 = vunpack.c.h.s8.bf16 %v6537_v31  ;;  %v6650_v11 = vunpack.c.l.s8.bf16 %v6506_v46 }
 0xb64   :  { %7088 = vmatprep.subr.bf16.mxu1 %v6686_v47  ;;  %v6714_v47 = vunpack.c.l.s8.bf16 %v6538_v32 }
 0xb66   :  { %7048 = vmatpush1.bf16.msra.mxu0 %v6621_v58  ;;  %v6649_v58 = vunpack.c.l.s8.bf16 %v6505_v17 }
 0xb67   :  { %7089 = vmatpush1.bf16.msra.mxu1 %v6685_v3  ;;  %7049 = vmatprep.subr.bf16.mxu0 %v6618_v34  ;;  %v6713_v3 = vunpack.c.l.s8.bf16 %v6537_v31  ;;  %v6774_v34 = vunpack.c.h.s8.bf16 %v6566_v24 }
 0xb68   :  { %7090 = vmatprep.subr.bf16.mxu1 %v6682_v35  ;;  %v6838_v35 = vunpack.c.h.s8.bf16 %v6598_v41 }
 0xb6a   :  { %7050 = vmatpush1.bf16.msra.mxu0 %v6617_v25  ;;  %v6773_v25 = vunpack.c.h.s8.bf16 %v6565_v42 }
 0xb6b   :  { %7091 = vmatpush1.bf16.msra.mxu1 %v6681_v21  ;;  %7051 = vmatprep.subr.bf16.mxu0 %v6678_v16  ;;  %v6837_v21 = vunpack.c.h.s8.bf16 %v6597_v18  ;;  %v6770_v16 = vunpack.c.l.s8.bf16 %v6566_v24 }
 0xb6c   :  { %7092 = vmatprep.subr.bf16.mxu1 %v6742_v37  ;;  %v6834_v37 = vunpack.c.l.s8.bf16 %v6598_v41 }
 0xb6e   :  { %7052 = vmatpush2.bf16.msra.mxu0 %v6677_v33  ;;  %v6769_v33 = vunpack.c.l.s8.bf16 %v6565_v42 }
 0xb6f   :  { %7093 = vmatpush2.bf16.msra.mxu1 %v6741_v30  ;;  %7053 = vmatprep.subr.bf16.mxu0 %v6674_v14  ;;  %v6833_v30 = vunpack.c.l.s8.bf16 %v6597_v18  ;;  %v6766_v14 = vunpack.c.h.s8.bf16 %v6562_v57 }
 0xb70   :  { %7094 = vmatprep.subr.bf16.mxu1 %v6738_v48  ;;  %v6830_v48 = vunpack.c.h.s8.bf16 %v6594_v50 }
 0xb72   :  { %7054 = vmatpush2.bf16.msra.mxu0 %v6673_v62  ;;  %v6765_v62 = vunpack.c.h.s8.bf16 %v6561_v29 }
 0xb73   :  { %7095 = vmatpush2.bf16.msra.mxu1 %v6737_v10  ;;  %7055 = vmatprep.subr.bf16.mxu0 %v6670_v12  ;;  %v6826_v10 = vunpack.c.l.s8.bf16 %v6594_v50  ;;  %v6558_v12 = vld [vmem:[#allocation6 + $0x238] sm:$0xff] }
 0xb74   :  { %7096 = vmatprep.subr.bf16.mxu1 %v6734_v19  ;;  %v6590_v19 = vld [vmem:[#allocation6 + $0x338] sm:$0xff]  ;;  %v6754_v2 = vunpack.c.l.s8.bf16 %v6558_v12 }
 0xb75   :  { %v6818_v5 = vunpack.c.l.s8.bf16 %v6590_v19 }
 0xb76   :  { %7056 = vmatpush2.bf16.msra.mxu0 %v6669_v13  ;;  %v6758_v13 = vunpack.c.h.s8.bf16 %v6558_v12 }
 0xb77   :  { %7097 = vmatpush2.bf16.msra.mxu1 %v6733_v56  ;;  %7057 = vmatprep.subr.bf16.mxu0 %v6666_v6  ;;  %v6557_v56 = vld [vmem:[#allocation6 + $0x230] sm:$0xff] }
 0xb78   :  { %7098 = vmatprep.subr.bf16.mxu1 %v6730_v38  ;;  %v6757_v6 = vunpack.c.h.s8.bf16 %v6557_v56 }
 0xb7a   :  { %7058 = vmatpush2.bf16.msra.mxu0 %v6665_v8  ;;  %v6554_v8 = vld [vmem:[#allocation6 + $0x218] sm:$0xff] }
 0xb7b   :  { %7099 = vmatpush2.bf16.msra.mxu1 %v6729_v20  ;;  %7059 = vmatprep.subr.bf16.mxu0 %v6662_v26  ;;  %v6586_v20 = vld [vmem:[#allocation6 + $0x318] sm:$0xff]  ;;  %v6753_v26 = vunpack.c.l.s8.bf16 %v6557_v56  ;;  %v6750_v0 = vunpack.c.h.s8.bf16 %v6554_v8  ;;  %v6746_v46 = vunpack.c.l.s8.bf16 %v6554_v8 }
 0xb7c   :  { %7100 = vmatprep.subr.bf16.mxu1 %v6726_v40  ;;  %v6814_v53 = vunpack.c.h.s8.bf16 %v6586_v20  ;;  %v6810_v32 = vunpack.c.l.s8.bf16 %v6586_v20 }
 0xb7e   :  { %7060 = vmatpush2.bf16.msra.mxu0 %v6661_v9  ;;  %v6553_v9 = vld [vmem:[#allocation6 + $0x210] sm:$0xff] }
 0xb7f   :  { %7101 = vmatpush2.bf16.msra.mxu1 %v6725_v27  ;;  %7061 = vmatprep.subr.bf16.mxu0 %v6658_v36  ;;  %v6585_v27 = vld [vmem:[#allocation6 + $0x310] sm:$0xff]  ;;  %v6749_v36 = vunpack.c.h.s8.bf16 %v6553_v9 }
 0xb80   :  { %7102 = vmatprep.subr.bf16.mxu1 %v6722_v15  ;;  %v6813_v15 = vunpack.c.h.s8.bf16 %v6585_v27 }
 0xb82   :  { %7062 = vmatpush2.bf16.msra.mxu0 %v6657_v22  ;;  %v6582_v22 = vld [vmem:[#allocation6 + $0x2f8] sm:$0xff] }
 0xb83   :  { %7103 = vmatpush2.bf16.msra.mxu1 %v6721_v61  ;;  %7063 = vmatprep.subr.bf16.mxu0 %v6654_v49  ;;  %v6614_v61 = vld [vmem:[#allocation6 + $0x3f8] sm:$0xff]  ;;  %v6745_v49 = vunpack.c.l.s8.bf16 %v6553_v9  ;;  %v6806_v17 = vunpack.c.h.s8.bf16 %v6582_v22  ;;  %v6802_v24 = vunpack.c.l.s8.bf16 %v6582_v22 }
 0xb84   :  { %7104 = vmatprep.subr.bf16.mxu1 %v6718_v44  ;;  %v6809_v44 = vunpack.c.l.s8.bf16 %v6585_v27  ;;  %v6870_v31 = vunpack.c.h.s8.bf16 %v6614_v61  ;;  %v6866_v41 = vunpack.c.l.s8.bf16 %v6614_v61 }
 0xb86   :  { %7064 = vmatpush2.bf16.msra.mxu0 %v6653_v39  ;;  %v6581_v39 = vld [vmem:[#allocation6 + $0x2f0] sm:$0xff] }
 0xb87   :  { %7105 = vmatpush2.bf16.msra.mxu1 %v6717_v52  ;;  %7065 = vmatprep.subr.bf16.mxu0 %v6650_v11  ;;  %v6613_v52 = vld [vmem:[#allocation6 + $0x3f0] sm:$0xff]  ;;  %v6805_v11 = vunpack.c.h.s8.bf16 %v6581_v39 }
 0xb88   :  { %7106 = vmatprep.subr.bf16.mxu1 %v6714_v47  ;;  %v6869_v47 = vunpack.c.h.s8.bf16 %v6613_v52 }
 0xb8a   :  { %7066 = vmatpush2.bf16.msra.mxu0 %v6649_v58  ;;  %v6578_v58 = vld [vmem:[#allocation6 + $0x2d8] sm:$0xff] }
 0xb8b   :  { %7107 = vmatpush2.bf16.msra.mxu1 %v6713_v3  ;;  %7117 = vmatprep.subr.bf16.mxu0 %v6774_v34  ;;  %v6610_v3 = vld [vmem:[#allocation6 + $0x3d8] sm:$0xff]  ;;  %v6801_v34 = vunpack.c.l.s8.bf16 %v6581_v39  ;;  %v6798_v42 = vunpack.c.h.s8.bf16 %v6578_v58 }
 0xb8c   :  { %7158 = vmatprep.subr.bf16.mxu1 %v6838_v35  ;;  %v6865_v35 = vunpack.c.l.s8.bf16 %v6613_v52  ;;  %v6862_v18 = vunpack.c.h.s8.bf16 %v6610_v3  ;;  %v6858_v50 = vunpack.c.l.s8.bf16 %v6610_v3 }
 0xb8d   :  { %7068 = vmatmul.mubr.bf16.vlgmr.msra.gmra.mxu0 %v9346_v63  ;;  %v6829_v63 = vunpack.c.h.s8.bf16 %v6593_v4 }
 0xb8e   :  { %7109 = vmatmul.mubr.bf16.vlgmr.msra.gmra.mxu1 %v9388_v7  ;;  %7118 = vmatpush1.bf16.msra.mxu0 %v6773_v25  ;;  %v6762_v7 = vunpack.c.l.s8.bf16 %v6562_v57  ;;  %v6577_v25 = vld [vmem:[#allocation6 + $0x2d0] sm:$0xff]  ;;  %v6794_v57 = vunpack.c.l.s8.bf16 %v6578_v58 }
 0xb8f   :  { %7159 = vmatpush1.bf16.msra.mxu1 %v6837_v21  ;;  %7119 = vmatprep.subr.bf16.mxu0 %v6770_v16  ;;  %v6609_v21 = vld [vmem:[#allocation6 + $0x3d0] sm:$0xff]  ;;  %v6797_v16 = vunpack.c.h.s8.bf16 %v6577_v25 }
 0xb90   :  { %7160 = vmatprep.subr.bf16.mxu1 %v6834_v37  ;;  %7149 = vmatprep.mubr.bf16.mxu0 %v9440_v51  ;;  %v6822_v51 = vunpack.c.h.s8.bf16 %v6590_v19  ;;  %v6861_v37 = vunpack.c.h.s8.bf16 %v6609_v21 }
 0xb91   :  { %7190 = vmatprep.mubr.bf16.mxu1 %v9454_v43  ;;  %v6589_v43 = vld [vmem:[#allocation6 + $0x330] sm:$0xff] }
 0xb92   :  { %7120 = vmatpush1.bf16.msra.mxu0 %v6769_v33  ;;  %v6821_v38 = vunpack.c.h.s8.bf16 %v6589_v43  ;;  %v6817_v40 = vunpack.c.l.s8.bf16 %v6589_v43  ;;  %v6574_v33 = vld [vmem:[#allocation6 + $0x2b8] sm:$0xff] }
 0xb93   :  { %7161 = vmatpush1.bf16.msra.mxu1 %v6833_v30  ;;  %7121 = vmatprep.subr.bf16.mxu0 %v6766_v14  ;;  %v6606_v30 = vld [vmem:[#allocation6 + $0x3b8] sm:$0xff]  ;;  %v6793_v14 = vunpack.c.l.s8.bf16 %v6577_v25  ;;  %v6790_v29 = vunpack.c.h.s8.bf16 %v6574_v33  ;;  %v6786_v12 = vunpack.c.l.s8.bf16 %v6574_v33 }
 0xb94   :  { %7162 = vmatprep.subr.bf16.mxu1 %v6830_v48  ;;  %v6857_v48 = vunpack.c.l.s8.bf16 %v6609_v21  ;;  %v6854_v4 = vunpack.c.h.s8.bf16 %v6606_v30  ;;  %v6850_v19 = vunpack.c.l.s8.bf16 %v6606_v30 }
 0xb96   :  { %7122 = vmatpush1.bf16.msra.mxu0 %v6765_v62  ;;  %v6573_v62 = vld [vmem:[#allocation6 + $0x2b0] sm:$0xff] }
 0xb97   :  { %7163 = vmatpush1.bf16.msra.mxu1 %v6829_v63  ;;  %7123 = vmatprep.subr.bf16.mxu0 %v6762_v7  ;;  %v6605_v63 = vld [vmem:[#allocation6 + $0x3b0] sm:$0xff]  ;;  %v6789_v7 = vunpack.c.h.s8.bf16 %v6573_v62 }
 0xb98   :  { %7164 = vmatprep.subr.bf16.mxu1 %v6826_v10  ;;  %v6853_v10 = vunpack.c.h.s8.bf16 %v6605_v63 }
 0xb9a   :  { %7124 = vmatpush1.bf16.msra.mxu0 %v6761_v45  ;;  %v6570_v45 = vld [vmem:[#allocation6 + $0x298] sm:$0xff] }
 0xb9b   :  { %7165 = vmatpush1.bf16.msra.mxu1 %v6825_v23  ;;  %7125 = vmatprep.subr.bf16.mxu0 %v6758_v13  ;;  %v6602_v23 = vld [vmem:[#allocation6 + $0x398] sm:$0xff]  ;;  %v6785_v13 = vunpack.c.l.s8.bf16 %v6573_v62  ;;  %v6782_v56 = vunpack.c.h.s8.bf16 %v6570_v45  ;;  %v6778_v8 = vunpack.c.l.s8.bf16 %v6570_v45 }
 0xb9c   :  { %7166 = vmatprep.subr.bf16.mxu1 %v6822_v51  ;;  %v6849_v51 = vunpack.c.l.s8.bf16 %v6605_v63  ;;  %v6846_v43 = vunpack.c.h.s8.bf16 %v6602_v23  ;;  %v6842_v20 = vunpack.c.l.s8.bf16 %v6602_v23 }
 0xb9e   :  { %7126 = vmatpush1.bf16.msra.mxu0 %v6757_v6  ;;  %v6569_v6 = vld [vmem:[#allocation6 + $0x290] sm:$0xff] }
 0xb9f   :  { %7167 = vmatpush1.bf16.msra.mxu1 %v6821_v38  ;;  %7127 = vmatprep.subr.bf16.mxu0 %v6754_v2  ;;  %v6601_v38 = vld [vmem:[#allocation6 + $0x390] sm:$0xff]  ;;  %v6781_v2 = vunpack.c.h.s8.bf16 %v6569_v6 }
 0xba0   :  { %7168 = vmatprep.subr.bf16.mxu1 %v6818_v5  ;;  %v6845_v5 = vunpack.c.h.s8.bf16 %v6601_v38 }
 0xba2   :  { %7128 = vmatpush1.bf16.msra.mxu0 %v6753_v26  ;;  %v6777_v26 = vunpack.c.l.s8.bf16 %v6569_v6 }
 0xba3   :  { %7169 = vmatpush1.bf16.msra.mxu1 %v6817_v40  ;;  %7129 = vmatprep.subr.bf16.mxu0 %v6750_v0  ;;  %v6841_v40 = vunpack.c.l.s8.bf16 %v6601_v38 }
 0xba4   :  { %7170 = vmatprep.subr.bf16.mxu1 %v6814_v53 }
 0xba6   :  { %7130 = vmatpush1.bf16.msra.mxu0 %v6749_v36 }
 0xba7   :  { %7171 = vmatpush1.bf16.msra.mxu1 %v6813_v15  ;;  %7131 = vmatprep.subr.bf16.mxu0 %v6746_v46 }
 0xba8   :  { %7172 = vmatprep.subr.bf16.mxu1 %v6810_v32 }
 0xbaa   :  { %7132 = vmatpush1.bf16.msra.mxu0 %v6745_v49  ;;  %v7199_v49 = vld [vmem:[#allocation25] sm:$0xf] }
 0xbab   :  { %7173 = vmatpush1.bf16.msra.mxu1 %v6809_v44  ;;  %7133 = vmatprep.subr.bf16.mxu0 %v6806_v17  ;;  %v7204_v52 = vrot.slane %v7199_v49, %v8755_v54 }
 0xbac   :  { %7174 = vmatprep.subr.bf16.mxu1 %v6870_v31  ;;  %v7225_v31 = vld [vmem:[#allocation27] sm:$0xf] }
 0xbad   :  { %v7238_v38 = vrot.slane %v7225_v31, %v8758_v55 }
 0xbae   :  { %7134 = vmatpush2.bf16.msra.mxu0 %v6805_v11 }
 0xbaf   :  { %7175 = vmatpush2.bf16.msra.mxu1 %v6869_v47  ;;  %7135 = vmatprep.subr.bf16.mxu0 %v6802_v24 }
 0xbb0   :  { %7176 = vmatprep.subr.bf16.mxu1 %v6866_v41  ;;  %v7208_v41 = vrot.slane %v7199_v49, %v8761_v59 }
 0xbb2   :  { %7136 = vmatpush2.bf16.msra.mxu0 %v6801_v34 }
 0xbb3   :  { %7177 = vmatpush2.bf16.msra.mxu1 %v6865_v35  ;;  %7137 = vmatprep.subr.bf16.mxu0 %v6798_v42  ;;  %v7234_v42 = vrot.slane %v7225_v31, %v8761_v59 }
 0xbb4   :  { %7178 = vmatprep.subr.bf16.mxu1 %v6862_v18 }
 0xbb6   :  { %7138 = vmatpush2.bf16.msra.mxu0 %v6797_v16 }
 0xbb7   :  { %7179 = vmatpush2.bf16.msra.mxu1 %v6861_v37  ;;  %7139 = vmatprep.subr.bf16.mxu0 %v6794_v57 }
 0xbb8   :  { %7180 = vmatprep.subr.bf16.mxu1 %v6858_v50 }
 0xbba   :  { %7140 = vmatpush2.bf16.msra.mxu0 %v6793_v14 }
 0xbbb   :  { %7181 = vmatpush2.bf16.msra.mxu1 %v6857_v48  ;;  %7141 = vmatprep.subr.bf16.mxu0 %v6790_v29 }
 0xbbc   :  { %7182 = vmatprep.subr.bf16.mxu1 %v6854_v4 }
 0xbbe   :  { %7142 = vmatpush2.bf16.msra.mxu0 %v6789_v7 }
 0xbbf   :  { %7183 = vmatpush2.bf16.msra.mxu1 %v6853_v10  ;;  %7143 = vmatprep.subr.bf16.mxu0 %v6786_v12 }
 0xbc0   :  { %7184 = vmatprep.subr.bf16.mxu1 %v6850_v19 }
 0xbc2   :  { %7144 = vmatpush2.bf16.msra.mxu0 %v6785_v13 }
 0xbc3   :  { %7185 = vmatpush2.bf16.msra.mxu1 %v6849_v51  ;;  %7145 = vmatprep.subr.bf16.mxu0 %v6782_v56  ;;  %v7212_v51 = vrot.slane %v7199_v49, %v8758_v55 }
 0xbc4   :  { %7186 = vmatprep.subr.bf16.mxu1 %v6846_v43 }
 0xbc6   :  { %7146 = vmatpush2.bf16.msra.mxu0 %v6781_v2 }
 0xbc7   :  { %7187 = vmatpush2.bf16.msra.mxu1 %v6845_v5  ;;  %7147 = vmatprep.subr.bf16.mxu0 %v6778_v8  ;;  %v7216_v5 = vrot.slane %v7199_v49, %v8764_v60 }
 0xbc8   :  { %7188 = vmatprep.subr.bf16.mxu1 %v6842_v20 }
 0xbca   :  { %7148 = vmatpush2.bf16.msra.mxu0 %v6777_v26 }
 0xbcb   :  { %7189 = vmatpush2.bf16.msra.mxu1 %v6841_v40 }
 0xbcd   :  { %v6905_v0 = vpop.f32.mrf.mxu0  ;;  %7150 = vmatmul.mubr.bf16.vlgmr.msra.gmra.mxu0 %v9438_v1 }
 0xbce   :  { %v6946_v53 = vpop.f32.mrf.mxu1  ;;  %7191 = vmatmul.mubr.bf16.vlgmr.msra.gmra.mxu1 %v9452_v28  ;;  %v7230_v28 = vrot.slane %v7225_v31, %v8755_v54 }
 0xbcf   :  { %v6947_v9 = vadd.f32 %v6946_v53, %v6905_v0  ;;  %v6907_v27 = vpop.f32.mrf.mxu0  ;;  %v7242_v0 = vrot.slane %v7225_v31, %v8764_v60 }
 0xbd0   :  { %v6948_v36 = vpop.f32.mrf.mxu1 }
 0xbd1   :  { %v6949_v15 = vadd.f32 %v6948_v36, %v6907_v27  ;;  %v6909_v46 = vpop.f32.mrf.mxu0 }
 0xbd2   :  { %v6950_v32 = vpop.f32.mrf.mxu1 }
 0xbd3   :  { %v6910_v22 = vpop.f32.mrf.mxu0 }
 0xbd4   :  { %v6951_v61 = vpop.f32.mrf.mxu1 }
 0xc0d   :  { %v6987_v44 = vpop.f32.mrf.mxu0 }
 0xc0e   :  { %v7028_v17 = vpop.f32.mrf.mxu1  ;;  %v6988_v39 = vadd.f32 %v6987_v44, %v6947_v9 }
 0xc0f   :  { %v6989_v11 = vpop.f32.mrf.mxu0 }
 0xc10   :  { %v7030_v47 = vpop.f32.mrf.mxu1  ;;  %v7029_v1 = vadd.f32 %v7028_v17, %v6988_v39  ;;  %v6990_v24 = vadd.f32 %v6989_v11, %v6949_v15 }
 0xc11   :  { %v6991_v58 = vpop.f32.mrf.mxu0 }
 0xc12   :  { %v7032_v3 = vpop.f32.mrf.mxu1  ;;  %v7221_v34 = vmul.f32 %v7204_v52, %v7029_v1  ;;  %v7031_v35 = vadd.f32 %v7030_v47, %v6990_v24 }
 0xc13   :  { %v6992_v18 = vpop.f32.mrf.mxu0 }
 0xc14   :  { %v7033_v25 = vpop.f32.mrf.mxu1  ;;  %v7247_v21 = vadd.f32 %v7230_v28, %v7221_v34  ;;  %v7222_v16 = vmul.f32 %v7208_v41, %v7031_v35 }
 0xc16   :  { %v7251_v37 = vmax.f32 %v7247_v21, 0.0  ;;  %v7248_v57 = vadd.f32 %v7234_v42, %v7222_v16 }
 0xc18   :  { %v9476_v50 = vpack.c.bf16 %v7251_v37, %v7251_v37  ;;  %v7252_v33 = vmax.f32 %v7248_v57, 0.0 }
 0xc1a   :  { %v7256_v30 = vpack.c.bf16 %v7252_v33, %v7252_v33 }
 0xc4d   :  { %v7069_v14 = vpop.f32.mrf.mxu0 }
 0xc4e   :  { %v7110_v48 = vpop.f32.mrf.mxu1 }
 0xc4f   :  { %v7111_v29 = vadd.f32 %v7110_v48, %v7069_v14  ;;  %v7071_v4 = vpop.f32.mrf.mxu0 }
 0xc50   :  { %v7112_v62 = vpop.f32.mrf.mxu1 }
 0xc51   :  { %v7073_v63 = vpop.f32.mrf.mxu0  ;;  %v7113_v23 = vadd.f32 %v7112_v62, %v7071_v4 }
 0xc52   :  { %v7114_v7 = vpop.f32.mrf.mxu1 }
 0xc53   :  { %v7074_v10 = vpop.f32.mrf.mxu0 }
 0xc54   :  { %v7115_v12 = vpop.f32.mrf.mxu1 }
 0xc8d   :  { %v7151_v19 = vpop.f32.mrf.mxu0 }
 0xc8e   :  { %v7192_v45 = vpop.f32.mrf.mxu1  ;;  %v7152_v13 = vadd.f32 %v7151_v19, %v7111_v29 }
 0xc8f   :  { %v7153_v56 = vpop.f32.mrf.mxu0 }
 0xc90   :  { %v7194_v43 = vpop.f32.mrf.mxu1  ;;  %v7193_v6 = vadd.f32 %v7192_v45, %v7152_v13  ;;  %v7154_v2 = vadd.f32 %v7153_v56, %v7113_v23 }
 0xc91   :  { %v7155_v8 = vpop.f32.mrf.mxu0 }
 0xc92   :  { %v7196_v20 = vpop.f32.mrf.mxu1  ;;  %v7223_v26 = vmul.f32 %v7212_v51, %v7193_v6  ;;  %v7195_v40 = vadd.f32 %v7194_v43, %v7154_v2 }
 0xc93   :  { %v7156_v53 = vpop.f32.mrf.mxu0 }
 0xc94   :  { %v7197_v9 = vpop.f32.mrf.mxu1  ;;  %v7249_v27 = vadd.f32 %v7238_v38, %v7223_v26  ;;  %v7224_v36 = vmul.f32 %v7216_v5, %v7195_v40 }
 0xc96   :  { %v7253_v15 = vmax.f32 %v7249_v27, 0.0  ;;  %v7250_v46 = vadd.f32 %v7242_v0, %v7224_v36 }
 0xc98   :  { %v9482_v32 = vpack.c.bf16 %v7253_v15, %v7253_v15  ;;  %v7254_v22 = vmax.f32 %v7250_v46, 0.0 }
 0xc9a   :  { %v7258_v61 = vpack.c.bf16 %v7254_v22, %v7254_v22 }
 0xc9b   :  { %8431 = dma.done.wait [#allocation10 + $0x5], 4096 }
 0xc9c   :  { %8432 = vsyncadd [#allocation10 + $0x5], 4294963200  ;;  %7395 = vmatprep.mubr.bf16.mxu0 %v7256_v30  ;;  %7436 = vmatprep.mubr.bf16.mxu1 %v7258_v61  ;;  %v7274_v55 = vld [vmem:[#allocation7 + $0x38] sm:$0xff]  ;;  %v7273_v44 = vld [vmem:[#allocation7 + $0x30] sm:$0xff] }
 0xc9d   :  { %v7290_v49 = vld [vmem:[#allocation7 + $0xb8] sm:$0xff]  ;;  %v7312_v17 = vunpack.c.l.s8.bf16 %v7274_v55  ;;  %v7314_v39 = vunpack.c.h.s8.bf16 %v7274_v55  ;;  %v7289_v52 = vld [vmem:[#allocation7 + $0xb0] sm:$0xff]  ;;  %v7313_v11 = vunpack.c.h.s8.bf16 %v7273_v44  ;;  %v7272_v1 = vld [vmem:[#allocation7 + $0x28] sm:$0xff]  ;;  %v7311_v24 = vunpack.c.l.s8.bf16 %v7273_v44 }
 0xc9e   :  { %v7344_v60 = vunpack.c.l.s8.bf16 %v7290_v49  ;;  %v7346_v31 = vunpack.c.h.s8.bf16 %v7290_v49  ;;  %v7345_v47 = vunpack.c.h.s8.bf16 %v7289_v52  ;;  %v7288_v28 = vld [vmem:[#allocation7 + $0xa8] sm:$0xff]  ;;  %v7343_v41 = vunpack.c.l.s8.bf16 %v7289_v52  ;;  %v7271_v34 = vld [vmem:[#allocation7 + $0x20] sm:$0xff]  ;;  %v7270_v16 = vld [vmem:[#allocation7 + $0x18] sm:$0xff] }
 0xc9f   :  { %7363 = vmatprep.subr.bf16.mxu0 %v7314_v39  ;;  %v7310_v58 = vunpack.c.h.s8.bf16 %v7272_v1  ;;  %v7342_v3 = vunpack.c.h.s8.bf16 %v7288_v28  ;;  %v7287_v35 = vld [vmem:[#allocation7 + $0xa0] sm:$0xff]  ;;  %v7309_v42 = vunpack.c.h.s8.bf16 %v7271_v34  ;;  %v7308_v25 = vunpack.c.l.s8.bf16 %v7272_v1  ;;  %v7286_v37 = vld [vmem:[#allocation7 + $0x98] sm:$0xff]  ;;  %v7269_v48 = vld [vmem:[#allocation7 + $0x10] sm:$0xff] }
 0xca0   :  { %7404 = vmatprep.subr.bf16.mxu1 %v7346_v31  ;;  %7364 = vmatpush1.bf16.msra.mxu0 %v7313_v11  ;;  %v7341_v18 = vunpack.c.h.s8.bf16 %v7287_v35  ;;  %v7340_v21 = vunpack.c.l.s8.bf16 %v7288_v28  ;;  %v7307_v57 = vunpack.c.l.s8.bf16 %v7271_v34  ;;  %v7339_v33 = vunpack.c.l.s8.bf16 %v7287_v35  ;;  %v7285_v29 = vld [vmem:[#allocation7 + $0x90] sm:$0xff]  ;;  %v7268_v10 = vld [vmem:[#allocation7 + $0x8] sm:$0xff]  ;;  %v7267_v51 = vld [vmem:[#allocation7] sm:$0xff] }
 0xca1   :  { %7405 = vmatpush1.bf16.msra.mxu1 %v7345_v47  ;;  %7365 = vmatprep.subr.bf16.mxu0 %v7312_v17  ;;  %v7306_v30 = vunpack.c.h.s8.bf16 %v7270_v16  ;;  %v7338_v14 = vunpack.c.h.s8.bf16 %v7286_v37  ;;  %v7305_v4 = vunpack.c.h.s8.bf16 %v7269_v48  ;;  %v7337_v62 = vunpack.c.h.s8.bf16 %v7285_v29  ;;  %v7284_v12 = vld [vmem:[#allocation7 + $0x88] sm:$0xff]  ;;  %v7283_v56 = vld [vmem:[#allocation7 + $0x80] sm:$0xff]  ;;  %v7282_v5 = vld [vmem:[#allocation7 + $0x78] sm:$0xff] }
 0xca2   :  { %7406 = vmatprep.subr.bf16.mxu1 %v7344_v60  ;;  %v7304_v63 = vunpack.c.l.s8.bf16 %v7270_v16  ;;  %v7336_v7 = vunpack.c.l.s8.bf16 %v7286_v37  ;;  %v7303_v19 = vunpack.c.l.s8.bf16 %v7269_v48  ;;  %v7335_v45 = vunpack.c.l.s8.bf16 %v7285_v29  ;;  %v7298_v8 = vld [vmem:[#allocation7 + $0xf8] sm:$0xff]  ;;  %v7281_v53 = vld [vmem:[#allocation7 + $0x70] sm:$0xff]  ;;  %v7280_v22 = vld [vmem:[#allocation7 + $0x68] sm:$0xff] }
 0xca3   :  { %v7302_v23 = vunpack.c.h.s8.bf16 %v7268_v10  ;;  %v7334_v13 = vunpack.c.h.s8.bf16 %v7284_v12  ;;  %v7301_v43 = vunpack.c.h.s8.bf16 %v7267_v51  ;;  %v7333_v6 = vunpack.c.h.s8.bf16 %v7283_v56  ;;  %v7297_v9 = vld [vmem:[#allocation7 + $0xf0] sm:$0xff]  ;;  %v7296_v61 = vld [vmem:[#allocation7 + $0xe8] sm:$0xff]  ;;  %v7279_v39 = vld [vmem:[#allocation7 + $0x60] sm:$0xff] }
 0xca4   :  { %7366 = vmatpush1.bf16.msra.mxu0 %v7311_v24  ;;  %v7300_v38 = vunpack.c.l.s8.bf16 %v7268_v10  ;;  %v7332_v2 = vunpack.c.l.s8.bf16 %v7284_v12  ;;  %v7299_v20 = vunpack.c.l.s8.bf16 %v7267_v51  ;;  %v7331_v26 = vunpack.c.l.s8.bf16 %v7283_v56  ;;  %v7295_v60 = vld [vmem:[#allocation7 + $0xe0] sm:$0xff]  ;;  %v7278_v1 = vld [vmem:[#allocation7 + $0x58] sm:$0xff]  ;;  %v7277_v34 = vld [vmem:[#allocation7 + $0x50] sm:$0xff] }
 0xca5   :  { %7407 = vmatpush1.bf16.msra.mxu1 %v7343_v41  ;;  %7367 = vmatprep.subr.bf16.mxu0 %v7310_v58  ;;  %v7330_v40 = vunpack.c.h.s8.bf16 %v7282_v5  ;;  %v7362_v0 = vunpack.c.h.s8.bf16 %v7298_v8  ;;  %v7329_v27 = vunpack.c.h.s8.bf16 %v7281_v53  ;;  %v7361_v36 = vunpack.c.h.s8.bf16 %v7297_v9  ;;  %v7294_v28 = vld [vmem:[#allocation7 + $0xd8] sm:$0xff]  ;;  %v7293_v35 = vld [vmem:[#allocation7 + $0xd0] sm:$0xff]  ;;  %v7276_v16 = vld [vmem:[#allocation7 + $0x48] sm:$0xff] }
 0xca6   :  { %7408 = vmatprep.subr.bf16.mxu1 %v7342_v3  ;;  %v7328_v15 = vunpack.c.l.s8.bf16 %v7282_v5  ;;  %v7360_v46 = vunpack.c.l.s8.bf16 %v7298_v8  ;;  %v7327_v55 = vunpack.c.l.s8.bf16 %v7281_v53  ;;  %v7359_v49 = vunpack.c.l.s8.bf16 %v7297_v9  ;;  %v7292_v37 = vld [vmem:[#allocation7 + $0xc8] sm:$0xff]  ;;  %v7275_v48 = vld [vmem:[#allocation7 + $0x40] sm:$0xff] }
 0xca7   :  { %v7326_v44 = vunpack.c.h.s8.bf16 %v7280_v22  ;;  %v7358_v17 = vunpack.c.h.s8.bf16 %v7296_v61  ;;  %v7325_v31 = vunpack.c.h.s8.bf16 %v7279_v39  ;;  %v7357_v52 = vunpack.c.h.s8.bf16 %v7295_v60  ;;  %v7291_v29 = vld [vmem:[#allocation7 + $0xc0] sm:$0xff] }
 0xca8   :  { %7368 = vmatpush1.bf16.msra.mxu0 %v7309_v42  ;;  %v7324_v11 = vunpack.c.l.s8.bf16 %v7280_v22  ;;  %v7356_v47 = vunpack.c.l.s8.bf16 %v7296_v61  ;;  %v7323_v24 = vunpack.c.l.s8.bf16 %v7279_v39  ;;  %v7355_v41 = vunpack.c.l.s8.bf16 %v7295_v60 }
 0xca9   :  { %7409 = vmatpush1.bf16.msra.mxu1 %v7341_v18  ;;  %7369 = vmatprep.subr.bf16.mxu0 %v7308_v25  ;;  %v7322_v58 = vunpack.c.h.s8.bf16 %v7278_v1  ;;  %v7354_v3 = vunpack.c.h.s8.bf16 %v7294_v28  ;;  %v7321_v42 = vunpack.c.h.s8.bf16 %v7277_v34  ;;  %v7353_v18 = vunpack.c.h.s8.bf16 %v7293_v35 }
 0xcaa   :  { %7410 = vmatprep.subr.bf16.mxu1 %v7340_v21  ;;  %v7320_v25 = vunpack.c.l.s8.bf16 %v7278_v1  ;;  %v7352_v21 = vunpack.c.l.s8.bf16 %v7294_v28  ;;  %v7315_v10 = vunpack.c.l.s8.bf16 %v7275_v48  ;;  %v7347_v12 = vunpack.c.l.s8.bf16 %v7291_v29 }
 0xcac   :  { %7370 = vmatpush1.bf16.msra.mxu0 %v7307_v57  ;;  %v7319_v57 = vunpack.c.l.s8.bf16 %v7277_v34 }
 0xcad   :  { %7411 = vmatpush1.bf16.msra.mxu1 %v7339_v33  ;;  %7371 = vmatprep.subr.bf16.mxu0 %v7306_v30  ;;  %v7351_v33 = vunpack.c.l.s8.bf16 %v7293_v35  ;;  %v7318_v30 = vunpack.c.h.s8.bf16 %v7276_v16 }
 0xcae   :  { %7412 = vmatprep.subr.bf16.mxu1 %v7338_v14  ;;  %v7350_v14 = vunpack.c.h.s8.bf16 %v7292_v37 }
 0xcb0   :  { %7372 = vmatpush1.bf16.msra.mxu0 %v7305_v4  ;;  %v7317_v4 = vunpack.c.h.s8.bf16 %v7275_v48 }
 0xcb1   :  { %7413 = vmatpush1.bf16.msra.mxu1 %v7337_v62  ;;  %7373 = vmatprep.subr.bf16.mxu0 %v7304_v63  ;;  %v7349_v62 = vunpack.c.h.s8.bf16 %v7291_v29  ;;  %v7316_v63 = vunpack.c.l.s8.bf16 %v7276_v16 }
 0xcb2   :  { %7414 = vmatprep.subr.bf16.mxu1 %v7336_v7  ;;  %v7348_v7 = vunpack.c.l.s8.bf16 %v7292_v37 }
 0xcb4   :  { %7374 = vmatpush1.bf16.msra.mxu0 %v7303_v19  ;;  %v7445_v19 = vld [vmem:[#allocation28] sm:$0x3] }
 0xcb5   :  { %7415 = vmatpush1.bf16.msra.mxu1 %v7335_v45  ;;  %7375 = vmatprep.subr.bf16.mxu0 %v7302_v23  ;;  %v7459_v45 = vld [vmem:[#allocation30] sm:$0x3]  ;;  %v7450_v23 = vrot.slane %v7445_v19, %v8755_v54 }
 0xcb6   :  { %7416 = vmatprep.subr.bf16.mxu1 %v7334_v13 }
 0xcb8   :  { %7376 = vmatpush1.bf16.msra.mxu0 %v7301_v43  ;;  %v7464_v43 = vrot.slane %v7459_v45, %v8755_v54 }
 0xcb9   :  { %7417 = vmatpush1.bf16.msra.mxu1 %v7333_v6  ;;  %7377 = vmatprep.subr.bf16.mxu0 %v7300_v38  ;;  %v7454_v6 = vrot.slane %v7445_v19, %v8761_v59 }
 0xcba   :  { %7418 = vmatprep.subr.bf16.mxu1 %v7332_v2 }
 0xcbc   :  { %7378 = vmatpush1.bf16.msra.mxu0 %v7299_v20  ;;  %v7468_v20 = vrot.slane %v7459_v45, %v8761_v59 }
 0xcbd   :  { %7419 = vmatpush1.bf16.msra.mxu1 %v7331_v26  ;;  %7379 = vmatprep.subr.bf16.mxu0 %v7330_v40 }
 0xcbe   :  { %7420 = vmatprep.subr.bf16.mxu1 %v7362_v0 }
 0xcc0   :  { %7380 = vmatpush2.bf16.msra.mxu0 %v7329_v27 }
 0xcc1   :  { %7421 = vmatpush2.bf16.msra.mxu1 %v7361_v36  ;;  %7381 = vmatprep.subr.bf16.mxu0 %v7328_v15 }
 0xcc2   :  { %7422 = vmatprep.subr.bf16.mxu1 %v7360_v46 }
 0xcc4   :  { %7382 = vmatpush2.bf16.msra.mxu0 %v7327_v55 }
 0xcc5   :  { %7423 = vmatpush2.bf16.msra.mxu1 %v7359_v49  ;;  %7383 = vmatprep.subr.bf16.mxu0 %v7326_v44 }
 0xcc6   :  { %7424 = vmatprep.subr.bf16.mxu1 %v7358_v17 }
 0xcc8   :  { %7384 = vmatpush2.bf16.msra.mxu0 %v7325_v31 }
 0xcc9   :  { %7425 = vmatpush2.bf16.msra.mxu1 %v7357_v52  ;;  %7385 = vmatprep.subr.bf16.mxu0 %v7324_v11 }
 0xcca   :  { %7426 = vmatprep.subr.bf16.mxu1 %v7356_v47 }
 0xccc   :  { %7386 = vmatpush2.bf16.msra.mxu0 %v7323_v24 }
 0xccd   :  { %7427 = vmatpush2.bf16.msra.mxu1 %v7355_v41  ;;  %7387 = vmatprep.subr.bf16.mxu0 %v7322_v58 }
 0xcce   :  { %7428 = vmatprep.subr.bf16.mxu1 %v7354_v3 }
 0xcd0   :  { %7388 = vmatpush2.bf16.msra.mxu0 %v7321_v42 }
 0xcd1   :  { %7429 = vmatpush2.bf16.msra.mxu1 %v7353_v18  ;;  %7389 = vmatprep.subr.bf16.mxu0 %v7320_v25 }
 0xcd2   :  { %7430 = vmatprep.subr.bf16.mxu1 %v7352_v21 }
 0xcd4   :  { %7390 = vmatpush2.bf16.msra.mxu0 %v7319_v57 }
 0xcd5   :  { %7431 = vmatpush2.bf16.msra.mxu1 %v7351_v33  ;;  %7391 = vmatprep.subr.bf16.mxu0 %v7318_v30 }
 0xcd6   :  { %7432 = vmatprep.subr.bf16.mxu1 %v7350_v14 }
 0xcd8   :  { %7392 = vmatpush2.bf16.msra.mxu0 %v7317_v4 }
 0xcd9   :  { %7433 = vmatpush2.bf16.msra.mxu1 %v7349_v62  ;;  %7393 = vmatprep.subr.bf16.mxu0 %v7316_v63 }
 0xcda   :  { %7434 = vmatprep.subr.bf16.mxu1 %v7348_v7 }
 0xcdc   :  { %7394 = vmatpush2.bf16.msra.mxu0 %v7315_v10 }
 0xcdd   :  { %7435 = vmatpush2.bf16.msra.mxu1 %v7347_v12 }
 0xcdf   :  { %7396 = vmatmul.mubr.bf16.vlgmr.msra.gmra.mxu0 %v9476_v50 }
 0xce0   :  { %7437 = vmatmul.mubr.bf16.vlgmr.msra.gmra.mxu1 %v9482_v32 }
 0xd9f   :  { %v7397_v13 = vpop.f32.mrf.mxu0 }
 0xda0   :  { %v7438_v51 = vpop.f32.mrf.mxu1 }
 0xda1   :  { %v7439_v56 = vadd.f32 %v7438_v51, %v7397_v13  ;;  %v7399_v38 = vpop.f32.mrf.mxu0 }
 0xda2   :  { %v7440_v2 = vpop.f32.mrf.mxu1 }
 0xda3   :  { %v7457_v5 = vmul.f32 %v7450_v23, %v7439_v56  ;;  %v7441_v8 = vadd.f32 %v7440_v2, %v7399_v38  ;;  %v7401_v50 = vpop.f32.mrf.mxu0 }
 0xda4   :  { %v7442_v26 = vpop.f32.mrf.mxu1 }
 0xda5   :  { %v7471_v32 = vadd.f32 %v7464_v43, %v7457_v5  ;;  %v7458_v40 = vmul.f32 %v7454_v6, %v7441_v8  ;;  %v7402_v0 = vpop.f32.mrf.mxu0 }
 0xda6   :  { %v7443_v53 = vpop.f32.mrf.mxu1 }
 0xda7   :  { %v7473_v9 = vmax.f32 %v7471_v32, 0.0  ;;  %v7472_v27 = vadd.f32 %v7468_v20, %v7458_v40 }
 0xda9   :  { %v7475_v36 = vpack.c.bf16 %v7473_v9, %v7473_v9  ;;  %v7474_v15 = vmax.f32 %v7472_v27, 0.0 }
 0xdab   :  { %v7476_v46 = vpack.c.bf16 %v7474_v15, %v7474_v15 }
 0xdac   :  { %8433 = dma.done.wait [#allocation10 + $0x6], 1024 }
 0xdad   :  { %8434 = vsyncadd [#allocation10 + $0x6], 4294966272  ;;  %7541 = vmatprep.mubr.bf16.mxu0 %v7476_v46  ;;  %v7492_v54 = vld [vmem:[#allocation8 + $0x38] sm:$0xff]  ;;  %v7491_v59 = vld [vmem:[#allocation8 + $0x30] sm:$0xff] }
 0xdae   :  { %v7488_v22 = vld [vmem:[#allocation8 + $0x18] sm:$0xff]  ;;  %v7507_v61 = vunpack.c.l.s8.bf16 %v7492_v54  ;;  %v7508_v55 = vunpack.c.h.s8.bf16 %v7492_v54  ;;  %v7506_v17 = vunpack.c.h.s8.bf16 %v7491_v59  ;;  %v7487_v39 = vld [vmem:[#allocation8 + $0x10] sm:$0xff]  ;;  %v7505_v31 = vunpack.c.l.s8.bf16 %v7491_v59  ;;  %v7490_v52 = vld [vmem:[#allocation8 + $0x28] sm:$0xff] }
 0xdaf   :  { %v7500_v49 = vunpack.c.h.s8.bf16 %v7488_v22  ;;  %v7499_v44 = vunpack.c.l.s8.bf16 %v7488_v22  ;;  %v7498_v60 = vunpack.c.h.s8.bf16 %v7487_v39  ;;  %v7497_v11 = vunpack.c.l.s8.bf16 %v7487_v39  ;;  %v7486_v1 = vld [vmem:[#allocation8 + $0x8] sm:$0xff]  ;;  %v7489_v41 = vld [vmem:[#allocation8 + $0x20] sm:$0xff] }
 0xdb0   :  { %7778 = vmatprep.subr.bf16.mxu0 %v7508_v55  ;;  %v7504_v47 = vunpack.c.h.s8.bf16 %v7490_v52  ;;  %v7496_v28 = vunpack.c.h.s8.bf16 %v7486_v1  ;;  %v7503_v24 = vunpack.c.l.s8.bf16 %v7490_v52  ;;  %v7495_v58 = vunpack.c.l.s8.bf16 %v7486_v1  ;;  %v7485_v34 = vld [vmem:[#allocation8] sm:$0xff] }
 0xdb1   :  { %7779 = vmatpush3.bf16.msra.mxu0 %v7500_v49  ;;  %v7502_v3 = vunpack.c.h.s8.bf16 %v7489_v41  ;;  %v7494_v35 = vunpack.c.h.s8.bf16 %v7485_v34  ;;  %v7501_v42 = vunpack.c.l.s8.bf16 %v7489_v41  ;;  %v7493_v18 = vunpack.c.l.s8.bf16 %v7485_v34  ;;  %v7755_v16 = vld [vmem:[#allocation31] ss:$0 sm:$0xff]  ;;  %v7756_v57 = vld [vmem:[#allocation33] ss:$0 sm:$0xff] }
 0xdb2   :  { %7780 = vmatprep.subr.bf16.mxu0 %v7507_v61 }
 0xdb5   :  { %7781 = vmatpush3.bf16.msra.mxu0 %v7499_v44 }
 0xdb6   :  { %7782 = vmatprep.subr.bf16.mxu0 %v7506_v17 }
 0xdb9   :  { %7783 = vmatpush3.bf16.msra.mxu0 %v7498_v60 }
 0xdba   :  { %7784 = vmatprep.subr.bf16.mxu0 %v7505_v31 }
 0xdbd   :  { %7785 = vmatpush3.bf16.msra.mxu0 %v7497_v11 }
 0xdbe   :  { %7786 = vmatprep.subr.bf16.mxu0 %v7504_v47 }
 0xdc1   :  { %7787 = vmatpush3.bf16.msra.mxu0 %v7496_v28 }
 0xdc2   :  { %7788 = vmatprep.subr.bf16.mxu0 %v7503_v24 }
 0xdc5   :  { %7789 = vmatpush3.bf16.msra.mxu0 %v7495_v58 }
 0xdc6   :  { %7790 = vmatprep.subr.bf16.mxu0 %v7502_v3 }
 0xdc9   :  { %7791 = vmatpush3.bf16.msra.mxu0 %v7494_v35 }
 0xdca   :  { %7792 = vmatprep.subr.bf16.mxu0 %v7501_v42 }
 0xdcd   :  { %7793 = vmatpush3.bf16.msra.mxu0 %v7493_v18 }
 0xdd0   :  { %7542 = vmatmul.mubr.bf16.vlgmr.msra.gmra.mxu0 %v7475_v36 }
 0xe90   :  { %v7794_v25 = vpop.f32.mrf.mxu0 }
 0xe92   :  { %v7795_v21 = vpop.f32.mrf.mxu0 }
 0xe93   :  { %v7796_v37 = vadd.f32 %v7795_v21, %v7794_v25 }
 0xe94   :  { %v7797_v33 = vpop.f32.mrf.mxu0 }
 0xe95   :  { %v7556_v30 = vmul.f32 %v7796_v37, %v7755_v16 }
 0xe96   :  { %v7798_v14 = vpop.f32.mrf.mxu0 }
 0xe97   :  { %v7564_v48 = vadd.f32 %v7756_v57, %v7556_v30 }
 0xe99   :  { %v7565_v29 = vmax.f32 %v7564_v48, 0.0 }
 0xe9b   :  { %v7566_v4 = vpack.c.bf16 %v7565_v29, %v7565_v29 }
 0xe9c   :  { %8435 = dma.done.wait [#allocation10 + $0x7], 512 }
 0xe9d   :  { %8436 = vsyncadd [#allocation10 + $0x7], 4294966784  ;;  %v9626_v62 = vmov 0.0   ;;  %v7578_v63 = vld [vmem:[#allocation9 + $0x18] sm:$0xff]  ;;  %v7577_v12 = vld [vmem:[#allocation9 + $0x10] sm:$0xff]  ;;  %s9627_s4 = sld [smem:[#allocation84_spill]] }
 0xe9e   :  { %7835 = vmatprep.subr.bf16.mxu1 %v9626_v62  ;;  %7851 = vmatprep.mubr.msk.bf16.mxu1 %vm8459_vm0, %v9626_v62  ;;  %v7586_v7 = vunpack.c.h.s8.bf16 %v7578_v63  ;;  %v7585_v10 = vunpack.c.l.s8.bf16 %v7578_v63  ;;  %v7584_v19 = vunpack.c.h.s8.bf16 %v7577_v12  ;;  %v7583_v45 = vunpack.c.l.s8.bf16 %v7577_v12  ;;  %v7576_v23 = vld [vmem:[#allocation9 + $0x8] sm:$0xff]  ;;  %v7575_v56 = vld [vmem:[#allocation9] sm:$0xff] }
 0xe9f   :  { %v7582_v13 = vunpack.c.h.s8.bf16 %v7576_v23  ;;  %v7581_v51 = vunpack.c.l.s8.bf16 %v7576_v23  ;;  %v7580_v43 = vunpack.c.h.s8.bf16 %v7575_v56  ;;  %v7579_v6 = vunpack.c.l.s8.bf16 %v7575_v56  ;;  %v7757_v38 = vld [vmem:[#allocation34] ss:$0 sm:$0xff]  ;;  %v7758_v5 = vld [vmem:[#allocation36] ss:$0 sm:$0xff] }
 0xea0   :  { %7836 = vmatpush3.bf16.msra.mxu1 %v7586_v7 }
 0xea1   :  { %7837 = vmatprep.subr.bf16.mxu1 %v9626_v62 }
 0xea4   :  { %7838 = vmatpush3.bf16.msra.mxu1 %v7585_v10 }
 0xea5   :  { %7839 = vmatprep.subr.bf16.mxu1 %v9626_v62 }
 0xea8   :  { %7840 = vmatpush3.bf16.msra.mxu1 %v7584_v19 }
 0xea9   :  { %7841 = vmatprep.subr.bf16.mxu1 %v9626_v62 }
 0xeac   :  { %7842 = vmatpush3.bf16.msra.mxu1 %v7583_v45 }
 0xead   :  { %7843 = vmatprep.subr.bf16.mxu1 %v9626_v62 }
 0xeb0   :  { %7844 = vmatpush3.bf16.msra.mxu1 %v7582_v13 }
 0xeb1   :  { %7845 = vmatprep.subr.bf16.mxu1 %v9626_v62 }
 0xeb4   :  { %7846 = vmatpush3.bf16.msra.mxu1 %v7581_v51 }
 0xeb5   :  { %7847 = vmatprep.subr.bf16.mxu1 %v9626_v62 }
 0xeb8   :  { %7848 = vmatpush3.bf16.msra.mxu1 %v7580_v43 }
 0xeb9   :  { %7849 = vmatprep.subr.bf16.mxu1 %v9626_v62 }
 0xebc   :  { %7850 = vmatpush3.bf16.msra.mxu1 %v7579_v6 }
 0xebf   :  { %7852 = vmatmul.mubr.bf16.vlgmr.msra.gmra.mxu1 %v7566_v4 }
 0xf7f   :  { %v7621_v2 = vpop.f32.mrf.mxu1 }
 0xf80   :  { %v7634_v8 = vmul.f32 %v7757_v38, %v7621_v2 }
 0xf81   :  { %v7853_v20 = vpop.f32.mrf.mxu1 }
 0xf82   :  { %v7642_v50 = vadd.f32 %v7758_v5, %v7634_v8 }
 0xf83   :  { %v7624_v26 = vpop.f32.mrf.mxu1 }
 0xf84   :  { %v7759_v32 = vmul.f32 -1.442695, %v7642_v50 }
 0xf85   :  { %v7854_v40 = vpop.f32.mrf.mxu1 }
 0xf86   :  { %7899 = vpow2.f32 %v7759_v32 }
 0xf93   :  { %v7900_v0 = vpop.eup %7899 }
 0xf94   :  { %v7646_v53 = vadd.f32 1.0, %v7900_v0 }
 0xf96   :  { %7901 = vrcp.f32 %v7646_v53 }
 0xfa3   :  { %v7902_v9 = vpop.eup %7901 }
 0xfa4   :  { %7649 = vst [vmem:[%s9627_s4] sm:$0xff] %v7902_v9 }
 0xfa5   :  { %7654 = vsyncpa [#allocation12], 1 }
 0xfa6   :  { %7655 = vsyncpa [#allocation14], 1 }
 0xfa7   :  { %7656 = vsyncpa [#allocation17], 1 }
 0xfa8   :  { %7657 = vsyncpa [#allocation20], 1 }
 0xfa9   :  { %7658 = vsyncpa [#allocation23], 1 }
 0xfaa   :  { %7659 = vsyncpa [#allocation26], 1 }
 0xfab   :  { %7660 = vsyncpa [#allocation29], 1 }
 0xfac   :  { %7661 = vsyncpa [#allocation32], 1 }
 0xfad   :  { %7662 = vsyncpa [#allocation35], 1 }
 0xfae   :  { %7663 = vsyncmov [#allocation10] }
 0xfb1   :  { %s7664_s30 = vpop.sfrf %7663 }
 0xfb2   :  { %p7760_p13 = scmp.ne.s32.totalorder %s7664_s30, 0 }
 0xfb4   :  { %7668 = shalt.err (%p7760_p13)  }
 0xfb5   :  { %7670 = vsyncmov [#allocation10 + $0x1] }
 0xfb8   :  { %s7671_s17 = vpop.sfrf %7670 }
 0xfb9   :  { %p7761_p0 = scmp.ne.s32.totalorder %s7671_s17, 0 }
 0xfbb   :  { %7675 = shalt.err (%p7761_p0)  }
 0xfbc   :  { %7677 = vsyncmov [#allocation10 + $0x2] }
 0xfbf   :  { %s7678_s14 = vpop.sfrf %7677 }
 0xfc0   :  { %p7762_p1 = scmp.ne.s32.totalorder %s7678_s14, 0 }
 0xfc2   :  { %7682 = shalt.err (%p7762_p1)  }
 0xfc3   :  { %7684 = vsyncmov [#allocation10 + $0x3] }
 0xfc6   :  { %s7685_s19 = vpop.sfrf %7684 }
 0xfc7   :  { %p7763_p2 = scmp.ne.s32.totalorder %s7685_s19, 0 }
 0xfc9   :  { %7689 = shalt.err (%p7763_p2)  }
 0xfca   :  { %7691 = vsyncmov [#allocation10 + $0x4] }
 0xfcd   :  { %s7692_s6 = vpop.sfrf %7691 }
 0xfce   :  { %p7764_p3 = scmp.ne.s32.totalorder %s7692_s6, 0 }
 0xfd0   :  { %7696 = shalt.err (%p7764_p3)  }
 0xfd1   :  { %7698 = vsyncmov [#allocation10 + $0x5] }
 0xfd4   :  { %s7699_s5 = vpop.sfrf %7698 }
 0xfd5   :  { %p7765_p4 = scmp.ne.s32.totalorder %s7699_s5, 0 }
 0xfd7   :  { %7703 = shalt.err (%p7765_p4)  }
 0xfd8   :  { %7705 = vsyncmov [#allocation10 + $0x6] }
 0xfdb   :  { %s7706_s20 = vpop.sfrf %7705 }
 0xfdc   :  { %p7766_p5 = scmp.ne.s32.totalorder %s7706_s20, 0 }
 0xfde   :  { %7710 = shalt.err (%p7766_p5)  }
 0xfdf   :  { %7712 = vsyncmov [#allocation10 + $0x7] }
 0xfe2   :  { %s7713_s16 = vpop.sfrf %7712 }
 0xfe3   :  { %p7767_p6 = scmp.ne.s32.totalorder %s7713_s16, 0 }
 0xfe5   :  { %7717 = shalt.err (%p7767_p6)  }

</bundles_post_ra>
